<compile_context>
chip_gen: v6e
topology: v6e:2x2x1
jax: 0.10.0
libtpu: 0.0.40
codegen_flags: <defaults>
</compile_context>

<pallas_src>
import functools
import math

import jax
import jax.numpy as jnp
from jax import lax
from jax.experimental import pallas as pl
from jax.experimental.pallas import tpu as pltpu

_EPS = 1e-5
_VMEM = pl.BlockSpec(memory_space=pltpu.MemorySpace.VMEM)


# ---------------------------------------------------------------------------
# In-kernel helpers (traced inside the Pallas kernel body).
# ---------------------------------------------------------------------------
def _fill_padded(pad_ref, val):
    """Write `val` into the interior of a (N, H+2, W+2, C) scratch and zero
    ONLY the 1-pixel halo border (not the whole buffer)."""
    n, hp2, wp2, c = pad_ref.shape
    hp, wp = hp2 - 2, wp2 - 2
    dt = pad_ref.dtype
    zrow = jnp.zeros((n, 1, wp2, c), dt)
    zcol = jnp.zeros((n, hp2, 1, c), dt)
    pad_ref[:, 0:1, :, :] = zrow                    # top halo row
    pad_ref[:, hp + 1:hp + 2, :, :] = zrow          # bottom halo row
    pad_ref[:, :, 0:1, :] = zcol                    # left halo column
    pad_ref[:, :, wp + 1:wp + 2, :] = zcol          # right halo column
    pad_ref[:, 1:hp + 1, 1:wp + 1, :] = val.astype(dt)


def _conv3x3(pad_ref, col_ref, w_ref):
    """3x3 / stride-1 conv via im2col: copy the 9 shifted windows once into a
    contiguous (M, 9*C) VMEM buffer, then do ONE MXU contraction.

    pad_ref: (N, H+2, W+2, C)  halo-padded activations (bf16 or f32)
    col_ref: (N*H*W, 9*C)      im2col scratch, same dtype as pad_ref
    w_ref  : (9*C, Cout)       weights laid out to match the col buffer
    Returns (N*H*W, Cout) f32 (MXU f32 accumulation).
    """
    n, hp2, wp2, c = pad_ref.shape
    hp, wp = hp2 - 2, wp2 - 2
    m = n * hp * wp
    for k in range(9):                              # static: 9 window copies
        dy, dx = divmod(k, 3)
        col_ref[:, k * c:(k + 1) * c] = (
            pad_ref[:, dy:dy + hp, dx:dx + wp, :].reshape(m, c))
    return jnp.dot(col_ref[...], w_ref[...], preferred_element_type=jnp.float32)


def _bn_relu(a, gamma, beta):
    """Training-mode BatchNorm (biased batch variance, two-pass) + ReLU.

    a: (M, C) f32.  Elementwise math stays f32 (v5e VPU has no bf16)."""
    mean = jnp.mean(a, axis=0, keepdims=True)
    var = jnp.mean(jnp.square(a - mean), axis=0, keepdims=True)
    y = (a - mean) * lax.rsqrt(var + _EPS) * gamma + beta
    return jnp.maximum(y, 0.0)


# ---------------------------------------------------------------------------
# Fused DownBlock kernel: (maxpool | conv0) -> conv1+BN+ReLU -> conv2+BN+ReLU
# ---------------------------------------------------------------------------
def _down_block_kernel(*refs, first_block):
    if first_block:
        (x_ref, w0_ref, b0_ref,
         w1_ref, b1_ref, g1_ref, be1_ref,
         w2_ref, b2_ref, g2_ref, be2_ref,
         o_ref,
         pad0_ref, col0_ref, pad1_ref, col1_ref, pad2_ref, col2_ref) = refs
    else:
        (x_ref,
         w1_ref, b1_ref, g1_ref, be1_ref,
         w2_ref, b2_ref, g2_ref, be2_ref,
         o_ref,
         pad1_ref, col1_ref, pad2_ref, col2_ref) = refs

    n, hp, wp, cout = o_ref.shape
    cin = pad1_ref.shape[-1]

    # ---- stage 0: MaxPool2d(2)  |  Conv2d(1, in_ch, 3, 1, 1) ----------------
    if first_block:
        _fill_padded(pad0_ref, x_ref[...])                      # (n,hp,wp,1)
        a0 = _conv3x3(pad0_ref, col0_ref, w0_ref) + b0_ref[...]  # (m, cin) f32
        s1 = a0.reshape(n, hp, wp, cin)
    else:
        # 2x2 / stride-2 max pool.  W pairs via stride-2 ref reads, H pairs via
        # a leading-dim split; odd H/W are floored (crop) like nn.MaxPool2d(2).
        xw = jnp.maximum(x_ref[:, :, pl.ds(0, wp, 2), :],
                         x_ref[:, :, pl.ds(1, wp, 2), :])        # (n, hin, wp, cin)
        xw = xw[:, :2 * hp]                                      # floor odd H
        xw = xw.reshape(n, hp, 2, wp, cin)
        s1 = jnp.maximum(xw[:, :, 0], xw[:, :, 1])               # (n, hp, wp, cin)

    # ---- stage 1: Conv(cin -> cout) + BN + ReLU ------------------------------
    _fill_padded(pad1_ref, s1)
    a1 = _conv3x3(pad1_ref, col1_ref, w1_ref) + b1_ref[...]      # (m, cout) f32
    y1 = _bn_relu(a1, g1_ref[...], be1_ref[...])

    # ---- stage 2: Conv(cout -> cout) + BN + ReLU -----------------------------
    _fill_padded(pad2_ref, y1.reshape(n, hp, wp, cout))
    a2 = _conv3x3(pad2_ref, col2_ref, w2_ref) + b2_ref[...]
    y2 = _bn_relu(a2, g2_ref[...], be2_ref[...])

    # TODO(synk): at real resolutions emit a lane-dense output slab instead of
    # a narrow-C NHWC store (cout=8 -> masked vst); negligible at toy shapes.
    o_ref[...] = y2.reshape(n, hp, wp, cout).astype(o_ref.dtype)


# ---------------------------------------------------------------------------
# Wrapper: parameter packing + the single fused pallas_call.
# ---------------------------------------------------------------------------
def _prep_w(w_pt, dtype):
    """PyTorch (Cout, Cin, 3, 3) -> (9*Cin, Cout), matching im2col layout."""
    cout, cin, kh, kw = w_pt.shape
    w = jnp.transpose(w_pt, (2, 3, 1, 0)).reshape(kh * kw * cin, cout)
    return w.astype(dtype)


def _prep_vec(v):
    return v.astype(jnp.float32).reshape(1, -1)


def _padded_nbytes(shape, dtype):
    """Approximate VMEM footprint of an array (lane/sublane tile padding)."""
    dt = jnp.dtype(dtype)
    s = list(shape)
    if len(s) >= 1:
        s[-1] = -(-s[-1] // 128) * 128
    if len(s) >= 2:
        sub = 8 if dt.itemsize >= 4 else 16
        s[-2] = -(-s[-2] // sub) * sub
    return math.prod(s) * dt.itemsize


def down_block_forward_nhwc(x_nhwc, params, first_block=False):
    """Fused DownBlock forward, NHWC in / NHWC out (the UNet-internal API)."""
    n, hin, win, _ = x_nhwc.shape
    cout, cin = params['w1'].shape[0], params['w1'].shape[1]

    if first_block:
        hp, wp = hin, win                      # Conv2d front end keeps H, W
    else:
        hp, wp = hin // 2, win // 2            # MaxPool2d(2) floors odd H/W
    m = n * hp * wp

    w1 = _prep_w(params['w1'], jnp.bfloat16)   # (9*cin,  cout)
    w2 = _prep_w(params['w2'], jnp.bfloat16)   # (9*cout, cout)
    b1, g1, be1 = (_prep_vec(params[k]) for k in ('b1', 'g1', 'be1'))
    b2, g2, be2 = (_prep_vec(params[k]) for k in ('b2', 'g2', 'be2'))

    inputs = [x_nhwc]
    scratch_specs = []                          # (shape, dtype) pairs
    if first_block:
        inputs += [_prep_w(params['w0'], jnp.float32),   # (9, cin) f32
                   _prep_vec(params['b0'])]
        scratch_specs += [((n, hp + 2, wp + 2, 1), jnp.float32),
                          ((m, 9), jnp.float32)]
    inputs += [w1, b1, g1, be1, w2, b2, g2, be2]
    # bf16 halo + im2col scratch for the two main convs (f32 MXU accumulate).
    scratch_specs += [((n, hp + 2, wp + 2, cin), jnp.bfloat16),
                      ((m, 9 * cin), jnp.bfloat16),
                      ((n, hp + 2, wp + 2, cout), jnp.bfloat16),
                      ((m, 9 * cout), jnp.bfloat16)]
    scratch = [pltpu.VMEM(s, d) for s, d in scratch_specs]

    # VMEM budget from actual byte counts (not a hard-coded constant).
    io_bytes = sum(_padded_nbytes(a.shape, a.dtype) for a in inputs)
    io_bytes += _padded_nbytes((n, hp, wp, cout), jnp.float32)
    scratch_bytes = sum(_padded_nbytes(s, d) for s, d in scratch_specs)
    vmem_limit = int(min(max(2 * io_bytes + scratch_bytes + (4 << 20),
                             16 << 20), 100 << 20))

    return pl.pallas_call(
        functools.partial(_down_block_kernel, first_block=first_block),
        out_shape=jax.ShapeDtypeStruct((n, hp, wp, cout), jnp.float32),
        in_specs=[_VMEM] * len(inputs),
        out_specs=_VMEM,
        scratch_shapes=scratch,
        compiler_params=pltpu.CompilerParams(vmem_limit_bytes=vmem_limit),
    )(*inputs)


def down_block_forward(x_nchw, params, first_block=False):
    """PyTorch-facing wrapper (NCHW in, NCHW out).  In a full UNet keep
    activations NHWC between blocks and call down_block_forward_nhwc directly,
    paying the layout change only once at the model boundary."""
    x = jnp.transpose(x_nchw, (0, 2, 3, 1))
    out = down_block_forward_nhwc(x, params, first_block=first_block)
    return jnp.transpose(out, (0, 3, 1, 2))


# ---------------------------------------------------------------------------
# Pure-JAX reference (same bf16-feed / f32-accumulate convs) for checking.
# ---------------------------------------------------------------------------
def _ref_forward(x_nchw, params, first_block=False):
    x = jnp.transpose(x_nchw, (0, 2, 3, 1))

    def conv(y, w, b, bf16=True):
        wk = jnp.transpose(w, (2, 3, 1, 0))            # OIHW -> HWIO
        if bf16:
            y, wk = y.astype(jnp.bfloat16), wk.astype(jnp.bfloat16)
        z = lax.conv_general_dilated(
            y, wk, (1, 1), 'SAME',
            dimension_numbers=('NHWC', 'HWIO', 'NHWC'),
            preferred_element_type=jnp.float32)
        return z + b.astype(jnp.float32)

    def bn_relu(y, g, be):
        mu = jnp.mean(y, axis=(0, 1, 2), keepdims=True)
        var = jnp.mean(jnp.square(y - mu), axis=(0, 1, 2), keepdims=True)
        return jnp.maximum((y - mu) * lax.rsqrt(var + _EPS) * g + be, 0.0)

    if first_block:
        x = conv(x, params['w0'], params['b0'], bf16=False)
    else:
        x = lax.reduce_window(x, -jnp.inf, lax.max, (1, 2, 2, 1),
                              (1, 2, 2, 1), 'VALID')
    x = bn_relu(conv(x, params['w1'], params['b1']), params['g1'], params['be1'])
    x = bn_relu(conv(x, params['w2'], params['b2']), params['g2'], params['be2'])
    return jnp.transpose(x, (0, 3, 1, 2))


# ---------------------------------------------------------------------------
if __name__ == "__main__":
    in_ch, out_ch = 4, 8
    n, h, w = 2, 16, 16

    key = jax.random.PRNGKey(0)
    ks = jax.random.split(key, 12)

    params = {
        'w1': 0.1 * jax.random.normal(ks[1], (out_ch, in_ch, 3, 3), jnp.float32),
        'b1': 0.1 * jax.random.normal(ks[2], (out_ch,), jnp.float32),
        'g1': 1.0 + 0.1 * jax.random.normal(ks[3], (out_ch,), jnp.float32),
        'be1': 0.1 * jax.random.normal(ks[4], (out_ch,), jnp.float32),
        'w2': 0.1 * jax.random.normal(ks[5], (out_ch, out_ch, 3, 3), jnp.float32),
        'b2': 0.1 * jax.random.normal(ks[6], (out_ch,), jnp.float32),
        'g2': 1.0 + 0.1 * jax.random.normal(ks[7], (out_ch,), jnp.float32),
        'be2': 0.1 * jax.random.normal(ks[8], (out_ch,), jnp.float32),
    }

    fwd = jax.jit(down_block_forward, static_argnames=('first_block',))

    # Standard DownBlock: MaxPool2d(2) -> conv+BN+ReLU -> conv+BN+ReLU.
    x = jax.random.normal(ks[0], (n, in_ch, h, w), jnp.float32)
    out = jax.block_until_ready(fwd(x, params, first_block=False))
    assert out.shape == (n, out_ch, h // 2, w // 2), out.shape
    err = float(jnp.max(jnp.abs(out - _ref_forward(x, params))))
    # Conv operands are fed as bf16 (matched in the reference); the bound
    # covers occasional one-ulp bf16 rounding flips on the conv2 input.
    if err > 1e-2:
        raise AssertionError(f"first_block=False mismatch: max abs err {err}")

    # first_block variant: Conv2d(1, in_ch, 3, 1, 1) front end, no pooling.
    params_fb = dict(
        params,
        w0=0.1 * jax.random.normal(ks[9], (in_ch, 1, 3, 3), jnp.float32),
        b0=0.1 * jax.random.normal(ks[10], (in_ch,), jnp.float32))
    x1 = jax.random.normal(ks[11], (n, 1, h, w), jnp.float32)
    out_fb = jax.block_until_ready(fwd(x1, params_fb, first_block=True))
    assert out_fb.shape == (n, out_ch, h, w), out_fb.shape
    err_fb = float(jnp.max(jnp.abs(out_fb - _ref_forward(x1, params_fb, True))))
    if err_fb > 1e-2:
        raise AssertionError(f"first_block=True mismatch: max abs err {err_fb}")

    print("KERNEL_OK")
</pallas_src>

<mosaic_0001>
module attributes {stable_mosaic.version = 11 : i64} {
  func.func @_down_block_kernel(%arg0: memref<2x16x16x4xf32, #tpu.memory_space<vmem>>, %arg1: memref<36x8xbf16, #tpu.memory_space<vmem>>, %arg2: memref<1x8xf32, #tpu.memory_space<vmem>>, %arg3: memref<1x8xf32, #tpu.memory_space<vmem>>, %arg4: memref<1x8xf32, #tpu.memory_space<vmem>>, %arg5: memref<72x8xbf16, #tpu.memory_space<vmem>>, %arg6: memref<1x8xf32, #tpu.memory_space<vmem>>, %arg7: memref<1x8xf32, #tpu.memory_space<vmem>>, %arg8: memref<1x8xf32, #tpu.memory_space<vmem>>, %arg9: memref<2x8x8x8xf32, #tpu.memory_space<vmem>>, %arg10: memref<2x10x10x4xbf16, #tpu.memory_space<vmem>>, %arg11: memref<128x36xbf16, #tpu.memory_space<vmem>>, %arg12: memref<2x10x10x8xbf16, #tpu.memory_space<vmem>>, %arg13: memref<128x72xbf16, #tpu.memory_space<vmem>>) attributes {dimension_semantics = [], scalar_prefetch = 0 : i64, scratch_operands = 4 : i64, tpu.core_type = #tpu.core_type<tc>} {
    %c0 = arith.constant 0 : index
    %c0_0 = arith.constant 0 : index
    %c0_1 = arith.constant 0 : index
    %c0_2 = arith.constant 0 : index
    %0 = tpu.strided_load %arg0[%c0, %c0_0, %c0_1, %c0_2] {strides = array<i32: 1, 1, 2, 1>} : memref<2x16x16x4xf32, #tpu.memory_space<vmem>>, vector<2x16x8x4xf32>
    %c0_3 = arith.constant 0 : index
    %c0_4 = arith.constant 0 : index
    %c1 = arith.constant 1 : index
    %c0_5 = arith.constant 0 : index
    %1 = tpu.strided_load %arg0[%c0_3, %c0_4, %c1, %c0_5] {strides = array<i32: 1, 1, 2, 1>} : memref<2x16x16x4xf32, #tpu.memory_space<vmem>>, vector<2x16x8x4xf32>
    %2 = arith.maximumf %0, %1 : vector<2x16x8x4xf32>
    %3 = vector.shape_cast %2 : vector<2x16x8x4xf32> to vector<2x8x2x8x4xf32>
    %4 = vector.extract_strided_slice %3 {offsets = [0, 0, 0, 0, 0], sizes = [2, 8, 1, 8, 4], strides = [1, 1, 1, 1, 1]} : vector<2x8x2x8x4xf32> to vector<2x8x1x8x4xf32>
    %5 = vector.shape_cast %4 : vector<2x8x1x8x4xf32> to vector<2x8x8x4xf32>
    %6 = vector.extract_strided_slice %3 {offsets = [0, 0, 1, 0, 0], sizes = [2, 8, 1, 8, 4], strides = [1, 1, 1, 1, 1]} : vector<2x8x2x8x4xf32> to vector<2x8x1x8x4xf32>
    %7 = vector.shape_cast %6 : vector<2x8x1x8x4xf32> to vector<2x8x8x4xf32>
    %8 = arith.maximumf %5, %7 : vector<2x8x8x4xf32>
    %cst = arith.constant 0.000000e+00 : bf16
    %9 = vector.broadcast %cst : bf16 to vector<2x1x10x4xbf16>
    %cst_6 = arith.constant 0.000000e+00 : bf16
    %10 = vector.broadcast %cst_6 : bf16 to vector<2x10x1x4xbf16>
    %c0_7 = arith.constant 0 : index
    %c0_8 = arith.constant 0 : index
    %c0_9 = arith.constant 0 : index
    %c0_10 = arith.constant 0 : index
    %11 = vector.load %arg10[%c0_7, %c0_8, %c0_9, %c0_10] : memref<2x10x10x4xbf16, #tpu.memory_space<vmem>>, vector<2x1x10x4xbf16>
    tpu.vector_store %arg10[%c0_7, %c0_8, %c0_9, %c0_10], %9 {strides = array<i32>} : memref<2x10x10x4xbf16, #tpu.memory_space<vmem>>, vector<2x1x10x4xbf16>,
    %c0_11 = arith.constant 0 : index
    %c9 = arith.constant 9 : index
    %c0_12 = arith.constant 0 : index
    %c0_13 = arith.constant 0 : index
    %12 = vector.load %arg10[%c0_11, %c9, %c0_12, %c0_13] : memref<2x10x10x4xbf16, #tpu.memory_space<vmem>>, vector<2x1x10x4xbf16>
    tpu.vector_store %arg10[%c0_11, %c9, %c0_12, %c0_13], %9 {strides = array<i32>} : memref<2x10x10x4xbf16, #tpu.memory_space<vmem>>, vector<2x1x10x4xbf16>,
    %c0_14 = arith.constant 0 : index
    %c0_15 = arith.constant 0 : index
    %c0_16 = arith.constant 0 : index
    %c0_17 = arith.constant 0 : index
    %13 = vector.load %arg10[%c0_14, %c0_15, %c0_16, %c0_17] : memref<2x10x10x4xbf16, #tpu.memory_space<vmem>>, vector<2x10x1x4xbf16>
    tpu.vector_store %arg10[%c0_14, %c0_15, %c0_16, %c0_17], %10 {strides = array<i32>} : memref<2x10x10x4xbf16, #tpu.memory_space<vmem>>, vector<2x10x1x4xbf16>,
    %c0_18 = arith.constant 0 : index
    %c0_19 = arith.constant 0 : index
    %c9_20 = arith.constant 9 : index
    %c0_21 = arith.constant 0 : index
    %14 = vector.load %arg10[%c0_18, %c0_19, %c9_20, %c0_21] : memref<2x10x10x4xbf16, #tpu.memory_space<vmem>>, vector<2x10x1x4xbf16>
    tpu.vector_store %arg10[%c0_18, %c0_19, %c9_20, %c0_21], %10 {strides = array<i32>} : memref<2x10x10x4xbf16, #tpu.memory_space<vmem>>, vector<2x10x1x4xbf16>,
    %15 = arith.truncf %8 : vector<2x8x8x4xf32> to vector<2x8x8x4xbf16>
    %c0_22 = arith.constant 0 : index
    %c1_23 = arith.constant 1 : index
    %c1_24 = arith.constant 1 : index
    %c0_25 = arith.constant 0 : index
    %16 = vector.load %arg10[%c0_22, %c1_23, %c1_24, %c0_25] : memref<2x10x10x4xbf16, #tpu.memory_space<vmem>>, vector<2x8x8x4xbf16>
    tpu.vector_store %arg10[%c0_22, %c1_23, %c1_24, %c0_25], %15 {strides = array<i32>} : memref<2x10x10x4xbf16, #tpu.memory_space<vmem>>, vector<2x8x8x4xbf16>,
    %c0_26 = arith.constant 0 : index
    %c0_27 = arith.constant 0 : index
    %c0_28 = arith.constant 0 : index
    %c0_29 = arith.constant 0 : index
    %17 = vector.load %arg10[%c0_26, %c0_27, %c0_28, %c0_29] : memref<2x10x10x4xbf16, #tpu.memory_space<vmem>>, vector<2x8x8x4xbf16>
    %18 = vector.shape_cast %17 : vector<2x8x8x4xbf16> to vector<128x4xbf16>
    %c0_30 = arith.constant 0 : index
    %c0_31 = arith.constant 0 : index
    %19 = vector.load %arg11[%c0_30, %c0_31] : memref<128x36xbf16, #tpu.memory_space<vmem>>, vector<128x4xbf16>
    tpu.vector_store %arg11[%c0_30, %c0_31], %18 {strides = array<i32>} : memref<128x36xbf16, #tpu.memory_space<vmem>>, vector<128x4xbf16>,
    %c0_32 = arith.constant 0 : index
    %c0_33 = arith.constant 0 : index
    %c1_34 = arith.constant 1 : index
    %c0_35 = arith.constant 0 : index
    %20 = vector.load %arg10[%c0_32, %c0_33, %c1_34, %c0_35] : memref<2x10x10x4xbf16, #tpu.memory_space<vmem>>, vector<2x8x8x4xbf16>
    %21 = vector.shape_cast %20 : vector<2x8x8x4xbf16> to vector<128x4xbf16>
    %c0_36 = arith.constant 0 : index
    %c4 = arith.constant 4 : index
    %22 = vector.load %arg11[%c0_36, %c4] : memref<128x36xbf16, #tpu.memory_space<vmem>>, vector<128x4xbf16>
    tpu.vector_store %arg11[%c0_36, %c4], %21 {strides = array<i32>} : memref<128x36xbf16, #tpu.memory_space<vmem>>, vector<128x4xbf16>,
    %c0_37 = arith.constant 0 : index
    %c0_38 = arith.constant 0 : index
    %c2 = arith.constant 2 : index
    %c0_39 = arith.constant 0 : index
    %23 = vector.load %arg10[%c0_37, %c0_38, %c2, %c0_39] : memref<2x10x10x4xbf16, #tpu.memory_space<vmem>>, vector<2x8x8x4xbf16>
    %24 = vector.shape_cast %23 : vector<2x8x8x4xbf16> to vector<128x4xbf16>
    %c0_40 = arith.constant 0 : index
    %c8 = arith.constant 8 : index
    %25 = vector.load %arg11[%c0_40, %c8] : memref<128x36xbf16, #tpu.memory_space<vmem>>, vector<128x4xbf16>
    tpu.vector_store %arg11[%c0_40, %c8], %24 {strides = array<i32>} : memref<128x36xbf16, #tpu.memory_space<vmem>>, vector<128x4xbf16>,
    %c0_41 = arith.constant 0 : index
    %c1_42 = arith.constant 1 : index
    %c0_43 = arith.constant 0 : index
    %c0_44 = arith.constant 0 : index
    %26 = vector.load %arg10[%c0_41, %c1_42, %c0_43, %c0_44] : memref<2x10x10x4xbf16, #tpu.memory_space<vmem>>, vector<2x8x8x4xbf16>
    %27 = vector.shape_cast %26 : vector<2x8x8x4xbf16> to vector<128x4xbf16>
    %c0_45 = arith.constant 0 : index
    %c12 = arith.constant 12 : index
    %28 = vector.load %arg11[%c0_45, %c12] : memref<128x36xbf16, #tpu.memory_space<vmem>>, vector<128x4xbf16>
    tpu.vector_store %arg11[%c0_45, %c12], %27 {strides = array<i32>} : memref<128x36xbf16, #tpu.memory_space<vmem>>, vector<128x4xbf16>,
    %c0_46 = arith.constant 0 : index
    %c1_47 = arith.constant 1 : index
    %c1_48 = arith.constant 1 : index
    %c0_49 = arith.constant 0 : index
    %29 = vector.load %arg10[%c0_46, %c1_47, %c1_48, %c0_49] : memref<2x10x10x4xbf16, #tpu.memory_space<vmem>>, vector<2x8x8x4xbf16>
    %30 = vector.shape_cast %29 : vector<2x8x8x4xbf16> to vector<128x4xbf16>
    %c0_50 = arith.constant 0 : index
    %c16 = arith.constant 16 : index
    %31 = vector.load %arg11[%c0_50, %c16] : memref<128x36xbf16, #tpu.memory_space<vmem>>, vector<128x4xbf16>
    tpu.vector_store %arg11[%c0_50, %c16], %30 {strides = array<i32>} : memref<128x36xbf16, #tpu.memory_space<vmem>>, vector<128x4xbf16>,
    %c0_51 = arith.constant 0 : index
    %c1_52 = arith.constant 1 : index
    %c2_53 = arith.constant 2 : index
    %c0_54 = arith.constant 0 : index
    %32 = vector.load %arg10[%c0_51, %c1_52, %c2_53, %c0_54] : memref<2x10x10x4xbf16, #tpu.memory_space<vmem>>, vector<2x8x8x4xbf16>
    %33 = vector.shape_cast %32 : vector<2x8x8x4xbf16> to vector<128x4xbf16>
    %c0_55 = arith.constant 0 : index
    %c20 = arith.constant 20 : index
    %34 = vector.load %arg11[%c0_55, %c20] : memref<128x36xbf16, #tpu.memory_space<vmem>>, vector<128x4xbf16>
    tpu.vector_store %arg11[%c0_55, %c20], %33 {strides = array<i32>} : memref<128x36xbf16, #tpu.memory_space<vmem>>, vector<128x4xbf16>,
    %c0_56 = arith.constant 0 : index
    %c2_57 = arith.constant 2 : index
    %c0_58 = arith.constant 0 : index
    %c0_59 = arith.constant 0 : index
    %35 = vector.load %arg10[%c0_56, %c2_57, %c0_58, %c0_59] : memref<2x10x10x4xbf16, #tpu.memory_space<vmem>>, vector<2x8x8x4xbf16>
    %36 = vector.shape_cast %35 : vector<2x8x8x4xbf16> to vector<128x4xbf16>
    %c0_60 = arith.constant 0 : index
    %c24 = arith.constant 24 : index
    %37 = vector.load %arg11[%c0_60, %c24] : memref<128x36xbf16, #tpu.memory_space<vmem>>, vector<128x4xbf16>
    tpu.vector_store %arg11[%c0_60, %c24], %36 {strides = array<i32>} : memref<128x36xbf16, #tpu.memory_space<vmem>>, vector<128x4xbf16>,
    %c0_61 = arith.constant 0 : index
    %c2_62 = arith.constant 2 : index
    %c1_63 = arith.constant 1 : index
    %c0_64 = arith.constant 0 : index
    %38 = vector.load %arg10[%c0_61, %c2_62, %c1_63, %c0_64] : memref<2x10x10x4xbf16, #tpu.memory_space<vmem>>, vector<2x8x8x4xbf16>
    %39 = vector.shape_cast %38 : vector<2x8x8x4xbf16> to vector<128x4xbf16>
    %c0_65 = arith.constant 0 : index
    %c28 = arith.constant 28 : index
    %40 = vector.load %arg11[%c0_65, %c28] : memref<128x36xbf16, #tpu.memory_space<vmem>>, vector<128x4xbf16>
    tpu.vector_store %arg11[%c0_65, %c28], %39 {strides = array<i32>} : memref<128x36xbf16, #tpu.memory_space<vmem>>, vector<128x4xbf16>,
    %c0_66 = arith.constant 0 : index
    %c2_67 = arith.constant 2 : index
    %c2_68 = arith.constant 2 : index
    %c0_69 = arith.constant 0 : index
    %41 = vector.load %arg10[%c0_66, %c2_67, %c2_68, %c0_69] : memref<2x10x10x4xbf16, #tpu.memory_space<vmem>>, vector<2x8x8x4xbf16>
    %42 = vector.shape_cast %41 : vector<2x8x8x4xbf16> to vector<128x4xbf16>
    %c0_70 = arith.constant 0 : index
    %c32 = arith.constant 32 : index
    %43 = vector.load %arg11[%c0_70, %c32] : memref<128x36xbf16, #tpu.memory_space<vmem>>, vector<128x4xbf16>
    tpu.vector_store %arg11[%c0_70, %c32], %42 {strides = array<i32>} : memref<128x36xbf16, #tpu.memory_space<vmem>>, vector<128x4xbf16>,
    %c0_71 = arith.constant 0 : index
    %c0_72 = arith.constant 0 : index
    %44 = vector.load %arg11[%c0_71, %c0_72] : memref<128x36xbf16, #tpu.memory_space<vmem>>, vector<128x36xbf16>
    %c0_73 = arith.constant 0 : index
    %c0_74 = arith.constant 0 : index
    %45 = vector.load %arg1[%c0_73, %c0_74] : memref<36x8xbf16, #tpu.memory_space<vmem>>, vector<36x8xbf16>
    %cst_75 = arith.constant dense<0.000000e+00> : vector<128x8xf32>
    %46 = tpu.matmul %44, %45, %cst_75 {dimension_numbers = #tpu.dot_dimension_numbers<[1], [0], [0], [1], [0, 0, 1, 1], [], []>} : vector<128x36xbf16>, vector<36x8xbf16>, vector<128x8xf32> -> vector<128x8xf32>
    %c0_76 = arith.constant 0 : index
    %c0_77 = arith.constant 0 : index
    %47 = vector.load %arg2[%c0_76, %c0_77] : memref<1x8xf32, #tpu.memory_space<vmem>>, vector<1x8xf32>
    %48 = vector.broadcast %47 : vector<1x8xf32> to vector<128x8xf32>
    %49 = arith.addf %46, %48 : vector<128x8xf32>
    %c0_78 = arith.constant 0 : index
    %c0_79 = arith.constant 0 : index
    %50 = vector.load %arg3[%c0_78, %c0_79] : memref<1x8xf32, #tpu.memory_space<vmem>>, vector<1x8xf32>
    %c0_80 = arith.constant 0 : index
    %c0_81 = arith.constant 0 : index
    %51 = vector.load %arg4[%c0_80, %c0_81] : memref<1x8xf32, #tpu.memory_space<vmem>>, vector<1x8xf32>
    %cst_82 = arith.constant dense<0.000000e+00> : vector<8xf32>
    %52 = vector.multi_reduction <add>, %49, %cst_82 [0] : vector<128x8xf32> to vector<8xf32>
    %53 = vector.shape_cast %52 : vector<8xf32> to vector<1x8xf32>
    %cst_83 = arith.constant 1.280000e+02 : f32
    %54 = vector.broadcast %cst_83 : f32 to vector<1x8xf32>
    %55 = arith.divf %53, %54 : vector<1x8xf32>
    %56 = vector.broadcast %55 : vector<1x8xf32> to vector<128x8xf32>
    %57 = arith.subf %49, %56 : vector<128x8xf32>
    %58 = arith.mulf %57, %57 : vector<128x8xf32>
    %cst_84 = arith.constant dense<0.000000e+00> : vector<8xf32>
    %59 = vector.multi_reduction <add>, %58, %cst_84 [0] : vector<128x8xf32> to vector<8xf32>
    %60 = vector.shape_cast %59 : vector<8xf32> to vector<1x8xf32>
    %cst_85 = arith.constant 1.280000e+02 : f32
    %61 = vector.broadcast %cst_85 : f32 to vector<1x8xf32>
    %62 = arith.divf %60, %61 : vector<1x8xf32>
    %63 = vector.broadcast %55 : vector<1x8xf32> to vector<128x8xf32>
    %64 = arith.subf %49, %63 : vector<128x8xf32>
    %cst_86 = arith.constant 9.99999974E-6 : f32
    %65 = vector.broadcast %cst_86 : f32 to vector<1x8xf32>
    %66 = arith.addf %62, %65 : vector<1x8xf32>
    %67 = math.rsqrt %66 : vector<1x8xf32>
    %68 = vector.broadcast %67 : vector<1x8xf32> to vector<128x8xf32>
    %69 = arith.mulf %64, %68 : vector<128x8xf32>
    %70 = vector.broadcast %50 : vector<1x8xf32> to vector<128x8xf32>
    %71 = arith.mulf %69, %70 : vector<128x8xf32>
    %72 = vector.broadcast %51 : vector<1x8xf32> to vector<128x8xf32>
    %73 = arith.addf %71, %72 : vector<128x8xf32>
    %cst_87 = arith.constant 0.000000e+00 : f32
    %74 = vector.broadcast %cst_87 : f32 to vector<128x8xf32>
    %75 = arith.maximumf %73, %74 : vector<128x8xf32>
    %76 = vector.shape_cast %75 : vector<128x8xf32> to vector<2x8x8x8xf32>
    %cst_88 = arith.constant 0.000000e+00 : bf16
    %77 = vector.broadcast %cst_88 : bf16 to vector<2x1x10x8xbf16>
    %cst_89 = arith.constant 0.000000e+00 : bf16
    %78 = vector.broadcast %cst_89 : bf16 to vector<2x10x1x8xbf16>
    %c0_90 = arith.constant 0 : index
    %c0_91 = arith.constant 0 : index
    %c0_92 = arith.constant 0 : index
    %c0_93 = arith.constant 0 : index
    %79 = vector.load %arg12[%c0_90, %c0_91, %c0_92, %c0_93] : memref<2x10x10x8xbf16, #tpu.memory_space<vmem>>, vector<2x1x10x8xbf16>
    tpu.vector_store %arg12[%c0_90, %c0_91, %c0_92, %c0_93], %77 {strides = array<i32>} : memref<2x10x10x8xbf16, #tpu.memory_space<vmem>>, vector<2x1x10x8xbf16>,
    %c0_94 = arith.constant 0 : index
    %c9_95 = arith.constant 9 : index
    %c0_96 = arith.constant 0 : index
    %c0_97 = arith.constant 0 : index
    %80 = vector.load %arg12[%c0_94, %c9_95, %c0_96, %c0_97] : memref<2x10x10x8xbf16, #tpu.memory_space<vmem>>, vector<2x1x10x8xbf16>
    tpu.vector_store %arg12[%c0_94, %c9_95, %c0_96, %c0_97], %77 {strides = array<i32>} : memref<2x10x10x8xbf16, #tpu.memory_space<vmem>>, vector<2x1x10x8xbf16>,
    %c0_98 = arith.constant 0 : index
    %c0_99 = arith.constant 0 : index
    %c0_100 = arith.constant 0 : index
    %c0_101 = arith.constant 0 : index
    %81 = vector.load %arg12[%c0_98, %c0_99, %c0_100, %c0_101] : memref<2x10x10x8xbf16, #tpu.memory_space<vmem>>, vector<2x10x1x8xbf16>
    tpu.vector_store %arg12[%c0_98, %c0_99, %c0_100, %c0_101], %78 {strides = array<i32>} : memref<2x10x10x8xbf16, #tpu.memory_space<vmem>>, vector<2x10x1x8xbf16>,
    %c0_102 = arith.constant 0 : index
    %c0_103 = arith.constant 0 : index
    %c9_104 = arith.constant 9 : index
    %c0_105 = arith.constant 0 : index
    %82 = vector.load %arg12[%c0_102, %c0_103, %c9_104, %c0_105] : memref<2x10x10x8xbf16, #tpu.memory_space<vmem>>, vector<2x10x1x8xbf16>
    tpu.vector_store %arg12[%c0_102, %c0_103, %c9_104, %c0_105], %78 {strides = array<i32>} : memref<2x10x10x8xbf16, #tpu.memory_space<vmem>>, vector<2x10x1x8xbf16>,
    %83 = arith.truncf %76 : vector<2x8x8x8xf32> to vector<2x8x8x8xbf16>
    %c0_106 = arith.constant 0 : index
    %c1_107 = arith.constant 1 : index
    %c1_108 = arith.constant 1 : index
    %c0_109 = arith.constant 0 : index
    %84 = vector.load %arg12[%c0_106, %c1_107, %c1_108, %c0_109] : memref<2x10x10x8xbf16, #tpu.memory_space<vmem>>, vector<2x8x8x8xbf16>
    tpu.vector_store %arg12[%c0_106, %c1_107, %c1_108, %c0_109], %83 {strides = array<i32>} : memref<2x10x10x8xbf16, #tpu.memory_space<vmem>>, vector<2x8x8x8xbf16>,
    %c0_110 = arith.constant 0 : index
    %c0_111 = arith.constant 0 : index
    %c0_112 = arith.constant 0 : index
    %c0_113 = arith.constant 0 : index
    %85 = vector.load %arg12[%c0_110, %c0_111, %c0_112, %c0_113] : memref<2x10x10x8xbf16, #tpu.memory_space<vmem>>, vector<2x8x8x8xbf16>
    %86 = vector.shape_cast %85 : vector<2x8x8x8xbf16> to vector<128x8xbf16>
    %c0_114 = arith.constant 0 : index
    %c0_115 = arith.constant 0 : index
    %87 = vector.load %arg13[%c0_114, %c0_115] : memref<128x72xbf16, #tpu.memory_space<vmem>>, vector<128x8xbf16>
    tpu.vector_store %arg13[%c0_114, %c0_115], %86 {strides = array<i32>} : memref<128x72xbf16, #tpu.memory_space<vmem>>, vector<128x8xbf16>,
    %c0_116 = arith.constant 0 : index
    %c0_117 = arith.constant 0 : index
    %c1_118 = arith.constant 1 : index
    %c0_119 = arith.constant 0 : index
    %88 = vector.load %arg12[%c0_116, %c0_117, %c1_118, %c0_119] : memref<2x10x10x8xbf16, #tpu.memory_space<vmem>>, vector<2x8x8x8xbf16>
    %89 = vector.shape_cast %88 : vector<2x8x8x8xbf16> to vector<128x8xbf16>
    %c0_120 = arith.constant 0 : index
    %c8_121 = arith.constant 8 : index
    %90 = vector.load %arg13[%c0_120, %c8_121] : memref<128x72xbf16, #tpu.memory_space<vmem>>, vector<128x8xbf16>
    tpu.vector_store %arg13[%c0_120, %c8_121], %89 {strides = array<i32>} : memref<128x72xbf16, #tpu.memory_space<vmem>>, vector<128x8xbf16>,
    %c0_122 = arith.constant 0 : index
    %c0_123 = arith.constant 0 : index
    %c2_124 = arith.constant 2 : index
    %c0_125 = arith.constant 0 : index
    %91 = vector.load %arg12[%c0_122, %c0_123, %c2_124, %c0_125] : memref<2x10x10x8xbf16, #tpu.memory_space<vmem>>, vector<2x8x8x8xbf16>
    %92 = vector.shape_cast %91 : vector<2x8x8x8xbf16> to vector<128x8xbf16>
    %c0_126 = arith.constant 0 : index
    %c16_127 = arith.constant 16 : index
    %93 = vector.load %arg13[%c0_126, %c16_127] : memref<128x72xbf16, #tpu.memory_space<vmem>>, vector<128x8xbf16>
    tpu.vector_store %arg13[%c0_126, %c16_127], %92 {strides = array<i32>} : memref<128x72xbf16, #tpu.memory_space<vmem>>, vector<128x8xbf16>,
    %c0_128 = arith.constant 0 : index
    %c1_129 = arith.constant 1 : index
    %c0_130 = arith.constant 0 : index
    %c0_131 = arith.constant 0 : index
    %94 = vector.load %arg12[%c0_128, %c1_129, %c0_130, %c0_131] : memref<2x10x10x8xbf16, #tpu.memory_space<vmem>>, vector<2x8x8x8xbf16>
    %95 = vector.shape_cast %94 : vector<2x8x8x8xbf16> to vector<128x8xbf16>
    %c0_132 = arith.constant 0 : index
    %c24_133 = arith.constant 24 : index
    %96 = vector.load %arg13[%c0_132, %c24_133] : memref<128x72xbf16, #tpu.memory_space<vmem>>, vector<128x8xbf16>
    tpu.vector_store %arg13[%c0_132, %c24_133], %95 {strides = array<i32>} : memref<128x72xbf16, #tpu.memory_space<vmem>>, vector<128x8xbf16>,
    %c0_134 = arith.constant 0 : index
    %c1_135 = arith.constant 1 : index
    %c1_136 = arith.constant 1 : index
    %c0_137 = arith.constant 0 : index
    %97 = vector.load %arg12[%c0_134, %c1_135, %c1_136, %c0_137] : memref<2x10x10x8xbf16, #tpu.memory_space<vmem>>, vector<2x8x8x8xbf16>
    %98 = vector.shape_cast %97 : vector<2x8x8x8xbf16> to vector<128x8xbf16>
    %c0_138 = arith.constant 0 : index
    %c32_139 = arith.constant 32 : index
    %99 = vector.load %arg13[%c0_138, %c32_139] : memref<128x72xbf16, #tpu.memory_space<vmem>>, vector<128x8xbf16>
    tpu.vector_store %arg13[%c0_138, %c32_139], %98 {strides = array<i32>} : memref<128x72xbf16, #tpu.memory_space<vmem>>, vector<128x8xbf16>,
    %c0_140 = arith.constant 0 : index
    %c1_141 = arith.constant 1 : index
    %c2_142 = arith.constant 2 : index
    %c0_143 = arith.constant 0 : index
    %100 = vector.load %arg12[%c0_140, %c1_141, %c2_142, %c0_143] : memref<2x10x10x8xbf16, #tpu.memory_space<vmem>>, vector<2x8x8x8xbf16>
    %101 = vector.shape_cast %100 : vector<2x8x8x8xbf16> to vector<128x8xbf16>
    %c0_144 = arith.constant 0 : index
    %c40 = arith.constant 40 : index
    %102 = vector.load %arg13[%c0_144, %c40] : memref<128x72xbf16, #tpu.memory_space<vmem>>, vector<128x8xbf16>
    tpu.vector_store %arg13[%c0_144, %c40], %101 {strides = array<i32>} : memref<128x72xbf16, #tpu.memory_space<vmem>>, vector<128x8xbf16>,
    %c0_145 = arith.constant 0 : index
    %c2_146 = arith.constant 2 : index
    %c0_147 = arith.constant 0 : index
    %c0_148 = arith.constant 0 : index
    %103 = vector.load %arg12[%c0_145, %c2_146, %c0_147, %c0_148] : memref<2x10x10x8xbf16, #tpu.memory_space<vmem>>, vector<2x8x8x8xbf16>
    %104 = vector.shape_cast %103 : vector<2x8x8x8xbf16> to vector<128x8xbf16>
    %c0_149 = arith.constant 0 : index
    %c48 = arith.constant 48 : index
    %105 = vector.load %arg13[%c0_149, %c48] : memref<128x72xbf16, #tpu.memory_space<vmem>>, vector<128x8xbf16>
    tpu.vector_store %arg13[%c0_149, %c48], %104 {strides = array<i32>} : memref<128x72xbf16, #tpu.memory_space<vmem>>, vector<128x8xbf16>,
    %c0_150 = arith.constant 0 : index
    %c2_151 = arith.constant 2 : index
    %c1_152 = arith.constant 1 : index
    %c0_153 = arith.constant 0 : index
    %106 = vector.load %arg12[%c0_150, %c2_151, %c1_152, %c0_153] : memref<2x10x10x8xbf16, #tpu.memory_space<vmem>>, vector<2x8x8x8xbf16>
    %107 = vector.shape_cast %106 : vector<2x8x8x8xbf16> to vector<128x8xbf16>
    %c0_154 = arith.constant 0 : index
    %c56 = arith.constant 56 : index
    %108 = vector.load %arg13[%c0_154, %c56] : memref<128x72xbf16, #tpu.memory_space<vmem>>, vector<128x8xbf16>
    tpu.vector_store %arg13[%c0_154, %c56], %107 {strides = array<i32>} : memref<128x72xbf16, #tpu.memory_space<vmem>>, vector<128x8xbf16>,
    %c0_155 = arith.constant 0 : index
    %c2_156 = arith.constant 2 : index
    %c2_157 = arith.constant 2 : index
    %c0_158 = arith.constant 0 : index
    %109 = vector.load %arg12[%c0_155, %c2_156, %c2_157, %c0_158] : memref<2x10x10x8xbf16, #tpu.memory_space<vmem>>, vector<2x8x8x8xbf16>
    %110 = vector.shape_cast %109 : vector<2x8x8x8xbf16> to vector<128x8xbf16>
    %c0_159 = arith.constant 0 : index
    %c64 = arith.constant 64 : index
    %111 = vector.load %arg13[%c0_159, %c64] : memref<128x72xbf16, #tpu.memory_space<vmem>>, vector<128x8xbf16>
    tpu.vector_store %arg13[%c0_159, %c64], %110 {strides = array<i32>} : memref<128x72xbf16, #tpu.memory_space<vmem>>, vector<128x8xbf16>,
    %c0_160 = arith.constant 0 : index
    %c0_161 = arith.constant 0 : index
    %112 = vector.load %arg13[%c0_160, %c0_161] : memref<128x72xbf16, #tpu.memory_space<vmem>>, vector<128x72xbf16>
    %c0_162 = arith.constant 0 : index
    %c0_163 = arith.constant 0 : index
    %113 = vector.load %arg5[%c0_162, %c0_163] : memref<72x8xbf16, #tpu.memory_space<vmem>>, vector<72x8xbf16>
    %cst_164 = arith.constant dense<0.000000e+00> : vector<128x8xf32>
    %114 = tpu.matmul %112, %113, %cst_164 {dimension_numbers = #tpu.dot_dimension_numbers<[1], [0], [0], [1], [0, 0, 1, 1], [], []>} : vector<128x72xbf16>, vector<72x8xbf16>, vector<128x8xf32> -> vector<128x8xf32>
    %c0_165 = arith.constant 0 : index
    %c0_166 = arith.constant 0 : index
    %115 = vector.load %arg6[%c0_165, %c0_166] : memref<1x8xf32, #tpu.memory_space<vmem>>, vector<1x8xf32>
    %116 = vector.broadcast %115 : vector<1x8xf32> to vector<128x8xf32>
    %117 = arith.addf %114, %116 : vector<128x8xf32>
    %c0_167 = arith.constant 0 : index
    %c0_168 = arith.constant 0 : index
    %118 = vector.load %arg7[%c0_167, %c0_168] : memref<1x8xf32, #tpu.memory_space<vmem>>, vector<1x8xf32>
    %c0_169 = arith.constant 0 : index
    %c0_170 = arith.constant 0 : index
    %119 = vector.load %arg8[%c0_169, %c0_170] : memref<1x8xf32, #tpu.memory_space<vmem>>, vector<1x8xf32>
    %cst_171 = arith.constant dense<0.000000e+00> : vector<8xf32>
    %120 = vector.multi_reduction <add>, %117, %cst_171 [0] : vector<128x8xf32> to vector<8xf32>
    %121 = vector.shape_cast %120 : vector<8xf32> to vector<1x8xf32>
    %cst_172 = arith.constant 1.280000e+02 : f32
    %122 = vector.broadcast %cst_172 : f32 to vector<1x8xf32>
    %123 = arith.divf %121, %122 : vector<1x8xf32>
    %124 = vector.broadcast %123 : vector<1x8xf32> to vector<128x8xf32>
    %125 = arith.subf %117, %124 : vector<128x8xf32>
    %126 = arith.mulf %125, %125 : vector<128x8xf32>
    %cst_173 = arith.constant dense<0.000000e+00> : vector<8xf32>
    %127 = vector.multi_reduction <add>, %126, %cst_173 [0] : vector<128x8xf32> to vector<8xf32>
    %128 = vector.shape_cast %127 : vector<8xf32> to vector<1x8xf32>
    %cst_174 = arith.constant 1.280000e+02 : f32
    %129 = vector.broadcast %cst_174 : f32 to vector<1x8xf32>
    %130 = arith.divf %128, %129 : vector<1x8xf32>
    %131 = vector.broadcast %123 : vector<1x8xf32> to vector<128x8xf32>
    %132 = arith.subf %117, %131 : vector<128x8xf32>
    %cst_175 = arith.constant 9.99999974E-6 : f32
    %133 = vector.broadcast %cst_175 : f32 to vector<1x8xf32>
    %134 = arith.addf %130, %133 : vector<1x8xf32>
    %135 = math.rsqrt %134 : vector<1x8xf32>
    %136 = vector.broadcast %135 : vector<1x8xf32> to vector<128x8xf32>
    %137 = arith.mulf %132, %136 : vector<128x8xf32>
    %138 = vector.broadcast %118 : vector<1x8xf32> to vector<128x8xf32>
    %139 = arith.mulf %137, %138 : vector<128x8xf32>
    %140 = vector.broadcast %119 : vector<1x8xf32> to vector<128x8xf32>
    %141 = arith.addf %139, %140 : vector<128x8xf32>
    %cst_176 = arith.constant 0.000000e+00 : f32
    %142 = vector.broadcast %cst_176 : f32 to vector<128x8xf32>
    %143 = arith.maximumf %141, %142 : vector<128x8xf32>
    %144 = vector.shape_cast %143 : vector<128x8xf32> to vector<2x8x8x8xf32>
    %c0_177 = arith.constant 0 : index
    %c0_178 = arith.constant 0 : index
    %c0_179 = arith.constant 0 : index
    %c0_180 = arith.constant 0 : index
    %145 = vector.load %arg9[%c0_177, %c0_178, %c0_179, %c0_180] : memref<2x8x8x8xf32, #tpu.memory_space<vmem>>, vector<2x8x8x8xf32>
    tpu.vector_store %arg9[%c0_177, %c0_178, %c0_179, %c0_180], %144 {strides = array<i32>} : memref<2x8x8x8xf32, #tpu.memory_space<vmem>>, vector<2x8x8x8xf32>,
    return
  }
}

</mosaic_0001>

<bundles_post_ra>
// kernel: down_block_forward.1
= control target key start
LH: loop header
LB: loop body
LE: loop exit
PB: predicated region body
PF: predicated region fallthrough
CT: control target
= control target key end

     0   :  { %vm208_vm0 = vcmask 27648   ;;  %vm210_vm1 = vcmask 24576   ;;  %vm220_vm2 = vsmask.f32 256  ;;  %v5884_v0 = vmov 0   ;;  %s5885_s20 = smov 8   ;;  %s8767_s0 = inlined_call_operand.vmem [shape: f32[2,16,16,4], index: 0, kind: input, shape index: {}]   ;;  %s8768_s1 = inlined_call_operand.vmem [shape: bf16[36,8], index: 1, kind: input, shape index: {}]   ;;  %s8769_s2 = inlined_call_operand.vmem [shape: f32[1,8], index: 2, kind: input, shape index: {}]   ;;  %s8770_s3 = inlined_call_operand.vmem [shape: f32[1,8], index: 3, kind: input, shape index: {}]   ;;  %s8771_s4 = inlined_call_operand.vmem [shape: f32[1,8], index: 4, kind: input, shape index: {}]   ;;  %s8772_s5 = inlined_call_operand.vmem [shape: bf16[72,8], index: 5, kind: input, shape index: {}]   ;;  %s8773_s6 = inlined_call_operand.vmem [shape: f32[1,8], index: 6, kind: input, shape index: {}]   ;;  %s8774_s7 = inlined_call_operand.vmem [shape: f32[1,8], index: 7, kind: input, shape index: {}]   ;;  %s8775_s8 = inlined_call_operand.vmem [shape: f32[1,8], index: 8, kind: input, shape index: {}]   ;;  %s8776_s9 = inlined_call_operand.vmem [shape: f32[2,8,8,8], index: 9, kind: output, shape index: {}]  }
   0x1   :  { %209 = vst.msk [vmem:[#allocation2] sm:$0xf] %vm208_vm0, %v5884_v0  ;;  %vm8777_vm3 = vcmask 60416   ;;  %212 = vst.msk [vmem:[#allocation2 + $0x50] sm:$0xf] %vm208_vm0, %v5884_v0  ;;  %vm8779_vm5 = vcmask 57344  }
   0x2   :  { %211 = vst.msk [vmem:[#allocation2 + $0x4] sm:$0x1] %vm210_vm1, %v5884_v0  ;;  %213 = vst.msk [vmem:[#allocation2 + $0x54] sm:$0x1] %vm210_vm1, %v5884_v0  ;;  %v5501_v2 = vld [vmem:[%s8767_s0 + $0x20] ss:$2 sm:$0xff] }
   0x3   :  { %215 = vst.msk [vmem:[#allocation2 + $0x48] sm:$0xf] %vm208_vm0, %v5884_v0  ;;  %217 = vst.msk [vmem:[#allocation2 + $0x98] sm:$0xf] %vm208_vm0, %v5884_v0  ;;  %v5502_v3 = vld [vmem:[%s8767_s0 + $0x30] ss:$2 sm:$0xff] }
   0x4   :  { %216 = vst.msk [vmem:[#allocation2 + $0x4c] sm:$0x1] %vm210_vm1, %v5884_v0  ;;  %218 = vst.msk [vmem:[#allocation2 + $0x9c] sm:$0x1] %vm210_vm1, %v5884_v0  ;;  %vm8778_vm6 = vsmask.f32 7938 }
   0x5   :  { %vm5957_vm4 = vmand %vm210_vm1, %vm220_vm2  ;;  %2842 = vst.msk [vmem:[#allocation4] sm:$0xf] %vm8777_vm3, %v5884_v0  ;;  %v5533_v4 = vld [vmem:[%s8767_s0 + $0x21] ss:$2 sm:$0xff]  ;;  %v5534_v5 = vld [vmem:[%s8767_s0 + $0x31] ss:$2 sm:$0xff] }
   0x6   :  { %2845 = vst.msk [vmem:[#allocation4 + $0x50] sm:$0xf] %vm8777_vm3, %v5884_v0  ;;  %2848 = vst.msk [vmem:[#allocation4 + $0x48] sm:$0xf] %vm8777_vm3, %v5884_v0  ;;  %v162_v6 = vmax.f32 %v5501_v2, %v5533_v4  ;;  %v163_v7 = vmax.f32 %v5502_v3, %v5534_v5  ;;  %v228_v8 = vld [vmem:[#allocation2 + $0x10] sm:$0x1] }
   0x7   :  { %2850 = vst.msk [vmem:[#allocation4 + $0x98] sm:$0xf] %vm8777_vm3, %v5884_v0  ;;  %v33_v9 = vld [vmem:[%s8767_s0] ss:$2 sm:$0xff]  ;;  %v229_v10 = vsel %vm5957_vm4, 0, %v228_v8  ;;  %vm5994_vm7 = vmand %vm210_vm1, %vm8778_vm6  ;;  %vm1087_vm8 = vcmask 1042432  }
   0x8   :  { %2844 = vst.msk [vmem:[#allocation4 + $0x4] sm:$0x1] %vm8779_vm5, %v5884_v0  ;;  %2846 = vst.msk [vmem:[#allocation4 + $0x54] sm:$0x1] %vm8779_vm5, %v5884_v0  ;;  %v5500_v11 = vld [vmem:[%s8767_s0 + $0x10] ss:$2 sm:$0xff]  ;;  %v193_v14 = vmax.f32 %v162_v6, %v163_v7 }
   0x9   :  { %2849 = vst.msk [vmem:[#allocation4 + $0x4c] sm:$0x1] %vm8779_vm5, %v5884_v0  ;;  %2851 = vst.msk [vmem:[#allocation4 + $0x9c] sm:$0x1] %vm8779_vm5, %v5884_v0  ;;  %v5531_v12 = vld [vmem:[%s8767_s0 + $0x1] ss:$2 sm:$0xff] }
   0xa   :  { %230 = vst [vmem:[#allocation2 + $0x10] sm:$0x1] %v229_v10  ;;  %v5532_v15 = vld [vmem:[%s8767_s0 + $0x11] ss:$2 sm:$0xff]  ;;  %v160_v16 = vmax.f32 %v33_v9, %v5531_v12  ;;  %v225_v17 = vld [vmem:[#allocation2 + $0x8] sm:$0x1]  ;;  %v5738_v23 = vpack.c.bf16 %v193_v14, %v193_v14  ;;  %vm6035_vm9 = vmand %vm208_vm0, %vm8778_vm6 }
   0xb   :  { %v161_v18 = vmax.f32 %v5500_v11, %v5532_v15  ;;  %v226_v19 = vsel %vm5957_vm4, 0, %v225_v17  ;;  %v5505_v20 = vld [vmem:[%s8767_s0 + $0x60] ss:$2 sm:$0xff]  ;;  %v5506_v21 = vld [vmem:[%s8767_s0 + $0x70] ss:$2 sm:$0xff]  ;;  %vm1088_vm10 = vcmask 1046532  }
   0xc   :  { %v284_v22 = vld [vmem:[#allocation2 + $0x4] sm:$0x1]  ;;  %227 = vst [vmem:[#allocation2 + $0x8] sm:$0x1] %v226_v19  ;;  %v5537_v24 = vld [vmem:[%s8767_s0 + $0x61] ss:$2 sm:$0xff]  ;;  %vm6052_vm11 = vmor %vm1087_vm8, %vm1088_vm10 }
   0xd   :  { %v285_v25 = vsel %vm5994_vm7, 0, %v284_v22  ;;  %v192_v26 = vmax.f32 %v160_v16, %v161_v18  ;;  %v5538_v27 = vld [vmem:[%s8767_s0 + $0x71] ss:$2 sm:$0xff]  ;;  %v166_v28 = vmax.f32 %v5505_v20, %v5537_v24  ;;  %v234_v29 = vld [vmem:[#allocation2 + $0x20] sm:$0x1]  ;;  %v417_v31 = vshrl.u32 %v5738_v23, 16 }
   0xe   :  { %286 = vst [vmem:[#allocation2 + $0x4] sm:$0x1] %v285_v25  ;;  %v1023_v30 = vld [vmem:[#allocation2] sm:$0xe]  ;;  %v420_v32 = vshll.u32 %v5738_v23, 16  ;;  %v167_v33 = vmax.f32 %v5506_v21, %v5538_v27  ;;  %v235_v34 = vsel %vm5957_vm4, 0, %v234_v29 }
   0xf   :  { %v5503_v35 = vld [vmem:[%s8767_s0 + $0x40] ss:$2 sm:$0xff]  ;;  %v5737_v36 = vpack.c.bf16 %v192_v26, %v192_v26  ;;  %236 = vst [vmem:[#allocation2 + $0x20] sm:$0x1] %v235_v34  ;;  %v5504_v37 = vld [vmem:[%s8767_s0 + $0x50] ss:$2 sm:$0xff] }
  0x10   :  { %v5535_v38 = vld [vmem:[%s8767_s0 + $0x41] ss:$2 sm:$0xff]  ;;  %v5536_v39 = vld [vmem:[%s8767_s0 + $0x51] ss:$2 sm:$0xff]  ;;  %v6031_v40 = vrot.slane %v417_v31, 7  ;;  %v195_v41 = vmax.f32 %v166_v28, %v167_v33  ;;  %v5579_v57 = vrot.slane %v1023_v30, 9 }
  0x11   :  { %v164_v42 = vmax.f32 %v5503_v35, %v5535_v38  ;;  %v165_v43 = vmax.f32 %v5504_v37, %v5536_v39  ;;  %v231_v44 = vld [vmem:[#allocation2 + $0x18] sm:$0x1]  ;;  %v287_v45 = vld [vmem:[#allocation2 + $0xc] sm:$0x1]  ;;  %v577_v47 = vld [vmem:[#allocation2 + $0x10] sm:$0xf] }
  0x12   :  { %v409_v48 = vshrl.u32 %v5737_v36, 16  ;;  %v412_v49 = vshll.u32 %v5737_v36, 16  ;;  %v232_v50 = vsel %vm5957_vm4, 0, %v231_v44  ;;  %v288_v51 = vsel %vm5994_vm7, 0, %v287_v45  ;;  %v290_v55 = vld [vmem:[#allocation2 + $0x14] sm:$0x1] }
  0x13   :  { %v422_v52 = vor.u32 %v420_v32, %v6031_v40  ;;  %v5740_v53 = vpack.c.bf16 %v195_v41, %v195_v41  ;;  %v194_v54 = vmax.f32 %v164_v42, %v165_v43  ;;  %233 = vst [vmem:[#allocation2 + $0x18] sm:$0x1] %v232_v50  ;;  %289 = vst [vmem:[#allocation2 + $0xc] sm:$0x1] %v288_v51  ;;  %v293_v56 = vld [vmem:[#allocation2 + $0x1c] sm:$0x1] }
  0x14   :  { %v411_v58 = vrot.slane %v409_v48, 7  ;;  %v571_v59 = vld [vmem:[#allocation2 + $0x8] sm:$0xf]  ;;  %v291_v60 = vsel %vm5994_vm7, 0, %v290_v55  ;;  %v294_v61 = vsel %vm5994_vm7, 0, %v293_v56  ;;  %v423_v16 = vrot.slane %v6031_v40, 4 }
  0x15   :  { %v578_v62 = vsel %vm6035_vm9, %v422_v52, %v577_v47  ;;  %v433_v63 = vshrl.u32 %v5740_v53, 16  ;;  %v436_v0 = vshll.u32 %v5740_v53, 16  ;;  %v5739_v2 = vpack.c.bf16 %v194_v54, %v194_v54  ;;  %292 = vst [vmem:[#allocation2 + $0x14] sm:$0x1] %v291_v60  ;;  %295 = vst [vmem:[#allocation2 + $0x1c] sm:$0x1] %v294_v61 }
  0x16   :  { %v222_v3 = vld [vmem:[#allocation2] sm:$0x1]  ;;  %v296_v4 = vld [vmem:[#allocation2 + $0x24] sm:$0x1]  ;;  %579 = vst [vmem:[#allocation2 + $0x10] sm:$0xf] %v578_v62  ;;  %v414_v7 = vor.u32 %v412_v49, %v411_v58 }
  0x17   :  { %v1024_v5 = vld [vmem:[#allocation2 + $0x4] sm:$0x1]  ;;  %v415_v8 = vrot.slane %v411_v58, 4  ;;  %v223_v9 = vsel %vm5957_vm4, 0, %v222_v3  ;;  %v6058_v12 = vrot.slane %v433_v63, 7  ;;  %v425_v14 = vshrl.u32 %v5739_v2, 16 }
  0x18   :  { %v700_v10 = vld [vmem:[#allocation2 + $0x4] sm:$0x1]  ;;  %v1092_v11 = vrot.slane %v1024_v5, 5  ;;  %v428_v15 = vshll.u32 %v5739_v2, 16  ;;  %224 = vst [vmem:[#allocation2] sm:$0x1] %v223_v9  ;;  %v572_v17 = vsel %vm6035_vm9, %v414_v7, %v571_v59 }
  0x19   :  { %v589_v18 = vld [vmem:[#allocation2 + $0x20] sm:$0xf]  ;;  %v297_v19 = vsel %vm5994_vm7, 0, %v296_v4  ;;  %573 = vst [vmem:[#allocation2 + $0x8] sm:$0xf] %v572_v17  ;;  %v438_v21 = vor.u32 %v436_v0, %v6058_v12  ;;  %v427_v22 = vrot.slane %v425_v14, 7 }
  0x1a   :  { %v1093_v20 = vsel %vm6052_vm11, %v5579_v57, %v1092_v11  ;;  %v744_v23 = vshll.u32 %v700_v10, 16  ;;  %298 = vst [vmem:[#allocation2 + $0x24] sm:$0x1] %v297_v19  ;;  %v439_v24 = vrot.slane %v6058_v12, 4  ;;  %v583_v25 = vld [vmem:[#allocation2 + $0x18] sm:$0xf] }
  0x1b   :  { %1154 = vrot.lane.b32.xlu0 %v1093_v20, %s5885_s20  ;;  %v574_v26 = vld [vmem:[#allocation2 + $0xc] sm:$0x1]  ;;  %v590_v27 = vsel %vm6035_vm9, %v438_v21, %v589_v18  ;;  %v430_v28 = vor.u32 %v428_v15, %v427_v22  ;;  %v431_v29 = vrot.slane %v427_v22, 4  ;;  %v5508_v32 = vld [vmem:[%s8767_s0 + $0x90] ss:$2 sm:$0xff]  ;;  %s5886_s29 = smov 12  }
  0x1c   :  { %v575_v30 = vsel %vm5957_vm4, %v415_v8, %v574_v26  ;;  %v6077_v31 = vld [vmem:[%s8767_s0 + $0x80] ss:$2 sm:$0xff]  ;;  %v5539_v33 = vld [vmem:[%s8767_s0 + $0x81] ss:$2 sm:$0xff]  ;;  %591 = vst [vmem:[#allocation2 + $0x20] sm:$0xf] %v590_v27 }
  0x1d   :  { %v237_v34 = vld [vmem:[#allocation2 + $0x28] sm:$0x1]  ;;  %v299_v35 = vld [vmem:[#allocation2 + $0x2c] sm:$0x1]  ;;  %576 = vst [vmem:[#allocation2 + $0xc] sm:$0x1] %v575_v30  ;;  %v584_v41 = vsel %vm6035_vm9, %v430_v28, %v583_v25  ;;  %v168_v57 = vmax.f32 %v6077_v31, %v5539_v33 }
  0x1e   :  { %v580_v36 = vld [vmem:[#allocation2 + $0x14] sm:$0x1]  ;;  %v586_v37 = vld [vmem:[#allocation2 + $0x1c] sm:$0x1]  ;;  %v238_v38 = vsel %vm5957_vm4, 0, %v237_v34  ;;  %v300_v39 = vsel %vm5994_vm7, 0, %v299_v35 }
  0x1f   :  { %v1220_v40 = vld [vmem:[#allocation2 + $0x10] sm:$0xf]  ;;  %v581_v42 = vsel %vm5957_vm4, %v423_v16, %v580_v36  ;;  %v587_v43 = vsel %vm5957_vm4, %v431_v29, %v586_v37  ;;  %v6095_v44 = vrot.slane %v744_v23, 5  ;;  %239 = vst [vmem:[#allocation2 + $0x28] sm:$0x1] %v238_v38  ;;  %s5887_s30 = smov 20  }
  0x20   :  { %v5540_v45 = vld [vmem:[%s8767_s0 + $0x91] ss:$2 sm:$0xff]  ;;  %301 = vst [vmem:[#allocation2 + $0x2c] sm:$0x1] %v300_v39  ;;  %1253 = vrot.lane.b32.xlu1 %v1220_v40, %s5886_s29  ;;  %585 = vst [vmem:[#allocation2 + $0x18] sm:$0xf] %v584_v41 }
  0x21   :  { %582 = vst [vmem:[#allocation2 + $0x14] sm:$0x1] %v581_v42  ;;  %v1027_v47 = vld [vmem:[#allocation2 + $0x10] sm:$0xe]  ;;  %588 = vst [vmem:[#allocation2 + $0x1c] sm:$0x1] %v587_v43  ;;  %v169_v58 = vmax.f32 %v5508_v32, %v5540_v45 }
  0x22   :  { %v699_v48 = vld [vmem:[#allocation2] sm:$0xf]  ;;  %vm731_vm12 = vsmask.f32 3328  ;;  %vm732_vm13 = vsmask.f32 7440 }
  0x23   :  { %v703_v49 = vld [vmem:[#allocation2 + $0x10] sm:$0xf]  ;;  %v735_v50 = vshrl.u32 %v699_v48, 16  ;;  %v738_v51 = vshll.u32 %v699_v48, 16  ;;  %v1219_v54 = vld [vmem:[#allocation2 + $0x8] sm:$0xf]  ;;  %v196_v21 = vmax.f32 %v168_v57, %v169_v58  ;;  %vm6116_vm14 = vmor %vm731_vm12, %vm732_vm13 }
  0x24   :  { %v763_v52 = vshrl.u32 %v703_v49, 16  ;;  %v766_v53 = vshll.u32 %v703_v49, 16  ;;  %v1025_v55 = vld [vmem:[#allocation2 + $0x8] sm:$0xe]  ;;  %1251 = vrot.lane.b32.xlu0 %v1219_v54, %s5886_s29  ;;  %v5581_v60 = vrot.slane %v1027_v47, 9  ;;  %s5888_s10 = smov 4  }
  0x25   :  { %v1637_v56 = vld [vmem:[#allocation2 + $0x8] sm:$0xe]  ;;  %v5580_v59 = vrot.slane %v1025_v55, 9  ;;  %v737_v61 = vrot.slane %v735_v50, 4  ;;  %v740_v62 = vrot.slane %v738_v51, 5  ;;  %v6120_v47 = vpack.c.bf16 %v196_v21, %v196_v21  ;;  %s5889_s11 = smov 16  }
  0x26   :  { %v701_v63 = vld [vmem:[#allocation2 + $0x8] sm:$0xf]  ;;  %v5595_v0 = vrot.slane %v1637_v56, 9  ;;  %v1639_v2 = vld [vmem:[#allocation2 + $0x10] sm:$0xe]  ;;  %v765_v3 = vrot.slane %v763_v52, 4 }
  0x27   :  { %v768_v4 = vrot.slane %v766_v53, 5  ;;  %v749_v5 = vshrl.u32 %v701_v63, 16  ;;  %v1222_v7 = vld [vmem:[#allocation2 + $0x20] sm:$0xf]  ;;  %v1026_v8 = vld [vmem:[#allocation2 + $0xc] sm:$0x1]  ;;  %v741_v10 = vor.u32 %v740_v62, %v737_v61 }
  0x28   :  { %v1638_v9 = vld [vmem:[#allocation2 + $0xc] sm:$0x1]  ;;  %1257 = vrot.lane.b32.xlu1 %v1222_v7, %s5886_s29  ;;  %v1096_v11 = vrot.slane %v1026_v8, 5  ;;  %v752_v17 = vshll.u32 %v701_v63, 16  ;;  %v1221_v18 = vld [vmem:[#allocation2 + $0x18] sm:$0xf] }
  0x29   :  { %v1703_v14 = vrot.slane %v1638_v9, 5  ;;  %v702_v15 = vld [vmem:[#allocation2 + $0xc] sm:$0x1]  ;;  %v751_v16 = vrot.slane %v749_v5, 4  ;;  %v1028_v19 = vld [vmem:[#allocation2 + $0x14] sm:$0x1]  ;;  %1255 = vrot.lane.b32.xlu0 %v1221_v18, %s5886_s29  ;;  %v769_v28 = vor.u32 %v768_v4, %v765_v3 }
  0x2a   :  { %v1029_v20 = vld [vmem:[#allocation2 + $0x18] sm:$0xe]  ;;  %v1097_v22 = vsel %vm6052_vm11, %v5580_v59, %v1096_v11  ;;  %v1100_v23 = vrot.slane %v1028_v19, 5  ;;  %v1030_v25 = vld [vmem:[#allocation2 + $0x1c] sm:$0x1]  ;;  %v5596_v31 = vrot.slane %v1639_v2, 9 }
  0x2b   :  { %v5582_v26 = vrot.slane %v1029_v20, 9  ;;  %v1640_v27 = vld [vmem:[#allocation2 + $0x14] sm:$0x1]  ;;  %v1316_v29 = vld [vmem:[#allocation2 + $0x8] sm:$0xf]  ;;  %v1104_v30 = vrot.slane %v1030_v25, 5  ;;  %v1704_v41 = vsel %vm6052_vm11, %v5595_v0, %v1703_v14 }
  0x2c   :  { %v1707_v32 = vrot.slane %v1640_v27, 5  ;;  %v742_v33 = vrot.slane %v741_v10, 4  ;;  %v704_v34 = vld [vmem:[#allocation2 + $0x14] sm:$0x1]  ;;  %1156 = vrot.lane.b32.xlu1 %v1097_v22, %s5885_s20  ;;  %v1101_v35 = vsel %vm6052_vm11, %v5581_v60, %v1100_v23  ;;  %v754_v37 = vrot.slane %v752_v17, 5  ;;  %s5890_s16 = smov 24  }
  0x2d   :  { %v772_v36 = vshll.u32 %v704_v34, 16  ;;  %v758_v38 = vshll.u32 %v702_v15, 16  ;;  %v705_v39 = vld [vmem:[#allocation2 + $0x18] sm:$0xf]  ;;  %v1105_v40 = vsel %vm6052_vm11, %v5582_v26, %v1104_v30  ;;  %v706_v43 = vld [vmem:[#allocation2 + $0x1c] sm:$0x1]  ;;  %1158 = vrot.lane.b32.xlu0 %v1101_v35, %s5885_s20 }
  0x2e   :  { %v777_v45 = vshrl.u32 %v705_v39, 16  ;;  %v770_v48 = vrot.slane %v769_v28, 4  ;;  %v755_v50 = vor.u32 %v754_v37, %v751_v16  ;;  %v780_v51 = vshll.u32 %v705_v39, 16  ;;  %v1318_v52 = vld [vmem:[#allocation2 + $0x10] sm:$0xf]  ;;  %s5891_s13 = smov 28  }
  0x2f   :  { %v774_v49 = vrot.slane %v772_v36, 5  ;;  %v786_v54 = vshll.u32 %v706_v43, 16  ;;  %v1317_v55 = vld [vmem:[#allocation2 + $0xc] sm:$0x1]  ;;  %v1349_v56 = vshrl.u32 %v1316_v29, 16  ;;  %v1352_v57 = vshll.u32 %v1316_v29, 16 }
  0x30   :  { %v779_v53 = vrot.slane %v777_v45, 4  ;;  %1160 = vrot.lane.b32.xlu1 %v1105_v40, %s5885_s20  ;;  %v1708_v58 = vsel %vm6052_vm11, %v5596_v31, %v1707_v32  ;;  %v747_v59 = vsel %vm6116_vm14, %v742_v33, %v6095_v44  ;;  %v760_v60 = vrot.slane %v758_v38, 5  ;;  %v1319_v62 = vld [vmem:[#allocation2 + $0x14] sm:$0x1]  ;;  %v592_v63 = vld [vmem:[#allocation2 + $0x24] sm:$0x1] }
  0x31   :  { %v782_v61 = vrot.slane %v780_v51, 5  ;;  %v756_v0 = vrot.slane %v755_v50, 4  ;;  %v1351_v2 = vrot.slane %v1349_v56, 4  ;;  %v1354_v3 = vrot.slane %v1352_v57, 5  ;;  %v1322_v5 = vld [vmem:[#allocation2 + $0x20] sm:$0xf]  ;;  %1765 = vrot.lane.b32.xlu0 %v1704_v41, %s5887_s30 }
  0x32   :  { %v1363_v4 = vshrl.u32 %v1318_v52, 16  ;;  %v788_v8 = vrot.slane %v786_v54, 5  ;;  %v1358_v9 = vshll.u32 %v1317_v55, 16  ;;  %v1366_v10 = vshll.u32 %v1318_v52, 16  ;;  %v1320_v11 = vld [vmem:[#allocation2 + $0x18] sm:$0xf] }
  0x33   :  { %v783_v7 = vor.u32 %v782_v61, %v779_v53  ;;  %v1355_v14 = vor.u32 %v1354_v3, %v1351_v2  ;;  %v1372_v44 = vshll.u32 %v1319_v62, 16  ;;  %v593_v16 = vsel %vm5957_vm4, %v439_v24, %v592_v63  ;;  %v1321_v21 = vld [vmem:[#allocation2 + $0x1c] sm:$0x1]  ;;  %v1930_v33 = vld [vmem:[#allocation2 + $0x18] sm:$0xf]  ;;  %s5892_s24 = smov 32  }
  0x34   :  { %v1365_v15 = vrot.slane %v1363_v4, 4  ;;  %1767 = vrot.lane.b32.xlu1 %v1708_v58, %s5887_s30  ;;  %v1368_v18 = vrot.slane %v1366_v10, 5  ;;  %594 = vst [vmem:[#allocation2 + $0x24] sm:$0x1] %v593_v16  ;;  %v1391_v19 = vshrl.u32 %v1322_v5, 16  ;;  %v1394_v20 = vshll.u32 %v1322_v5, 16 }
  0x35   :  { %v784_v17 = vrot.slane %v783_v7, 4  ;;  %v775_v22 = vsel %vm6116_vm14, %v770_v48, %v774_v49  ;;  %v761_v23 = vsel %vm6116_vm14, %v756_v0, %v760_v60  ;;  %v1377_v25 = vshrl.u32 %v1320_v11, 16  ;;  %958 = vrot.lane.b32.xlu0 %v747_v59, %s5888_s10  ;;  %v1641_v39 = vld [vmem:[#allocation2 + $0x18] sm:$0xe]  ;;  %v1642_v43 = vld [vmem:[#allocation2 + $0x1c] sm:$0x1] }
  0x36   :  { %v1380_v26 = vshll.u32 %v1320_v11, 16  ;;  %v1360_v12 = vrot.slane %v1358_v9, 5  ;;  %v1369_v24 = vor.u32 %v1368_v18, %v1365_v15  ;;  %v1393_v27 = vrot.slane %v1391_v19, 4  ;;  %v595_v48 = vld [vmem:[#allocation2 + $0x28] sm:$0xf] }
  0x37   :  { %v1396_v28 = vrot.slane %v1394_v20, 5  ;;  %v1356_v29 = vrot.slane %v1355_v14, 4  ;;  %v1379_v30 = vrot.slane %v1377_v25, 4  ;;  %v1386_v32 = vshll.u32 %v1321_v21, 16  ;;  %v1643_v53 = vld [vmem:[#allocation2 + $0x20] sm:$0xe] }
  0x38   :  { %v1382_v31 = vrot.slane %v1380_v26, 5  ;;  %962 = vrot.lane.b32.xlu1 %v775_v22, %s5888_s10  ;;  %v789_v34 = vsel %vm6116_vm14, %v784_v17, %v788_v8  ;;  %v1374_v35 = vrot.slane %v1372_v44, 5  ;;  %v1370_v36 = vrot.slane %v1369_v24, 4  ;;  %v1928_v55 = vld [vmem:[#allocation2 + $0x10] sm:$0xf] }
  0x39   :  { %v1397_v37 = vor.u32 %v1396_v28, %v1393_v27  ;;  %v441_v40 = vshrl.u32 %v6120_v47, 16  ;;  %960 = vrot.lane.b32.xlu0 %v761_v23, %s5888_s10  ;;  %v1388_v41 = vrot.slane %v1386_v32, 5  ;;  %v444_v45 = vshll.u32 %v6120_v47, 16  ;;  %v1931_v58 = vld [vmem:[#allocation2 + $0x1c] sm:$0x1] }
  0x3a   :  { %v1383_v38 = vor.u32 %v1382_v31, %v1379_v30  ;;  %v1975_v49 = vshrl.u32 %v1930_v33, 16  ;;  %v1361_v50 = vsel %vm6116_vm14, %v1356_v29, %v1360_v12  ;;  %v5597_v57 = vrot.slane %v1641_v39, 9  ;;  %v598_v0 = vld [vmem:[#allocation2 + $0x2c] sm:$0x1]  ;;  %v1932_v7 = vld [vmem:[#allocation2 + $0x20] sm:$0xf] }
  0x3b   :  { %v1323_v51 = vld [vmem:[#allocation2 + $0x24] sm:$0x1]  ;;  %v443_v54 = vrot.slane %v441_v40, 7  ;;  %v1978_v59 = vshll.u32 %v1930_v33, 16  ;;  %v1375_v60 = vsel %vm6116_vm14, %v1370_v36, %v1374_v35  ;;  %v1398_v47 = vrot.slane %v1397_v37, 4 }
  0x3c   :  { %v1384_v52 = vrot.slane %v1383_v38, 4  ;;  %964 = vrot.lane.b32.xlu1 %v789_v34, %s5888_s10  ;;  %v1400_v56 = vshll.u32 %v1323_v51, 16  ;;  %v1644_v61 = vld [vmem:[#allocation2 + $0x24] sm:$0x1]  ;;  %v1977_v3 = vrot.slane %v1975_v49, 4  ;;  %v1961_v5 = vshrl.u32 %v1928_v55, 16 }
  0x3d   :  { %v446_v62 = vor.u32 %v444_v45, %v443_v54  ;;  %v447_v63 = vrot.slane %v443_v54, 4  ;;  %1572 = vrot.lane.b32.xlu0 %v1361_v50, %s5889_s11  ;;  %v1980_v4 = vrot.slane %v1978_v59, 5  ;;  %v1711_v9 = vrot.slane %v1642_v43, 5  ;;  %v1929_v11 = vld [vmem:[#allocation2 + $0x14] sm:$0x1] }
  0x3e   :  { %v1402_v2 = vrot.slane %v1400_v56, 5  ;;  %v1389_v8 = vsel %vm6116_vm14, %v1384_v52, %v1388_v41  ;;  %v1964_v14 = vshll.u32 %v1928_v55, 16  ;;  %v5598_v15 = vrot.slane %v1643_v53, 9  ;;  %v1933_v26 = vld [vmem:[#allocation2 + $0x24] sm:$0x1] }
  0x3f   :  { %v596_v10 = vsel %vm6035_vm9, %v446_v62, %v595_v48  ;;  %v1715_v44 = vrot.slane %v1644_v61, 5  ;;  %v599_v16 = vsel %vm5957_vm4, %v447_v63, %v598_v0  ;;  %v1984_v18 = vshll.u32 %v1931_v58, 16  ;;  %v6164_v24 = vld [vmem:[#allocation2 + $0x18] sm:$0xe]  ;;  %v6169_v28 = vld [vmem:[#allocation2 + $0x1c] sm:$0x1] }
  0x40   :  { %1574 = vrot.lane.b32.xlu1 %v1375_v60, %s5889_s11  ;;  %597 = vst [vmem:[#allocation2 + $0x28] sm:$0xf] %v596_v10  ;;  %v1403_v17 = vsel %vm6116_vm14, %v1398_v47, %v1402_v2  ;;  %600 = vst [vmem:[#allocation2 + $0x2c] sm:$0x1] %v599_v16  ;;  %v1989_v19 = vshrl.u32 %v1932_v7, 16  ;;  %v1992_v20 = vshll.u32 %v1932_v7, 16  ;;  %v1981_v21 = vor.u32 %v1980_v4, %v1977_v3 }
  0x41   :  { %1576 = vrot.lane.b32.xlu0 %v1389_v8, %s5889_s11  ;;  %v1963_v22 = vrot.slane %v1961_v5, 4  ;;  %v1966_v23 = vrot.slane %v1964_v14, 5  ;;  %v1970_v25 = vshll.u32 %v1929_v11, 16  ;;  %v1712_v12 = vsel %vm6052_vm11, %v5597_v57, %v1711_v9  ;;  %v1831_v29 = vld [vmem:[#allocation2 + $0x10] sm:$0xf] }
  0x42   :  { %v1716_v27 = vsel %vm6052_vm11, %v5598_v15, %v1715_v44  ;;  %v6171_v30 = vrot.slane %v1984_v18, 5  ;;  %v1991_v31 = vrot.slane %v1989_v19, 4  ;;  %v1994_v32 = vrot.slane %v1992_v20, 5  ;;  %v6173_v34 = vld [vmem:[#allocation2 + $0x10] sm:$0xe] }
  0x43   :  { %v1998_v33 = vshll.u32 %v1933_v26, 16  ;;  %v6176_v35 = vrot.slane %v1981_v21, 4  ;;  %v1967_v36 = vor.u32 %v1966_v23, %v1963_v22  ;;  %v6178_v37 = vrot.slane %v1970_v25, 5  ;;  %v707_v39 = vld [vmem:[#allocation2 + $0x20] sm:$0xf] }
  0x44   :  { %1578 = vrot.lane.b32.xlu1 %v1403_v17, %s5889_s11  ;;  %v5612_v38 = vrot.slane %v6164_v24, 9  ;;  %v1832_v40 = vld [vmem:[#allocation2 + $0x18] sm:$0xf]  ;;  %v6181_v43 = vld [vmem:[#allocation2 + $0x24] sm:$0x1]  ;;  %v1995_v53 = vor.u32 %v1994_v32, %v1991_v31  ;;  %v2319_v55 = vrot.slane %v6169_v28, 5 }
  0x45   :  { %1769 = vrot.lane.b32.xlu0 %v1712_v12, %s5887_s30  ;;  %v5511_v45 = vld [vmem:[%s8767_s0 + $0xc0] ss:$2 sm:$0xff]  ;;  %v5543_v51 = vld [vmem:[%s8767_s0 + $0xc1] ss:$2 sm:$0xff]  ;;  %v6190_v54 = vrot.slane %v1998_v33, 5  ;;  %v5611_v56 = vrot.slane %v6173_v34, 9  ;;  %v1987_v17 = vsel %vm6116_vm14, %v6176_v35, %v6171_v30 }
  0x46   :  { %v1833_v52 = vld [vmem:[#allocation2 + $0x20] sm:$0xf]  ;;  %v1968_v58 = vrot.slane %v1967_v36, 4  ;;  %v791_v47 = vshrl.u32 %v707_v39, 16  ;;  %v5512_v61 = vld [vmem:[%s8767_s0 + $0xd0] ss:$2 sm:$0xff]  ;;  %v172_v3 = vmax.f32 %v5511_v45, %v5543_v51  ;;  %v2320_v34 = vsel %vm6052_vm11, %v5612_v38, %v2319_v55 }
  0x47   :  { %v1934_v41 = vld [vmem:[#allocation2 + $0x28] sm:$0xf]  ;;  %v1935_v48 = vld [vmem:[#allocation2 + $0x2c] sm:$0x1]  ;;  %v794_v0 = vshll.u32 %v707_v39, 16  ;;  %v800_v2 = vshll.u32 %v6181_v43, 16 }
  0x48   :  { %1771 = vrot.lane.b32.xlu1 %v1716_v27, %s5887_s30  ;;  %v2003_v49 = vshrl.u32 %v1934_v41, 16  ;;  %v2006_v50 = vshll.u32 %v1934_v41, 16  ;;  %v709_v57 = vld [vmem:[#allocation2 + $0x28] sm:$0xf]  ;;  %v2012_v63 = vshll.u32 %v1935_v48, 16  ;;  %v1996_v10 = vrot.slane %v1995_v53, 4 }
  0x49   :  { %1863 = vrot.lane.b32.xlu0 %v1831_v29, %s5890_s16  ;;  %v1834_v62 = vld [vmem:[#allocation2 + $0x28] sm:$0xf]  ;;  %v805_v4 = vshrl.u32 %v709_v57, 16  ;;  %v808_v5 = vshll.u32 %v709_v57, 16  ;;  %v5544_v7 = vld [vmem:[%s8767_s0 + $0xd1] ss:$2 sm:$0xff]  ;;  %v1973_v22 = vsel %vm6116_vm14, %v1968_v58, %v6178_v37 }
  0x4a   :  { %v2005_v59 = vrot.slane %v2003_v49, 4  ;;  %v2008_v60 = vrot.slane %v2006_v50, 5  ;;  %v243_v8 = vld [vmem:[#allocation2 + $0x38] sm:$0x1]  ;;  %v2250_v11 = vld [vmem:[#allocation2 + $0x14] sm:$0x1]  ;;  %v173_v14 = vmax.f32 %v5512_v61, %v5544_v7  ;;  %v2001_v41 = vsel %vm6116_vm14, %v1996_v10, %v6190_v54 }
  0x4b   :  { %v244_v15 = vsel %vm5957_vm4, 0, %v243_v8  ;;  %v305_v44 = vld [vmem:[#allocation2 + $0x3c] sm:$0x1]  ;;  %v5509_v16 = vld [vmem:[%s8767_s0 + $0xa0] ss:$2 sm:$0xff]  ;;  %v793_v19 = vrot.slane %v791_v47, 4 }
  0x4c   :  { %1865 = vrot.lane.b32.xlu1 %v1832_v40, %s5890_s16  ;;  %v2009_v9 = vor.u32 %v2008_v60, %v2005_v59  ;;  %v710_v18 = vld [vmem:[#allocation2 + $0x2c] sm:$0x1]  ;;  %245 = vst [vmem:[#allocation2 + $0x38] sm:$0x1] %v244_v15  ;;  %v306_v20 = vsel %vm5994_vm7, 0, %v305_v44  ;;  %v2014_v23 = vrot.slane %v2012_v63, 5  ;;  %v198_v26 = vmax.f32 %v172_v3, %v173_v14 }
  0x4d   :  { %1867 = vrot.lane.b32.xlu0 %v1833_v52, %s5890_s16  ;;  %v5510_v21 = vld [vmem:[%s8767_s0 + $0xb0] ss:$2 sm:$0xff]  ;;  %v796_v25 = vrot.slane %v794_v0, 5  ;;  %307 = vst [vmem:[#allocation2 + $0x3c] sm:$0x1] %v306_v20  ;;  %v807_v29 = vrot.slane %v805_v4, 4 }
  0x4e   :  { %v5541_v12 = vld [vmem:[%s8767_s0 + $0xa1] ss:$2 sm:$0xff]  ;;  %v5542_v27 = vld [vmem:[%s8767_s0 + $0xb1] ss:$2 sm:$0xff]  ;;  %v810_v30 = vrot.slane %v808_v5, 5  ;;  %v2010_v36 = vrot.slane %v2009_v9, 4  ;;  %v5743_v37 = vpack.c.bf16 %v198_v26, %v198_v26 }
  0x4f   :  { %v170_v31 = vmax.f32 %v5509_v16, %v5541_v12  ;;  %v171_v32 = vmax.f32 %v5510_v21, %v5542_v27  ;;  %v240_v33 = vld [vmem:[#allocation2 + $0x30] sm:$0x1]  ;;  %v302_v35 = vld [vmem:[#allocation2 + $0x34] sm:$0x1]  ;;  %v2315_v43 = vrot.slane %v2250_v11, 5  ;;  %v814_v45 = vshll.u32 %v710_v18, 16 }
  0x50   :  { %1869 = vrot.lane.b32.xlu1 %v1834_v62, %s5890_s16  ;;  %v241_v39 = vsel %vm5957_vm4, 0, %v240_v33  ;;  %v303_v40 = vsel %vm5994_vm7, 0, %v302_v35  ;;  %v797_v49 = vor.u32 %v796_v25, %v793_v19  ;;  %v6236_v50 = vrot.slane %v800_v2, 5  ;;  %v5513_v57 = vld [vmem:[%s8767_s0 + $0xe0] ss:$2 sm:$0xff] }
  0x51   :  { %2184 = vrot.lane.b32.xlu0 %v1973_v22, %s5891_s13  ;;  %v197_v48 = vmax.f32 %v170_v31, %v171_v32  ;;  %242 = vst [vmem:[#allocation2 + $0x30] sm:$0x1] %v241_v39  ;;  %304 = vst [vmem:[#allocation2 + $0x34] sm:$0x1] %v303_v40  ;;  %v457_v51 = vshrl.u32 %v5743_v37, 16  ;;  %v460_v52 = vshll.u32 %v5743_v37, 16  ;;  %v2015_v59 = vsel %vm6116_vm14, %v2010_v36, %v2014_v23 }
  0x52   :  { %v5514_v54 = vld [vmem:[%s8767_s0 + $0xf0] ss:$2 sm:$0xff]  ;;  %v5545_v58 = vld [vmem:[%s8767_s0 + $0xe1] ss:$2 sm:$0xff]  ;;  %v811_v60 = vor.u32 %v810_v30, %v807_v29  ;;  %v5546_v62 = vld [vmem:[%s8767_s0 + $0xf1] ss:$2 sm:$0xff]  ;;  %v2316_v0 = vsel %vm6052_vm11, %v5611_v56, %v2315_v43 }
  0x53   :  { %v5742_v53 = vpack.c.bf16 %v197_v48, %v197_v48  ;;  %v459_v47 = vrot.slane %v457_v51, 7  ;;  %v607_v61 = vld [vmem:[#allocation2 + $0x38] sm:$0xf]  ;;  %v174_v63 = vmax.f32 %v5513_v57, %v5545_v58  ;;  %v2253_v2 = vld [vmem:[#allocation2 + $0x20] sm:$0xe]  ;;  %v175_v7 = vmax.f32 %v5514_v54, %v5546_v62 }
  0x54   :  { %2186 = vrot.lane.b32.xlu1 %v1987_v17, %s5891_s13  ;;  %v610_v3 = vld [vmem:[#allocation2 + $0x3c] sm:$0x1]  ;;  %v246_v8 = vld [vmem:[#allocation2 + $0x40] sm:$0x1]  ;;  %v798_v9 = vrot.slane %v797_v49, 4  ;;  %v816_v56 = vrot.slane %v814_v45, 5 }
  0x55   :  { %2188 = vrot.lane.b32.xlu0 %v2001_v41, %s5891_s13  ;;  %v449_v4 = vshrl.u32 %v5742_v53, 16  ;;  %v452_v5 = vshll.u32 %v5742_v53, 16  ;;  %v2254_v10 = vld [vmem:[#allocation2 + $0x24] sm:$0x1]  ;;  %v462_v11 = vor.u32 %v460_v52, %v459_v47  ;;  %v463_v14 = vrot.slane %v459_v47, 4 }
  0x56   :  { %v247_v15 = vsel %vm5957_vm4, 0, %v246_v8  ;;  %v2255_v44 = vld [vmem:[#allocation2 + $0x28] sm:$0xe]  ;;  %v199_v17 = vmax.f32 %v174_v63, %v175_v7  ;;  %v308_v18 = vld [vmem:[#allocation2 + $0x44] sm:$0x1]  ;;  %v812_v19 = vrot.slane %v811_v60, 4  ;;  %v803_v26 = vsel %vm6116_vm14, %v798_v9, %v6236_v50 }
  0x57   :  { %v451_v16 = vrot.slane %v449_v4, 7  ;;  %248 = vst [vmem:[#allocation2 + $0x40] sm:$0x1] %v247_v15  ;;  %v608_v20 = vsel %vm6035_vm9, %v462_v11, %v607_v61  ;;  %v611_v21 = vsel %vm5957_vm4, %v463_v14, %v610_v3  ;;  %v309_v24 = vsel %vm5994_vm7, 0, %v308_v18  ;;  %v2256_v38 = vld [vmem:[#allocation2 + $0x2c] sm:$0x1] }
  0x58   :  { %2190 = vrot.lane.b32.xlu1 %v2015_v59, %s5891_s13  ;;  %v601_v22 = vld [vmem:[#allocation2 + $0x30] sm:$0xf]  ;;  %v604_v28 = vld [vmem:[#allocation2 + $0x34] sm:$0x1]  ;;  %609 = vst [vmem:[#allocation2 + $0x38] sm:$0xf] %v608_v20  ;;  %v5744_v25 = vpack.c.bf16 %v199_v17, %v199_v17  ;;  %v817_v37 = vsel %vm6116_vm14, %v812_v19, %v816_v56 }
  0x59   :  { %2377 = vrot.lane.b32.xlu0 %v2316_v0, %s5892_s24  ;;  %612 = vst [vmem:[#allocation2 + $0x3c] sm:$0x1] %v611_v21  ;;  %v454_v55 = vor.u32 %v452_v5, %v451_v16  ;;  %v455_v23 = vrot.slane %v451_v16, 4  ;;  %310 = vst [vmem:[#allocation2 + $0x44] sm:$0x1] %v309_v24  ;;  %v5614_v12 = vrot.slane %v2255_v44, 9 }
  0x5a   :  { %v5613_v27 = vrot.slane %v2253_v2, 9  ;;  %v2323_v29 = vrot.slane %v2254_v10, 5  ;;  %v249_v30 = vld [vmem:[#allocation2 + $0x48] sm:$0x1]  ;;  %v465_v33 = vshrl.u32 %v5744_v25, 16  ;;  %v468_v35 = vshll.u32 %v5744_v25, 16 }
  0x5b   :  { %v602_v31 = vsel %vm6035_vm9, %v454_v55, %v601_v22  ;;  %v605_v32 = vsel %vm5957_vm4, %v455_v23, %v604_v28  ;;  %v311_v36 = vld [vmem:[#allocation2 + $0x4c] sm:$0x1]  ;;  %v2327_v39 = vrot.slane %v2256_v38, 5  ;;  %v250_v40 = vsel %vm5957_vm4, 0, %v249_v30  ;;  %v255_v45 = vld [vmem:[#allocation2 + $0x58] sm:$0x1] }
  0x5c   :  { %2379 = vrot.lane.b32.xlu1 %v2320_v34, %s5892_s24  ;;  %603 = vst [vmem:[#allocation2 + $0x30] sm:$0xf] %v602_v31  ;;  %606 = vst [vmem:[#allocation2 + $0x34] sm:$0x1] %v605_v32  ;;  %v312_v41 = vsel %vm5994_vm7, 0, %v311_v36  ;;  %v467_v43 = vrot.slane %v465_v33, 7  ;;  %v2324_v48 = vsel %vm6052_vm11, %v5613_v27, %v2323_v29 }
  0x5d   :  { %966 = vrot.lane.b32.xlu0 %v803_v26, %s5888_s10  ;;  %251 = vst [vmem:[#allocation2 + $0x48] sm:$0x1] %v250_v40  ;;  %313 = vst [vmem:[#allocation2 + $0x4c] sm:$0x1] %v312_v41  ;;  %v256_v49 = vsel %vm5957_vm4, 0, %v255_v45  ;;  %v2328_v60 = vsel %vm6052_vm11, %v5614_v12, %v2327_v39  ;;  %vm1006_vm15 = vcmask 60448  }
  0x5e   :  { %v317_v50 = vld [vmem:[#allocation2 + $0x5c] sm:$0x1]  ;;  %v470_v51 = vor.u32 %v468_v35, %v467_v43  ;;  %v471_v52 = vrot.slane %v467_v43, 4  ;;  %v613_v53 = vld [vmem:[#allocation2 + $0x40] sm:$0xf]  ;;  %vm1202_vm1 = vcmask 93248  }
  0x5f   :  { %v5515_v57 = vld [vmem:[%s8767_s0 + $0x100] ss:$2 sm:$0xff]  ;;  %v5516_v54 = vld [vmem:[%s8767_s0 + $0x110] ss:$2 sm:$0xff]  ;;  %257 = vst [vmem:[#allocation2 + $0x58] sm:$0x1] %v256_v49 }
  0x60   :  { %968 = vrot.lane.b32.xlu1 %v817_v37, %s5888_s10  ;;  %v318_v58 = vsel %vm5994_vm7, 0, %v317_v50  ;;  %v252_v59 = vld [vmem:[#allocation2 + $0x50] sm:$0x1]  ;;  %v713_v47 = vld [vmem:[#allocation2 + $0x38] sm:$0xf]  ;;  %v614_v5 = vsel %vm6035_vm9, %v470_v51, %v613_v53  ;;  %vm1299_vm8 = vcmask 126048  }
  0x61   :  { %v714_v61 = vld [vmem:[#allocation2 + $0x3c] sm:$0x1]  ;;  %v5547_v62 = vld [vmem:[%s8767_s0 + $0x101] ss:$2 sm:$0xff]  ;;  %319 = vst [vmem:[#allocation2 + $0x5c] sm:$0x1] %v318_v58  ;;  %2381 = vrot.lane.b32.xlu0 %v2324_v48, %s5892_s24 }
  0x62   :  { %v833_v63 = vshrl.u32 %v713_v47, 16  ;;  %v836_v0 = vshll.u32 %v713_v47, 16  ;;  %v842_v2 = vshll.u32 %v714_v61, 16  ;;  %v5548_v3 = vld [vmem:[%s8767_s0 + $0x111] ss:$2 sm:$0xff]  ;;  %v253_v8 = vsel %vm5957_vm4, 0, %v252_v59 }
  0x63   :  { %v1033_v4 = vld [vmem:[#allocation2 + $0x28] sm:$0xe]  ;;  %v616_v7 = vld [vmem:[#allocation2 + $0x44] sm:$0x1]  ;;  %v711_v11 = vld [vmem:[#allocation2 + $0x30] sm:$0xf]  ;;  %v176_v17 = vmax.f32 %v5515_v57, %v5547_v62  ;;  %v177_v18 = vmax.f32 %v5516_v54, %v5548_v3 }
  0x64   :  { %2383 = vrot.lane.b32.xlu1 %v2328_v60, %s5892_s24  ;;  %v835_v9 = vrot.slane %v833_v63, 4  ;;  %v838_v10 = vrot.slane %v836_v0, 5  ;;  %v1034_v14 = vld [vmem:[#allocation2 + $0x2c] sm:$0x1]  ;;  %615 = vst [vmem:[#allocation2 + $0x40] sm:$0xf] %v614_v5  ;;  %v617_v15 = vsel %vm5957_vm4, %v471_v52, %v616_v7 }
  0x65   :  { %254 = vst [vmem:[#allocation2 + $0x50] sm:$0x1] %v253_v8  ;;  %v712_v34 = vld [vmem:[#allocation2 + $0x34] sm:$0x1]  ;;  %v819_v56 = vshrl.u32 %v711_v11, 16  ;;  %v822_v44 = vshll.u32 %v711_v11, 16  ;;  %v200_v33 = vmax.f32 %v176_v17, %v177_v18 }
  0x66   :  { %v1324_v16 = vld [vmem:[#allocation2 + $0x28] sm:$0xf]  ;;  %618 = vst [vmem:[#allocation2 + $0x44] sm:$0x1] %v617_v15  ;;  %v839_v19 = vor.u32 %v838_v10, %v835_v9  ;;  %v844_v20 = vrot.slane %v842_v2, 5  ;;  %v828_v21 = vshll.u32 %v712_v34, 16 }
  0x67   :  { %v821_v22 = vrot.slane %v819_v56, 4  ;;  %v824_v28 = vrot.slane %v822_v44, 5  ;;  %v1031_v24 = vld [vmem:[#allocation2 + $0x20] sm:$0xe]  ;;  %v1326_v38 = vld [vmem:[#allocation2 + $0x30] sm:$0xf]  ;;  %v6325_v58 = vpack.c.bf16 %v200_v33, %v200_v33 }
  0x68   :  { %v840_v55 = vrot.slane %v839_v19, 4  ;;  %v5584_v23 = vrot.slane %v1033_v4, 9  ;;  %v1112_v25 = vrot.slane %v1034_v14, 5  ;;  %v1032_v26 = vld [vmem:[#allocation2 + $0x24] sm:$0x1]  ;;  %v1405_v12 = vshrl.u32 %v1324_v16, 16 }
  0x69   :  { %v825_v27 = vor.u32 %v824_v28, %v821_v22  ;;  %v830_v29 = vrot.slane %v828_v21, 5  ;;  %v1037_v30 = vld [vmem:[#allocation2 + $0x38] sm:$0xe]  ;;  %v1038_v31 = vld [vmem:[#allocation2 + $0x3c] sm:$0x1]  ;;  %v1408_v32 = vshll.u32 %v1324_v16, 16 }
  0x6a   :  { %v845_v35 = vsel %vm6116_vm14, %v840_v55, %v844_v20  ;;  %v5583_v36 = vrot.slane %v1031_v24, 9  ;;  %v1419_v37 = vshrl.u32 %v1326_v38, 16  ;;  %v1422_v39 = vshll.u32 %v1326_v38, 16  ;;  %v1035_v43 = vld [vmem:[#allocation2 + $0x30] sm:$0xe] }
  0x6b   :  { %972 = vrot.lane.b32.xlu1 %v845_v35, %s5888_s10  ;;  %v826_v40 = vrot.slane %v825_v27, 4  ;;  %v1108_v41 = vrot.slane %v1032_v26, 5  ;;  %v1036_v45 = vld [vmem:[#allocation2 + $0x34] sm:$0x1]  ;;  %v1113_v48 = vsel %vm6052_vm11, %v5584_v23, %v1112_v25  ;;  %v5586_v49 = vrot.slane %v1037_v30, 9 }
  0x6c   :  { %v1120_v50 = vrot.slane %v1038_v31, 5  ;;  %v1330_v51 = vld [vmem:[#allocation2 + $0x40] sm:$0xf]  ;;  %v1325_v53 = vld [vmem:[#allocation2 + $0x2c] sm:$0x1]  ;;  %v1407_v57 = vrot.slane %v1405_v12, 4 }
  0x6d   :  { %v831_v52 = vsel %vm6116_vm14, %v826_v40, %v830_v29  ;;  %v1410_v54 = vrot.slane %v1408_v32, 5  ;;  %v5585_v59 = vrot.slane %v1035_v43, 9  ;;  %v1116_v60 = vrot.slane %v1036_v45, 5  ;;  %v1327_v63 = vld [vmem:[#allocation2 + $0x34] sm:$0x1] }
  0x6e   :  { %970 = vrot.lane.b32.xlu0 %v831_v52, %s5888_s10  ;;  %v1421_v47 = vrot.slane %v1419_v37, 4  ;;  %v1424_v61 = vrot.slane %v1422_v39, 5  ;;  %v1109_v62 = vsel %vm6052_vm11, %v5583_v36, %v1108_v41  ;;  %v1447_v0 = vshrl.u32 %v1330_v51, 16  ;;  %v1328_v5 = vld [vmem:[#allocation2 + $0x38] sm:$0xf] }
  0x6f   :  { %1164 = vrot.lane.b32.xlu1 %v1113_v48, %s5885_s20  ;;  %v1450_v2 = vshll.u32 %v1330_v51, 16  ;;  %v1121_v3 = vsel %vm6052_vm11, %v5586_v49, %v1120_v50  ;;  %v1414_v4 = vshll.u32 %v1325_v53, 16  ;;  %v1411_v7 = vor.u32 %v1410_v54, %v1407_v57  ;;  %v1331_v8 = vld [vmem:[#allocation2 + $0x44] sm:$0x1]  ;;  %v6333_v9 = vld [vmem:[#allocation2 + $0x28] sm:$0xe] }
  0x70   :  { %v1117_v10 = vsel %vm6052_vm11, %v5585_v59, %v1116_v60  ;;  %v1425_v11 = vor.u32 %v1424_v61, %v1421_v47  ;;  %v1428_v14 = vshll.u32 %v1327_v63, 16  ;;  %v1329_v15 = vld [vmem:[#allocation2 + $0x3c] sm:$0x1]  ;;  %v6338_v34 = vld [vmem:[#allocation2 + $0x2c] sm:$0x1]  ;;  %v473_v56 = vshrl.u32 %v6325_v58, 16 }
  0x71   :  { %v1449_v44 = vrot.slane %v1447_v0, 4  ;;  %v1452_v16 = vrot.slane %v1450_v2, 5  ;;  %v1433_v17 = vshrl.u32 %v1328_v5, 16  ;;  %v1436_v18 = vshll.u32 %v1328_v5, 16  ;;  %v1224_v19 = vld [vmem:[#allocation2 + $0x30] sm:$0xf] }
  0x72   :  { %1162 = vrot.lane.b32.xlu0 %v1109_v62, %s5885_s20  ;;  %v6342_v20 = vrot.slane %v1414_v4, 5  ;;  %v1456_v21 = vshll.u32 %v1331_v8, 16  ;;  %v1223_v22 = vld [vmem:[#allocation2 + $0x28] sm:$0xf]  ;;  %v6344_v28 = vrot.slane %v1411_v7, 4  ;;  %v1442_v24 = vshll.u32 %v1329_v15, 16 }
  0x73   :  { %1168 = vrot.lane.b32.xlu1 %v1121_v3, %s5885_s20  ;;  %v6346_v38 = vld [vmem:[#allocation2 + $0x30] sm:$0xe]  ;;  %v5599_v55 = vrot.slane %v6333_v9, 9  ;;  %v1719_v23 = vrot.slane %v6338_v34, 5  ;;  %v1426_v25 = vrot.slane %v1425_v11, 4  ;;  %v1430_v26 = vrot.slane %v1428_v14, 5 }
  0x74   :  { %v6351_v12 = vld [vmem:[#allocation2 + $0x34] sm:$0x1]  ;;  %v475_v27 = vrot.slane %v473_v56, 7  ;;  %v476_v29 = vshll.u32 %v6325_v58, 16  ;;  %v1226_v30 = vld [vmem:[#allocation2 + $0x40] sm:$0xf]  ;;  %v1453_v31 = vor.u32 %v1452_v16, %v1449_v44  ;;  %v1417_v3 = vsel %vm6116_vm14, %v6344_v28, %v6342_v20 }
  0x75   :  { %v1435_v32 = vrot.slane %v1433_v17, 4  ;;  %v1438_v33 = vrot.slane %v1436_v18, 5  ;;  %v6355_v35 = vld [vmem:[#allocation2 + $0x40] sm:$0xe]  ;;  %v1458_v36 = vrot.slane %v1456_v21, 5  ;;  %v5600_v37 = vrot.slane %v6346_v38, 9 }
  0x76   :  { %1166 = vrot.lane.b32.xlu0 %v1117_v10, %s5885_s20  ;;  %v6358_v39 = vld [vmem:[#allocation2 + $0x44] sm:$0x1]  ;;  %v1938_v40 = vld [vmem:[#allocation2 + $0x38] sm:$0xf]  ;;  %v6360_v41 = vrot.slane %v1442_v24, 5  ;;  %v1723_v43 = vrot.slane %v6351_v12, 5  ;;  %v1431_v50 = vsel %vm6116_vm14, %v1426_v25, %v1430_v26  ;;  %v478_v52 = vor.u32 %v476_v29, %v475_v27 }
  0x77   :  { %1261 = vrot.lane.b32.xlu1 %v1224_v19, %s5886_s29  ;;  %v6363_v45 = vld [vmem:[#allocation2 + $0x38] sm:$0xe]  ;;  %v1936_v48 = vld [vmem:[#allocation2 + $0x30] sm:$0xf]  ;;  %v5602_v51 = vrot.slane %v6355_v35, 9  ;;  %v479_v53 = vrot.slane %v475_v27, 4  ;;  %v1439_v58 = vor.u32 %v1438_v33, %v1435_v32  ;;  %v1720_v38 = vsel %vm6052_vm11, %v5599_v55, %v1719_v23 }
  0x78   :  { %v1225_v49 = vld [vmem:[#allocation2 + $0x38] sm:$0xf]  ;;  %v314_v57 = vld [vmem:[#allocation2 + $0x54] sm:$0x1]  ;;  %v1454_v54 = vrot.slane %v1453_v31, 4  ;;  %v1731_v59 = vrot.slane %v6358_v39, 5 }
  0x79   :  { %v1650_v60 = vld [vmem:[#allocation2 + $0x3c] sm:$0x1]  ;;  %v2031_v47 = vshrl.u32 %v1938_v40, 16  ;;  %v5601_v61 = vrot.slane %v6363_v45, 9  ;;  %v2034_v63 = vshll.u32 %v1938_v40, 16  ;;  %v2017_v0 = vshrl.u32 %v1936_v48, 16 }
  0x7a   :  { %1259 = vrot.lane.b32.xlu0 %v1223_v22, %s5886_s29  ;;  %v6372_v62 = vld [vmem:[#allocation2 + $0x3c] sm:$0x1]  ;;  %v2020_v2 = vshll.u32 %v1936_v48, 16  ;;  %v6378_v4 = vld [vmem:[#allocation2 + $0x34] sm:$0x1]  ;;  %v1727_v8 = vrot.slane %v1650_v60, 5  ;;  %v1459_v56 = vsel %vm6116_vm14, %v1454_v54, %v1458_v36  ;;  %v1724_v36 = vsel %vm6052_vm11, %v5600_v37, %v1723_v43 }
  0x7b   :  { %1265 = vrot.lane.b32.xlu1 %v1226_v30, %s5886_s29  ;;  %v619_v5 = vld [vmem:[#allocation2 + $0x58] sm:$0xf]  ;;  %v622_v7 = vld [vmem:[#allocation2 + $0x5c] sm:$0x1]  ;;  %v6381_v10 = vld [vmem:[#allocation2 + $0x48] sm:$0xf]  ;;  %v1732_v37 = vsel %vm6052_vm11, %v5602_v51, %v1731_v59 }
  0x7c   :  { %v620_v11 = vsel %vm6035_vm9, %v478_v52, %v619_v5  ;;  %v623_v14 = vsel %vm5957_vm4, %v479_v53, %v622_v7  ;;  %v315_v15 = vsel %vm5994_vm7, 0, %v314_v57  ;;  %v1440_v44 = vrot.slane %v1439_v58, 4  ;;  %v1943_v22 = vld [vmem:[#allocation2 + $0x4c] sm:$0x1]  ;;  %v667_v25 = vld [vmem:[#allocation2] sm:$0xf] }
  0x7d   :  { %v2033_v16 = vrot.slane %v2031_v47, 4  ;;  %v2040_v17 = vshll.u32 %v6372_v62, 16  ;;  %621 = vst [vmem:[#allocation2 + $0x58] sm:$0xf] %v620_v11  ;;  %624 = vst [vmem:[#allocation2 + $0x5c] sm:$0x1] %v623_v14  ;;  %v1728_v43 = vsel %vm6052_vm11, %v5601_v61, %v1727_v8 }
  0x7e   :  { %1263 = vrot.lane.b32.xlu0 %v1225_v49, %s5886_s29  ;;  %316 = vst [vmem:[#allocation2 + $0x54] sm:$0x1] %v315_v15  ;;  %v2036_v18 = vrot.slane %v2034_v63, 5  ;;  %v6393_v19 = vrot.slane %v2017_v0, 4  ;;  %v6395_v20 = vrot.slane %v2020_v2, 5  ;;  %v2026_v21 = vshll.u32 %v6378_v4, 16 }
  0x7f   :  { %1582 = vrot.lane.b32.xlu1 %v1431_v50, %s5889_s11  ;;  %v2059_v28 = vshrl.u32 %v6381_v10, 16  ;;  %v2062_v24 = vshll.u32 %v6381_v10, 16  ;;  %v5519_v26 = vld [vmem:[%s8767_s0 + $0x140] ss:$2 sm:$0xff]  ;;  %683 = vst.msk [vmem:[#allocation3] sm:$0xf] %vm208_vm0, %v667_v25  ;;  %v1445_v30 = vsel %vm6116_vm14, %v1440_v44, %v6360_v41 }
  0x80   :  { %v1940_v12 = vld [vmem:[#allocation2 + $0x40] sm:$0xf]  ;;  %v5520_v27 = vld [vmem:[%s8767_s0 + $0x150] ss:$2 sm:$0xff]  ;;  %v5552_v31 = vld [vmem:[%s8767_s0 + $0x151] ss:$2 sm:$0xff]  ;;  %v2037_v49 = vor.u32 %v2036_v18, %v2033_v16  ;;  %v2023_v57 = vor.u32 %v6395_v20, %v6393_v19 }
  0x81   :  { %v5551_v29 = vld [vmem:[%s8767_s0 + $0x141] ss:$2 sm:$0xff]  ;;  %v261_v33 = vld [vmem:[#allocation2 + $0x68] sm:$0x1]  ;;  %v323_v35 = vld [vmem:[#allocation2 + $0x6c] sm:$0x1]  ;;  %v181_v39 = vmax.f32 %v5520_v27, %v5552_v31 }
  0x82   :  { %1580 = vrot.lane.b32.xlu0 %v1417_v3, %s5889_s11  ;;  %v180_v32 = vmax.f32 %v5519_v26, %v5551_v29  ;;  %v262_v40 = vsel %vm5957_vm4, 0, %v261_v33  ;;  %v324_v45 = vsel %vm5994_vm7, 0, %v323_v35  ;;  %v5517_v41 = vld [vmem:[%s8767_s0 + $0x120] ss:$2 sm:$0xff]  ;;  %v5518_v48 = vld [vmem:[%s8767_s0 + $0x130] ss:$2 sm:$0xff] }
  0x83   :  { %1586 = vrot.lane.b32.xlu1 %v1459_v56, %s5889_s11  ;;  %263 = vst [vmem:[#allocation2 + $0x68] sm:$0x1] %v262_v40  ;;  %325 = vst [vmem:[#allocation2 + $0x6c] sm:$0x1] %v324_v45  ;;  %v5549_v50 = vld [vmem:[%s8767_s0 + $0x121] ss:$2 sm:$0xff] }
  0x84   :  { %v5550_v9 = vld [vmem:[%s8767_s0 + $0x131] ss:$2 sm:$0xff]  ;;  %v258_v34 = vld [vmem:[#allocation2 + $0x60] sm:$0x1]  ;;  %v2068_v55 = vshll.u32 %v1943_v22, 16  ;;  %v202_v23 = vmax.f32 %v180_v32, %v181_v39  ;;  %v178_v51 = vmax.f32 %v5517_v41, %v5549_v50  ;;  %v6450_v53 = vrot.slane %v2040_v17, 5 }
  0x85   :  { %v179_v52 = vmax.f32 %v5518_v48, %v5550_v9  ;;  %v2045_v54 = vshrl.u32 %v1940_v12, 16  ;;  %v2048_v58 = vshll.u32 %v1940_v12, 16  ;;  %v320_v59 = vld [vmem:[#allocation2 + $0x64] sm:$0x1]  ;;  %v6454_v60 = vrot.slane %v2026_v21, 5 }
  0x86   :  { %1584 = vrot.lane.b32.xlu0 %v1445_v30, %s5889_s11  ;;  %v6456_v47 = vld [vmem:[#allocation2 + $0x44] sm:$0x1]  ;;  %v5747_v61 = vpack.c.bf16 %v202_v23, %v202_v23  ;;  %v259_v63 = vsel %vm5957_vm4, 0, %v258_v34  ;;  %v669_v0 = vld [vmem:[#allocation2 + $0x10] sm:$0xf]  ;;  %v6460_v2 = vrot.slane %v2037_v49, 4 }
  0x87   :  { %1775 = vrot.lane.b32.xlu1 %v1724_v36, %s5887_s30  ;;  %v201_v62 = vmax.f32 %v178_v51, %v179_v52  ;;  %v6462_v3 = vrot.slane %v2059_v28, 4  ;;  %v6464_v4 = vrot.slane %v2062_v24, 5  ;;  %260 = vst [vmem:[#allocation2 + $0x60] sm:$0x1] %v259_v63  ;;  %v321_v5 = vsel %vm5994_vm7, 0, %v320_v59 }
  0x88   :  { %685 = vst.msk [vmem:[#allocation3 + $0x8] sm:$0xf] %vm208_vm0, %v669_v0  ;;  %v6470_v7 = vrot.slane %v2068_v55, 5  ;;  %v6472_v8 = vld [vmem:[#allocation2 + $0x58] sm:$0xf]  ;;  %v489_v10 = vshrl.u32 %v5747_v61, 16  ;;  %v2043_v63 = vsel %vm6116_vm14, %v6460_v2, %v6450_v53 }
  0x89   :  { %v492_v11 = vshll.u32 %v5747_v61, 16  ;;  %322 = vst [vmem:[#allocation2 + $0x64] sm:$0x1] %v321_v5  ;;  %v5746_v14 = vpack.c.bf16 %v201_v62, %v201_v62  ;;  %v1836_v15 = vld [vmem:[#allocation2 + $0x38] sm:$0xf]  ;;  %v6475_v56 = vrot.slane %v2023_v57, 4  ;;  %v2065_v35 = vor.u32 %v6464_v4, %v6462_v3 }
  0x8a   :  { %1773 = vrot.lane.b32.xlu0 %v1720_v38, %s5887_s30  ;;  %v6477_v44 = vrot.slane %v2045_v54, 4  ;;  %v6479_v16 = vrot.slane %v2048_v58, 5  ;;  %v2054_v17 = vshll.u32 %v6456_v47, 16  ;;  %v6482_v18 = vld [vmem:[#allocation2 + $0x50] sm:$0xf]  ;;  %v491_v19 = vrot.slane %v489_v10, 7 }
  0x8b   :  { %1779 = vrot.lane.b32.xlu1 %v1732_v37, %s5887_s30  ;;  %v631_v20 = vld [vmem:[#allocation2 + $0x68] sm:$0xf]  ;;  %v481_v21 = vshrl.u32 %v5746_v14, 16  ;;  %v1835_v22 = vld [vmem:[#allocation2 + $0x30] sm:$0xf]  ;;  %v861_v24 = vshrl.u32 %v6472_v8, 16 }
  0x8c   :  { %v6484_v28 = vld [vmem:[#allocation2 + $0x38] sm:$0xe]  ;;  %v634_v25 = vld [vmem:[#allocation2 + $0x6c] sm:$0x1]  ;;  %v484_v26 = vshll.u32 %v5746_v14, 16  ;;  %v864_v29 = vshll.u32 %v6472_v8, 16  ;;  %v494_v30 = vor.u32 %v492_v11, %v491_v19  ;;  %v2051_v36 = vor.u32 %v6479_v16, %v6477_v44 }
  0x8d   :  { %v668_v12 = vld [vmem:[#allocation2 + $0x8] sm:$0xf]  ;;  %v495_v31 = vrot.slane %v491_v19, 4  ;;  %v483_v32 = vrot.slane %v481_v21, 7  ;;  %v670_v33 = vld [vmem:[#allocation2 + $0x18] sm:$0xf]  ;;  %v6514_v9 = vpop.permute.xlu0 %1154 }
  0x8e   :  { %1777 = vrot.lane.b32.xlu0 %v1728_v43, %s5887_s30  ;;  %v1838_v27 = vld [vmem:[#allocation2 + $0x48] sm:$0xf]  ;;  %684 = vst.msk [vmem:[#allocation3 + $0x4] sm:$0xf] %vm208_vm0, %v668_v12  ;;  %v6495_v39 = vld [vmem:[#allocation2 + $0x3c] sm:$0x1]  ;;  %v632_v48 = vsel %vm6035_vm9, %v494_v30, %v631_v20 }
  0x8f   :  { %1873 = vrot.lane.b32.xlu1 %v1836_v15, %s5890_s16  ;;  %686 = vst.msk [vmem:[#allocation3 + $0xc] sm:$0xf] %vm208_vm0, %v670_v33  ;;  %v5521_v40 = vld [vmem:[%s8767_s0 + $0x160] ss:$2 sm:$0xff]  ;;  %v5522_v45 = vld [vmem:[%s8767_s0 + $0x170] ss:$2 sm:$0xff]  ;;  %v635_v38 = vsel %vm5957_vm4, %v495_v31, %v634_v25  ;;  %v486_v37 = vor.u32 %v484_v26, %v483_v32 }
  0x90   :  { %v5553_v41 = vld [vmem:[%s8767_s0 + $0x161] ss:$2 sm:$0xff]  ;;  %v487_v43 = vrot.slane %v483_v32, 4  ;;  %v5554_v50 = vld [vmem:[%s8767_s0 + $0x171] ss:$2 sm:$0xff]  ;;  %v847_v34 = vshrl.u32 %v6482_v18, 16 }
  0x91   :  { %v625_v49 = vld [vmem:[#allocation2 + $0x60] sm:$0xf]  ;;  %v850_v55 = vshll.u32 %v6482_v18, 16  ;;  %633 = vst [vmem:[#allocation2 + $0x68] sm:$0xf] %v632_v48  ;;  %v182_v51 = vmax.f32 %v5521_v40, %v5553_v41  ;;  %v183_v52 = vmax.f32 %v5522_v45, %v5554_v50  ;;  %v5616_v58 = vrot.slane %v6484_v28, 9 }
  0x92   :  { %636 = vst [vmem:[#allocation2 + $0x6c] sm:$0x1] %v635_v38  ;;  %v628_v23 = vld [vmem:[#allocation2 + $0x64] sm:$0x1]  ;;  %v264_v57 = vld [vmem:[#allocation2 + $0x70] sm:$0x1]  ;;  %1871 = vrot.lane.b32.xlu0 %v1835_v22, %s5890_s16  ;;  %v626_v59 = vsel %vm6035_vm9, %v486_v37, %v625_v49  ;;  %v6535_v10 = vpop.permute.xlu1 %1253  ;;  %v2029_v28 = vsel %vm6116_vm14, %v6475_v56, %v6454_v60 }
  0x93   :  { %v1837_v54 = vld [vmem:[#allocation2 + $0x40] sm:$0xf]  ;;  %v629_v47 = vsel %vm5957_vm4, %v487_v43, %v628_v23  ;;  %v265_v61 = vsel %vm5957_vm4, 0, %v264_v57  ;;  %v326_v62 = vld [vmem:[#allocation2 + $0x74] sm:$0x1]  ;;  %1877 = vrot.lane.b32.xlu1 %v1838_v27, %s5890_s16  ;;  %v6531_v0 = vrot.slane %v2054_v17, 5  ;;  %v203_v5 = vmax.f32 %v182_v51, %v183_v52 }
  0x94   :  { %v2257_v3 = vld [vmem:[#allocation2 + $0x30] sm:$0xe]  ;;  %v2258_v4 = vld [vmem:[#allocation2 + $0x34] sm:$0x1]  ;;  %627 = vst [vmem:[#allocation2 + $0x60] sm:$0xf] %v626_v59 }
  0x95   :  { %630 = vst [vmem:[#allocation2 + $0x64] sm:$0x1] %v629_v47  ;;  %266 = vst [vmem:[#allocation2 + $0x70] sm:$0x1] %v265_v61  ;;  %v327_v8 = vsel %vm5994_vm7, 0, %v326_v62  ;;  %v2066_v11 = vrot.slane %v2065_v35, 4  ;;  %v5748_v19 = vpack.c.bf16 %v203_v5, %v203_v5 }
  0x96   :  { %v2335_v14 = vrot.slane %v6495_v39, 5  ;;  %v718_v15 = vld [vmem:[#allocation2 + $0x5c] sm:$0x1]  ;;  %v863_v44 = vrot.slane %v861_v24, 4  ;;  %v866_v16 = vrot.slane %v864_v29, 5  ;;  %v2052_v53 = vrot.slane %v2051_v36, 4  ;;  %1875 = vrot.lane.b32.xlu0 %v1837_v54, %s5890_s16  ;;  %v6553_v24 = vpop.permute.xlu0 %1251 }
  0x97   :  { %328 = vst [vmem:[#allocation2 + $0x74] sm:$0x1] %v327_v8  ;;  %v716_v2 = vld [vmem:[#allocation2 + $0x54] sm:$0x1]  ;;  %v849_v17 = vrot.slane %v847_v34, 4  ;;  %v852_v18 = vrot.slane %v850_v55, 5  ;;  %2194 = vrot.lane.b32.xlu1 %v2043_v63, %s5891_s13  ;;  %v2071_v29 = vsel %vm6116_vm14, %v2066_v11, %v6470_v7 }
  0x98   :  { %v5523_v20 = vld [vmem:[%s8767_s0 + $0x180] ss:$2 sm:$0xff]  ;;  %v5524_v21 = vld [vmem:[%s8767_s0 + $0x190] ss:$2 sm:$0xff]  ;;  %v5555_v22 = vld [vmem:[%s8767_s0 + $0x181] ss:$2 sm:$0xff]  ;;  %v867_v32 = vor.u32 %v866_v16, %v863_v44  ;;  %v2057_v37 = vsel %vm6116_vm14, %v2052_v53, %v6531_v0  ;;  %v2336_v43 = vsel %vm6052_vm11, %v5616_v58, %v2335_v14 }
  0x99   :  { %v870_v25 = vshll.u32 %v718_v15, 16  ;;  %v497_v26 = vshrl.u32 %v5748_v19, 16  ;;  %v5556_v12 = vld [vmem:[%s8767_s0 + $0x191] ss:$2 sm:$0xff]  ;;  %v672_v27 = vld [vmem:[#allocation2 + $0x28] sm:$0xf]  ;;  %v853_v60 = vor.u32 %v852_v18, %v849_v17  ;;  %v184_v38 = vmax.f32 %v5523_v20, %v5555_v22 }
  0x9a   :  { %v5615_v30 = vrot.slane %v2257_v3, 9  ;;  %v2331_v31 = vrot.slane %v2258_v4, 5  ;;  %v721_v33 = vld [vmem:[#allocation2 + $0x68] sm:$0xf]  ;;  %688 = vst.msk [vmem:[#allocation3 + $0x14] sm:$0xf] %vm208_vm0, %v672_v27  ;;  %2192 = vrot.lane.b32.xlu0 %v2029_v28, %s5891_s13  ;;  %v6563_v39 = vpop.permute.xlu1 %1257  ;;  %v185_v7 = vmax.f32 %v5524_v21, %v5556_v12 }
  0x9b   :  { %v889_v56 = vshrl.u32 %v721_v33, 16  ;;  %v892_v35 = vshll.u32 %v721_v33, 16  ;;  %v500_v36 = vshll.u32 %v5748_v19, 16  ;;  %v856_v40 = vshll.u32 %v716_v2, 16  ;;  %v2263_v45 = vld [vmem:[#allocation2 + $0x48] sm:$0xe]  ;;  %2198 = vrot.lane.b32.xlu1 %v2071_v29, %s5891_s13  ;;  %v6571_v55 = vpop.permute.xlu0 %1255 }
  0x9c   :  { %v719_v41 = vld [vmem:[#allocation2 + $0x60] sm:$0xf]  ;;  %v499_v48 = vrot.slane %v497_v26, 7  ;;  %v872_v49 = vrot.slane %v870_v25, 5  ;;  %v2264_v50 = vld [vmem:[#allocation2 + $0x4c] sm:$0x1]  ;;  %v2332_v59 = vsel %vm6052_vm11, %v5615_v30, %v2331_v31  ;;  %v204_v8 = vmax.f32 %v184_v38, %v185_v7 }
  0x9d   :  { %v875_v34 = vshrl.u32 %v719_v41, 16  ;;  %v868_v23 = vrot.slane %v867_v32, 4  ;;  %v891_v51 = vrot.slane %v889_v56, 4  ;;  %v894_v52 = vrot.slane %v892_v35, 5  ;;  %v267_v54 = vld [vmem:[#allocation2 + $0x78] sm:$0x1] }
  0x9e   :  { %v878_v57 = vshll.u32 %v719_v41, 16  ;;  %v5618_v47 = vrot.slane %v2263_v45, 9  ;;  %v722_v61 = vld [vmem:[#allocation2 + $0x6c] sm:$0x1]  ;;  %v502_v62 = vor.u32 %v500_v36, %v499_v48  ;;  %v637_v63 = vld [vmem:[#allocation2 + $0x70] sm:$0xf]  ;;  %2196 = vrot.lane.b32.xlu0 %v2057_v37, %s5891_s13  ;;  %v6576_v58 = vpop.permute.xlu1 %1156  ;;  %v5749_v26 = vpack.c.bf16 %v204_v8, %v204_v8 }
  0x9f   :  { %v854_v0 = vrot.slane %v853_v60, 4  ;;  %v858_v3 = vrot.slane %v856_v40, 5  ;;  %v2261_v4 = vld [vmem:[#allocation2 + $0x40] sm:$0xe]  ;;  %v503_v5 = vrot.slane %v499_v48, 4  ;;  %2387 = vrot.lane.b32.xlu1 %v2336_v43, %s5892_s24  ;;  %v877_v14 = vrot.slane %v875_v34, 4  ;;  %v6583_v53 = vpop.permute.xlu0 %1158 }
  0xa0   :  { %v2262_v11 = vld [vmem:[#allocation2 + $0x44] sm:$0x1]  ;;  %v880_v15 = vrot.slane %v878_v57, 5  ;;  %v638_v44 = vsel %vm6035_vm9, %v502_v62, %v637_v63  ;;  %v268_v16 = vsel %vm5957_vm4, 0, %v267_v54  ;;  %v873_v2 = vsel %vm6116_vm14, %v868_v23, %v872_v49  ;;  %v640_v21 = vld [vmem:[#allocation2 + $0x74] sm:$0x1] }
  0xa1   :  { %v2343_v17 = vrot.slane %v2264_v50, 5  ;;  %v895_v18 = vor.u32 %v894_v52, %v891_v51  ;;  %v898_v19 = vshll.u32 %v722_v61, 16  ;;  %v720_v20 = vld [vmem:[#allocation2 + $0x64] sm:$0x1]  ;;  %639 = vst [vmem:[#allocation2 + $0x70] sm:$0xf] %v638_v44  ;;  %v641_v22 = vsel %vm5957_vm4, %v503_v5, %v640_v21 }
  0xa2   :  { %269 = vst [vmem:[#allocation2 + $0x78] sm:$0x1] %v268_v16  ;;  %2385 = vrot.lane.b32.xlu0 %v2332_v59, %s5892_s24  ;;  %v6590_v28 = vpop.permute.xlu1 %1160  ;;  %v5617_v25 = vrot.slane %v2261_v4, 9  ;;  %642 = vst [vmem:[#allocation2 + $0x74] sm:$0x1] %v641_v22  ;;  %v859_v12 = vsel %vm6116_vm14, %v854_v0, %v858_v3  ;;  %v2339_v27 = vrot.slane %v2262_v11, 5  ;;  %v881_v29 = vor.u32 %v880_v15, %v877_v14 }
  0xa3   :  { %976 = vrot.lane.b32.xlu1 %v873_v2, %s5888_s10  ;;  %v884_v30 = vshll.u32 %v720_v20, 16  ;;  %v6595_v31 = vpop.permute.xlu0 %1765  ;;  %v2344_v32 = vsel %vm6052_vm11, %v5618_v47, %v2343_v17  ;;  %v896_v33 = vrot.slane %v895_v18, 4  ;;  %v900_v60 = vrot.slane %v898_v19, 5  ;;  %v1041_v56 = vld [vmem:[#allocation2 + $0x58] sm:$0xe] }
  0xa4   :  { %v1042_v35 = vld [vmem:[#allocation2 + $0x5c] sm:$0x1]  ;;  %v1039_v36 = vld [vmem:[#allocation2 + $0x50] sm:$0xe]  ;;  %v1040_v40 = vld [vmem:[#allocation2 + $0x54] sm:$0x1]  ;;  %v2340_v37 = vsel %vm6052_vm11, %v5617_v25, %v2339_v27 }
  0xa5   :  { %v1332_v45 = vld [vmem:[#allocation2 + $0x58] sm:$0xf]  ;;  %v6602_v48 = vld [vmem:[#allocation2 + $0x68] sm:$0xe]  ;;  %vm1620_vm10 = vcmask 158848   ;;  %v505_v38 = vshrl.u32 %v5749_v26, 16  ;;  %v901_v51 = vsel %vm6116_vm14, %v896_v33, %v900_v60 }
  0xa6   :  { %974 = vrot.lane.b32.xlu0 %v859_v12, %s5888_s10  ;;  %v6600_v41 = vpop.permute.xlu1 %1767  ;;  %v671_v7 = vld [vmem:[#allocation2 + $0x20] sm:$0xf]  ;;  %v882_v43 = vrot.slane %v881_v29, 4  ;;  %v886_v49 = vrot.slane %v884_v30, 5  ;;  %v1046_v50 = vld [vmem:[#allocation2 + $0x6c] sm:$0x1] }
  0xa7   :  { %2391 = vrot.lane.b32.xlu1 %v2344_v32, %s5892_s24  ;;  %v508_v34 = vshll.u32 %v5749_v26, 16  ;;  %687 = vst.msk [vmem:[#allocation3 + $0x10] sm:$0xf] %vm208_vm0, %v671_v7  ;;  %v959_v23 = vpop.permute.xlu0 %958  ;;  %v5588_v52 = vrot.slane %v1041_v56, 9  ;;  %v1128_v57 = vrot.slane %v1042_v35, 5  ;;  %v1461_v59 = vshrl.u32 %v1332_v45, 16 }
  0xa8   :  { %v1334_v54 = vld [vmem:[#allocation2 + $0x60] sm:$0xf]  ;;  %1007 = vst.msk [vmem:[#allocation3] sm:$0xf] %vm1006_vm15, %v959_v23  ;;  %v5587_v47 = vrot.slane %v1039_v36, 9  ;;  %v1124_v61 = vrot.slane %v1040_v40, 5  ;;  %v887_v11 = vsel %vm6116_vm14, %v882_v43, %v886_v49 }
  0xa9   :  { %v1464_v62 = vshll.u32 %v1332_v45, 16  ;;  %v6611_v63 = vrot.slane %v505_v38, 7  ;;  %1203 = vst.msk [vmem:[#allocation3] sm:$0xf] %vm1202_vm1, %v6514_v9  ;;  %v5590_v3 = vrot.slane %v6602_v48, 9  ;;  %v1136_v4 = vrot.slane %v1046_v50, 5 }
  0xaa   :  { %2389 = vrot.lane.b32.xlu0 %v2340_v37, %s5892_s24  ;;  %v963_v0 = vpop.permute.xlu1 %962  ;;  %v6617_v5 = vld [vmem:[#allocation2 + $0x60] sm:$0xe]  ;;  %v643_v8 = vld [vmem:[#allocation2 + $0x78] sm:$0xf]  ;;  %v6623_v14 = vld [vmem:[#allocation2 + $0x64] sm:$0x1]  ;;  %v1129_v16 = vsel %vm6052_vm11, %v5588_v52, %v1128_v57  ;;  %v1125_v26 = vsel %vm6052_vm11, %v5587_v47, %v1124_v61 }
  0xab   :  { %980 = vrot.lane.b32.xlu1 %v901_v51, %s5888_s10  ;;  %1009 = vst.msk [vmem:[#allocation3 + $0x8] sm:$0xf] %vm1006_vm15, %v963_v0  ;;  %v1475_v9 = vshrl.u32 %v1334_v54, 16  ;;  %v1478_v15 = vshll.u32 %v1334_v54, 16  ;;  %v510_v44 = vor.u32 %v508_v34, %v6611_v63  ;;  %v961_v2 = vpop.permute.xlu0 %960  ;;  %vm1813_vm12 = vcmask 191648   ;;  %v6651_v25 = vld [vmem:[%s8768_s1 + $0x8] sm:$0xff]  }
  0xac   :  { %1300 = vst.msk [vmem:[#allocation3] sm:$0xf] %vm1299_vm8, %v6553_v24  ;;  %v6632_v17 = vld [vmem:[#allocation2 + $0x5c] sm:$0x1]  ;;  %v6634_v18 = vrot.slane %v1461_v59, 4  ;;  %v5589_v24 = vrot.slane %v6617_v5, 9  ;;  %v1137_v30 = vsel %vm6052_vm11, %v5590_v3, %v1136_v4 }
  0xad   :  { %1205 = vst.msk [vmem:[#allocation3 + $0x8] sm:$0xf] %vm1202_vm1, %v6583_v53  ;;  %v6636_v19 = vld [vmem:[#allocation2 + $0x68] sm:$0xf]  ;;  %v6642_v20 = vrot.slane %v1464_v62, 5  ;;  %v644_v22 = vsel %vm6035_vm9, %v510_v44, %v643_v8  ;;  %v1132_v12 = vrot.slane %v6623_v14, 5 }
  0xae   :  { %1008 = vst.msk [vmem:[#allocation3 + $0x4] sm:$0xf] %vm1006_vm15, %v961_v2  ;;  %v1338_v53 = vld [vmem:[#allocation2 + $0x70] sm:$0xf]  ;;  %v6644_v21 = vld [vmem:[#allocation2 + $0x58] sm:$0xe]  ;;  %978 = vrot.lane.b32.xlu0 %v887_v11, %s5888_s10 }
  0xaf   :  { %1302 = vst.msk [vmem:[#allocation3 + $0x8] sm:$0xf] %vm1299_vm8, %v6571_v55  ;;  %v965_v55 = vpop.permute.xlu1 %964  ;;  %v1335_v27 = vld [vmem:[#allocation2 + $0x64] sm:$0x1]  ;;  %645 = vst [vmem:[#allocation2 + $0x78] sm:$0xf] %v644_v22  ;;  %1172 = vrot.lane.b32.xlu1 %v1129_v16, %s5885_s20  ;;  %v1573_v56 = vpop.permute.xlu0 %1572  ;;  %v1467_v43 = vor.u32 %v6642_v20, %v6634_v18  ;;  %v1133_v50 = vsel %vm6052_vm11, %v5589_v24, %v1132_v12 }
  0xb0   :  { %1204 = vst.msk [vmem:[#allocation3 + $0x4] sm:$0xf] %vm1202_vm1, %v6576_v58  ;;  %vm2550_vm13 = vcmask 1041408   ;;  %v329_v29 = vld [vmem:[#allocation2 + $0x7c] sm:$0x1]  ;;  %v1477_v32 = vrot.slane %v1475_v9, 4 }
  0xb1   :  { %1010 = vst.msk [vmem:[#allocation3 + $0xc] sm:$0xf] %vm1006_vm15, %v965_v55  ;;  %v1480_v33 = vrot.slane %v1478_v15, 5  ;;  %v1489_v58 = vshrl.u32 %v6636_v19, 16  ;;  %v1503_v35 = vshrl.u32 %v1338_v53, 16  ;;  %v1506_v36 = vshll.u32 %v1338_v53, 16 }
  0xb2   :  { %1301 = vst.msk [vmem:[#allocation3 + $0x4] sm:$0xf] %vm1299_vm8, %v6535_v10  ;;  %v5856_v60 = vld [vmem:[%s8768_s1 + $0x10] ss:$0 sps:$4 sm:$0x33]   ;;  %v1492_v40 = vshll.u32 %v6636_v19, 16  ;;  %1170 = vrot.lane.b32.xlu0 %v1125_v26, %s5885_s20 }
  0xb3   :  { %1206 = vst.msk [vmem:[#allocation3 + $0xc] sm:$0xf] %vm1202_vm1, %v6590_v28  ;;  %v330_v45 = vsel %vm5994_vm7, 0, %v329_v29  ;;  %v1470_v10 = vshll.u32 %v6632_v17, 16  ;;  %v6678_v48 = vld [vmem:[#allocation2 + $0x5c] sm:$0x1]  ;;  %5841 = vmatprep.subr.msk.bf16.mxu0 %vm2550_vm13, %v5856_v60  ;;  %v1575_v7 = vpop.permute.xlu1 %1574  ;;  %1176 = vrot.lane.b32.xlu1 %v1137_v30, %s5885_s20  ;;  %v1481_v34 = vor.u32 %v1480_v33, %v1477_v32  ;;  %v1577_v52 = vpop.permute.xlu0 %1576 }
  0xb4   :  { %1621 = vst.msk [vmem:[#allocation3] sm:$0xf] %vm1620_vm10, %v1573_v56  ;;  %v2552_v28 = vsel %vm2550_vm13, %v5856_v60, 0  ;;  %331 = vst [vmem:[#allocation2 + $0x7c] sm:$0x1] %v330_v45  ;;  %v6685_v38 = vld [vmem:[%s8768_s1] sm:$0xff]  }
  0xb5   :  { %1303 = vst.msk [vmem:[#allocation3 + $0xc] sm:$0xf] %vm1299_vm8, %v6563_v39  ;;  %v1228_v37 = vld [vmem:[#allocation2 + $0x60] sm:$0xf]  ;;  %v1484_v39 = vshll.u32 %v1335_v27, 16  ;;  %vm1911_vm3 = vcmask 224448   ;;  %5794 = vmatpush3.bf16.msra.mxu0 %v2552_v28 }
  0xb6   :  { %1814 = vst.msk [vmem:[#allocation3] sm:$0xf] %vm1813_vm12, %v6595_v31  ;;  %v5603_v49 = vrot.slane %v6644_v21, 9  ;;  %v1337_v23 = vld [vmem:[#allocation2 + $0x6c] sm:$0x1]  ;;  %5795 = vmatprep.subr.bf16.mxu0 %v6651_v25  ;;  %v1505_v57 = vrot.slane %v1503_v35, 4  ;;  %1174 = vrot.lane.b32.xlu0 %v1133_v50, %s5885_s20 }
  0xb7   :  { %1622 = vst.msk [vmem:[#allocation3 + $0x4] sm:$0xf] %vm1620_vm10, %v1575_v7  ;;  %v6697_v51 = vld [vmem:[#allocation2 + $0x60] sm:$0xe]  ;;  %v674_v31 = vld [vmem:[#allocation2 + $0x38] sm:$0xf]  ;;  %1269 = vrot.lane.b32.xlu1 %v1228_v37, %s5886_s29  ;;  %v1770_v18 = vpop.permute.xlu0 %1769 }
  0xb8   :  { %1815 = vst.msk [vmem:[#allocation3 + $0x4] sm:$0xf] %vm1813_vm12, %v6600_v41  ;;  %v1508_v54 = vrot.slane %v1506_v36, 5  ;;  %v1491_v59 = vrot.slane %v1489_v58, 4  ;;  %v1494_v47 = vrot.slane %v1492_v40, 5  ;;  %v6704_v0 = vrot.slane %v1470_v10, 5  ;;  %v1579_v41 = vpop.permute.xlu1 %1578 }
  0xb9   :  { %690 = vst.msk [vmem:[#allocation3 + $0x1c] sm:$0xf] %vm208_vm0, %v674_v31  ;;  %v673_v61 = vld [vmem:[#allocation2 + $0x30] sm:$0xf]  ;;  %v1227_v62 = vld [vmem:[#allocation2 + $0x58] sm:$0xf]  ;;  %5796 = vmatpush3.bf16.msra.mxu0 %v6651_v25 }
  0xba   :  { %1623 = vst.msk [vmem:[#allocation3 + $0x8] sm:$0xf] %vm1620_vm10, %v1577_v52  ;;  %v1339_v3 = vld [vmem:[#allocation2 + $0x74] sm:$0x1]  ;;  %v6706_v4 = vld [vmem:[#allocation2 + $0x64] sm:$0x1]  ;;  %5797 = vmatprep.subr.bf16.mxu0 %v6685_v38  ;;  %v1509_v19 = vor.u32 %v1508_v54, %v1505_v57  ;;  %v1495_v20 = vor.u32 %v1494_v47, %v1491_v59  ;;  %1267 = vrot.lane.b32.xlu0 %v1227_v62, %s5886_s29 }
  0xbb   :  { %v511_v5 = vrot.slane %v6611_v63, 4  ;;  %689 = vst.msk [vmem:[#allocation3 + $0x18] sm:$0xf] %vm208_vm0, %v673_v61  ;;  %v1486_v8 = vrot.slane %v1484_v39, 5  ;;  %v6711_v11 = vrot.slane %v1467_v43, 4  ;;  %v1498_v14 = vshll.u32 %v1337_v23, 16  ;;  %v1864_v35 = vpop.permute.xlu0 %1863 }
  0xbc   :  { %v1735_v9 = vrot.slane %v6678_v48, 5  ;;  %v6714_v15 = vld [vmem:[#allocation2 + $0x68] sm:$0xe]  ;;  %1624 = vst.msk [vmem:[#allocation3 + $0xc] sm:$0xf] %vm1620_vm10, %v1579_v41  ;;  %v1482_v63 = vrot.slane %v1481_v34, 4  ;;  %v1772_v55 = vpop.permute.xlu1 %1771 }
  0xbd   :  { %v5604_v44 = vrot.slane %v6697_v51, 9  ;;  %v6720_v16 = vld [vmem:[#allocation2 + $0x6c] sm:$0x1]  ;;  %v1946_v2 = vld [vmem:[#allocation2 + $0x68] sm:$0xf]  ;;  %v1512_v24 = vshll.u32 %v1339_v3, 16  ;;  %5798 = vmatpush3.bf16.msra.mxu0 %v6685_v38  ;;  %v1473_v51 = vsel %vm6116_vm14, %v6711_v11, %v6704_v0 }
  0xbe   :  { %v1230_v17 = vld [vmem:[#allocation2 + $0x70] sm:$0xf]  ;;  %v1739_v53 = vrot.slane %v6706_v4, 5  ;;  %v646_v22 = vld [vmem:[#allocation2 + $0x7c] sm:$0x1]  ;;  %vm2232_vm13 = vcmask 257248   ;;  %v1487_v33 = vsel %vm6116_vm14, %v1482_v63, %v1486_v8 }
  0xbf   :  { %1816 = vst.msk [vmem:[#allocation3 + $0x8] sm:$0xf] %vm1813_vm12, %v1770_v18  ;;  %v6725_v25 = vld [vmem:[#allocation2 + $0x70] sm:$0xe]  ;;  %v647_v26 = vsel %vm5957_vm4, %v511_v5, %v646_v22  ;;  %v1660_v12 = vld [vmem:[#allocation2 + $0x74] sm:$0x1]  ;;  %1273 = vrot.lane.b32.xlu1 %v1230_v17, %s5886_s29  ;;  %v1868_v59 = vpop.permute.xlu0 %1867  ;;  %v1736_v5 = vsel %vm6052_vm11, %v5603_v49, %v1735_v9 }
  0xc0   :  { %v1947_v27 = vld [vmem:[#allocation2 + $0x6c] sm:$0x1]  ;;  %v2087_v29 = vshrl.u32 %v1946_v2, 16  ;;  %v2090_v30 = vshll.u32 %v1946_v2, 16  ;;  %648 = vst [vmem:[#allocation2 + $0x7c] sm:$0x1] %v647_v26  ;;  %v1866_v39 = vpop.permute.xlu1 %1865  ;;  %v1740_v4 = vsel %vm6052_vm11, %v5604_v44, %v1739_v53 }
  0xc1   :  { %v1229_v32 = vld [vmem:[#allocation2 + $0x68] sm:$0xf]  ;;  %1817 = vst.msk [vmem:[#allocation3 + $0xc] sm:$0xf] %vm1813_vm12, %v1772_v55  ;;  %v6735_v58 = vrot.slane %v1498_v14, 5  ;;  %v5605_v60 = vrot.slane %v6714_v15, 9 }
  0xc2   :  { %v1743_v56 = vrot.slane %v6720_v16, 5  ;;  %v1510_v36 = vrot.slane %v1509_v19, 4  ;;  %v1514_v40 = vrot.slane %v1512_v24, 5  ;;  %v6739_v45 = vrot.slane %v1495_v20, 4  ;;  %1912 = vst.msk [vmem:[#allocation3] sm:$0xf] %vm1911_vm3, %v1864_v35  ;;  %1271 = vrot.lane.b32.xlu0 %v1229_v32, %s5886_s29 }
  0xc3   :  { %v5606_v10 = vrot.slane %v6725_v25, 9  ;;  %v1747_v28 = vrot.slane %v1660_v12, 5  ;;  %v2096_v38 = vshll.u32 %v1947_v27, 16  ;;  %v1944_v7 = vld [vmem:[#allocation2 + $0x60] sm:$0xf]  ;;  %v6744_v43 = vrot.slane %v2087_v29, 4  ;;  %1590 = vrot.lane.b32.xlu1 %v1487_v33, %s5889_s11  ;;  %v2185_v53 = vpop.permute.xlu0 %2184 }
  0xc4   :  { %v1945_v37 = vld [vmem:[#allocation2 + $0x64] sm:$0x1]  ;;  %v6746_v50 = vrot.slane %v2090_v30, 5  ;;  %v5528_v23 = vld [vmem:[%s8767_s0 + $0x1d0] ss:$2 sm:$0xff]  ;;  %v1515_v54 = vsel %vm6116_vm14, %v1510_v36, %v1514_v40  ;;  %v2073_v47 = vshrl.u32 %v1944_v7, 16  ;;  %v1501_v48 = vsel %vm6116_vm14, %v6739_v45, %v6735_v58  ;;  %v1870_v21 = vpop.permute.xlu1 %1869 }
  0xc5   :  { %v5527_v34 = vld [vmem:[%s8767_s0 + $0x1c0] ss:$2 sm:$0xff]  ;;  %1913 = vst.msk [vmem:[#allocation3 + $0x4] sm:$0xf] %vm1911_vm3, %v1866_v39  ;;  %v5559_v31 = vld [vmem:[%s8767_s0 + $0x1c1] ss:$2 sm:$0xff]  ;;  %v1748_v2 = vsel %vm6052_vm11, %v5606_v10, %v1747_v28 }
  0xc6   :  { %v5560_v52 = vld [vmem:[%s8767_s0 + $0x1d1] ss:$2 sm:$0xff]  ;;  %v273_v57 = vld [vmem:[#allocation2 + $0x88] sm:$0x1]  ;;  %v188_v62 = vmax.f32 %v5527_v34, %v5559_v31  ;;  %v335_v3 = vld [vmem:[#allocation2 + $0x8c] sm:$0x1]  ;;  %1588 = vrot.lane.b32.xlu0 %v1473_v51, %s5889_s11  ;;  %v2093_v17 = vor.u32 %v6746_v50, %v6744_v43 }
  0xc7   :  { %v6768_v61 = vld [vmem:[#allocation2 + $0x70] sm:$0xf]  ;;  %v189_v0 = vmax.f32 %v5528_v23, %v5560_v52  ;;  %1914 = vst.msk [vmem:[#allocation3 + $0x8] sm:$0xf] %vm1911_vm3, %v1868_v59  ;;  %v2076_v41 = vshll.u32 %v1944_v7, 16  ;;  %v274_v11 = vsel %vm5957_vm4, 0, %v273_v57  ;;  %1594 = vrot.lane.b32.xlu1 %v1515_v54, %s5889_s11  ;;  %v2189_v39 = vpop.permute.xlu0 %2188 }
  0xc8   :  { %v1950_v8 = vld [vmem:[#allocation2 + $0x78] sm:$0xf]  ;;  %v5525_v14 = vld [vmem:[%s8767_s0 + $0x1a0] ss:$2 sm:$0xff]  ;;  %vm2425_vm6 = vcmask 290048   ;;  %v2082_v63 = vshll.u32 %v1945_v37, 16  ;;  %v2187_v35 = vpop.permute.xlu1 %2186 }
  0xc9   :  { %v6789_v49 = vld [vmem:[#allocation2 + $0x74] sm:$0x1]  ;;  %v206_v9 = vmax.f32 %v188_v62, %v189_v0  ;;  %275 = vst [vmem:[#allocation2 + $0x88] sm:$0x1] %v274_v11  ;;  %v336_v44 = vsel %vm5994_vm7, 0, %v335_v3  ;;  %v6799_v18 = vrot.slane %v2096_v38, 5 }
  0xca   :  { %1915 = vst.msk [vmem:[#allocation3 + $0xc] sm:$0xf] %vm1911_vm3, %v1870_v21  ;;  %v2101_v19 = vshrl.u32 %v6768_v61, 16  ;;  %337 = vst [vmem:[#allocation2 + $0x8c] sm:$0x1] %v336_v44  ;;  %v2115_v22 = vshrl.u32 %v1950_v8, 16  ;;  %1592 = vrot.lane.b32.xlu0 %v1501_v48, %s5889_s11 }
  0xcb   :  { %v5526_v24 = vld [vmem:[%s8767_s0 + $0x1b0] ss:$2 sm:$0xff]  ;;  %v5557_v20 = vld [vmem:[%s8767_s0 + $0x1a1] ss:$2 sm:$0xff]  ;;  %v2118_v25 = vshll.u32 %v1950_v8, 16  ;;  %v5751_v26 = vpack.c.bf16 %v206_v9, %v206_v9  ;;  %v2075_v29 = vrot.slane %v2073_v47, 4  ;;  %1783 = vrot.lane.b32.xlu1 %v1740_v4, %s5887_s30  ;;  %v1744_v8 = vsel %vm6052_vm11, %v5605_v60, %v1743_v56 }
  0xcc   :  { %v5558_v55 = vld [vmem:[%s8767_s0 + $0x1b1] ss:$2 sm:$0xff]  ;;  %v186_v12 = vmax.f32 %v5525_v14, %v5557_v20  ;;  %v270_v27 = vld [vmem:[#allocation2 + $0x80] sm:$0x1]  ;;  %2233 = vst.msk [vmem:[#allocation3] sm:$0xf] %vm2232_vm13, %v2185_v53 }
  0xcd   :  { %v2078_v30 = vrot.slane %v2076_v41, 5  ;;  %v187_v32 = vmax.f32 %v5526_v24, %v5558_v55  ;;  %v271_v33 = vsel %vm5957_vm4, 0, %v270_v27  ;;  %v332_v58 = vld [vmem:[#allocation2 + $0x84] sm:$0x1]  ;;  %v6815_v36 = vrot.slane %v2082_v63, 5 }
  0xce   :  { %v2104_v40 = vshll.u32 %v6768_v61, 16  ;;  %v521_v45 = vshrl.u32 %v5751_v26, 16  ;;  %v524_v10 = vshll.u32 %v5751_v26, 16  ;;  %272 = vst [vmem:[#allocation2 + $0x80] sm:$0x1] %v271_v33  ;;  %v6820_v28 = vrot.slane %v2093_v17, 4  ;;  %1781 = vrot.lane.b32.xlu0 %v1736_v5, %s5887_s30  ;;  %v2191_v61 = vpop.permute.xlu1 %2190 }
  0xcf   :  { %2234 = vst.msk [vmem:[#allocation3 + $0x4] sm:$0xf] %vm2232_vm13, %v2187_v35  ;;  %v2110_v38 = vshll.u32 %v6789_v49, 16  ;;  %v205_v7 = vmax.f32 %v186_v12, %v187_v32  ;;  %v333_v37 = vsel %vm5994_vm7, 0, %v332_v58  ;;  %v6825_v43 = vrot.slane %v2115_v22, 4  ;;  %1787 = vrot.lane.b32.xlu1 %v1748_v2, %s5887_s30  ;;  %v2378_v49 = vpop.permute.xlu0 %2377 }
  0xd0   :  { %v6827_v50 = vrot.slane %v2118_v25, 5  ;;  %v6829_v34 = vrot.slane %v2101_v19, 4  ;;  %v6831_v23 = vld [vmem:[#allocation2 + $0x78] sm:$0xf]  ;;  %v523_v51 = vrot.slane %v521_v45, 7  ;;  %v2079_v31 = vor.u32 %v2078_v30, %v2075_v29 }
  0xd1   :  { %334 = vst [vmem:[#allocation2 + $0x84] sm:$0x1] %v333_v37  ;;  %2235 = vst.msk [vmem:[#allocation3 + $0x8] sm:$0xf] %vm2232_vm13, %v2189_v39  ;;  %v6834_v52 = vld [vmem:[#allocation2 + $0x68] sm:$0xe]  ;;  %v5750_v54 = vpack.c.bf16 %v205_v7, %v205_v7 }
  0xd2   :  { %v655_v57 = vld [vmem:[#allocation2 + $0x88] sm:$0xf]  ;;  %v5530_v47 = vld [vmem:[%s8767_s0 + $0x1f0] ss:$2 sm:$0xff]  ;;  %v6843_v62 = vrot.slane %v2104_v40, 5  ;;  %v526_v0 = vor.u32 %v524_v10, %v523_v51  ;;  %v527_v3 = vrot.slane %v523_v51, 4  ;;  %v2121_v19 = vor.u32 %v6827_v50, %v6825_v43  ;;  %1785 = vrot.lane.b32.xlu0 %v1744_v8, %s5887_s30  ;;  %v2380_v53 = vpop.permute.xlu1 %2379 }
  0xd3   :  { %v5529_v59 = vld [vmem:[%s8767_s0 + $0x1e0] ss:$2 sm:$0xff]  ;;  %v5561_v41 = vld [vmem:[%s8767_s0 + $0x1e1] ss:$2 sm:$0xff]  ;;  %2236 = vst.msk [vmem:[#allocation3 + $0xc] sm:$0xf] %vm2232_vm13, %v2191_v61  ;;  %v967_v40 = vpop.permute.xlu0 %966  ;;  %v2099_v8 = vsel %vm6116_vm14, %v6820_v28, %v6799_v18 }
  0xd4   :  { %v658_v4 = vld [vmem:[#allocation2 + $0x8c] sm:$0x1]  ;;  %v513_v5 = vshrl.u32 %v5750_v54, 16  ;;  %v516_v11 = vshll.u32 %v5750_v54, 16  ;;  %v5562_v14 = vld [vmem:[%s8767_s0 + $0x1f1] ss:$2 sm:$0xff]  ;;  %v190_v48 = vmax.f32 %v5529_v59, %v5561_v41  ;;  %v656_v15 = vsel %vm6035_vm9, %v526_v0, %v655_v57 }
  0xd5   :  { %v276_v21 = vld [vmem:[#allocation2 + $0x90] sm:$0x1]  ;;  %v1840_v63 = vld [vmem:[#allocation2 + $0x68] sm:$0xf]  ;;  %v659_v16 = vsel %vm5957_vm4, %v527_v3, %v658_v4  ;;  %v191_v60 = vmax.f32 %v5530_v47, %v5562_v14  ;;  %v1839_v44 = vld [vmem:[#allocation2 + $0x60] sm:$0xf]  ;;  %v2107_v25 = vor.u32 %v6843_v62, %v6829_v34 }
  0xd6   :  { %v6859_v9 = vld [vmem:[#allocation2 + $0x70] sm:$0xf]  ;;  %v277_v56 = vsel %vm5957_vm4, 0, %v276_v21  ;;  %2426 = vst.msk [vmem:[#allocation3] sm:$0xf] %vm2425_vm6, %v2378_v49  ;;  %v6868_v2 = vrot.slane %v2079_v31, 4  ;;  %1881 = vrot.lane.b32.xlu1 %v1840_v63, %s5890_s16  ;;  %1879 = vrot.lane.b32.xlu0 %v1839_v44, %s5890_s16  ;;  %v969_v54 = vpop.permute.xlu1 %968 }
  0xd7   :  { %v1951_v17 = vld [vmem:[#allocation2 + $0x7c] sm:$0x1]  ;;  %vm2525_vm5 = vcmask 293888   ;;  %v917_v24 = vshrl.u32 %v6831_v23, 16  ;;  %657 = vst [vmem:[#allocation2 + $0x88] sm:$0xf] %v656_v15  ;;  %v207_v27 = vmax.f32 %v190_v48, %v191_v60 }
  0xd8   :  { %660 = vst [vmem:[#allocation2 + $0x8c] sm:$0x1] %v659_v16  ;;  %v515_v20 = vrot.slane %v513_v5, 7  ;;  %278 = vst [vmem:[#allocation2 + $0x90] sm:$0x1] %v277_v56  ;;  %v6876_v26 = vrot.slane %v2110_v38, 5  ;;  %v2382_v5 = vpop.permute.xlu0 %2381  ;;  %v2085_v60 = vsel %vm6116_vm14, %v6868_v2, %v6815_v36 }
  0xd9   :  { %v1842_v22 = vld [vmem:[#allocation2 + $0x78] sm:$0xf]  ;;  %v5620_v55 = vrot.slane %v6834_v52, 9  ;;  %v649_v12 = vld [vmem:[#allocation2 + $0x80] sm:$0xf]  ;;  %v920_v30 = vshll.u32 %v6831_v23, 16  ;;  %v5752_v38 = vpack.c.bf16 %v207_v27, %v207_v27 }
  0xda   :  { %v338_v29 = vld [vmem:[#allocation2 + $0x94] sm:$0x1]  ;;  %2427 = vst.msk [vmem:[#allocation3 + $0x4] sm:$0xf] %vm2425_vm6, %v2380_v53  ;;  %v903_v32 = vshrl.u32 %v6859_v9, 16  ;;  %v518_v33 = vor.u32 %v516_v11, %v515_v20  ;;  %v519_v58 = vrot.slane %v515_v20, 4  ;;  %1885 = vrot.lane.b32.xlu1 %v1842_v22, %s5890_s16 }
  0xdb   :  { %v652_v35 = vld [vmem:[#allocation2 + $0x84] sm:$0x1]  ;;  %v2124_v45 = vshll.u32 %v1951_v17, 16  ;;  %v906_v10 = vshll.u32 %v6859_v9, 16  ;;  %v339_v7 = vsel %vm5994_vm7, 0, %v338_v29  ;;  %v6887_v43 = vrot.slane %v2121_v19, 4  ;;  %v2384_v9 = vpop.permute.xlu1 %2383 }
  0xdc   :  { %v279_v37 = vld [vmem:[#allocation2 + $0x98] sm:$0x1]  ;;  %v1841_v39 = vld [vmem:[#allocation2 + $0x70] sm:$0xf]  ;;  %1011 = vst.msk [vmem:[#allocation3 + $0x10] sm:$0xf] %vm1006_vm15, %v967_v40  ;;  %v650_v23 = vsel %vm6035_vm9, %v518_v33, %v649_v12  ;;  %v653_v51 = vsel %vm5957_vm4, %v519_v58, %v652_v35 }
  0xdd   :  { %v6889_v50 = vld [vmem:[#allocation2 + $0x6c] sm:$0x1]  ;;  %v6891_v34 = vrot.slane %v917_v24, 4  ;;  %340 = vst [vmem:[#allocation2 + $0x94] sm:$0x1] %v339_v7  ;;  %v529_v47 = vshrl.u32 %v5752_v38, 16  ;;  %1883 = vrot.lane.b32.xlu0 %v1841_v39, %s5890_s16 }
  0xde   :  { %v676_v31 = vld [vmem:[#allocation2 + $0x58] sm:$0xf]  ;;  %v675_v57 = vld [vmem:[#allocation2 + $0x50] sm:$0xf]  ;;  %v6898_v59 = vld [vmem:[#allocation2 + $0x7c] sm:$0x1]  ;;  %2202 = vrot.lane.b32.xlu1 %v2099_v8, %s5891_s13 }
  0xdf   :  { %651 = vst [vmem:[#allocation2 + $0x80] sm:$0xf] %v650_v23  ;;  %654 = vst [vmem:[#allocation2 + $0x84] sm:$0x1] %v653_v51  ;;  %v280_v61 = vsel %vm5957_vm4, 0, %v279_v37  ;;  %v922_v0 = vrot.slane %v920_v30, 5 }
  0xe0   :  { %692 = vst.msk [vmem:[#allocation3 + $0x24] sm:$0xf] %vm208_vm0, %v676_v31  ;;  %691 = vst.msk [vmem:[#allocation3 + $0x20] sm:$0xf] %vm208_vm0, %v675_v57  ;;  %v341_v62 = vld [vmem:[#allocation2 + $0x9c] sm:$0x1] }
  0xe1   :  { %1012 = vst.msk [vmem:[#allocation3 + $0x14] sm:$0xf] %vm1006_vm15, %v969_v54  ;;  %281 = vst [vmem:[#allocation2 + $0x98] sm:$0x1] %v280_v61  ;;  %v342_v3 = vsel %vm5994_vm7, 0, %v341_v62  ;;  %v2126_v11 = vrot.slane %v2124_v45, 5  ;;  %v923_v56 = vor.u32 %v922_v0, %v6891_v34  ;;  %2200 = vrot.lane.b32.xlu0 %v2085_v60, %s5891_s13  ;;  %v971_v54 = vpop.permute.xlu0 %970 }
  0xe2   :  { %v678_v4 = vld [vmem:[#allocation2 + $0x68] sm:$0xf]  ;;  %v677_v41 = vld [vmem:[#allocation2 + $0x60] sm:$0xf]  ;;  %v532_v48 = vshll.u32 %v5752_v38, 16  ;;  %v2108_v13 = vrot.slane %v2107_v25, 4 }
  0xe3   :  { %v729_v14 = vld [vmem:[#allocation2 + $0x88] sm:$0xf]  ;;  %343 = vst [vmem:[#allocation2 + $0x9c] sm:$0x1] %v342_v3  ;;  %694 = vst.msk [vmem:[#allocation3 + $0x2c] sm:$0xf] %vm208_vm0, %v678_v4  ;;  %v2127_v24 = vsel %vm6116_vm14, %v6887_v43, %v2126_v11 }
  0xe4   :  { %693 = vst.msk [vmem:[#allocation3 + $0x28] sm:$0xf] %vm208_vm0, %v677_v41  ;;  %v2265_v21 = vld [vmem:[#allocation2 + $0x60] sm:$0xe]  ;;  %v2266_v63 = vld [vmem:[#allocation2 + $0x64] sm:$0x1]  ;;  %v2113_v29 = vsel %vm6116_vm14, %v2108_v13, %v6876_v26  ;;  %2206 = vrot.lane.b32.xlu1 %v2127_v24, %s5891_s13 }
  0xe5   :  { %2428 = vst.msk [vmem:[#allocation3 + $0x8] sm:$0xf] %vm2425_vm6, %v2382_v5  ;;  %v531_v49 = vrot.slane %v529_v47, 7  ;;  %v5858_v15 = vld [vmem:[#allocation3] sm:$0xff]   ;;  %v2351_v18 = vrot.slane %v6889_v50, 5  ;;  %v905_v28 = vrot.slane %v903_v32, 4  ;;  %2204 = vrot.lane.b32.xlu0 %v2113_v29, %s5891_s13 }
  0xe6   :  { %v908_v16 = vrot.slane %v906_v10, 5  ;;  %2429 = vst.msk [vmem:[#allocation3 + $0xc] sm:$0xf] %vm2425_vm6, %v2384_v9  ;;  %v926_v44 = vshll.u32 %v6898_v59, 16  ;;  %v724_v17 = vld [vmem:[#allocation2 + $0x74] sm:$0x1]  ;;  %5799 = vmatprep.mubr.msk.bf16.mxu0 %vm2525_vm5, %v5858_v15 }
  0xe7   :  { %v945_v19 = vshrl.u32 %v729_v14, 16  ;;  %v948_v20 = vshll.u32 %v729_v14, 16  ;;  %v534_v53 = vor.u32 %v532_v48, %v531_v49  ;;  %v535_v22 = vrot.slane %v531_v49, 4  ;;  %v661_v25 = vld [vmem:[#allocation2 + $0x90] sm:$0xf]  ;;  %v1163_v14 = vpop.permute.xlu0 %1162 }
  0xe8   :  { %v664_v12 = vld [vmem:[#allocation2 + $0x94] sm:$0x1]  ;;  %v5619_v36 = vrot.slane %v2265_v21, 9  ;;  %v2347_v2 = vrot.slane %v2266_v63, 5  ;;  %v727_v27 = vld [vmem:[#allocation2 + $0x80] sm:$0xf]  ;;  %v2352_v30 = vsel %vm6052_vm11, %v5620_v55, %v2351_v18  ;;  %v909_v32 = vor.u32 %v908_v16, %v905_v28  ;;  %v973_v55 = vpop.permute.xlu1 %972 }
  0xe9   :  { %v912_v33 = vshll.u32 %v724_v17, 16  ;;  %v2271_v58 = vld [vmem:[#allocation2 + $0x78] sm:$0xe]  ;;  %v931_v35 = vshrl.u32 %v727_v27, 16  ;;  %v934_v40 = vshll.u32 %v727_v27, 16  ;;  %v662_v45 = vsel %vm6035_vm9, %v534_v53, %v661_v25  ;;  %2395 = vrot.lane.b32.xlu1 %v2352_v30, %s5892_s24 }
  0xea   :  { %v665_v10 = vsel %vm5957_vm4, %v535_v22, %v664_v12  ;;  %v924_v38 = vrot.slane %v923_v56, 4  ;;  %v928_v26 = vrot.slane %v926_v44, 5  ;;  %v947_v7 = vrot.slane %v945_v19, 4  ;;  %663 = vst [vmem:[#allocation2 + $0x90] sm:$0xf] %v662_v45 }
  0xeb   :  { %v950_v52 = vrot.slane %v948_v20, 5  ;;  %666 = vst [vmem:[#allocation2 + $0x94] sm:$0x1] %v665_v10  ;;  %v2272_v37 = vld [vmem:[#allocation2 + $0x7c] sm:$0x1]  ;;  %v2348_v46 = vsel %vm6052_vm11, %v5619_v36, %v2347_v2  ;;  %v5622_v50 = vrot.slane %v2271_v58, 9  ;;  %v1167_v44 = vpop.permute.xlu0 %1166 }
  0xec   :  { %v730_v39 = vld [vmem:[#allocation2 + $0x8c] sm:$0x1]  ;;  %1014 = vst.msk [vmem:[#allocation3 + $0x1c] sm:$0xf] %vm1006_vm15, %v973_v55  ;;  %v2269_v1 = vld [vmem:[#allocation2 + $0x70] sm:$0xe]  ;;  %v929_v59 = vsel %vm6116_vm14, %v924_v38, %v928_v26  ;;  %v1165_v3 = vpop.permute.xlu1 %1164  ;;  %2393 = vrot.lane.b32.xlu0 %v2348_v46, %s5892_s24 }
  0xed   :  { %v5860_v43 = vld [vmem:[#allocation3 + $0x8] sm:$0xff]   ;;  %v910_v34 = vrot.slane %v909_v32, 4  ;;  %v914_v23 = vrot.slane %v912_v33, 5  ;;  %v2270_v51 = vld [vmem:[#allocation2 + $0x74] sm:$0x1]  ;;  %v933_v31 = vrot.slane %v931_v35, 4  ;;  %v951_v61 = vor.u32 %v950_v52, %v947_v7  ;;  %984 = vrot.lane.b32.xlu1 %v929_v59, %s5888_s10 }
  0xee   :  { %v936_v57 = vrot.slane %v934_v40, 5  ;;  %5800 = vmatmul.mubr.msk.bf16.vlgmr.msra.gmra.mxu0 %vm2525_vm5, %v5860_v43  ;;  %v2359_v47 = vrot.slane %v2272_v37, 5  ;;  %v954_v62 = vshll.u32 %v730_v39, 16  ;;  %v728_v0 = vld [vmem:[#allocation2 + $0x84] sm:$0x1]  ;;  %v5621_v4 = vrot.slane %v2269_v1, 9 }
  0xef   :  { %1013 = vst.msk [vmem:[#allocation3 + $0x18] sm:$0xf] %vm1006_vm15, %v971_v54  ;;  %v2355_v41 = vrot.slane %v2270_v51, 5  ;;  %v915_v8 = vsel %vm6116_vm14, %v910_v34, %v914_v23  ;;  %v940_v11 = vshll.u32 %v728_v0, 16  ;;  %v952_v13 = vrot.slane %v951_v61, 4  ;;  %v1260_v30 = vpop.permute.xlu0 %1259 }
  0xf0   :  { %1208 = vst.msk [vmem:[#allocation3 + $0x14] sm:$0xf] %vm1202_vm1, %v1165_v3  ;;  %v937_v5 = vor.u32 %v936_v57, %v933_v31  ;;  %v2360_v48 = vsel %vm6052_vm11, %v5622_v50, %v2359_v47  ;;  %v956_v21 = vrot.slane %v954_v62, 5  ;;  %v1049_v63 = vld [vmem:[#allocation2 + $0x78] sm:$0xe]  ;;  %v1169_v9 = vpop.permute.xlu1 %1168  ;;  %982 = vrot.lane.b32.xlu0 %v915_v8, %s5888_s10  ;;  %vm8797_vm7 = vcmask 60416  }
  0xf1   :  { %v1050_v49 = vld [vmem:[#allocation2 + $0x7c] sm:$0x1]  ;;  %1207 = vst.msk [vmem:[#allocation3 + $0x10] sm:$0xf] %vm1202_vm1, %v1163_v14  ;;  %1210 = vst.msk [vmem:[#allocation3 + $0x1c] sm:$0xf] %vm1202_vm1, %v1169_v9  ;;  %v2356_v15 = vsel %vm6052_vm11, %v5621_v4, %v2355_v41  ;;  %2399 = vrot.lane.b32.xlu1 %v2360_v48, %s5892_s24 }
  0xf2   :  { %v938_v18 = vrot.slane %v937_v5, 4  ;;  %v942_v28 = vrot.slane %v940_v11, 5  ;;  %v5592_v16 = vrot.slane %v1049_v63, 9  ;;  %v1144_v60 = vrot.slane %v1050_v49, 5  ;;  %v1047_v56 = vld [vmem:[#allocation2 + $0x70] sm:$0xe]  ;;  %vm8798_vm9 = vmmov %vm8797_vm7 }
  0xf3   :  { %v957_v17 = vsel %vm6116_vm14, %v952_v13, %v956_v21  ;;  %v1048_v19 = vld [vmem:[#allocation2 + $0x74] sm:$0x1]  ;;  %v1053_v24 = vld [vmem:[#allocation2 + $0x88] sm:$0xe]  ;;  %v1054_v20 = vld [vmem:[#allocation2 + $0x8c] sm:$0x1]  ;;  %v1264_v46 = vpop.permute.xlu0 %1263 }
  0xf4   :  { %1209 = vst.msk [vmem:[#allocation3 + $0x18] sm:$0xf] %vm1202_vm1, %v1167_v44  ;;  %v1262_v53 = vpop.permute.xlu1 %1261  ;;  %v1342_v22 = vld [vmem:[#allocation2 + $0x80] sm:$0xf]  ;;  %2397 = vrot.lane.b32.xlu0 %v2356_v15, %s5892_s24  ;;  %v5591_v25 = vrot.slane %v1047_v56, 9  ;;  %v943_v12 = vsel %vm6116_vm14, %v938_v18, %v942_v28  ;;  %v1140_v36 = vrot.slane %v1048_v19, 5  ;;  %v1145_v32 = vsel %vm6052_vm11, %v5592_v16, %v1144_v60 }
  0xf5   :  { %1305 = vst.msk [vmem:[#allocation3 + $0x14] sm:$0xf] %vm1299_vm8, %v1262_v53  ;;  %988 = vrot.lane.b32.xlu1 %v957_v17, %s5888_s10  ;;  %v5594_v2 = vrot.slane %v1053_v24, 9  ;;  %v1152_v27 = vrot.slane %v1054_v20, 5  ;;  %v1340_v29 = vld [vmem:[#allocation2 + $0x78] sm:$0xf] }
  0xf6   :  { %v1051_v33 = vld [vmem:[#allocation2 + $0x80] sm:$0xe]  ;;  %v1052_v58 = vld [vmem:[#allocation2 + $0x84] sm:$0x1]  ;;  %v1531_v35 = vshrl.u32 %v1342_v22, 16  ;;  %v1534_v40 = vshll.u32 %v1342_v22, 16  ;;  %v1141_v7 = vsel %vm6052_vm11, %v5591_v25, %v1140_v36 }
  0xf7   :  { %1304 = vst.msk [vmem:[#allocation3 + $0x10] sm:$0xf] %vm1299_vm8, %v1260_v30  ;;  %v1346_v10 = vld [vmem:[#allocation2 + $0x90] sm:$0xf]  ;;  %v1517_v38 = vshrl.u32 %v1340_v29, 16  ;;  %v1520_v26 = vshll.u32 %v1340_v29, 16  ;;  %v1153_v52 = vsel %vm6052_vm11, %v5594_v2, %v1152_v27  ;;  %v1581_v3 = vpop.permute.xlu0 %1580 }
  0xf8   :  { %v1266_v45 = vpop.permute.xlu1 %1265  ;;  %986 = vrot.lane.b32.xlu0 %v943_v12, %s5888_s10  ;;  %v5593_v55 = vrot.slane %v1051_v33, 9  ;;  %v1148_v37 = vrot.slane %v1052_v58, 5  ;;  %v1343_v39 = vld [vmem:[#allocation2 + $0x84] sm:$0x1]  ;;  %v1533_v43 = vrot.slane %v1531_v35, 4  ;;  %v1536_v50 = vrot.slane %v1534_v40, 5 }
  0xf9   :  { %1307 = vst.msk [vmem:[#allocation3 + $0x1c] sm:$0xf] %vm1299_vm8, %v1266_v45  ;;  %1180 = vrot.lane.b32.xlu1 %v1145_v32, %s5885_s20  ;;  %v1559_v1 = vshrl.u32 %v1346_v10, 16  ;;  %v1562_v34 = vshll.u32 %v1346_v10, 16  ;;  %v1344_v23 = vld [vmem:[#allocation2 + $0x88] sm:$0xf] }
  0xfa   :  { %1306 = vst.msk [vmem:[#allocation3 + $0x18] sm:$0xf] %vm1299_vm8, %v1264_v46  ;;  %v1341_v31 = vld [vmem:[#allocation2 + $0x7c] sm:$0x1]  ;;  %v1519_v57 = vrot.slane %v1517_v38, 4  ;;  %v1522_v54 = vrot.slane %v1520_v26, 5  ;;  %v1149_v59 = vsel %vm6052_vm11, %v5593_v55, %v1148_v37  ;;  %v1537_v4 = vor.u32 %v1536_v50, %v1533_v43 }
  0xfb   :  { %v1232_v47 = vld [vmem:[#allocation2 + $0x80] sm:$0xf]  ;;  %v1540_v61 = vshll.u32 %v1343_v39, 16  ;;  %v1545_v62 = vshrl.u32 %v1344_v23, 16  ;;  %v1548_v0 = vshll.u32 %v1344_v23, 16  ;;  %v1561_v41 = vrot.slane %v1559_v1, 4  ;;  %v1585_v16 = vpop.permute.xlu0 %1584 }
  0xfc   :  { %v1583_v51 = vpop.permute.xlu1 %1582  ;;  %1178 = vrot.lane.b32.xlu0 %v1141_v7, %s5885_s20  ;;  %v1564_v8 = vrot.slane %v1562_v34, 5  ;;  %v680_v5 = vld [vmem:[#allocation2 + $0x78] sm:$0xf]  ;;  %v679_v11 = vld [vmem:[#allocation2 + $0x70] sm:$0xf]  ;;  %v1523_v49 = vor.u32 %v1522_v54, %v1519_v57  ;;  %v1526_v9 = vshll.u32 %v1341_v31, 16 }
  0xfd   :  { %1626 = vst.msk [vmem:[#allocation3 + $0x14] sm:$0xf] %vm1620_vm10, %v1583_v51  ;;  %1184 = vrot.lane.b32.xlu1 %v1153_v52, %s5885_s20  ;;  %1625 = vst.msk [vmem:[#allocation3 + $0x10] sm:$0xf] %vm1620_vm10, %v1581_v3  ;;  %v1347_v48 = vld [vmem:[#allocation2 + $0x94] sm:$0x1] }
  0xfe   :  { %696 = vst.msk [vmem:[#allocation3 + $0x34] sm:$0xf] %vm208_vm0, %v680_v5  ;;  %695 = vst.msk [vmem:[#allocation3 + $0x30] sm:$0xf] %vm208_vm0, %v679_v11  ;;  %v682_v13 = vld [vmem:[#allocation2 + $0x88] sm:$0xf]  ;;  %v1565_v17 = vor.u32 %v1564_v8, %v1561_v41 }
  0xff   :  { %v681_v21 = vld [vmem:[#allocation2 + $0x80] sm:$0xf]  ;;  %v1231_v63 = vld [vmem:[#allocation2 + $0x78] sm:$0xf]  ;;  %698 = vst.msk [vmem:[#allocation3 + $0x3c] sm:$0xf] %vm208_vm0, %v682_v13  ;;  %v1774_v36 = vpop.permute.xlu0 %1773 }
 0x100   :  { %v1587_v14 = vpop.permute.xlu1 %1586  ;;  %1182 = vrot.lane.b32.xlu0 %v1149_v59, %s5885_s20  ;;  %697 = vst.msk [vmem:[#allocation3 + $0x38] sm:$0xf] %vm208_vm0, %v681_v21  ;;  %v1345_v15 = vld [vmem:[#allocation2 + $0x8c] sm:$0x1]  ;;  %v1547_v18 = vrot.slane %v1545_v62, 4  ;;  %v1550_v28 = vrot.slane %v1548_v0, 5 }
 0x101   :  { %1628 = vst.msk [vmem:[#allocation3 + $0x1c] sm:$0xf] %vm1620_vm10, %v1587_v14  ;;  %1277 = vrot.lane.b32.xlu1 %v1232_v47, %s5886_s29  ;;  %v1234_v60 = vld [vmem:[#allocation2 + $0x90] sm:$0xf]  ;;  %v1538_v56 = vrot.slane %v1537_v4, 4  ;;  %v1542_v44 = vrot.slane %v1540_v61, 5 }
 0x102   :  { %v1568_v19 = vshll.u32 %v1347_v48, 16  ;;  %1627 = vst.msk [vmem:[#allocation3 + $0x18] sm:$0xf] %vm1620_vm10, %v1585_v16  ;;  %v1233_v20 = vld [vmem:[#allocation2 + $0x88] sm:$0xf]  ;;  %v1524_v53 = vrot.slane %v1523_v49, 4  ;;  %v1551_v25 = vor.u32 %v1550_v28, %v1547_v18 }
 0x103   :  { %v1528_v22 = vrot.slane %v1526_v9, 5  ;;  %v1554_v12 = vshll.u32 %v1345_v15, 16  ;;  %v1543_v2 = vsel %vm6116_vm14, %v1538_v56, %v1542_v44  ;;  %v1566_v27 = vrot.slane %v1565_v17, 4  ;;  %1818 = vst.msk [vmem:[#allocation3 + $0x10] sm:$0xf] %vm1813_vm12, %v1774_v36  ;;  %v1778_v38 = vpop.permute.xlu0 %1777  ;;  %s5895_s10 = smov 64  }
 0x104   :  { %v1776_v24 = vpop.permute.xlu1 %1775  ;;  %1275 = vrot.lane.b32.xlu0 %v1231_v63, %s5886_s29  ;;  %v1570_v29 = vrot.slane %v1568_v19, 5  ;;  %v1663_v32 = vld [vmem:[#allocation2 + $0x80] sm:$0xe]  ;;  %v1664_v33 = vld [vmem:[#allocation2 + $0x84] sm:$0x1]  ;;  %v1552_v35 = vrot.slane %v1551_v25, 4 }
 0x105   :  { %1819 = vst.msk [vmem:[#allocation3 + $0x14] sm:$0xf] %vm1813_vm12, %v1776_v24  ;;  %1281 = vrot.lane.b32.xlu1 %v1234_v60, %s5886_s29  ;;  %v1529_v58 = vsel %vm6116_vm14, %v1524_v53, %v1528_v22  ;;  %v1556_v40 = vrot.slane %v1554_v12, 5  ;;  %v1661_v45 = vld [vmem:[#allocation2 + $0x78] sm:$0xe]  ;;  %v5608_v7 = vrot.slane %v1663_v32, 9 }
 0x106   :  { %v1662_v10 = vld [vmem:[#allocation2 + $0x7c] sm:$0x1]  ;;  %v1571_v26 = vsel %vm6116_vm14, %v1566_v27, %v1570_v29  ;;  %v1755_v52 = vrot.slane %v1664_v33, 5  ;;  %v1667_v55 = vld [vmem:[#allocation2 + $0x90] sm:$0xe]  ;;  %v5607_v43 = vrot.slane %v1661_v45, 9 }
 0x107   :  { %v1668_v37 = vld [vmem:[#allocation2 + $0x94] sm:$0x1]  ;;  %1820 = vst.msk [vmem:[#allocation3 + $0x18] sm:$0xf] %vm1813_vm12, %v1778_v38  ;;  %v1954_v46 = vld [vmem:[#allocation2 + $0x88] sm:$0xf]  ;;  %v1557_v1 = vsel %vm6116_vm14, %v1552_v35, %v1556_v40  ;;  %v1872_v57 = vpop.permute.xlu0 %1871 }
 0x108   :  { %v1780_v30 = vpop.permute.xlu1 %1779  ;;  %1279 = vrot.lane.b32.xlu0 %v1233_v20, %s5886_s29  ;;  %v1751_v50 = vrot.slane %v1662_v10, 5  ;;  %v5610_v34 = vrot.slane %v1667_v55, 9  ;;  %v1763_v23 = vrot.slane %v1668_v37, 5  ;;  %v1665_v51 = vld [vmem:[#allocation2 + $0x88] sm:$0xe]  ;;  %v1756_v54 = vsel %vm6052_vm11, %v5608_v7, %v1755_v52 }
 0x109   :  { %1821 = vst.msk [vmem:[#allocation3 + $0x1c] sm:$0xf] %vm1813_vm12, %v1780_v30  ;;  %1598 = vrot.lane.b32.xlu1 %v1543_v2, %s5889_s11  ;;  %v1666_v31 = vld [vmem:[#allocation2 + $0x8c] sm:$0x1]  ;;  %v2143_v59 = vshrl.u32 %v1954_v46, 16  ;;  %v2146_v47 = vshll.u32 %v1954_v46, 16 }
 0x10a   :  { %v1952_v61 = vld [vmem:[#allocation2 + $0x80] sm:$0xf]  ;;  %1916 = vst.msk [vmem:[#allocation3 + $0x10] sm:$0xf] %vm1911_vm3, %v1872_v57  ;;  %v1958_v0 = vld [vmem:[#allocation2 + $0x98] sm:$0xf]  ;;  %v1752_v41 = vsel %vm6052_vm11, %v5607_v43, %v1751_v50  ;;  %v1764_v8 = vsel %vm6052_vm11, %v5610_v34, %v1763_v23 }
 0x10b   :  { %v5609_v3 = vrot.slane %v1665_v51, 9  ;;  %v1759_v4 = vrot.slane %v1666_v31, 5  ;;  %v2129_v5 = vshrl.u32 %v1952_v61, 16  ;;  %v2132_v11 = vshll.u32 %v1952_v61, 16  ;;  %v1876_v14 = vpop.permute.xlu0 %1875  ;;  %v1956_v49 = vld [vmem:[#allocation2 + $0x90] sm:$0xf] }
 0x10c   :  { %v1874_v39 = vpop.permute.xlu1 %1873  ;;  %1596 = vrot.lane.b32.xlu0 %v1529_v58, %s5889_s11  ;;  %v2145_v48 = vrot.slane %v2143_v59, 4  ;;  %v2148_v13 = vrot.slane %v2146_v47, 5  ;;  %v2171_v21 = vshrl.u32 %v1958_v0, 16  ;;  %v2174_v63 = vshll.u32 %v1958_v0, 16  ;;  %1918 = vst.msk [vmem:[#allocation3 + $0x18] sm:$0xf] %vm1911_vm3, %v1876_v14 }
 0x10d   :  { %1917 = vst.msk [vmem:[#allocation3 + $0x14] sm:$0xf] %vm1911_vm3, %v1874_v39  ;;  %1602 = vrot.lane.b32.xlu1 %v1571_v26, %s5889_s11  ;;  %v1955_v15 = vld [vmem:[#allocation2 + $0x8c] sm:$0x1]  ;;  %v1760_v18 = vsel %vm6052_vm11, %v5609_v3, %v1759_v4  ;;  %v1844_v28 = vld [vmem:[#allocation2 + $0x88] sm:$0xf] }
 0x10e   :  { %v2131_v16 = vrot.slane %v2129_v5, 4  ;;  %v2134_v60 = vrot.slane %v2132_v11, 5  ;;  %v2157_v56 = vshrl.u32 %v1956_v49, 16  ;;  %v2160_v44 = vshll.u32 %v1956_v49, 16  ;;  %v1953_v20 = vld [vmem:[#allocation2 + $0x84] sm:$0x1] }
 0x10f   :  { %v2193_v17 = vpop.permute.xlu0 %2192  ;;  %v2149_v19 = vor.u32 %v2148_v13, %v2145_v48  ;;  %v2152_v24 = vshll.u32 %v1955_v15, 16  ;;  %v2173_v53 = vrot.slane %v2171_v21, 4  ;;  %v2176_v22 = vrot.slane %v2174_v63, 5  ;;  %v1959_v12 = vld [vmem:[#allocation2 + $0x9c] sm:$0x1] }
 0x110   :  { %v1878_v62 = vpop.permute.xlu1 %1877  ;;  %1600 = vrot.lane.b32.xlu0 %v1557_v1, %s5889_s11  ;;  %2237 = vst.msk [vmem:[#allocation3 + $0x10] sm:$0xf] %vm2232_vm13, %v2193_v17  ;;  %v1843_v36 = vld [vmem:[#allocation2 + $0x80] sm:$0xf]  ;;  %v1846_v2 = vld [vmem:[#allocation2 + $0x98] sm:$0xf]  ;;  %v2135_v27 = vor.u32 %v2134_v60, %v2131_v16 }
 0x111   :  { %1919 = vst.msk [vmem:[#allocation3 + $0x1c] sm:$0xf] %vm1911_vm3, %v1878_v62  ;;  %1791 = vrot.lane.b32.xlu1 %v1756_v54, %s5887_s30  ;;  %v2138_v29 = vshll.u32 %v1953_v20, 16  ;;  %v2159_v30 = vrot.slane %v2157_v56, 4  ;;  %v2162_v32 = vrot.slane %v2160_v44, 5  ;;  %v2150_v58 = vrot.slane %v2149_v19, 4 }
 0x112   :  { %v2154_v35 = vrot.slane %v2152_v24, 5  ;;  %v2177_v40 = vor.u32 %v2176_v22, %v2173_v53  ;;  %v2180_v45 = vshll.u32 %v1959_v12, 16  ;;  %v1957_v10 = vld [vmem:[#allocation2 + $0x94] sm:$0x1]  ;;  %v1845_v26 = vld [vmem:[#allocation2 + $0x90] sm:$0xf] }
 0x113   :  { %v2197_v33 = vpop.permute.xlu0 %2196  ;;  %v2136_v7 = vrot.slane %v2135_v27, 4  ;;  %v2140_v52 = vrot.slane %v2138_v29, 5  ;;  %v2163_v55 = vor.u32 %v2162_v32, %v2159_v30  ;;  %v2166_v37 = vshll.u32 %v1957_v10, 16  ;;  %v2275_v34 = vld [vmem:[#allocation2 + $0x88] sm:$0xe] }
 0x114   :  { %v2195_v9 = vpop.permute.xlu1 %2194  ;;  %1789 = vrot.lane.b32.xlu0 %v1752_v41, %s5887_s30  ;;  %2239 = vst.msk [vmem:[#allocation3 + $0x18] sm:$0xf] %vm2232_vm13, %v2197_v33  ;;  %v2155_v46 = vsel %vm6116_vm14, %v2150_v58, %v2154_v35  ;;  %v2178_v43 = vrot.slane %v2177_v40, 4  ;;  %v2182_v50 = vrot.slane %v2180_v45, 5  ;;  %v2276_v23 = vld [vmem:[#allocation2 + $0x8c] sm:$0x1] }
 0x115   :  { %2238 = vst.msk [vmem:[#allocation3 + $0x14] sm:$0xf] %vm2232_vm13, %v2195_v9  ;;  %1795 = vrot.lane.b32.xlu1 %v1764_v8, %s5887_s30  ;;  %v2141_v51 = vsel %vm6116_vm14, %v2136_v7, %v2140_v52  ;;  %v2164_v31 = vrot.slane %v2163_v55, 4  ;;  %v2168_v57 = vrot.slane %v2166_v37, 5  ;;  %v2273_v54 = vld [vmem:[#allocation2 + $0x80] sm:$0xe] }
 0x116   :  { %v2183_v47 = vsel %vm6116_vm14, %v2178_v43, %v2182_v50  ;;  %v5624_v61 = vrot.slane %v2275_v34, 9  ;;  %v2367_v62 = vrot.slane %v2276_v23, 5  ;;  %v2274_v0 = vld [vmem:[#allocation2 + $0x84] sm:$0x1]  ;;  %v2279_v3 = vld [vmem:[#allocation2 + $0x98] sm:$0xe] }
 0x117   :  { %v2386_v39 = vpop.permute.xlu0 %2385  ;;  %v2280_v41 = vld [vmem:[#allocation2 + $0x9c] sm:$0x1]  ;;  %v2169_v8 = vsel %vm6116_vm14, %v2164_v31, %v2168_v57  ;;  %v5623_v5 = vrot.slane %v2273_v54, 9  ;;  %v2363_v11 = vrot.slane %v2274_v0, 5  ;;  %v5626_v14 = vrot.slane %v2279_v3, 9 }
 0x118   :  { %v2199_v25 = vpop.permute.xlu1 %2198  ;;  %1793 = vrot.lane.b32.xlu0 %v1760_v18, %s5887_s30  ;;  %2430 = vst.msk [vmem:[#allocation3 + $0x10] sm:$0xf] %vm2425_vm6, %v2386_v39  ;;  %v2277_v48 = vld [vmem:[#allocation2 + $0x90] sm:$0xe]  ;;  %v2368_v63 = vsel %vm6052_vm11, %v5624_v61, %v2367_v62  ;;  %v2375_v49 = vrot.slane %v2280_v41, 5  ;;  %vm2653_vm0 = vcmask 64512  }
 0x119   :  { %2240 = vst.msk [vmem:[#allocation3 + $0x1c] sm:$0xf] %vm2232_vm13, %v2199_v25  ;;  %1889 = vrot.lane.b32.xlu1 %v1844_v28, %s5890_s16  ;;  %v2278_v9 = vld [vmem:[#allocation2 + $0x94] sm:$0x1]  ;;  %v2364_v18 = vsel %vm6052_vm11, %v5623_v5, %v2363_v11  ;;  %v5625_v28 = vrot.slane %v2277_v48, 9  ;;  %s5894_s30 = smov 56  }
 0x11a   :  { %v2371_v16 = vrot.slane %v2278_v9, 5  ;;  %v2376_v56 = vsel %vm6052_vm11, %v5626_v14, %v2375_v49 }
 0x11b   :  { %v975_v59 = vpop.permute.xlu0 %974 }
 0x11c   :  { %v2388_v38 = vpop.permute.xlu1 %2387  ;;  %1887 = vrot.lane.b32.xlu0 %v1843_v36, %s5890_s16  ;;  %1015 = vst.msk [vmem:[#allocation3 + $0x20] sm:$0xf] %vm1006_vm15, %v975_v59  ;;  %v2372_v17 = vsel %vm6052_vm11, %v5625_v28, %v2371_v16 }
 0x11d   :  { %2431 = vst.msk [vmem:[#allocation3 + $0x14] sm:$0xf] %vm2425_vm6, %v2388_v38  ;;  %1893 = vrot.lane.b32.xlu1 %v1846_v2, %s5890_s16 }
 0x11f   :  { %v2390_v13 = vpop.permute.xlu0 %2389 }
 0x120   :  { %v977_v1 = vpop.permute.xlu1 %976  ;;  %1891 = vrot.lane.b32.xlu0 %v1845_v26, %s5890_s16  ;;  %2432 = vst.msk [vmem:[#allocation3 + $0x18] sm:$0xf] %vm2425_vm6, %v2390_v13 }
 0x121   :  { %1016 = vst.msk [vmem:[#allocation3 + $0x24] sm:$0xf] %vm1006_vm15, %v977_v1  ;;  %2210 = vrot.lane.b32.xlu1 %v2155_v46, %s5891_s13 }
 0x123   :  { %v979_v60 = vpop.permute.xlu0 %978 }
 0x124   :  { %v2392_v4 = vpop.permute.xlu1 %2391  ;;  %2208 = vrot.lane.b32.xlu0 %v2141_v51, %s5891_s13  ;;  %v5861_v21 = vld [vmem:[#allocation3 + $0x10] sm:$0xff]   ;;  %1017 = vst.msk [vmem:[#allocation3 + $0x28] sm:$0xf] %vm1006_vm15, %v979_v60 }
 0x125   :  { %2433 = vst.msk [vmem:[#allocation3 + $0x1c] sm:$0xf] %vm2425_vm6, %v2392_v4  ;;  %2214 = vrot.lane.b32.xlu1 %v2183_v47, %s5891_s13  ;;  %5803 = vmatprep.mubr.msk.bf16.mxu0 %vm2525_vm5, %v5861_v21 }
 0x127   :  { %v1171_v19 = vpop.permute.xlu0 %1170 }
 0x128   :  { %v981_v15 = vpop.permute.xlu1 %980  ;;  %2212 = vrot.lane.b32.xlu0 %v2169_v8, %s5891_s13  ;;  %1211 = vst.msk [vmem:[#allocation3 + $0x20] sm:$0xf] %vm1202_vm1, %v1171_v19 }
 0x129   :  { %1018 = vst.msk [vmem:[#allocation3 + $0x2c] sm:$0xf] %vm1006_vm15, %v981_v15  ;;  %2403 = vrot.lane.b32.xlu1 %v2368_v63, %s5892_s24 }
 0x12b   :  { %v1175_v53 = vpop.permute.xlu0 %1174 }
 0x12c   :  { %v1173_v44 = vpop.permute.xlu1 %1172  ;;  %2401 = vrot.lane.b32.xlu0 %v2364_v18, %s5892_s24  ;;  %v5862_v24 = vld [vmem:[#allocation3 + $0x18] sm:$0xff]   ;;  %1213 = vst.msk [vmem:[#allocation3 + $0x28] sm:$0xf] %vm1202_vm1, %v1175_v53 }
 0x12d   :  { %1212 = vst.msk [vmem:[#allocation3 + $0x24] sm:$0xf] %vm1202_vm1, %v1173_v44  ;;  %2407 = vrot.lane.b32.xlu1 %v2376_v56, %s5892_s24  ;;  %5804 = vmatmul.mubr.msk.bf16.gmra.mxu0 %vm2525_vm5, %v5862_v24 }
 0x12f   :  { %v1268_v25 = vpop.permute.xlu0 %1267 }
 0x130   :  { %v1177_v20 = vpop.permute.xlu1 %1176  ;;  %2405 = vrot.lane.b32.xlu0 %v2372_v17, %s5892_s24  ;;  %1308 = vst.msk [vmem:[#allocation3 + $0x20] sm:$0xf] %vm1299_vm8, %v1268_v25 }
 0x131   :  { %1214 = vst.msk [vmem:[#allocation3 + $0x2c] sm:$0xf] %vm1202_vm1, %v1177_v20 }
 0x134   :  { %v1270_v22 = vpop.permute.xlu1 %1269  ;;  %v1272_v36 = vpop.permute.xlu0 %1271 }
 0x135   :  { %1309 = vst.msk [vmem:[#allocation3 + $0x24] sm:$0xf] %vm1299_vm8, %v1270_v22  ;;  %1310 = vst.msk [vmem:[#allocation3 + $0x28] sm:$0xf] %vm1299_vm8, %v1272_v36 }
 0x138   :  { %v1274_v12 = vpop.permute.xlu1 %1273  ;;  %v1589_v27 = vpop.permute.xlu0 %1588 }
 0x139   :  { %1311 = vst.msk [vmem:[#allocation3 + $0x2c] sm:$0xf] %vm1299_vm8, %v1274_v12 }
 0x13a   :  { %1629 = vst.msk [vmem:[#allocation3 + $0x20] sm:$0xf] %vm1620_vm10, %v1589_v27  ;;  %v7141_v27 = vld [vmem:[%s8769_s2] ss:$0 sm:$0xff]  ;;  %s5893_s2 = smov 48  }
 0x13c   :  { %v1591_v2 = vpop.permute.xlu1 %1590  ;;  %v1593_v30 = vpop.permute.xlu0 %1592 }
 0x13d   :  { %1630 = vst.msk [vmem:[#allocation3 + $0x24] sm:$0xf] %vm1620_vm10, %v1591_v2  ;;  %1631 = vst.msk [vmem:[#allocation3 + $0x28] sm:$0xf] %vm1620_vm10, %v1593_v30 }
 0x140   :  { %v1595_v29 = vpop.permute.xlu1 %1594  ;;  %v1782_v33 = vpop.permute.xlu0 %1781 }
 0x141   :  { %1632 = vst.msk [vmem:[#allocation3 + $0x2c] sm:$0xf] %vm1620_vm10, %v1595_v29 }
 0x142   :  { %1822 = vst.msk [vmem:[#allocation3 + $0x20] sm:$0xf] %vm1813_vm12, %v1782_v33 }
 0x144   :  { %v1784_v32 = vpop.permute.xlu1 %1783  ;;  %v1786_v35 = vpop.permute.xlu0 %1785 }
 0x145   :  { %1823 = vst.msk [vmem:[#allocation3 + $0x24] sm:$0xf] %vm1813_vm12, %v1784_v32  ;;  %1824 = vst.msk [vmem:[#allocation3 + $0x28] sm:$0xf] %vm1813_vm12, %v1786_v35 }
 0x148   :  { %v1788_v58 = vpop.permute.xlu1 %1787  ;;  %v1880_v45 = vpop.permute.xlu0 %1879 }
 0x149   :  { %1825 = vst.msk [vmem:[#allocation3 + $0x2c] sm:$0xf] %vm1813_vm12, %v1788_v58 }
 0x14a   :  { %1920 = vst.msk [vmem:[#allocation3 + $0x20] sm:$0xf] %vm1911_vm3, %v1880_v45 }
 0x14c   :  { %v1882_v40 = vpop.permute.xlu1 %1881 }
 0x14d   :  { %1921 = vst.msk [vmem:[#allocation3 + $0x24] sm:$0xf] %vm1911_vm3, %v1882_v40 }
 0x14f   :  { %v1884_v38 = vpop.permute.xlu0 %1883 }
 0x150   :  { %v1886_v10 = vpop.permute.xlu1 %1885  ;;  %1922 = vst.msk [vmem:[#allocation3 + $0x28] sm:$0xf] %vm1911_vm3, %v1884_v38 }
 0x151   :  { %1923 = vst.msk [vmem:[#allocation3 + $0x2c] sm:$0xf] %vm1911_vm3, %v1886_v10 }
 0x153   :  { %v2201_v7 = vpop.permute.xlu0 %2200 }
 0x154   :  { %v2203_v26 = vpop.permute.xlu1 %2202  ;;  %2241 = vst.msk [vmem:[#allocation3 + $0x20] sm:$0xf] %vm2232_vm13, %v2201_v7 }
 0x155   :  { %2242 = vst.msk [vmem:[#allocation3 + $0x24] sm:$0xf] %vm2232_vm13, %v2203_v26 }
 0x157   :  { %v2205_v55 = vpop.permute.xlu0 %2204 }
 0x158   :  { %v2207_v52 = vpop.permute.xlu1 %2206  ;;  %2243 = vst.msk [vmem:[#allocation3 + $0x28] sm:$0xf] %vm2232_vm13, %v2205_v55 }
 0x159   :  { %2244 = vst.msk [vmem:[#allocation3 + $0x2c] sm:$0xf] %vm2232_vm13, %v2207_v52 }
 0x15c   :  { %v2396_v37 = vpop.permute.xlu1 %2395 }
 0x15d   :  { %2435 = vst.msk [vmem:[#allocation3 + $0x24] sm:$0xf] %vm2425_vm6, %v2396_v37 }
 0x15e   :  { %v2394_v39 = vpop.permute.xlu0 %2393 }
 0x15f   :  { %2434 = vst.msk [vmem:[#allocation3 + $0x20] sm:$0xf] %vm2425_vm6, %v2394_v39 }
 0x160   :  { %v985_v46 = vpop.permute.xlu1 %984 }
 0x161   :  { %1020 = vst.msk [vmem:[#allocation3 + $0x34] sm:$0xf] %vm1006_vm15, %v985_v46 }
 0x162   :  { %v983_v43 = vpop.permute.xlu0 %982 }
 0x163   :  { %1019 = vst.msk [vmem:[#allocation3 + $0x30] sm:$0xf] %vm1006_vm15, %v983_v43 }
 0x164   :  { %v2400_v50 = vpop.permute.xlu1 %2399 }
 0x165   :  { %2437 = vst.msk [vmem:[#allocation3 + $0x2c] sm:$0xf] %vm2425_vm6, %v2400_v50 }
 0x166   :  { %v2398_v1 = vpop.permute.xlu0 %2397  ;;  %v5863_v34 = vld [vmem:[#allocation3 + $0x20] sm:$0xff]  }
 0x167   :  { %2436 = vst.msk [vmem:[#allocation3 + $0x28] sm:$0xf] %vm2425_vm6, %v2398_v1  ;;  %5807 = vmatprep.mubr.msk.bf16.mxu0 %vm2525_vm5, %v5863_v34 }
 0x168   :  { %v989_v23 = vpop.permute.xlu1 %988 }
 0x169   :  { %1022 = vst.msk [vmem:[#allocation3 + $0x3c] sm:$0xf] %vm1006_vm15, %v989_v23 }
 0x16a   :  { %v987_v51 = vpop.permute.xlu0 %986 }
 0x16b   :  { %1021 = vst.msk [vmem:[#allocation3 + $0x38] sm:$0xf] %vm1006_vm15, %v987_v51 }
 0x16c   :  { %v1181_v31 = vpop.permute.xlu1 %1180 }
 0x16d   :  { %1216 = vst.msk [vmem:[#allocation3 + $0x34] sm:$0xf] %vm1202_vm1, %v1181_v31 }
 0x16e   :  { %v1179_v57 = vpop.permute.xlu0 %1178  ;;  %v5864_v54 = vld [vmem:[#allocation3 + $0x28] sm:$0xff]  }
 0x16f   :  { %1215 = vst.msk [vmem:[#allocation3 + $0x30] sm:$0xf] %vm1202_vm1, %v1179_v57  ;;  %5808 = vmatmul.mubr.msk.bf16.gmra.mxu0 %vm2525_vm5, %v5864_v54 }
 0x170   :  { %v1185_v59 = vpop.permute.xlu1 %1184 }
 0x171   :  { %1218 = vst.msk [vmem:[#allocation3 + $0x3c] sm:$0xf] %vm1202_vm1, %v1185_v59 }
 0x172   :  { %v1183_v47 = vpop.permute.xlu0 %1182 }
 0x173   :  { %1217 = vst.msk [vmem:[#allocation3 + $0x38] sm:$0xf] %vm1202_vm1, %v1183_v47  ;;  %vm8800_vm1 = vmmov %vm8797_vm7 }
 0x174   :  { %v1278_v61 = vpop.permute.xlu1 %1277 }
 0x175   :  { %1313 = vst.msk [vmem:[#allocation3 + $0x34] sm:$0xf] %vm1299_vm8, %v1278_v61 }
 0x176   :  { %v1276_v62 = vpop.permute.xlu0 %1275 }
 0x177   :  { %1312 = vst.msk [vmem:[#allocation3 + $0x30] sm:$0xf] %vm1299_vm8, %v1276_v62  ;;  %v2887_v62 = vld [vmem:[#allocation4 + $0x58] sm:$0x1] }
 0x178   :  { %v1282_v0 = vpop.permute.xlu1 %1281 }
 0x179   :  { %1315 = vst.msk [vmem:[#allocation3 + $0x3c] sm:$0xf] %vm1299_vm8, %v1282_v0  ;;  %v2890_v0 = vld [vmem:[#allocation4 + $0x60] sm:$0x1] }
 0x17a   :  { %v1280_v3 = vpop.permute.xlu0 %1279 }
 0x17b   :  { %1314 = vst.msk [vmem:[#allocation3 + $0x38] sm:$0xf] %vm1299_vm8, %v1280_v3  ;;  %v2893_v3 = vld [vmem:[#allocation4 + $0x68] sm:$0x1] }
 0x17c   :  { %v1599_v4 = vpop.permute.xlu1 %1598 }
 0x17d   :  { %1634 = vst.msk [vmem:[#allocation3 + $0x34] sm:$0xf] %vm1620_vm10, %v1599_v4 }
 0x17e   :  { %v1597_v41 = vpop.permute.xlu0 %1596 }
 0x17f   :  { %1633 = vst.msk [vmem:[#allocation3 + $0x30] sm:$0xf] %vm1620_vm10, %v1597_v41 }
 0x180   :  { %v1603_v8 = vpop.permute.xlu1 %1602 }
 0x181   :  { %1636 = vst.msk [vmem:[#allocation3 + $0x3c] sm:$0xf] %vm1620_vm10, %v1603_v8 }
 0x182   :  { %v1601_v5 = vpop.permute.xlu0 %1600 }
 0x183   :  { %1635 = vst.msk [vmem:[#allocation3 + $0x38] sm:$0xf] %vm1620_vm10, %v1601_v5  ;;  %vm3634_vm10 = vcmask 126016  }
 0x184   :  { %v1792_v11 = vpop.permute.xlu1 %1791 }
 0x185   :  { %1827 = vst.msk [vmem:[#allocation3 + $0x34] sm:$0xf] %vm1813_vm12, %v1792_v11  ;;  %v2896_v11 = vld [vmem:[#allocation4 + $0x70] sm:$0x1] }
 0x186   :  { %v1790_v14 = vpop.permute.xlu0 %1789 }
 0x187   :  { %1826 = vst.msk [vmem:[#allocation3 + $0x30] sm:$0xf] %vm1813_vm12, %v1790_v14 }
 0x188   :  { %v1796_v48 = vpop.permute.xlu1 %1795 }
 0x189   :  { %1829 = vst.msk [vmem:[#allocation3 + $0x3c] sm:$0xf] %vm1813_vm12, %v1796_v48 }
 0x18a   :  { %v1794_v13 = vpop.permute.xlu0 %1793 }
 0x18b   :  { %1828 = vst.msk [vmem:[#allocation3 + $0x38] sm:$0xf] %vm1813_vm12, %v1794_v13  ;;  %v2899_v13 = vld [vmem:[#allocation4 + $0x78] sm:$0x1]  ;;  %vm3827_vm12 = vcmask 191616  }
 0x18c   :  { %v1890_v21 = vpop.permute.xlu1 %1889 }
 0x18d   :  { %1925 = vst.msk [vmem:[#allocation3 + $0x34] sm:$0xf] %vm1911_vm3, %v1890_v21  ;;  %v2902_v21 = vld [vmem:[#allocation4 + $0x80] sm:$0x1] }
 0x18e   :  { %v1888_v63 = vpop.permute.xlu0 %1887 }
 0x18f   :  { %1924 = vst.msk [vmem:[#allocation3 + $0x30] sm:$0xf] %vm1911_vm3, %v1888_v63 }
 0x190   :  { %v1894_v49 = vpop.permute.xlu1 %1893 }
 0x191   :  { %1927 = vst.msk [vmem:[#allocation3 + $0x3c] sm:$0xf] %vm1911_vm3, %v1894_v49 }
 0x192   :  { %v1892_v9 = vpop.permute.xlu0 %1891 }
 0x193   :  { %1926 = vst.msk [vmem:[#allocation3 + $0x38] sm:$0xf] %vm1911_vm3, %v1892_v9  ;;  %vm8790_vm3 = vcmask 57344  }
 0x194   :  { %v2211_v15 = vpop.permute.xlu1 %2210  ;;  %vm7195_vm4 = vmand %vm8790_vm3, %vm220_vm2  ;;  %vm8793_vm2 = vsmask.f32 7938 }
 0x195   :  { %2246 = vst.msk [vmem:[#allocation3 + $0x34] sm:$0xf] %vm2232_vm13, %v2211_v15  ;;  %v2888_v41 = vsel %vm7195_vm4, 0, %v2887_v62  ;;  %v2891_v8 = vsel %vm7195_vm4, 0, %v2890_v0  ;;  %v2894_v5 = vsel %vm7195_vm4, 0, %v2893_v3  ;;  %v2897_v48 = vsel %vm7195_vm4, 0, %v2896_v11  ;;  %vm8799_vm15 = vmmov %vm8793_vm2 }
 0x196   :  { %v2209_v18 = vpop.permute.xlu0 %2208  ;;  %2889 = vst [vmem:[#allocation4 + $0x58] sm:$0x1] %v2888_v41  ;;  %2892 = vst [vmem:[#allocation4 + $0x60] sm:$0x1] %v2891_v8  ;;  %v2900_v49 = vsel %vm7195_vm4, 0, %v2899_v13  ;;  %v2903_v9 = vsel %vm7195_vm4, 0, %v2902_v21 }
 0x197   :  { %2245 = vst.msk [vmem:[#allocation3 + $0x30] sm:$0xf] %vm2232_vm13, %v2209_v18  ;;  %2895 = vst [vmem:[#allocation4 + $0x68] sm:$0x1] %v2894_v5  ;;  %v2905_v15 = vld [vmem:[#allocation4 + $0x88] sm:$0x1] }
 0x198   :  { %v2215_v28 = vpop.permute.xlu1 %2214  ;;  %2898 = vst [vmem:[#allocation4 + $0x70] sm:$0x1] %v2897_v48  ;;  %v2908_v18 = vld [vmem:[#allocation4 + $0x90] sm:$0x1]  ;;  %2901 = vst [vmem:[#allocation4 + $0x78] sm:$0x1] %v2900_v49 }
 0x199   :  { %2248 = vst.msk [vmem:[#allocation3 + $0x3c] sm:$0xf] %vm2232_vm13, %v2215_v28  ;;  %2904 = vst [vmem:[#allocation4 + $0x80] sm:$0x1] %v2903_v9  ;;  %v2915_v62 = vld [vmem:[#allocation4 + $0x4] sm:$0x1] }
 0x19a   :  { %v2213_v16 = vpop.permute.xlu0 %2212  ;;  %v2911_v8 = vld [vmem:[#allocation4 + $0x98] sm:$0x1]  ;;  %v2945_v5 = vld [vmem:[#allocation4 + $0x54] sm:$0x1]  ;;  %vm7510_vm8 = vmand %vm8800_vm1, %vm8799_vm15 }
 0x19b   :  { %2247 = vst.msk [vmem:[#allocation3 + $0x38] sm:$0xf] %vm2232_vm13, %v2213_v16  ;;  %v2906_v16 = vsel %vm7195_vm4, 0, %v2905_v15  ;;  %v2912_v13 = vsel %vm7195_vm4, 0, %v2911_v8  ;;  %vm3924_vm13 = vcmask 257216   ;;  %vm8817_vm15 = vmmov %vm8800_vm1 }
 0x19c   :  { %v2404_v60 = vpop.permute.xlu1 %2403  ;;  %2907 = vst [vmem:[#allocation4 + $0x88] sm:$0x1] %v2906_v16  ;;  %2913 = vst [vmem:[#allocation4 + $0x98] sm:$0x1] %v2912_v13 }
 0x19d   :  { %2439 = vst.msk [vmem:[#allocation3 + $0x34] sm:$0xf] %vm2425_vm6, %v2404_v60  ;;  %v2909_v60 = vsel %vm7195_vm4, 0, %v2908_v18 }
 0x19e   :  { %v2402_v56 = vpop.permute.xlu0 %2401  ;;  %2910 = vst [vmem:[#allocation4 + $0x90] sm:$0x1] %v2909_v60 }
 0x19f   :  { %2438 = vst.msk [vmem:[#allocation3 + $0x30] sm:$0xf] %vm2425_vm6, %v2402_v56  ;;  %v2936_v56 = vld [vmem:[#allocation4 + $0x3c] sm:$0x1] }
 0x1a0   :  { %v2408_v44 = vpop.permute.xlu1 %2407 }
 0x1a1   :  { %2441 = vst.msk [vmem:[#allocation3 + $0x3c] sm:$0xf] %vm2425_vm6, %v2408_v44  ;;  %v2939_v44 = vld [vmem:[#allocation4 + $0x44] sm:$0x1] }
 0x1a2   :  { %v2406_v17 = vpop.permute.xlu0 %2405 }
 0x1a3   :  { %2440 = vst.msk [vmem:[#allocation3 + $0x38] sm:$0xf] %vm2425_vm6, %v2406_v17 }
 0x1a6   :  { %v5865_v19 = vld [vmem:[#allocation3 + $0x30] sm:$0xff]  }
 0x1a7   :  { %5811 = vmatprep.mubr.msk.bf16.mxu0 %vm2525_vm5, %v5865_v19 }
 0x1aa   :  { %v5866_v24 = vld [vmem:[#allocation3 + $0x38] sm:$0xff]  }
 0x1ab   :  { %5812 = vmatmul.mubr.msk.bf16.gmra.mxu0 %vm2525_vm5, %v5866_v24  ;;  %vm8794_vm5 = vmmov %vm8790_vm3  ;;  %v2948_v24 = vld [vmem:[#allocation4 + $0x5c] sm:$0x1] }
 0x1ac   :  { %vm7217_vm6 = vmand %vm8794_vm5, %vm8793_vm2 }
 0x1ad   :  { %v2937_v17 = vsel %vm7217_vm6, 0, %v2936_v56  ;;  %v2940_v19 = vsel %vm7217_vm6, 0, %v2939_v44  ;;  %v2946_v21 = vsel %vm7217_vm6, 0, %v2945_v5  ;;  %vm8810_vm3 = vmmov %vm8800_vm1 }
 0x1ae   :  { %v5801_v20 = vpop.f32.mrf.mxu0  ;;  %2938 = vst [vmem:[#allocation4 + $0x3c] sm:$0x1] %v2937_v17  ;;  %2941 = vst [vmem:[#allocation4 + $0x44] sm:$0x1] %v2940_v19 }
 0x1af   :  { %v7154_v35 = vadd.f32 %v5801_v20, %v7141_v27  ;;  %v2951_v20 = vld [vmem:[#allocation4 + $0x64] sm:$0x1]  ;;  %2947 = vst [vmem:[#allocation4 + $0x54] sm:$0x1] %v2946_v21  ;;  %vm8812_vm2 = vmmov %vm8800_vm1 }
 0x1b0   :  { %v2588_v53 = vpop.f32.mrf.mxu0  ;;  %vm8813_vm5 = vmmov %vm8800_vm1 }
 0x1b1   :  { %v7147_v32 = vadd.f32 %v7141_v27, %v2588_v53  ;;  %v2657_v38 = vsel %vm2653_vm0, %v7154_v35, 0.0  ;;  %v2949_v53 = vsel %vm7217_vm6, 0, %v2948_v24 }
 0x1b2   :  { %v5802_v22 = vpop.f32.mrf.mxu0  ;;  %2950 = vst [vmem:[#allocation4 + $0x5c] sm:$0x1] %v2949_v53 }
 0x1b3   :  { %v2654_v40 = vsel %vm2653_vm0, %v7147_v32, 0.0  ;;  %v7161_v26 = vadd.f32 %v5802_v22, %v7141_v27  ;;  %v2952_v22 = vsel %vm7217_vm6, 0, %v2951_v20 }
 0x1b4   :  { %v2591_v25 = vpop.f32.mrf.mxu0  ;;  %2953 = vst [vmem:[#allocation4 + $0x64] sm:$0x1] %v2952_v22 }
 0x1b5   :  { %v7144_v29 = vadd.f32 %v7141_v27, %v2591_v25  ;;  %v2659_v39 = vsel %vm2653_vm0, %v7161_v26, 0.0  ;;  %v2954_v25 = vld [vmem:[#allocation4 + $0x6c] sm:$0x1] }
 0x1b7   :  { %v2655_v58 = vsel %vm2653_vm0, %v7144_v29, 0.0 }
 0x1b8   :  { %v2656_v45 = vadd.f32 %v2655_v58, %v2654_v40  ;;  %v2960_v58 = vld [vmem:[#allocation4 + $0x7c] sm:$0x1]  ;;  %v2963_v40 = vld [vmem:[#allocation4 + $0x84] sm:$0x1] }
 0x1ba   :  { %v2658_v52 = vadd.f32 %v2657_v38, %v2656_v45  ;;  %v2961_v45 = vsel %vm7217_vm6, 0, %v2960_v58  ;;  %v2966_v38 = vld [vmem:[#allocation4 + $0x8c] sm:$0x1] }
 0x1bb   :  { %2962 = vst [vmem:[#allocation4 + $0x7c] sm:$0x1] %v2961_v45 }
 0x1bc   :  { %v2660_v50 = vadd.f32 %v2659_v39, %v2658_v52  ;;  %v2969_v52 = vld [vmem:[#allocation4 + $0x94] sm:$0x1] }
 0x1ed   :  { %v5805_v12 = vpop.f32.mrf.mxu0 }
 0x1ee   :  { %v7176_v43 = vadd.f32 %v5805_v12, %v7141_v27  ;;  %v2957_v12 = vld [vmem:[#allocation4 + $0x74] sm:$0x1] }
 0x1ef   :  { %v2604_v36 = vpop.f32.mrf.mxu0 }
 0x1f0   :  { %v7164_v7 = vadd.f32 %v7141_v27, %v2604_v36  ;;  %v2665_v54 = vsel %vm2653_vm0, %v7176_v43, 0.0 }
 0x1f1   :  { %v5806_v2 = vpop.f32.mrf.mxu0 }
 0x1f2   :  { %v2661_v46 = vsel %vm2653_vm0, %v7164_v7, 0.0  ;;  %v7179_v1 = vadd.f32 %v5806_v2, %v7141_v27  ;;  %v2955_v2 = vsel %vm7217_vm6, 0, %v2954_v25 }
 0x1f3   :  { %v2607_v30 = vpop.f32.mrf.mxu0  ;;  %v2662_v51 = vadd.f32 %v2661_v46, %v2660_v50  ;;  %2956 = vst [vmem:[#allocation4 + $0x6c] sm:$0x1] %v2955_v2  ;;  %v2967_v46 = vsel %vm7217_vm6, 0, %v2966_v38  ;;  %v2970_v50 = vsel %vm7217_vm6, 0, %v2969_v52 }
 0x1f4   :  { %v7169_v37 = vadd.f32 %v7141_v27, %v2607_v30  ;;  %v2667_v59 = vsel %vm2653_vm0, %v7179_v1, 0.0  ;;  %v2958_v30 = vsel %vm7217_vm6, 0, %v2957_v12  ;;  %2968 = vst [vmem:[#allocation4 + $0x8c] sm:$0x1] %v2967_v46  ;;  %2971 = vst [vmem:[#allocation4 + $0x94] sm:$0x1] %v2970_v50 }
 0x1f5   :  { %2959 = vst [vmem:[#allocation4 + $0x74] sm:$0x1] %v2958_v30 }
 0x1f6   :  { %v2663_v23 = vsel %vm2653_vm0, %v7169_v37, 0.0 }
 0x1f7   :  { %v2664_v47 = vadd.f32 %v2663_v23, %v2662_v51  ;;  %v2942_v23 = vld [vmem:[#allocation4 + $0x4c] sm:$0x1] }
 0x1f9   :  { %v2666_v63 = vadd.f32 %v2665_v54, %v2664_v47  ;;  %v2854_v47 = vld [vmem:[#allocation4] sm:$0x1] }
 0x1fa   :  { %v2855_v3 = vsel %vm7195_vm4, 0, %v2854_v47 }
 0x1fb   :  { %v2668_v36 = vadd.f32 %v2667_v59, %v2666_v63  ;;  %v2943_v59 = vsel %vm7217_vm6, 0, %v2942_v23  ;;  %2856 = vst [vmem:[#allocation4] sm:$0x1] %v2855_v3  ;;  %v3651_v3 = vld [vmem:[#allocation4] sm:$0xe] }
 0x1fc   :  { %2944 = vst [vmem:[#allocation4 + $0x4c] sm:$0x1] %v2943_v59  ;;  %v4888_v59 = vld [vmem:[#allocation4 + $0x48] sm:$0xe]  ;;  %v5665_v21 = vrot.slane %v3651_v3, 9 }
 0x202   :  { %v3330_v19 = vld [vmem:[#allocation4] sm:$0xf] }
 0x203   :  { %v3363_v20 = vshrl.u32 %v3330_v19, 16  ;;  %v3366_v53 = vshll.u32 %v3330_v19, 16  ;;  %v4889_v47 = vld [vmem:[#allocation4 + $0x4c] sm:$0x1] }
 0x205   :  { %v3365_v58 = vrot.slane %v3363_v20, 4 }
 0x22f   :  { %v7149_v33 = vpop.f32.mrf.mxu0 }
 0x230   :  { %v7247_v51 = vadd.f32 %v7149_v33, %v7141_v27  ;;  %v2916_v33 = vsel %vm7217_vm6, 0, %v2915_v62 }
 0x231   :  { %v2620_v10 = vpop.f32.mrf.mxu0  ;;  %2917 = vst [vmem:[#allocation4 + $0x4] sm:$0x1] %v2916_v33  ;;  %v5704_v33 = vrot.slane %v4888_v59, 9  ;;  %v2863_v59 = vld [vmem:[#allocation4 + $0x18] sm:$0x1] }
 0x232   :  { %v7184_v31 = vadd.f32 %v7141_v27, %v2620_v10  ;;  %v2964_v10 = vsel %vm7217_vm6, 0, %v2963_v40  ;;  %v2673_v11 = vsel %vm2653_vm0, %v7247_v51, 0.0  ;;  %v3368_v40 = vrot.slane %v3366_v53, 5 }
 0x233   :  { %v7166_v55 = vpop.f32.mrf.mxu0  ;;  %2965 = vst [vmem:[#allocation4 + $0x84] sm:$0x1] %v2964_v10 }
 0x234   :  { %v2669_v4 = vsel %vm2653_vm0, %v7184_v31, 0.0  ;;  %v3369_v23 = vor.u32 %v3368_v40, %v3365_v58  ;;  %v2857_v58 = vld [vmem:[#allocation4 + $0x8] sm:$0x1] }
 0x235   :  { %v2623_v34 = vpop.f32.mrf.mxu0  ;;  %v2670_v39 = vadd.f32 %v2669_v4, %v2668_v36  ;;  %v2884_v4 = vld [vmem:[#allocation4 + $0x50] sm:$0x1]  ;;  %v4568_v36 = vld [vmem:[#allocation4 + $0x4c] sm:$0x1] }
 0x236   :  { %v7187_v57 = vadd.f32 %v7141_v27, %v2623_v34  ;;  %v2881_v34 = vld [vmem:[#allocation4 + $0x48] sm:$0x1]  ;;  %v2885_v41 = vsel %vm7195_vm4, 0, %v2884_v4  ;;  %v4968_v4 = vrot.slane %v4889_v47, 5 }
 0x237   :  { %v2882_v54 = vsel %vm7195_vm4, 0, %v2881_v34  ;;  %2886 = vst [vmem:[#allocation4 + $0x50] sm:$0x1] %v2885_v41  ;;  %v2972_v41 = vld [vmem:[#allocation4 + $0x9c] sm:$0x1] }
 0x238   :  { %v2671_v14 = vsel %vm2653_vm0, %v7187_v57, 0.0  ;;  %2883 = vst [vmem:[#allocation4 + $0x48] sm:$0x1] %v2882_v54  ;;  %v3331_v38 = vld [vmem:[#allocation4 + $0x4] sm:$0x1]  ;;  %v2973_v19 = vsel %vm7217_vm6, 0, %v2972_v41  ;;  %v4969_v53 = vsel %vm6052_vm11, %v5704_v33, %v4968_v4 }
 0x239   :  { %v2672_v0 = vadd.f32 %v2671_v14, %v2670_v39  ;;  %v7263_v14 = vadd.f32 %v7166_v55, %v7141_v27  ;;  %v4693_v39 = vshll.u32 %v4568_v36, 16  ;;  %v3372_v54 = vshll.u32 %v3331_v38, 16  ;;  %v3652_v13 = vld [vmem:[#allocation4 + $0x4] sm:$0x1]  ;;  %2974 = vst [vmem:[#allocation4 + $0x9c] sm:$0x1] %v2973_v19 }
 0x23a   :  { %v2869_v47 = vld [vmem:[#allocation4 + $0x28] sm:$0x1]  ;;  %v2872_v33 = vld [vmem:[#allocation4 + $0x30] sm:$0x1] }
 0x23b   :  { %v2674_v63 = vadd.f32 %v2673_v11, %v2672_v0  ;;  %v2675_v15 = vsel %vm2653_vm0, %v7263_v14, 0.0  ;;  %v4695_v0 = vrot.slane %v4693_v39, 5  ;;  %v3370_v11 = vrot.slane %v3369_v23, 4 }
 0x23c   :  { %v2858_v23 = vsel %vm7195_vm4, 0, %v2857_v58  ;;  %v2870_v3 = vsel %vm7195_vm4, 0, %v2869_v47  ;;  %v2873_v41 = vsel %vm7195_vm4, 0, %v2872_v33 }
 0x23d   :  { %v2676_v60 = vadd.f32 %v2675_v15, %v2674_v63  ;;  %v3717_v63 = vrot.slane %v3652_v13, 5  ;;  %2859 = vst [vmem:[#allocation4 + $0x8] sm:$0x1] %v2858_v23  ;;  %2871 = vst [vmem:[#allocation4 + $0x28] sm:$0x1] %v2870_v3 }
 0x23e   :  { %2874 = vst [vmem:[#allocation4 + $0x30] sm:$0x1] %v2873_v41  ;;  %v2930_v23 = vld [vmem:[#allocation4 + $0x2c] sm:$0x1] }
 0x23f   :  { %v4463_v55 = vld [vmem:[#allocation4 + $0x48] sm:$0xf]  ;;  %v2931_v33 = vsel %vm7217_vm6, 0, %v2930_v23 }
 0x240   :  { %v4567_v16 = vld [vmem:[#allocation4 + $0x48] sm:$0xf]  ;;  %4502 = vrot.lane.b32.xlu1 %v4463_v55, %s5893_s2  ;;  %2932 = vst [vmem:[#allocation4 + $0x2c] sm:$0x1] %v2931_v33 }
 0x241   :  { %v4684_v44 = vshrl.u32 %v4567_v16, 16  ;;  %v4687_v17 = vshll.u32 %v4567_v16, 16  ;;  %v3347_v16 = vld [vmem:[#allocation4 + $0x54] sm:$0x1] }
 0x243   :  { %v4686_v2 = vrot.slane %v4684_v44, 4  ;;  %v4689_v30 = vrot.slane %v4687_v17, 5  ;;  %v3484_v17 = vshll.u32 %v3347_v16, 16 }
 0x245   :  { %v4690_v34 = vor.u32 %v4689_v30, %v4686_v2  ;;  %v3668_v30 = vld [vmem:[#allocation4 + $0x54] sm:$0x1]  ;;  %v3486_v38 = vrot.slane %v3484_v17, 5 }
 0x247   :  { %v4691_v5 = vrot.slane %v4690_v34, 4  ;;  %v4583_v34 = vld [vmem:[#allocation4 + $0x98] sm:$0xf] }
 0x248   :  { %v4799_v16 = vshll.u32 %v4583_v34, 16 }
 0x26b   :  { %v5813_v48 = vpop.f32.mrf.mxu0 }
 0x26c   :  { %v7278_v22 = vadd.f32 %v5813_v48, %v7141_v27  ;;  %v3374_v48 = vrot.slane %v3372_v54, 5 }
 0x26d   :  { %v2636_v49 = vpop.f32.mrf.mxu0 }
 0x26e   :  { %v7270_v9 = vadd.f32 %v7141_v27, %v2636_v49  ;;  %v2681_v46 = vsel %vm2653_vm0, %v7278_v22, 0.0  ;;  %v3346_v49 = vld [vmem:[#allocation4 + $0x50] sm:$0xf]  ;;  %v3375_v55 = vsel %vm6116_vm14, %v3370_v11, %v3374_v48 }
 0x26f   :  { %v5814_v18 = vpop.f32.mrf.mxu0  ;;  %3586 = vrot.lane.b32.xlu0 %v3375_v55, %s5885_s20  ;;  %v3478_v44 = vshll.u32 %v3346_v49, 16  ;;  %v4796_v55 = vshrl.u32 %v4583_v34, 16 }
 0x270   :  { %v2677_v56 = vsel %vm2653_vm0, %v7270_v9, 0.0  ;;  %v7284_v45 = vadd.f32 %v5814_v18, %v7141_v27  ;;  %v4696_v18 = vsel %vm6116_vm14, %v4691_v5, %v4695_v0  ;;  %v2864_v0 = vsel %vm7195_vm4, 0, %v2863_v59  ;;  %v2875_v5 = vld [vmem:[#allocation4 + $0x38] sm:$0x1] }
 0x271   :  { %v2639_v24 = vpop.f32.mrf.mxu0  ;;  %v2678_v25 = vadd.f32 %v2677_v56, %v2676_v60  ;;  %v3475_v60 = vshrl.u32 %v3346_v49, 16  ;;  %v2860_v56 = vld [vmem:[#allocation4 + $0x10] sm:$0x1]  ;;  %4823 = vrot.lane.b32.xlu1 %v4696_v18, %s5894_s30  ;;  %v3480_v2 = vrot.slane %v3478_v44, 5  ;;  %2865 = vst [vmem:[#allocation4 + $0x18] sm:$0x1] %v2864_v0 }
 0x272   :  { %v7281_v12 = vadd.f32 %v7141_v27, %v2639_v24  ;;  %v2683_v62 = vsel %vm2653_vm0, %v7284_v45, 0.0  ;;  %v3667_v24 = vld [vmem:[#allocation4 + $0x50] sm:$0xe]  ;;  %v2861_v39 = vsel %vm7195_vm4, 0, %v2860_v56  ;;  %v2876_v13 = vsel %vm7195_vm4, 0, %v2875_v5 }
 0x273   :  { %v3477_v36 = vrot.slane %v3475_v60, 4  ;;  %2862 = vst [vmem:[#allocation4 + $0x10] sm:$0x1] %v2861_v39  ;;  %2877 = vst [vmem:[#allocation4 + $0x38] sm:$0x1] %v2876_v13 }
 0x274   :  { %v2679_v10 = vsel %vm2653_vm0, %v7281_v12, 0.0  ;;  %v2921_v56 = vld [vmem:[#allocation4 + $0x14] sm:$0x1] }
 0x275   :  { %v2680_v52 = vadd.f32 %v2679_v10, %v2678_v25  ;;  %v3718_v25 = vsel %vm6052_vm11, %v5665_v21, %v3717_v63  ;;  %v4471_v10 = vld [vmem:[#allocation4 + $0x98] sm:$0xf]  ;;  %5016 = vrot.lane.b32.xlu1 %v4969_v53, %s5895_s10  ;;  %v2918_v21 = vld [vmem:[#allocation4 + $0xc] sm:$0x1]  ;;  %v2922_v17 = vsel %vm7217_vm6, 0, %v2921_v56  ;;  %v4798_v53 = vrot.slane %v4796_v55, 4 }
 0x276   :  { %3779 = vrot.lane.b32.xlu0 %v3718_v25, %s5889_s11  ;;  %v2919_v49 = vsel %vm7217_vm6, 0, %v2918_v21  ;;  %2923 = vst [vmem:[#allocation4 + $0x14] sm:$0x1] %v2922_v17  ;;  %v4801_v25 = vrot.slane %v4799_v16, 5 }
 0x277   :  { %v2682_v50 = vadd.f32 %v2681_v46, %v2680_v52  ;;  %v5673_v52 = vrot.slane %v3667_v24, 9  ;;  %v2866_v46 = vld [vmem:[#allocation4 + $0x20] sm:$0x1]  ;;  %2920 = vst [vmem:[#allocation4 + $0xc] sm:$0x1] %v2919_v49 }
 0x278   :  { %v2867_v54 = vsel %vm7195_vm4, 0, %v2866_v46  ;;  %v4802_v58 = vor.u32 %v4801_v25, %v4798_v53  ;;  %v2927_v46 = vld [vmem:[#allocation4 + $0x24] sm:$0x1] }
 0x279   :  { %v2684_v27 = vadd.f32 %v2683_v62, %v2682_v50  ;;  %v3481_v50 = vor.u32 %v3480_v2, %v3477_v36  ;;  %2868 = vst [vmem:[#allocation4 + $0x20] sm:$0x1] %v2867_v54  ;;  %4518 = vrot.lane.b32.xlu1 %v4471_v10, %s5893_s2  ;;  %v4584_v2 = vld [vmem:[#allocation4 + $0x9c] sm:$0x1]  ;;  %v2933_v54 = vld [vmem:[#allocation4 + $0x34] sm:$0x1] }
 0x27a   :  { %v2928_v0 = vsel %vm7217_vm6, 0, %v2927_v46 }
 0x27b   :  { %v2685_v8 = vrot.slane %v2684_v27, 4  ;;  %v3482_v4 = vrot.slane %v3481_v50, 4  ;;  %2929 = vst [vmem:[#allocation4 + $0x24] sm:$0x1] %v2928_v0 }
 0x27d   :  { %v2686_v15 = vadd.f32 %v2685_v8, %v2684_v27  ;;  %v3749_v27 = vrot.slane %v3668_v30, 5  ;;  %v2878_v8 = vld [vmem:[#allocation4 + $0x40] sm:$0x1]  ;;  %v3487_v63 = vsel %vm6116_vm14, %v3482_v4, %v3486_v38  ;;  %v2934_v4 = vsel %vm7217_vm6, 0, %v2933_v54 }
 0x27e   :  { %v2879_v48 = vsel %vm7195_vm4, 0, %v2878_v8  ;;  %3602 = vrot.lane.b32.xlu0 %v3487_v63, %s5885_s20  ;;  %2935 = vst [vmem:[#allocation4 + $0x34] sm:$0x1] %v2934_v4 }
 0x27f   :  { %v2687_v20 = vrot.slane %v2686_v15, 2  ;;  %2880 = vst [vmem:[#allocation4 + $0x40] sm:$0x1] %v2879_v48  ;;  %v3750_v44 = vsel %vm6052_vm11, %v5673_v52, %v3749_v27 }
 0x281   :  { %v2688_v40 = vadd.f32 %v2687_v20, %v2686_v15  ;;  %v2924_v15 = vld [vmem:[#allocation4 + $0x1c] sm:$0x1] }
 0x282   :  { %v2925_v60 = vsel %vm7217_vm6, 0, %v2924_v15  ;;  %3795 = vrot.lane.b32.xlu0 %v3750_v44, %s5889_s11  ;;  %vm8814_vm6 = vmmov %vm8800_vm1 }
 0x283   :  { %v2689_v62 = vrot.slane %v2688_v40, 1  ;;  %2926 = vst [vmem:[#allocation4 + $0x1c] sm:$0x1] %v2925_v60 }
 0x285   :  { %v2690_v11 = vadd.f32 %v2689_v62, %v2688_v40  ;;  %v4805_v40 = vshll.u32 %v4584_v2, 16 }
 0x287   :  { %v7327_v18 = vmul.f32 0.0078125, %v2690_v11 }
 0x289   :  { %v7338_v19 = vsub.f32 %v7147_v32, %v7327_v18  ;;  %v7342_v24 = vsub.f32 %v7144_v29, %v7327_v18  ;;  %v7346_v20 = vsub.f32 %v7154_v35, %v7327_v18  ;;  %v7351_v36 = vsub.f32 %v7161_v26, %v7327_v18 }
 0x28a   :  { %v7359_v30 = vsub.f32 %v7164_v7, %v7327_v18  ;;  %v7365_v26 = vsub.f32 %v7169_v37, %v7327_v18  ;;  %v7373_v7 = vsub.f32 %v7176_v43, %v7327_v18  ;;  %v4803_v37 = vrot.slane %v4802_v58, 4 }
 0x28b   :  { %v2709_v32 = vmul.f32 %v7338_v19, %v7338_v19  ;;  %v2710_v29 = vmul.f32 %v7342_v24, %v7342_v24  ;;  %v2711_v35 = vmul.f32 %v7346_v20, %v7346_v20  ;;  %v2712_v10 = vmul.f32 %v7351_v36, %v7351_v36 }
 0x28c   :  { %v2713_v50 = vmul.f32 %v7359_v30, %v7359_v30  ;;  %v7380_v59 = vsub.f32 %v7179_v1, %v7327_v18  ;;  %v2714_v62 = vmul.f32 %v7365_v26, %v7365_v26  ;;  %v4807_v43 = vrot.slane %v4805_v40, 5 }
 0x28d   :  { %v2725_v38 = vsel %vm2653_vm0, %v2709_v32, 0.0  ;;  %v2726_v52 = vsel %vm2653_vm0, %v2710_v29, 0.0  ;;  %v2728_v34 = vsel %vm2653_vm0, %v2711_v35, 0.0  ;;  %v2730_v27 = vsel %vm2653_vm0, %v2712_v10, 0.0 }
 0x28e   :  { %v2727_v39 = vadd.f32 %v2726_v52, %v2725_v38  ;;  %v7393_v1 = vsub.f32 %v7184_v31, %v7327_v18  ;;  %v2715_v41 = vmul.f32 %v7373_v7, %v7373_v7  ;;  %v2732_v8 = vsel %vm2653_vm0, %v2713_v50, 0.0 }
 0x28f   :  { %v4808_v5 = vsel %vm6116_vm14, %v4803_v37, %v4807_v43  ;;  %v2702_v28 = vsub.f32 %v7187_v57, %v7327_v18  ;;  %v2716_v31 = vmul.f32 %v7380_v59, %v7380_v59  ;;  %v2734_v48 = vsel %vm2653_vm0, %v2714_v62, 0.0 }
 0x290   :  { %v2729_v47 = vadd.f32 %v2728_v34, %v2727_v39  ;;  %4839 = vrot.lane.b32.xlu1 %v4808_v5, %s5894_s30  ;;  %v2703_v21 = vsub.f32 %v7247_v51, %v7327_v18  ;;  %v2717_v63 = vmul.f32 %v7393_v1, %v7393_v1  ;;  %v2736_v49 = vsel %vm2653_vm0, %v2715_v41, 0.0 }
 0x291   :  { %v2704_v55 = vsub.f32 %v7263_v14, %v7327_v18  ;;  %v2718_v16 = vmul.f32 %v2702_v28, %v2702_v28  ;;  %v2738_v57 = vsel %vm2653_vm0, %v2716_v31, 0.0  ;;  %v2705_v56 = vsub.f32 %v7270_v9, %v7327_v18 }
 0x292   :  { %v2731_v3 = vadd.f32 %v2730_v27, %v2729_v47  ;;  %v2719_v44 = vmul.f32 %v2703_v21, %v2703_v21  ;;  %v2740_v17 = vsel %vm2653_vm0, %v2717_v63, 0.0  ;;  %v2706_v53 = vsub.f32 %v7281_v12, %v7327_v18 }
 0x293   :  { %v2720_v25 = vmul.f32 %v2704_v55, %v2704_v55  ;;  %v2742_v32 = vsel %vm2653_vm0, %v2718_v16, 0.0  ;;  %v2707_v14 = vsub.f32 %v7278_v22, %v7327_v18  ;;  %v2721_v2 = vmul.f32 %v2705_v56, %v2705_v56 }
 0x294   :  { %v2733_v11 = vadd.f32 %v2732_v8, %v2731_v3  ;;  %v2744_v35 = vsel %vm2653_vm0, %v2719_v44, 0.0  ;;  %v2708_v9 = vsub.f32 %v7284_v45, %v7327_v18  ;;  %v2722_v40 = vmul.f32 %v2706_v53, %v2706_v53 }
 0x295   :  { %v2746_v10 = vsel %vm2653_vm0, %v2720_v25, 0.0  ;;  %v2723_v52 = vmul.f32 %v2707_v14, %v2707_v14  ;;  %v2748_v12 = vsel %vm2653_vm0, %v2721_v2, 0.0 }
 0x296   :  { %v2735_v13 = vadd.f32 %v2734_v48, %v2733_v11  ;;  %v2724_v46 = vmul.f32 %v2708_v9, %v2708_v9  ;;  %v2750_v50 = vsel %vm2653_vm0, %v2722_v40, 0.0  ;;  %v5647_v11 = vld [vmem:[%s8770_s3] ss:$0 sm:$0xff] }
 0x297   :  { %v2752_v22 = vsel %vm2653_vm0, %v2723_v52, 0.0 }
 0x298   :  { %v2737_v15 = vadd.f32 %v2736_v49, %v2735_v13  ;;  %v2754_v23 = vsel %vm2653_vm0, %v2724_v46, 0.0 }
 0x29a   :  { %v2739_v60 = vadd.f32 %v2738_v57, %v2737_v15 }
 0x29c   :  { %v2741_v51 = vadd.f32 %v2740_v17, %v2739_v60 }
 0x29e   :  { %v2743_v29 = vadd.f32 %v2742_v32, %v2741_v51 }
 0x2a0   :  { %v2745_v58 = vadd.f32 %v2744_v35, %v2743_v29 }
 0x2a2   :  { %v2747_v38 = vadd.f32 %v2746_v10, %v2745_v58 }
 0x2a4   :  { %v2749_v39 = vadd.f32 %v2748_v12, %v2747_v38 }
 0x2a6   :  { %v2751_v34 = vadd.f32 %v2750_v50, %v2749_v39 }
 0x2a8   :  { %v2753_v37 = vadd.f32 %v2752_v22, %v2751_v34 }
 0x2aa   :  { %v2755_v54 = vadd.f32 %v2754_v23, %v2753_v37 }
 0x2ac   :  { %v2756_v47 = vrot.slane %v2755_v54, 4 }
 0x2ae   :  { %v2757_v45 = vadd.f32 %v2756_v47, %v2755_v54 }
 0x2b0   :  { %v2758_v18 = vrot.slane %v2757_v45, 2 }
 0x2b2   :  { %v2759_v62 = vadd.f32 %v2758_v18, %v2757_v45 }
 0x2b4   :  { %v2760_v27 = vrot.slane %v2759_v62, 1 }
 0x2b6   :  { %v2761_v43 = vadd.f32 %v2760_v27, %v2759_v62 }
 0x2b8   :  { %v2762_v0 = vmul.f32 0.0078125, %v2761_v43 }
 0x2ba   :  { %v2763_v3 = vadd.f32 1e-05, %v2762_v0 }
 0x2bc   :  { %5880 = vrsqrt.f32 %v2763_v3 }
 0x2c9   :  { %v5881_v33 = vpop.eup %5880 }
 0x2ca   :  { %v2765_v4 = vmul.f32 %v5881_v33, %v7338_v19  ;;  %v2766_v41 = vmul.f32 %v5881_v33, %v7342_v24  ;;  %v2767_v8 = vmul.f32 %v5881_v33, %v7346_v20  ;;  %v2768_v5 = vmul.f32 %v5881_v33, %v7351_v36 }
 0x2cb   :  { %v2769_v31 = vmul.f32 %v5881_v33, %v7359_v30  ;;  %v2770_v48 = vmul.f32 %v5881_v33, %v7365_v26  ;;  %v2771_v13 = vmul.f32 %v5881_v33, %v7373_v7  ;;  %v2772_v63 = vmul.f32 %v5881_v33, %v7380_v59  ;;  %v5648_v30 = vld [vmem:[%s8771_s4] ss:$0 sm:$0xff]  ;;  %s5896_s4 = smov 40  }
 0x2cc   :  { %v2773_v19 = vmul.f32 %v5881_v33, %v7393_v1  ;;  %v2774_v49 = vmul.f32 %v5881_v33, %v2702_v28  ;;  %v2775_v24 = vmul.f32 %v5881_v33, %v2703_v21  ;;  %v2776_v15 = vmul.f32 %v5881_v33, %v2704_v55 }
 0x2cd   :  { %v2777_v20 = vmul.f32 %v5881_v33, %v2705_v56  ;;  %v2778_v16 = vmul.f32 %v5881_v33, %v2706_v53  ;;  %v2779_v36 = vmul.f32 %v5881_v33, %v2707_v14  ;;  %v2780_v57 = vmul.f32 %v5881_v33, %v2708_v9 }
 0x2ce   :  { %v2787_v60 = vmul.f32 %v5647_v11, %v2765_v4  ;;  %v2788_v44 = vmul.f32 %v5647_v11, %v2766_v41  ;;  %v2789_v17 = vmul.f32 %v5647_v11, %v2767_v8  ;;  %v2790_v51 = vmul.f32 %v5647_v11, %v2768_v5 }
 0x2cf   :  { %v2791_v26 = vmul.f32 %v5647_v11, %v2769_v31  ;;  %v2792_v7 = vmul.f32 %v5647_v11, %v2770_v48  ;;  %v2793_v59 = vmul.f32 %v5647_v11, %v2771_v13  ;;  %v2794_v25 = vmul.f32 %v5647_v11, %v2772_v63 }
 0x2d0   :  { %v2795_v1 = vmul.f32 %v5647_v11, %v2773_v19  ;;  %v2796_v28 = vmul.f32 %v5647_v11, %v2774_v49  ;;  %v2797_v21 = vmul.f32 %v5647_v11, %v2775_v24  ;;  %v2798_v55 = vmul.f32 %v5647_v11, %v2776_v15 }
 0x2d1   :  { %v2799_v56 = vmul.f32 %v5647_v11, %v2777_v20  ;;  %v2800_v53 = vmul.f32 %v5647_v11, %v2778_v16  ;;  %v2801_v32 = vmul.f32 %v5647_v11, %v2779_v36  ;;  %v2802_v29 = vmul.f32 %v5647_v11, %v2780_v57 }
 0x2d2   :  { %v2809_v14 = vadd.f32 %v5648_v30, %v2787_v60  ;;  %v2810_v2 = vadd.f32 %v5648_v30, %v2788_v44  ;;  %v2811_v35 = vadd.f32 %v5648_v30, %v2789_v17  ;;  %v2812_v58 = vadd.f32 %v5648_v30, %v2790_v51 }
 0x2d3   :  { %v2813_v9 = vadd.f32 %v5648_v30, %v2791_v26  ;;  %v2814_v40 = vadd.f32 %v5648_v30, %v2792_v7  ;;  %v2815_v10 = vadd.f32 %v5648_v30, %v2793_v59  ;;  %v2816_v38 = vadd.f32 %v5648_v30, %v2794_v25 }
 0x2d4   :  { %v2817_v52 = vadd.f32 %v5648_v30, %v2795_v1  ;;  %v2818_v12 = vadd.f32 %v5648_v30, %v2796_v28  ;;  %v2819_v39 = vadd.f32 %v5648_v30, %v2797_v21  ;;  %v2820_v46 = vadd.f32 %v5648_v30, %v2798_v55 }
 0x2d5   :  { %v2821_v50 = vadd.f32 %v5648_v30, %v2799_v56  ;;  %v2822_v34 = vadd.f32 %v5648_v30, %v2800_v53  ;;  %v2823_v22 = vadd.f32 %v5648_v30, %v2801_v32  ;;  %v2824_v37 = vadd.f32 %v5648_v30, %v2802_v29 }
 0x2d6   :  { %v2825_v23 = vmax.f32 %v2809_v14, 0.0  ;;  %v2826_v54 = vmax.f32 %v2810_v2, 0.0  ;;  %v2827_v47 = vmax.f32 %v2811_v35, 0.0  ;;  %v2828_v45 = vmax.f32 %v2812_v58, 0.0 }
 0x2d7   :  { %v2829_v18 = vmax.f32 %v2813_v9, 0.0  ;;  %v2830_v62 = vmax.f32 %v2814_v40, 0.0  ;;  %v2831_v27 = vmax.f32 %v2815_v10, 0.0  ;;  %v2832_v43 = vmax.f32 %v2816_v38, 0.0  ;;  %v3298_v38 = vld [vmem:[#allocation4] sm:$0xf] }
 0x2d8   :  { %v2833_v0 = vmax.f32 %v2817_v52, 0.0  ;;  %v2834_v3 = vmax.f32 %v2818_v12, 0.0  ;;  %v2835_v33 = vmax.f32 %v2819_v39, 0.0  ;;  %v2836_v4 = vmax.f32 %v2820_v46, 0.0  ;;  %3314 = vst.msk [vmem:[#allocation5] sm:$0xf] %vm8797_vm7, %v3298_v38  ;;  %vm8815_vm7 = vmmov %vm8800_vm1 }
 0x2d9   :  { %v2837_v41 = vmax.f32 %v2821_v50, 0.0  ;;  %v2838_v8 = vmax.f32 %v2822_v34, 0.0  ;;  %v2839_v5 = vmax.f32 %v2823_v22, 0.0  ;;  %v2840_v11 = vmax.f32 %v2824_v37, 0.0  ;;  %v3286_v37 = vld [vmem:[#allocation4 + $0x88] sm:$0xf] }
 0x2da   :  { %v7445_v31 = vpack.c.bf16 %v2825_v23, %v2825_v23  ;;  %v7447_v48 = vpack.c.bf16 %v2826_v54, %v2826_v54  ;;  %v7449_v13 = vpack.c.bf16 %v2827_v47, %v2827_v47  ;;  %v5756_v63 = vpack.c.bf16 %v2828_v45, %v2828_v45  ;;  %v3289_v34 = vld [vmem:[#allocation4 + $0x8c] sm:$0x1] }
 0x2db   :  { %v5757_v19 = vpack.c.bf16 %v2829_v18, %v2829_v18  ;;  %v5758_v49 = vpack.c.bf16 %v2830_v62, %v2830_v62  ;;  %v5759_v24 = vpack.c.bf16 %v2831_v27, %v2831_v27  ;;  %v5760_v15 = vpack.c.bf16 %v2832_v43, %v2832_v43 }
 0x2dc   :  { %v5761_v20 = vpack.c.bf16 %v2833_v0, %v2833_v0  ;;  %v5762_v16 = vpack.c.bf16 %v2834_v3, %v2834_v3  ;;  %v5763_v36 = vpack.c.bf16 %v2835_v33, %v2835_v33  ;;  %v7451_v57 = vpack.c.bf16 %v2836_v4, %v2836_v4 }
 0x2dd   :  { %v7453_v60 = vpack.c.bf16 %v2837_v41, %v2837_v41  ;;  %v7455_v44 = vpack.c.bf16 %v2838_v8, %v2838_v8  ;;  %v7457_v17 = vpack.c.bf16 %v2839_v5, %v2839_v5  ;;  %v7459_v51 = vpack.c.bf16 %v2840_v11, %v2840_v11 }
 0x2de   :  { %v3040_v30 = vshrl.u32 %v7445_v31, 16  ;;  %v3043_v26 = vshll.u32 %v7445_v31, 16  ;;  %v3048_v7 = vshrl.u32 %v7447_v48, 16  ;;  %v3051_v59 = vshll.u32 %v7447_v48, 16 }
 0x2df   :  { %v3056_v25 = vshrl.u32 %v7449_v13, 16  ;;  %v3059_v1 = vshll.u32 %v7449_v13, 16  ;;  %v3064_v28 = vshrl.u32 %v5756_v63, 16  ;;  %v3067_v21 = vshll.u32 %v5756_v63, 16 }
 0x2e0   :  { %v3072_v55 = vshrl.u32 %v5757_v19, 16  ;;  %v3075_v56 = vshll.u32 %v5757_v19, 16  ;;  %v3080_v53 = vshrl.u32 %v5758_v49, 16  ;;  %v3083_v32 = vshll.u32 %v5758_v49, 16 }
 0x2e1   :  { %v7467_v29 = vrot.slane %v3056_v25, 7  ;;  %v7469_v14 = vrot.slane %v3064_v28, 7  ;;  %v3088_v2 = vshrl.u32 %v5759_v24, 16  ;;  %v3091_v35 = vshll.u32 %v5759_v24, 16  ;;  %v3247_v28 = vld [vmem:[#allocation4 + $0x44] sm:$0x1] }
 0x2e2   :  { %v7471_v58 = vrot.slane %v3072_v55, 7  ;;  %v7473_v9 = vrot.slane %v3080_v53, 7  ;;  %v3096_v40 = vshrl.u32 %v5760_v15, 16  ;;  %v3099_v10 = vshll.u32 %v5760_v15, 16  ;;  %v3241_v15 = vld [vmem:[#allocation4 + $0x3c] sm:$0x1] }
 0x2e3   :  { %v3062_v52 = vrot.slane %v7467_v29, 4  ;;  %v7477_v12 = vor.u32 %v3067_v21, %v7469_v14  ;;  %v3070_v39 = vrot.slane %v7469_v14, 4  ;;  %v3090_v46 = vrot.slane %v3088_v2, 7  ;;  %v3250_v21 = vld [vmem:[#allocation4 + $0x58] sm:$0xf] }
 0x2e4   :  { %v7482_v50 = vor.u32 %v3075_v56, %v7471_v58  ;;  %v7486_v22 = vor.u32 %v3083_v32, %v7473_v9  ;;  %v3098_v47 = vrot.slane %v3096_v40, 7  ;;  %v3104_v45 = vshrl.u32 %v5761_v20, 16  ;;  %v3253_v55 = vld [vmem:[#allocation4 + $0x5c] sm:$0x1]  ;;  %v3306_v56 = vld [vmem:[#allocation4 + $0x50] sm:$0xf] }
 0x2e5   :  { %v7489_v23 = vor.u32 %v3091_v35, %v3090_v46  ;;  %v3094_v54 = vrot.slane %v3090_v46, 4  ;;  %v3107_v18 = vshll.u32 %v5761_v20, 16  ;;  %v3112_v62 = vshrl.u32 %v5762_v16, 16  ;;  %3322 = vst.msk [vmem:[#allocation5 + $0x20] sm:$0xf] %vm8798_vm9, %v3306_v56  ;;  %vm8816_vm9 = vmmov %vm8800_vm1 }
 0x2e6   :  { %v3115_v27 = vshll.u32 %v5762_v16, 16  ;;  %v3120_v43 = vshrl.u32 %v5763_v36, 16  ;;  %v7491_v0 = vor.u32 %v3099_v10, %v3098_v47  ;;  %v3102_v3 = vrot.slane %v3098_v47, 4  ;;  %v3259_v47 = vld [vmem:[#allocation4 + $0x64] sm:$0x1] }
 0x2e7   :  { %v3106_v33 = vrot.slane %v3104_v45, 7  ;;  %v3123_v4 = vshll.u32 %v5763_v36, 16  ;;  %v7493_v41 = vrot.slane %v3112_v62, 7  ;;  %v3128_v5 = vshrl.u32 %v7451_v57, 16  ;;  %v3262_v45 = vld [vmem:[#allocation4 + $0x68] sm:$0xf] }
 0x2e8   :  { %v7495_v8 = vrot.slane %v3120_v43, 7  ;;  %v3131_v11 = vshll.u32 %v7451_v57, 16  ;;  %v3136_v49 = vshrl.u32 %v7453_v60, 16  ;;  %v3139_v24 = vshll.u32 %v7453_v60, 16  ;;  %v3256_v60 = vld [vmem:[#allocation4 + $0x60] sm:$0xf] }
 0x2e9   :  { %v3109_v63 = vor.u32 %v3107_v18, %v3106_v33  ;;  %v3110_v19 = vrot.slane %v3106_v33, 4  ;;  %v3117_v20 = vor.u32 %v3115_v27, %v7493_v41  ;;  %v3118_v16 = vrot.slane %v7493_v41, 4  ;;  %v3265_v43 = vld [vmem:[#allocation4 + $0x6c] sm:$0x1]  ;;  %v3268_v33 = vld [vmem:[#allocation4 + $0x70] sm:$0xf] }
 0x2ea   :  { %v3125_v36 = vor.u32 %v3123_v4, %v7495_v8  ;;  %v3126_v25 = vrot.slane %v7495_v8, 4  ;;  %v3130_v57 = vrot.slane %v3128_v5, 7  ;;  %v3138_v53 = vrot.slane %v3136_v49, 7  ;;  %v3271_v4 = vld [vmem:[#allocation4 + $0x74] sm:$0x1] }
 0x2eb   :  { %v3144_v32 = vshrl.u32 %v7455_v44, 16  ;;  %v3147_v2 = vshll.u32 %v7455_v44, 16  ;;  %v3152_v40 = vshrl.u32 %v7457_v17, 16  ;;  %v3155_v10 = vshll.u32 %v7457_v17, 16  ;;  %v3274_v17 = vld [vmem:[#allocation4 + $0x78] sm:$0xf] }
 0x2ec   :  { %v3160_v38 = vshrl.u32 %v7459_v51, 16  ;;  %v3163_v46 = vshll.u32 %v7459_v51, 16  ;;  %v3133_v44 = vor.u32 %v3131_v11, %v3130_v57  ;;  %v3134_v18 = vrot.slane %v3130_v57, 4  ;;  %v3277_v57 = vld [vmem:[#allocation4 + $0x7c] sm:$0x1] }
 0x2ed   :  { %v3141_v62 = vor.u32 %v3139_v24, %v3138_v53  ;;  %v3142_v27 = vrot.slane %v3138_v53, 4  ;;  %v3146_v41 = vrot.slane %v3144_v32, 7  ;;  %v3154_v8 = vrot.slane %v3152_v40, 7  ;;  %v3280_v53 = vld [vmem:[#allocation4 + $0x80] sm:$0xf] }
 0x2ee   :  { %v3162_v5 = vrot.slane %v3160_v38, 7  ;;  %v3242_v49 = vsel %vm7195_vm4, %v3094_v54, %v3241_v15  ;;  %v3248_v56 = vsel %vm7195_vm4, %v3102_v3, %v3247_v28  ;;  %v3251_v51 = vsel %vm7510_vm8, %v3109_v63, %v3250_v21  ;;  %v3283_v32 = vld [vmem:[#allocation4 + $0x84] sm:$0x1]  ;;  %v3292_v28 = vld [vmem:[#allocation4 + $0x90] sm:$0xf] }
 0x2ef   :  { %v3254_v11 = vsel %vm7195_vm4, %v3110_v19, %v3253_v55  ;;  %v3257_v24 = vsel %vm7510_vm8, %v3117_v20, %v3256_v60  ;;  %3243 = vst [vmem:[#allocation4 + $0x3c] sm:$0x1] %v3242_v49  ;;  %v3149_v40 = vor.u32 %v3147_v2, %v3146_v41  ;;  %v3150_v38 = vrot.slane %v3146_v41, 4  ;;  %3249 = vst [vmem:[#allocation4 + $0x44] sm:$0x1] %v3248_v56 }
 0x2f0   :  { %v3157_v54 = vor.u32 %v3155_v10, %v3154_v8  ;;  %v3158_v15 = vrot.slane %v3154_v8, 4  ;;  %3252 = vst [vmem:[#allocation4 + $0x58] sm:$0xf] %v3251_v51  ;;  %3255 = vst [vmem:[#allocation4 + $0x5c] sm:$0x1] %v3254_v11  ;;  %v3165_v3 = vor.u32 %v3163_v46, %v3162_v5  ;;  %v3166_v63 = vrot.slane %v3162_v5, 4 }
 0x2f1   :  { %3258 = vst [vmem:[#allocation4 + $0x60] sm:$0xf] %v3257_v24  ;;  %v3260_v19 = vsel %vm7195_vm4, %v3118_v16, %v3259_v47  ;;  %v3263_v20 = vsel %vm7510_vm8, %v3125_v36, %v3262_v45  ;;  %v3295_v21 = vld [vmem:[#allocation4 + $0x94] sm:$0x1]  ;;  %v3266_v55 = vsel %vm7195_vm4, %v3126_v25, %v3265_v43  ;;  %v3269_v2 = vsel %vm7510_vm8, %v3133_v44, %v3268_v33  ;;  %v3220_v16 = vld [vmem:[#allocation4 + $0x20] sm:$0xf] }
 0x2f2   :  { %v3272_v60 = vsel %vm7195_vm4, %v3134_v18, %v3271_v4  ;;  %v3275_v10 = vsel %vm7510_vm8, %v3141_v62, %v3274_v17  ;;  %3261 = vst [vmem:[#allocation4 + $0x64] sm:$0x1] %v3260_v19  ;;  %3264 = vst [vmem:[#allocation4 + $0x68] sm:$0xf] %v3263_v20  ;;  %v3226_v46 = vld [vmem:[#allocation4 + $0x28] sm:$0xf]  ;;  %v3278_v36 = vsel %vm7195_vm4, %v3142_v27, %v3277_v57 }
 0x2f3   :  { %3267 = vst [vmem:[#allocation4 + $0x6c] sm:$0x1] %v3266_v55  ;;  %3273 = vst [vmem:[#allocation4 + $0x74] sm:$0x1] %v3272_v60  ;;  %v3281_v25 = vsel %vm7510_vm8, %v3149_v40, %v3280_v53  ;;  %v3284_v47 = vsel %vm7195_vm4, %v3150_v38, %v3283_v32  ;;  %v3287_v45 = vsel %vm7510_vm8, %v3157_v54, %v3286_v37  ;;  %v3208_v44 = vld [vmem:[#allocation4 + $0x10] sm:$0xf]  ;;  %v3587_v38 = vpop.permute.xlu0 %3586 }
 0x2f4   :  { %3276 = vst [vmem:[#allocation4 + $0x78] sm:$0xf] %v3275_v10  ;;  %3270 = vst [vmem:[#allocation4 + $0x70] sm:$0xf] %v3269_v2  ;;  %v3214_v18 = vld [vmem:[#allocation4 + $0x18] sm:$0xf]  ;;  %v3290_v27 = vsel %vm7195_vm4, %v3158_v15, %v3289_v34  ;;  %v3293_v33 = vsel %vm7510_vm8, %v3165_v3, %v3292_v28  ;;  %v3296_v4 = vsel %vm7195_vm4, %v3166_v63, %v3295_v21 }
 0x2f5   :  { %v3232_v62 = vld [vmem:[#allocation4 + $0x30] sm:$0xf]  ;;  %v3244_v43 = vld [vmem:[#allocation4 + $0x40] sm:$0xf]  ;;  %3279 = vst [vmem:[#allocation4 + $0x7c] sm:$0x1] %v3278_v36  ;;  %v3221_v34 = vsel %vm7510_vm8, %v7477_v12, %v3220_v16  ;;  %v3061_v17 = vor.u32 %v3059_v1, %v7467_v29 }
 0x2f6   :  { %3282 = vst [vmem:[#allocation4 + $0x80] sm:$0xf] %v3281_v25  ;;  %3285 = vst [vmem:[#allocation4 + $0x84] sm:$0x1] %v3284_v47  ;;  %v3050_v37 = vrot.slane %v3048_v7, 7  ;;  %v3042_v49 = vrot.slane %v3040_v30, 7  ;;  %v3227_v7 = vsel %vm7510_vm8, %v7482_v50, %v3226_v46  ;;  %v3233_v30 = vsel %vm7510_vm8, %v7486_v22, %v3232_v62 }
 0x2f7   :  { %3288 = vst [vmem:[#allocation4 + $0x88] sm:$0xf] %v3287_v45  ;;  %v3202_v41 = vld [vmem:[#allocation4 + $0x8] sm:$0xf]  ;;  %v3238_v8 = vld [vmem:[#allocation4 + $0x38] sm:$0xf]  ;;  %v3245_v13 = vsel %vm7510_vm8, %v7491_v0, %v3244_v43  ;;  %v3215_v48 = vsel %vm7510_vm8, %v3061_v17, %v3214_v18  ;;  %v3780_v61 = vpop.permute.xlu0 %3779 }
 0x2f8   :  { %v3217_v5 = vld [vmem:[#allocation4 + $0x1c] sm:$0x1]  ;;  %3291 = vst [vmem:[#allocation4 + $0x8c] sm:$0x1] %v3290_v27  ;;  %3297 = vst [vmem:[#allocation4 + $0x94] sm:$0x1] %v3296_v4  ;;  %v3053_v11 = vor.u32 %v3051_v59, %v3050_v37  ;;  %v3045_v50 = vor.u32 %v3043_v26, %v3042_v49  ;;  %v3239_v59 = vsel %vm7510_vm8, %v7489_v23, %v3238_v8 }
 0x2f9   :  { %3294 = vst [vmem:[#allocation4 + $0x90] sm:$0xf] %v3293_v33  ;;  %v3211_v56 = vld [vmem:[#allocation4 + $0x14] sm:$0x1]  ;;  %v3223_v51 = vld [vmem:[#allocation4 + $0x24] sm:$0x1]  ;;  %v3218_v31 = vsel %vm7195_vm4, %v3062_v52, %v3217_v5 }
 0x2fa   :  { %v3054_v24 = vrot.slane %v3050_v37, 4  ;;  %3222 = vst [vmem:[#allocation4 + $0x20] sm:$0xf] %v3221_v34  ;;  %3228 = vst [vmem:[#allocation4 + $0x28] sm:$0xf] %v3227_v7  ;;  %v3046_v57 = vrot.slane %v3042_v49, 4  ;;  %v3209_v53 = vsel %vm7510_vm8, %v3053_v11, %v3208_v44  ;;  %v3224_v0 = vsel %vm7195_vm4, %v3070_v39, %v3223_v51 }
 0x2fb   :  { %v3205_v1 = vld [vmem:[#allocation4 + $0xc] sm:$0x1]  ;;  %3234 = vst [vmem:[#allocation4 + $0x30] sm:$0xf] %v3233_v30  ;;  %3246 = vst [vmem:[#allocation4 + $0x40] sm:$0xf] %v3245_v13  ;;  %v3203_v23 = vsel %vm7510_vm8, %v3045_v50, %v3202_v41  ;;  %v3603_v19 = vpop.permute.xlu0 %3602 }
 0x2fc   :  { %v3229_v12 = vld [vmem:[#allocation4 + $0x2c] sm:$0x1]  ;;  %v3235_v22 = vld [vmem:[#allocation4 + $0x34] sm:$0x1]  ;;  %3216 = vst [vmem:[#allocation4 + $0x18] sm:$0xf] %v3215_v48  ;;  %v3212_v26 = vsel %vm7195_vm4, %v3054_v24, %v3211_v56  ;;  %v3206_v32 = vsel %vm7195_vm4, %v3046_v57, %v3205_v1  ;;  %vm8823_vm8 = vmmov %vm8800_vm1 }
 0x2fd   :  { %3240 = vst [vmem:[#allocation4 + $0x38] sm:$0xf] %v3239_v59  ;;  %3210 = vst [vmem:[#allocation4 + $0x10] sm:$0xf] %v3209_v53  ;;  %v8803_v29 = vrot.slane %v7471_v58, 4  ;;  %v8804_v14 = vrot.slane %v7473_v9, 4 }
 0x2fe   :  { %3219 = vst [vmem:[#allocation4 + $0x1c] sm:$0x1] %v3218_v31  ;;  %3213 = vst [vmem:[#allocation4 + $0x14] sm:$0x1] %v3212_v26  ;;  %v3853_v16 = vld [vmem:[#allocation4 + $0x60] sm:$0xf] }
 0x2ff   :  { %3225 = vst [vmem:[#allocation4 + $0x24] sm:$0x1] %v3224_v0  ;;  %v3230_v52 = vsel %vm7195_vm4, %v8803_v29, %v3229_v12  ;;  %3204 = vst [vmem:[#allocation4 + $0x8] sm:$0xf] %v3203_v23  ;;  %v3236_v39 = vsel %vm7195_vm4, %v8804_v14, %v3235_v22  ;;  %v3796_v2 = vpop.permute.xlu0 %3795  ;;  %v3855_v36 = vld [vmem:[#allocation4 + $0x70] sm:$0xf] }
 0x300   :  { %3207 = vst [vmem:[#allocation4 + $0xc] sm:$0x1] %v3206_v32  ;;  %3231 = vst [vmem:[#allocation4 + $0x2c] sm:$0x1] %v3230_v52  ;;  %v3852_v25 = vld [vmem:[#allocation4 + $0x58] sm:$0xf] }
 0x301   :  { %3237 = vst [vmem:[#allocation4 + $0x34] sm:$0x1] %v3236_v39  ;;  %v3847_v58 = vld [vmem:[#allocation4 + $0x20] sm:$0xf]  ;;  %v4459_v3 = vld [vmem:[#allocation4 + $0x28] sm:$0xf]  ;;  %vm8811_vm4 = vmmov %vm8800_vm1 }
 0x302   :  { %v4458_v63 = vld [vmem:[#allocation4 + $0x20] sm:$0xf]  ;;  %v3849_v20 = vld [vmem:[#allocation4 + $0x30] sm:$0xf]  ;;  %v3848_v28 = vld [vmem:[#allocation4 + $0x28] sm:$0xf] }
 0x303   :  { %v3846_v54 = vld [vmem:[#allocation4 + $0x18] sm:$0xf]  ;;  %v3851_v21 = vld [vmem:[#allocation4 + $0x40] sm:$0xf]  ;;  %3635 = vst.msk [vmem:[#allocation5] sm:$0xf] %vm3634_vm10, %v3587_v38 }
 0x304   :  { %v3845_v35 = vld [vmem:[#allocation4 + $0x10] sm:$0xf]  ;;  %v4457_v15 = vld [vmem:[#allocation4 + $0x18] sm:$0xf]  ;;  %3643 = vst.msk [vmem:[#allocation5 + $0x20] sm:$0xf] %vm3634_vm10, %v3603_v19 }
 0x305   :  { %3878 = vrot.lane.b32.xlu1 %v3845_v35, %s5890_s16  ;;  %v4456_v9 = vld [vmem:[#allocation4 + $0x10] sm:$0xf]  ;;  %v3850_v55 = vld [vmem:[#allocation4 + $0x38] sm:$0xf]  ;;  %3828 = vst.msk [vmem:[#allocation5] sm:$0xf] %vm3827_vm12, %v3780_v61 }
 0x306   :  { %v3844_v40 = vld [vmem:[#allocation4 + $0x8] sm:$0xf]  ;;  %v4461_v60 = vld [vmem:[#allocation4 + $0x38] sm:$0xf]  ;;  %3836 = vst.msk [vmem:[#allocation5 + $0x20] sm:$0xf] %vm3827_vm12, %v3796_v2 }
 0x307   :  { %3876 = vrot.lane.b32.xlu0 %v3844_v40, %s5890_s16  ;;  %v4460_v10 = vld [vmem:[#allocation4 + $0x30] sm:$0xf]  ;;  %v4462_v46 = vld [vmem:[#allocation4 + $0x40] sm:$0xf]  ;;  %v4465_v47 = vld [vmem:[#allocation4 + $0x68] sm:$0xf] }
 0x308   :  { %v3854_v45 = vld [vmem:[#allocation4 + $0x68] sm:$0xf]  ;;  %v4467_v44 = vld [vmem:[#allocation4 + $0x78] sm:$0xf]  ;;  %v4464_v18 = vld [vmem:[#allocation4 + $0x60] sm:$0xf] }
 0x309   :  { %3882 = vrot.lane.b32.xlu1 %v3847_v58, %s5890_s16  ;;  %v3857_v62 = vld [vmem:[#allocation4 + $0x80] sm:$0xf]  ;;  %v4466_v43 = vld [vmem:[#allocation4 + $0x70] sm:$0xf]  ;;  %v3856_v33 = vld [vmem:[#allocation4 + $0x78] sm:$0xf] }
 0x30a   :  { %v3859_v27 = vld [vmem:[#allocation4 + $0x90] sm:$0xf]  ;;  %v3653_v4 = vld [vmem:[#allocation4 + $0x8] sm:$0xe]  ;;  %v3654_v37 = vld [vmem:[#allocation4 + $0xc] sm:$0x1] }
 0x30b   :  { %3880 = vrot.lane.b32.xlu0 %v3846_v54, %s5890_s16  ;;  %v4469_v41 = vld [vmem:[#allocation4 + $0x88] sm:$0xf]  ;;  %v5666_v8 = vrot.slane %v3653_v4, 9  ;;  %v3721_v5 = vrot.slane %v3654_v37, 5  ;;  %v3657_v34 = vld [vmem:[#allocation4 + $0x18] sm:$0xe] }
 0x30c   :  { %v3858_v49 = vld [vmem:[#allocation4 + $0x88] sm:$0xf]  ;;  %v3658_v17 = vld [vmem:[#allocation4 + $0x1c] sm:$0x1]  ;;  %v5668_v56 = vrot.slane %v3657_v34, 9 }
 0x30d   :  { %4490 = vrot.lane.b32.xlu1 %v4457_v15, %s5893_s2  ;;  %v3722_v7 = vsel %vm6052_vm11, %v5666_v8, %v3721_v5  ;;  %v3729_v51 = vrot.slane %v3658_v17, 5  ;;  %v4468_v11 = vld [vmem:[#allocation4 + $0x80] sm:$0xf]  ;;  %v4264_v24 = vld [vmem:[#allocation4 + $0x10] sm:$0xe] }
 0x30e   :  { %v4265_v30 = vld [vmem:[#allocation4 + $0x14] sm:$0x1]  ;;  %v3655_v13 = vld [vmem:[#allocation4 + $0x10] sm:$0xe]  ;;  %v5682_v57 = vrot.slane %v4264_v24, 9 }
 0x30f   :  { %4488 = vrot.lane.b32.xlu0 %v4456_v9, %s5893_s2  ;;  %v3656_v1 = vld [vmem:[#allocation4 + $0x14] sm:$0x1]  ;;  %v4470_v12 = vld [vmem:[#allocation4 + $0x90] sm:$0xf]  ;;  %v3730_v50 = vsel %vm6052_vm11, %v5668_v56, %v3729_v51  ;;  %v4332_v48 = vrot.slane %v4265_v30, 5  ;;  %v5667_v59 = vrot.slane %v3655_v13, 9 }
 0x310   :  { %v3725_v22 = vrot.slane %v3656_v1, 5  ;;  %v4268_v53 = vld [vmem:[#allocation4 + $0x20] sm:$0xe]  ;;  %v4269_v31 = vld [vmem:[#allocation4 + $0x24] sm:$0x1] }
 0x311   :  { %4494 = vrot.lane.b32.xlu1 %v4459_v3, %s5893_s2  ;;  %v4262_v26 = vld [vmem:[#allocation4 + $0x8] sm:$0xe]  ;;  %v4263_v0 = vld [vmem:[#allocation4 + $0xc] sm:$0x1]  ;;  %v4333_v23 = vsel %vm6052_vm11, %v5682_v57, %v4332_v48  ;;  %v5684_v32 = vrot.slane %v4268_v53, 9  ;;  %v4340_v29 = vrot.slane %v4269_v31, 5  ;;  %v7681_v53 = vpop.permute.xlu1 %4502 }
 0x312   :  { %v3726_v52 = vsel %vm6052_vm11, %v5667_v59, %v3725_v22  ;;  %v5681_v14 = vrot.slane %v4262_v26, 9  ;;  %v4328_v39 = vrot.slane %v4263_v0, 5  ;;  %v4876_v35 = vld [vmem:[#allocation4 + $0x18] sm:$0xe]  ;;  %v4877_v40 = vld [vmem:[#allocation4 + $0x1c] sm:$0x1] }
 0x313   :  { %4492 = vrot.lane.b32.xlu0 %v4458_v63, %s5893_s2  ;;  %v4266_v38 = vld [vmem:[#allocation4 + $0x18] sm:$0xe]  ;;  %v4267_v58 = vld [vmem:[#allocation4 + $0x1c] sm:$0x1]  ;;  %v4341_v54 = vsel %vm6052_vm11, %v5684_v32, %v4340_v29  ;;  %v5698_v15 = vrot.slane %v4876_v35, 9  ;;  %v4944_v9 = vrot.slane %v4877_v40, 5 }
 0x314   :  { %v4329_v61 = vsel %vm6052_vm11, %v5681_v14, %v4328_v39  ;;  %v5683_v3 = vrot.slane %v4266_v38, 9  ;;  %v4336_v63 = vrot.slane %v4267_v58, 5  ;;  %v4880_v19 = vld [vmem:[#allocation4 + $0x28] sm:$0xe]  ;;  %v3665_v4 = vld [vmem:[#allocation4 + $0x38] sm:$0xe] }
 0x315   :  { %3886 = vrot.lane.b32.xlu1 %v3849_v20, %s5890_s16  ;;  %v4881_v20 = vld [vmem:[#allocation4 + $0x2c] sm:$0x1]  ;;  %v5700_v2 = vrot.slane %v4880_v19, 9  ;;  %v3666_v37 = vld [vmem:[#allocation4 + $0x3c] sm:$0x1]  ;;  %8805 = vst [vmem:[#allocation6_spill] sm:$0xff] %v7681_v53 }
 0x316   :  { %v3660_v8 = vld [vmem:[#allocation4 + $0x24] sm:$0x1]  ;;  %v3745_v34 = vrot.slane %v3666_v37, 5  ;;  %v4272_v51 = vld [vmem:[#allocation4 + $0x30] sm:$0xe] }
 0x317   :  { %3884 = vrot.lane.b32.xlu0 %v3848_v28, %s5890_s16  ;;  %v4874_v28 = vld [vmem:[#allocation4 + $0x10] sm:$0xe]  ;;  %v3733_v56 = vrot.slane %v3660_v8, 5  ;;  %v3664_v30 = vld [vmem:[#allocation4 + $0x34] sm:$0x1]  ;;  %v5686_v1 = vrot.slane %v4272_v51, 9 }
 0x318   :  { %v3663_v24 = vld [vmem:[#allocation4 + $0x30] sm:$0xe]  ;;  %v3741_v48 = vrot.slane %v3664_v30, 5  ;;  %v4276_v59 = vld [vmem:[#allocation4 + $0x40] sm:$0xe] }
 0x319   :  { %3890 = vrot.lane.b32.xlu1 %v3851_v21, %s5890_s16  ;;  %v4875_v21 = vld [vmem:[#allocation4 + $0x14] sm:$0x1]  ;;  %v5671_v57 = vrot.slane %v3663_v24, 9  ;;  %v4277_v22 = vld [vmem:[#allocation4 + $0x44] sm:$0x1] }
 0x31a   :  { %v4270_v31 = vld [vmem:[#allocation4 + $0x28] sm:$0xe]  ;;  %v4271_v26 = vld [vmem:[#allocation4 + $0x2c] sm:$0x1]  ;;  %v4356_v32 = vrot.slane %v4277_v22, 5 }
 0x31b   :  { %3888 = vrot.lane.b32.xlu0 %v3850_v55, %s5890_s16  ;;  %v4945_v55 = vsel %vm6052_vm11, %v5698_v15, %v4944_v9  ;;  %v4274_v29 = vld [vmem:[#allocation4 + $0x38] sm:$0xe]  ;;  %v3742_v14 = vsel %vm6052_vm11, %v5671_v57, %v3741_v48  ;;  %v5685_v39 = vrot.slane %v4270_v31, 9  ;;  %v4344_v35 = vrot.slane %v4271_v26, 5  ;;  %v4885_v38 = vld [vmem:[#allocation4 + $0x3c] sm:$0x1]  ;;  %v7690_v15 = vpop.permute.xlu1 %4823 }
 0x31c   :  { %v4884_v40 = vld [vmem:[#allocation4 + $0x38] sm:$0xe]  ;;  %v5687_v58 = vrot.slane %v4274_v29, 9  ;;  %8806 = vst [vmem:[#allocation7_spill] sm:$0xff] %v7690_v15  ;;  %v4883_v19 = vld [vmem:[#allocation4 + $0x34] sm:$0x1] }
 0x31d   :  { %4498 = vrot.lane.b32.xlu1 %v4461_v60, %s5893_s2  ;;  %v4952_v60 = vrot.slane %v4881_v20, 5  ;;  %v4345_v20 = vsel %vm6052_vm11, %v5685_v39, %v4344_v35  ;;  %v4281_v37 = vld [vmem:[#allocation4 + $0x64] sm:$0x1]  ;;  %v7708_v8 = vld [vmem:[#allocation4 + $0x5c] sm:$0x1] }
 0x31e   :  { %v7722_v51 = vld [vmem:[#allocation4 + $0x68] sm:$0xe]  ;;  %v7734_v26 = vld [vmem:[#allocation4 + $0x6c] sm:$0x1]  ;;  %v7741_v29 = vld [vmem:[#allocation4 + $0x64] sm:$0x1] }
 0x31f   :  { %4496 = vrot.lane.b32.xlu0 %v4460_v10, %s5893_s2  ;;  %v4337_v10 = vsel %vm6052_vm11, %v5683_v3, %v4336_v63  ;;  %v4960_v3 = vrot.slane %v4885_v38, 5  ;;  %v4882_v63 = vld [vmem:[#allocation4 + $0x30] sm:$0xe]  ;;  %v7748_v39 = vld [vmem:[#allocation4 + $0x7c] sm:$0x1] }
 0x320   :  { %v7750_v35 = vld [vmem:[#allocation4 + $0x70] sm:$0xe]  ;;  %v7755_v38 = vld [vmem:[#allocation4 + $0x78] sm:$0xe] }
 0x321   :  { %3894 = vrot.lane.b32.xlu1 %v3853_v16, %s5890_s16  ;;  %v5697_v16 = vrot.slane %v4874_v28, 9  ;;  %v3669_v28 = vld [vmem:[#allocation4 + $0x58] sm:$0xe] }
 0x323   :  { %4500 = vrot.lane.b32.xlu0 %v4462_v46, %s5893_s2  ;;  %v4940_v46 = vrot.slane %v4875_v21, 5  ;;  %v3670_v21 = vld [vmem:[#allocation4 + $0x5c] sm:$0x1] }
 0x325   :  { %3898 = vrot.lane.b32.xlu1 %v3855_v36, %s5890_s16  ;;  %v3661_v36 = vld [vmem:[#allocation4 + $0x28] sm:$0xe] }
 0x327   :  { %3892 = vrot.lane.b32.xlu0 %v3852_v25, %s5890_s16  ;;  %v3662_v25 = vld [vmem:[#allocation4 + $0x2c] sm:$0x1] }
 0x329   :  { %4506 = vrot.lane.b32.xlu1 %v4465_v47, %s5893_s2  ;;  %v4878_v47 = vld [vmem:[#allocation4 + $0x20] sm:$0xe] }
 0x32b   :  { %3896 = vrot.lane.b32.xlu0 %v3854_v45, %s5890_s16  ;;  %v4879_v45 = vld [vmem:[#allocation4 + $0x24] sm:$0x1] }
 0x32d   :  { %4510 = vrot.lane.b32.xlu1 %v4467_v44, %s5893_s2  ;;  %v4953_v44 = vsel %vm6052_vm11, %v5700_v2, %v4952_v60  ;;  %v3673_v2 = vld [vmem:[#allocation4 + $0x68] sm:$0xe]  ;;  %v3674_v60 = vld [vmem:[#allocation4 + $0x6c] sm:$0x1] }
 0x32f   :  { %4504 = vrot.lane.b32.xlu0 %v4464_v18, %s5893_s2  ;;  %v5670_v18 = vrot.slane %v3661_v36, 9  ;;  %v5674_v36 = vrot.slane %v3669_v28, 9  ;;  %v4984_v28 = vrot.slane %v7748_v39, 5  ;;  %v3334_v39 = vld [vmem:[#allocation4 + $0x10] sm:$0xf] }
 0x331   :  { %3902 = vrot.lane.b32.xlu1 %v3857_v62, %s5890_s16  ;;  %v3737_v62 = vrot.slane %v3662_v25, 5  ;;  %v3753_v25 = vrot.slane %v3670_v21, 5  ;;  %v5707_v21 = vrot.slane %v7750_v35, 9  ;;  %v3307_v35 = vld [vmem:[#allocation4 + $0x58] sm:$0xf] }
 0x332   :  { %3323 = vst.msk [vmem:[#allocation5 + $0x24] sm:$0xf] %vm8817_vm15, %v3307_v35  ;;  %v3309_v35 = vld [vmem:[#allocation4 + $0x68] sm:$0xf]  ;;  %vm5050_vm15 = vcmask 585216  }
 0x333   :  { %4508 = vrot.lane.b32.xlu0 %v4466_v43, %s5893_s2  ;;  %v4941_v43 = vsel %vm6052_vm11, %v5697_v16, %v4940_v46  ;;  %v3738_v5 = vsel %vm6052_vm11, %v5670_v18, %v3737_v62  ;;  %v4956_v16 = vrot.slane %v4883_v19, 5  ;;  %v7703_v18 = vpop.permute.xlu1 %5016  ;;  %v5676_v62 = vrot.slane %v3673_v2, 9  ;;  %v7773_v2 = vld [vmem:[#allocation4 + $0x88] sm:$0xe]  ;;  %3325 = vst.msk [vmem:[#allocation5 + $0x2c] sm:$0xf] %vm8823_vm8, %v3309_v35 }
 0x334   :  { %8807 = vst [vmem:[#allocation8_spill] sm:$0xff] %v7703_v18  ;;  %v3313_v35 = vld [vmem:[#allocation4 + $0x88] sm:$0xf] }
 0x335   :  { %3906 = vrot.lane.b32.xlu1 %v3859_v27, %s5890_s16  ;;  %v5699_v27 = vrot.slane %v4878_v47, 9  ;;  %v4887_v47 = vld [vmem:[#allocation4 + $0x44] sm:$0x1]  ;;  %v3360_v18 = vld [vmem:[#allocation4 + $0x88] sm:$0xf] }
 0x337   :  { %3900 = vrot.lane.b32.xlu0 %v3856_v33, %s5890_s16  ;;  %v4948_v33 = vrot.slane %v4879_v45, 5  ;;  %v7729_v48 = vpop.permute.xlu1 %4518 }
 0x338   :  { %8808 = vst [vmem:[#allocation9_spill] sm:$0xff] %v7729_v48 }
 0x339   :  { %4514 = vrot.lane.b32.xlu1 %v4469_v41, %s5893_s2  ;;  %v3659_v41 = vld [vmem:[#allocation4 + $0x20] sm:$0xe]  ;;  %v4949_v17 = vsel %vm6052_vm11, %v5699_v27, %v4948_v33  ;;  %v3672_v33 = vld [vmem:[#allocation4 + $0x64] sm:$0x1] }
 0x33a   :  { %v3671_v27 = vld [vmem:[#allocation4 + $0x60] sm:$0xe]  ;;  %v3757_v30 = vrot.slane %v3672_v33, 5  ;;  %v3332_v33 = vld [vmem:[#allocation4 + $0x8] sm:$0xf] }
 0x33b   :  { %3904 = vrot.lane.b32.xlu0 %v3858_v49, %s5890_s16  ;;  %v5672_v49 = vrot.slane %v3665_v4, 9  ;;  %v4280_v4 = vld [vmem:[#allocation4 + $0x60] sm:$0xe]  ;;  %v5675_v24 = vrot.slane %v3671_v27, 9  ;;  %v7793_v27 = vld [vmem:[#allocation4 + $0x84] sm:$0x1] }
 0x33d   :  { %3781 = vrot.lane.b32.xlu1 %v3722_v7, %s5889_s11  ;;  %v5669_v7 = vrot.slane %v3659_v41, 9  ;;  %v3746_v13 = vsel %vm6052_vm11, %v5672_v49, %v3745_v34  ;;  %v7706_v41 = vld [vmem:[#allocation4 + $0x58] sm:$0xe]  ;;  %v7712_v49 = vld [vmem:[#allocation4 + $0x74] sm:$0x1]  ;;  %v3758_v19 = vsel %vm6052_vm11, %v5675_v24, %v3757_v30  ;;  %v3377_v30 = vshrl.u32 %v3332_v33, 16 }
 0x33e   :  { %v7813_v24 = vld [vmem:[#allocation4 + $0x88] sm:$0xe] }
 0x33f   :  { %4512 = vrot.lane.b32.xlu0 %v4468_v11, %s5893_s2  ;;  %v4273_v11 = vld [vmem:[#allocation4 + $0x34] sm:$0x1] }
 0x341   :  { %3785 = vrot.lane.b32.xlu1 %v3730_v50, %s5889_s11  ;;  %v3734_v50 = vsel %vm6052_vm11, %v5669_v7, %v3733_v56  ;;  %v7718_v7 = vld [vmem:[#allocation4 + $0x68] sm:$0xe]  ;;  %v7720_v56 = vld [vmem:[#allocation4 + $0x6c] sm:$0x1] }
 0x342   :  { %v5691_v22 = vrot.slane %v7718_v7, 9  ;;  %v4368_v31 = vrot.slane %v7720_v56, 5  ;;  %v3379_v56 = vrot.slane %v3377_v30, 4  ;;  %v3299_v30 = vld [vmem:[#allocation4 + $0x8] sm:$0xf] }
 0x343   :  { %4516 = vrot.lane.b32.xlu0 %v4470_v12, %s5893_s2  ;;  %v4348_v12 = vrot.slane %v4273_v11, 5  ;;  %v4964_v11 = vrot.slane %v4887_v47, 5  ;;  %v7785_v47 = vld [vmem:[#allocation4 + $0x80] sm:$0xe]  ;;  %3315 = vst.msk [vmem:[#allocation5 + $0x4] sm:$0xf] %vm8810_vm3, %v3299_v30  ;;  %vm8824_vm3 = vmmov %vm8800_vm1 }
 0x345   :  { %4392 = vrot.lane.b32.xlu1 %v4333_v23, %s5896_s4  ;;  %v4349_v0 = vsel %vm6052_vm11, %v5686_v1, %v4348_v12  ;;  %v5688_v23 = vrot.slane %v4276_v59, 9  ;;  %v4364_v1 = vrot.slane %v4281_v37, 5  ;;  %v5689_v12 = vrot.slane %v7706_v41, 9  ;;  %v7799_v41 = vld [vmem:[#allocation4 + $0x78] sm:$0xe] }
 0x346   :  { %v4372_v59 = vrot.slane %v7712_v49, 5 }
 0x347   :  { %3783 = vrot.lane.b32.xlu0 %v3726_v52, %s5889_s11  ;;  %v4275_v52 = vld [vmem:[#allocation4 + $0x3c] sm:$0x1]  ;;  %v4357_v9 = vsel %vm6052_vm11, %v5688_v23, %v4356_v32  ;;  %v7739_v32 = vld [vmem:[#allocation4 + $0x60] sm:$0xe] }
 0x349   :  { %4396 = vrot.lane.b32.xlu1 %v4341_v54, %s5896_s4  ;;  %v4352_v54 = vrot.slane %v4275_v52, 5  ;;  %v7743_v52 = vld [vmem:[#allocation4 + $0x78] sm:$0xe] }
 0x34b   :  { %4390 = vrot.lane.b32.xlu0 %v4329_v61, %s5896_s4  ;;  %v5702_v61 = vrot.slane %v4884_v40, 9  ;;  %v7752_v40 = vld [vmem:[#allocation4 + $0x74] sm:$0x1] }
 0x34d   :  { %5004 = vrot.lane.b32.xlu1 %v4945_v55, %s5895_s10  ;;  %v4886_v55 = vld [vmem:[#allocation4 + $0x40] sm:$0xe]  ;;  %v4961_v46 = vsel %vm6052_vm11, %v5702_v61, %v4960_v3  ;;  %v5705_v61 = vrot.slane %v7739_v32, 9  ;;  %v4972_v3 = vrot.slane %v7741_v29, 5  ;;  %v3941_v29 = vld [vmem:[#allocation4 + $0x8] sm:$0xf] }
 0x34e   :  { %v5703_v45 = vrot.slane %v4886_v55, 9  ;;  %v7771_v55 = vld [vmem:[#allocation4 + $0x74] sm:$0x1] }
 0x34f   :  { %4394 = vrot.lane.b32.xlu0 %v4337_v10, %s5896_s4  ;;  %v5701_v10 = vrot.slane %v4882_v63, 9  ;;  %v5708_v63 = vrot.slane %v7743_v52, 9  ;;  %v7823_v52 = vld [vmem:[#allocation4 + $0x8c] sm:$0x1] }
 0x351   :  { %5008 = vrot.lane.b32.xlu1 %v4953_v44, %s5895_s10  ;;  %v4353_v44 = vsel %vm6052_vm11, %v5687_v58, %v4352_v54  ;;  %v4957_v34 = vsel %vm6052_vm11, %v5701_v10, %v4956_v16  ;;  %v7757_v58 = vld [vmem:[#allocation4 + $0x7c] sm:$0x1]  ;;  %v7759_v54 = vld [vmem:[#allocation4 + $0x70] sm:$0xe]  ;;  %v4980_v10 = vrot.slane %v7752_v40, 5  ;;  %v5678_v16 = vrot.slane %v7755_v38, 9 }
 0x352   :  { %v3977_v40 = vshll.u32 %v3941_v29, 16 }
 0x353   :  { %5002 = vrot.lane.b32.xlu0 %v4941_v43, %s5895_s10  ;;  %v3761_v43 = vrot.slane %v3674_v60, 5  ;;  %v7776_v60 = vpop.permute.xlu1 %4839 }
 0x354   :  { %8809 = vst [vmem:[#allocation10_spill] sm:$0xff] %v7776_v60 }
 0x355   :  { %3789 = vrot.lane.b32.xlu1 %v3738_v5, %s5889_s11  ;;  %v7710_v5 = vld [vmem:[#allocation4 + $0x70] sm:$0xe]  ;;  %v3762_v23 = vsel %vm6052_vm11, %v5676_v62, %v3761_v43  ;;  %v3765_v62 = vrot.slane %v7771_v55, 5  ;;  %v5680_v43 = vrot.slane %v7773_v2, 9 }
 0x356   :  { %v5692_v57 = vrot.slane %v7710_v5, 9  ;;  %v7803_v5 = vld [vmem:[#allocation4 + $0x90] sm:$0xe] }
 0x357   :  { %5006 = vrot.lane.b32.xlu0 %v4949_v17, %s5895_s10  ;;  %v3754_v17 = vsel %vm6052_vm11, %v5674_v36, %v3753_v25  ;;  %v5677_v36 = vrot.slane %v7759_v54, 9  ;;  %v7782_v25 = vld [vmem:[#allocation4 + $0x8c] sm:$0x1] }
 0x358   :  { %v4373_v37 = vsel %vm6052_vm11, %v5692_v57, %v4372_v59  ;;  %v3777_v49 = vrot.slane %v7782_v25, 5  ;;  %v3391_v59 = vshrl.u32 %v3334_v39, 16  ;;  %v8820_v25 = vrot.slane %v7799_v41, 9 }
 0x359   :  { %3793 = vrot.lane.b32.xlu1 %v3746_v13, %s5889_s11  ;;  %v5690_v13 = vrot.slane %v4280_v4, 9 }
 0x35b   :  { %3787 = vrot.lane.b32.xlu0 %v3734_v50, %s5889_s11  ;;  %v4360_v50 = vrot.slane %v7708_v8, 5  ;;  %v7801_v8 = vld [vmem:[#allocation4 + $0x7c] sm:$0x1] }
 0x35d   :  { %4400 = vrot.lane.b32.xlu1 %v4349_v0, %s5896_s4  ;;  %v5706_v0 = vrot.slane %v7722_v51, 9  ;;  %v4361_v4 = vsel %vm6052_vm11, %v5689_v12, %v4360_v50  ;;  %v4380_v12 = vrot.slane %v7793_v27, 5  ;;  %v3394_v50 = vshll.u32 %v3334_v39, 16  ;;  %v3300_v39 = vld [vmem:[#allocation4 + $0x10] sm:$0xf] }
 0x35e   :  { %3316 = vst.msk [vmem:[#allocation5 + $0x8] sm:$0xf] %vm8811_vm4, %v3300_v39  ;;  %v7950_v27 = vld [vmem:[#allocation4 + $0x14] sm:$0x1]  ;;  %vm8825_vm4 = vmmov %vm8800_vm1 }
 0x35f   :  { %3791 = vrot.lane.b32.xlu0 %v3742_v14, %s5889_s11  ;;  %v4965_v14 = vsel %vm6052_vm11, %v5703_v45, %v4964_v11  ;;  %v7787_v45 = vld [vmem:[#allocation4 + $0x84] sm:$0x1]  ;;  %v7811_v11 = vld [vmem:[#allocation4 + $0x94] sm:$0x1] }
 0x361   :  { %4404 = vrot.lane.b32.xlu1 %v4357_v9, %s5896_s4  ;;  %v4976_v9 = vrot.slane %v7734_v26, 5 }
 0x363   :  { %4398 = vrot.lane.b32.xlu0 %v4345_v20, %s5896_s4  ;;  %v4365_v20 = vsel %vm6052_vm11, %v5690_v13, %v4364_v1  ;;  %v3380_v13 = vshll.u32 %v3332_v33, 16 }
 0x365   :  { %5012 = vrot.lane.b32.xlu1 %v4961_v46, %s5895_s10  ;;  %v3769_v46 = vrot.slane %v7757_v58, 5 }
 0x367   :  { %4402 = vrot.lane.b32.xlu0 %v4353_v44, %s5896_s4  ;;  %v7789_v44 = vld [vmem:[#allocation4 + $0x80] sm:$0xe] }
 0x368   :  { %v8818_v55 = vrot.slane %v7789_v44, 9  ;;  %v3310_v44 = vld [vmem:[#allocation4 + $0x70] sm:$0xf] }
 0x369   :  { %3797 = vrot.lane.b32.xlu1 %v3754_v17, %s5889_s11  ;;  %v3773_v17 = vrot.slane %v7787_v45, 5  ;;  %v8821_v45 = vrot.slane %v7811_v11, 5  ;;  %3326 = vst.msk [vmem:[#allocation5 + $0x30] sm:$0xf] %vm8824_vm3, %v3310_v44  ;;  %v4556_v44 = vld [vmem:[#allocation4 + $0x1c] sm:$0x1] }
 0x36a   :  { %v4381_v2 = vsel %vm6052_vm11, %v8818_v55, %v4380_v12 }
 0x36b   :  { %5010 = vrot.lane.b32.xlu0 %v4957_v34, %s5895_s10  ;;  %v5679_v34 = vrot.slane %v7785_v47, 9  ;;  %v8822_v47 = vrot.slane %v7803_v5, 9  ;;  %v3312_v5 = vld [vmem:[#allocation4 + $0x80] sm:$0xf] }
 0x36d   :  { %3801 = vrot.lane.b32.xlu1 %v3762_v23, %s5889_s11  ;;  %v4977_v23 = vsel %vm6052_vm11, %v5706_v0, %v4976_v9  ;;  %v3335_v0 = vld [vmem:[#allocation4 + $0x14] sm:$0x1]  ;;  %v3336_v9 = vld [vmem:[#allocation4 + $0x18] sm:$0xf]  ;;  %v3774_v54 = vsel %vm6052_vm11, %v5679_v34, %v3773_v17 }
 0x36e   :  { %v3400_v57 = vshll.u32 %v3335_v0, 16  ;;  %v3405_v51 = vshrl.u32 %v3336_v9, 16 }
 0x36f   :  { %5014 = vrot.lane.b32.xlu0 %v4965_v14, %s5895_s10  ;;  %v3333_v14 = vld [vmem:[#allocation4 + $0xc] sm:$0x1] }
 0x370   :  { %v3386_v33 = vshll.u32 %v3333_v14, 16  ;;  %v7860_v14 = vld [vmem:[#allocation4 + $0x1c] sm:$0x1]  ;;  %v7884_v39 = vrot.slane %v3400_v57, 5  ;;  %v7886_v58 = vrot.slane %v3405_v51, 4 }
 0x371   :  { %4408 = vrot.lane.b32.xlu1 %v4365_v20, %s5896_s4  ;;  %v3414_v38 = vshll.u32 %v7860_v14, 16  ;;  %v3304_v57 = vld [vmem:[#allocation4 + $0x30] sm:$0xf]  ;;  %v3305_v51 = vld [vmem:[#allocation4 + $0x38] sm:$0xf] }
 0x372   :  { %v7875_v30 = vrot.slane %v3386_v33, 5  ;;  %3320 = vst.msk [vmem:[#allocation5 + $0x18] sm:$0xf] %vm8815_vm7, %v3304_v57  ;;  %vm4536_vm7 = vcmask 454016  }
 0x373   :  { %3799 = vrot.lane.b32.xlu0 %v3758_v19, %s5889_s11  ;;  %v4369_v19 = vsel %vm6052_vm11, %v5691_v22, %v4368_v31  ;;  %v4985_v22 = vsel %vm6052_vm11, %v5708_v63, %v4984_v28  ;;  %v7844_v31 = vld [vmem:[#allocation4 + $0x80] sm:$0xe]  ;;  %v4973_v63 = vsel %vm6052_vm11, %v5705_v61, %v4972_v3  ;;  %v3301_v61 = vld [vmem:[#allocation4 + $0x18] sm:$0xf]  ;;  %3321 = vst.msk [vmem:[#allocation5 + $0x1c] sm:$0xf] %vm8816_vm9, %v3305_v51 }
 0x374   :  { %3317 = vst.msk [vmem:[#allocation5 + $0xc] sm:$0xf] %vm8812_vm2, %v3301_v61  ;;  %v3974_v61 = vshrl.u32 %v3941_v29, 16  ;;  %v3778_v29 = vsel %vm6052_vm11, %v5680_v43, %v3777_v49  ;;  %v4553_v51 = vld [vmem:[#allocation4 + $0x10] sm:$0xf]  ;;  %v4389_v43 = vsel %vm6052_vm11, %v8822_v47, %v8821_v45  ;;  %vm8826_vm2 = vmmov %vm8800_vm1  ;;  %vm4857_vm9 = vcmask 519616  }
 0x375   :  { %4412 = vrot.lane.b32.xlu1 %v4373_v37, %s5896_s4  ;;  %v7838_v37 = vld [vmem:[#allocation4 + $0x8c] sm:$0x1]  ;;  %v3311_v49 = vld [vmem:[#allocation4 + $0x78] sm:$0xf]  ;;  %3328 = vst.msk [vmem:[#allocation5 + $0x38] sm:$0xf] %vm8826_vm2, %v3312_v5 }
 0x376   :  { %3327 = vst.msk [vmem:[#allocation5 + $0x34] sm:$0xf] %vm8825_vm4, %v3311_v49  ;;  %v3976_v12 = vrot.slane %v3974_v61, 4  ;;  %v8828_v61 = vrot.slane %v7823_v52, 5  ;;  %v4555_v45 = vld [vmem:[#allocation4 + $0x18] sm:$0xf] }
 0x377   :  { %4406 = vrot.lane.b32.xlu0 %v4361_v4, %s5896_s4  ;;  %v7815_v1 = vpop.permute.xlu1 %3878  ;;  %v7836_v4 = vld [vmem:[#allocation4 + $0x88] sm:$0xe] }
 0x378   :  { %v5710_v28 = vrot.slane %v7836_v4, 9  ;;  %v4559_v5 = vld [vmem:[#allocation4 + $0x28] sm:$0xf] }
 0x379   :  { %v3877_v26 = vpop.permute.xlu0 %3876  ;;  %5020 = vrot.lane.b32.xlu1 %v4977_v23, %s5895_s10  ;;  %v7846_v23 = vld [vmem:[#allocation4 + $0x84] sm:$0x1] }
 0x37a   :  { %3925 = vst.msk [vmem:[#allocation5] sm:$0xf] %vm3924_vm13, %v3877_v26  ;;  %v3382_v26 = vrot.slane %v3380_v13, 5  ;;  %v4992_v13 = vrot.slane %v7838_v37, 5  ;;  %v4988_v32 = vrot.slane %v7846_v23, 5 }
 0x37b   :  { %4410 = vrot.lane.b32.xlu0 %v4369_v19, %s5896_s4  ;;  %v7840_v7 = vpop.permute.xlu1 %3882  ;;  %v3408_v19 = vshll.u32 %v3336_v9, 16  ;;  %v3302_v9 = vld [vmem:[#allocation4 + $0x20] sm:$0xf] }
 0x37c   :  { %v3383_v0 = vor.u32 %v3382_v26, %v3379_v56  ;;  %v7882_v26 = vrot.slane %v3394_v50, 5  ;;  %3318 = vst.msk [vmem:[#allocation5 + $0x10] sm:$0xf] %vm8813_vm5, %v3302_v9  ;;  %v3943_v50 = vld [vmem:[#allocation4 + $0x10] sm:$0xf]  ;;  %vm8827_vm5 = vmmov %vm8800_vm1  ;;  %v4993_v14 = vsel %vm6052_vm11, %v5710_v28, %v4992_v13  ;;  %v4600_v28 = vshrl.u32 %v4555_v45, 16 }
 0x37d   :  { %v7848_v20 = vpop.permute.xlu0 %3880  ;;  %5024 = vrot.lane.b32.xlu1 %v4985_v22, %s5895_s10  ;;  %v3770_v22 = vsel %vm6052_vm11, %v5678_v16, %v3769_v46  ;;  %v3303_v16 = vld [vmem:[#allocation4 + $0x28] sm:$0xf]  ;;  %v4981_v46 = vsel %vm6052_vm11, %v5707_v21, %v4980_v10  ;;  %v7901_v33 = vrot.slane %v3408_v19, 5  ;;  %v7907_v10 = vld [vmem:[#allocation4 + $0xc] sm:$0x1]  ;;  %v3766_v19 = vsel %vm6052_vm11, %v5677_v36, %v3765_v62 }
 0x37e   :  { %3319 = vst.msk [vmem:[#allocation5 + $0x14] sm:$0xf] %vm8814_vm6, %v3303_v16  ;;  %v3947_v9 = vld [vmem:[#allocation4 + $0x20] sm:$0xf]  ;;  %v3991_v57 = vshll.u32 %v3943_v50, 16  ;;  %v8819_v36 = vrot.slane %v7801_v8, 5 }
 0x37f   :  { %5018 = vrot.lane.b32.xlu0 %v4973_v63, %s5895_s10  ;;  %v7867_v3 = vpop.permute.xlu1 %4490  ;;  %v7877_v63 = vrot.slane %v3391_v59, 4  ;;  %v7899_v59 = vrot.slane %v3383_v0, 4  ;;  %v3308_v16 = vld [vmem:[#allocation4 + $0x60] sm:$0xf]  ;;  %v4016_v34 = vshrl.u32 %v3947_v9, 16  ;;  %v4019_v17 = vshll.u32 %v3947_v9, 16 }
 0x380   :  { %3324 = vst.msk [vmem:[#allocation5 + $0x28] sm:$0xf] %vm8800_vm1, %v3308_v16  ;;  %v4377_v62 = vsel %vm6052_vm11, %v8820_v25, %v8819_v36  ;;  %v4586_v16 = vshrl.u32 %v4553_v51, 16  ;;  %v3983_v9 = vshll.u32 %v7907_v10, 16  ;;  %v3993_v36 = vrot.slane %v3991_v57, 5 }
 0x381   :  { %v7880_v56 = vpop.permute.xlu0 %4488  ;;  %3805 = vrot.lane.b32.xlu1 %v3770_v22, %s5889_s11  ;;  %v3945_v22 = vld [vmem:[#allocation4 + $0x18] sm:$0xf]  ;;  %3329 = vst.msk [vmem:[#allocation5 + $0x3c] sm:$0xf] %vm8827_vm5, %v3313_v35  ;;  %v3411_v25 = vor.u32 %v7901_v33, %v7886_v58  ;;  %v3946_v10 = vld [vmem:[#allocation4 + $0x1c] sm:$0x1] }
 0x382   :  { %v4002_v8 = vshrl.u32 %v3945_v22, 16  ;;  %v4005_v41 = vshll.u32 %v3945_v22, 16  ;;  %v3397_v22 = vor.u32 %v7882_v26, %v7877_v63  ;;  %v7976_v63 = vrot.slane %v3414_v38, 5  ;;  %v4554_v38 = vld [vmem:[#allocation4 + $0x14] sm:$0x1] }
 0x383   :  { %5022 = vrot.lane.b32.xlu0 %v4981_v46, %s5895_s10  ;;  %v7905_v21 = vpop.permute.xlu1 %4494  ;;  %v3988_v46 = vshrl.u32 %v3943_v50, 16  ;;  %v3979_v50 = vrot.slane %v3977_v40, 5  ;;  %v8829_v40 = vrot.slane %v7813_v24, 9  ;;  %v3997_v26 = vshll.u32 %v7950_v27, 16 }
 0x384   :  { %v4004_v57 = vrot.slane %v4002_v8, 4  ;;  %v4007_v52 = vrot.slane %v4005_v41, 5  ;;  %v4021_v24 = vrot.slane %v4019_v17, 5  ;;  %v4588_v33 = vrot.slane %v4586_v16, 4  ;;  %v4557_v17 = vld [vmem:[#allocation4 + $0x20] sm:$0xf] }
 0x385   :  { %v7910_v0 = vpop.permute.xlu0 %4492  ;;  %3809 = vrot.lane.b32.xlu1 %v3778_v29, %s5889_s11  ;;  %v4589_v29 = vshll.u32 %v4553_v51, 16  ;;  %v4385_v51 = vsel %vm6052_vm11, %v8829_v40, %v8828_v61  ;;  %v3980_v58 = vor.u32 %v3979_v50, %v3976_v12  ;;  %v7990_v49 = vrot.slane %v3397_v22, 4 }
 0x386   :  { %v7992_v8 = vrot.slane %v3983_v9, 5  ;;  %v7995_v4 = vrot.slane %v3411_v25, 4  ;;  %v4603_v13 = vshll.u32 %v4555_v45, 16  ;;  %v4008_v12 = vor.u32 %v4007_v52, %v4004_v57  ;;  %v4558_v25 = vld [vmem:[#allocation4 + $0x24] sm:$0x1] }
 0x387   :  { %3803 = vrot.lane.b32.xlu0 %v3766_v19, %s5889_s11  ;;  %v7956_v11 = vpop.permute.xlu1 %3886  ;;  %v3990_v19 = vrot.slane %v3988_v46, 4  ;;  %v3948_v46 = vld [vmem:[#allocation4 + $0x24] sm:$0x1]  ;;  %v4591_v27 = vrot.slane %v4589_v29, 5  ;;  %v4595_v16 = vshll.u32 %v4554_v38, 16  ;;  %v4609_v29 = vshll.u32 %v4556_v44, 16 }
 0x388   :  { %v4025_v37 = vshll.u32 %v3948_v46, 16  ;;  %v8000_v22 = vrot.slane %v3980_v58, 4  ;;  %v8002_v9 = vrot.slane %v3997_v26, 5  ;;  %v4602_v57 = vrot.slane %v4600_v28, 4  ;;  %v3338_v26 = vld [vmem:[#allocation4 + $0x20] sm:$0xf] }
 0x389   :  { %v7959_v55 = vpop.permute.xlu0 %3884  ;;  %4416 = vrot.lane.b32.xlu1 %v4381_v2, %s5896_s4  ;;  %v4018_v2 = vrot.slane %v4016_v34, 4  ;;  %v3994_v41 = vor.u32 %v3993_v36, %v3990_v19  ;;  %v4011_v34 = vshll.u32 %v3946_v10, 16  ;;  %v4592_v19 = vor.u32 %v4591_v27, %v4588_v33  ;;  %v4560_v33 = vld [vmem:[#allocation4 + $0x2c] sm:$0x1]  ;;  %v3340_v27 = vld [vmem:[#allocation4 + $0x28] sm:$0xf] }
 0x38a   :  { %v4628_v10 = vshrl.u32 %v4559_v5, 16  ;;  %v8011_v46 = vrot.slane %v4025_v37, 5  ;;  %v4605_v52 = vrot.slane %v4603_v13, 5  ;;  %v8018_v58 = vrot.slane %v4595_v16, 5 }
 0x38b   :  { %3807 = vrot.lane.b32.xlu0 %v3774_v54, %s5889_s11  ;;  %v7980_v47 = vpop.permute.xlu1 %3890  ;;  %v4022_v50 = vor.u32 %v4021_v24, %v4018_v2  ;;  %v8006_v61 = vrot.slane %v3994_v41, 4  ;;  %v8008_v40 = vrot.slane %v4011_v34, 5  ;;  %v4631_v2 = vshll.u32 %v4559_v5, 16  ;;  %v5867_v34 = vld [vmem:[%s8772_s5 + $0x20] ss:$0 sps:$4 sm:$0xff]  }
 0x38c   :  { %v8014_v24 = vrot.slane %v4008_v12, 4  ;;  %v8020_v38 = vrot.slane %v4609_v29, 5  ;;  %v8028_v41 = vrot.slane %v4592_v19, 4  ;;  %v4623_v28 = vshll.u32 %v4558_v25, 16  ;;  %v8042_v29 = vld [vmem:[#allocation4 + $0x30] sm:$0xf] }
 0x38d   :  { %v7988_v54 = vpop.permute.xlu0 %3888  ;;  %4420 = vrot.lane.b32.xlu1 %v4389_v43, %s5896_s4  ;;  %v4614_v43 = vshrl.u32 %v4557_v17, 16  ;;  %v8016_v45 = vrot.slane %v4022_v50, 4  ;;  %v4630_v13 = vrot.slane %v4628_v10, 4  ;;  %v3419_v5 = vshrl.u32 %v3338_v26, 16  ;;  %v3344_v10 = vld [vmem:[#allocation4 + $0x38] sm:$0xf] }
 0x38e   :  { %8830 = vst [vmem:[#allocation11_spill] sm:$0xff] %v7988_v54  ;;  %v8835_v12 = vrot.slane %v7844_v31, 9  ;;  %v4633_v50 = vrot.slane %v4631_v2, 5  ;;  %v3422_v16 = vshll.u32 %v3338_v26, 16  ;;  %v3403_v19 = vsel %vm6116_vm14, %v7990_v49, %v7884_v39  ;;  %v5868_v31 = vld [vmem:[%s8772_s5 + $0x18] sm:$0xff]  }
 0x38f   :  { %4414 = vrot.lane.b32.xlu0 %v4377_v62, %s5896_s4  ;;  %v7998_v35 = vpop.permute.xlu1 %4498  ;;  %v4617_v62 = vshll.u32 %v4557_v17, 16  ;;  %v3433_v23 = vshrl.u32 %v3340_v27, 16  ;;  %vm5191_vm6 = vcmask 1043456   ;;  %v3417_v25 = vsel %vm6116_vm14, %v7995_v4, %v7976_v63  ;;  %v8062_v49 = vld [vmem:[#allocation4 + $0x24] sm:$0x1] }
 0x390   :  { %8831 = vst [vmem:[#allocation12_spill] sm:$0xff] %v7998_v35  ;;  %v4637_v39 = vshll.u32 %v4560_v33, 16  ;;  %5842 = vmatprep.subr.msk.bf16.mxu1 %vm5191_vm6, %v5867_v34  ;;  %v4000_v2 = vsel %vm6116_vm14, %v8006_v61, %v8002_v9  ;;  %v3949_v26 = vld [vmem:[#allocation4 + $0x28] sm:$0xf]  ;;  %v8080_v9 = vrot.slane %v4623_v28, 5  ;;  %v4634_v61 = vor.u32 %v4633_v50, %v4630_v13 }
 0x391   :  { %v8004_v36 = vpop.permute.xlu0 %4496  ;;  %5028 = vrot.lane.b32.xlu1 %v4993_v14, %s5895_s10  ;;  %v3389_v14 = vsel %vm6116_vm14, %v7899_v59, %v7875_v30  ;;  %v4619_v37 = vrot.slane %v4617_v62, 5  ;;  %v4989_v30 = vsel %vm6052_vm11, %v8835_v12, %v4988_v32  ;;  %v4606_v59 = vor.u32 %v4605_v52, %v4602_v57  ;;  %v3343_v12 = vld [vmem:[#allocation4 + $0x34] sm:$0x1]  ;;  %v3950_v63 = vld [vmem:[#allocation4 + $0x2c] sm:$0x1] }
 0x392   :  { %8832 = vst [vmem:[#allocation13_spill] sm:$0xff] %v8004_v36  ;;  %v3986_v62 = vsel %vm6116_vm14, %v8000_v22, %v7992_v8  ;;  %v5193_v57 = vsel %vm5191_vm6, %v5867_v34, 0  ;;  %v4028_v8 = vsel %vm6116_vm14, %v8016_v45, %v8011_v46  ;;  %v3341_v22 = vld [vmem:[#allocation4 + $0x2c] sm:$0x1]  ;;  %v3435_v34 = vrot.slane %v3433_v23, 4 }
 0x393   :  { %4418 = vrot.lane.b32.xlu0 %v4385_v51, %s5896_s4  ;;  %v8022_v44 = vpop.permute.xlu1 %3894  ;;  %v4616_v51 = vrot.slane %v4614_v43, 4  ;;  %v3436_v43 = vshll.u32 %v3340_v27, 16  ;;  %5816 = vmatpush3.bf16.msra.mxu1 %v5193_v57  ;;  %v8078_v33 = vrot.slane %v4606_v59, 4  ;;  %v3421_v27 = vrot.slane %v3419_v5, 4  ;;  %v3953_v57 = vld [vmem:[#allocation4 + $0x38] sm:$0xf] }
 0x394   :  { %8833 = vst [vmem:[#allocation14_spill] sm:$0xff] %v8022_v44  ;;  %5817 = vmatprep.subr.bf16.mxu1 %v5868_v31  ;;  %v3447_v45 = vshrl.u32 %v8042_v29, 16  ;;  %v3450_v28 = vshll.u32 %v8042_v29, 16  ;;  %v3464_v13 = vshll.u32 %v3344_v10, 16  ;;  %v4030_v5 = vshrl.u32 %v3949_v26, 16 }
 0x395   :  { %v8033_v17 = vpop.permute.xlu0 %4500  ;;  %3588 = vrot.lane.b32.xlu1 %v3389_v14, %s5885_s20  ;;  %v4620_v4 = vor.u32 %v4619_v37, %v4616_v51  ;;  %v3424_v14 = vrot.slane %v3422_v16, 5  ;;  %v3438_v46 = vrot.slane %v3436_v43, 5  ;;  %v5869_v51 = vld [vmem:[%s8772_s5 + $0x10] sm:$0xff]   ;;  %v8094_v16 = vrot.slane %v4637_v39, 5 }
 0x396   :  { %8834 = vst [vmem:[#allocation15_spill] sm:$0xff] %v8033_v17  ;;  %v4033_v23 = vshll.u32 %v3949_v26, 16  ;;  %v4598_v29 = vsel %vm6116_vm14, %v8028_v41, %v8018_v58  ;;  %v4612_v43 = vsel %vm6116_vm14, %v8078_v33, %v8020_v38  ;;  %v3442_v39 = vshll.u32 %v3341_v22, 16  ;;  %v5870_v58 = vld [vmem:[%s8772_s5 + $0x8] sm:$0xff]   ;;  %v3345_v38 = vld [vmem:[#allocation4 + $0x3c] sm:$0x1] }
 0x397   :  { %5026 = vrot.lane.b32.xlu0 %v4989_v30, %s5895_s10  ;;  %v8052_v32 = vpop.permute.xlu1 %3898  ;;  %v3461_v30 = vshrl.u32 %v3344_v10, 16  ;;  %v8092_v50 = vrot.slane %v4620_v4, 4  ;;  %5818 = vmatpush3.bf16.msra.mxu1 %v5868_v31  ;;  %v3951_v10 = vld [vmem:[#allocation4 + $0x30] sm:$0xf]  ;;  %v3425_v31 = vor.u32 %v3424_v14, %v3421_v27  ;;  %v3452_v4 = vrot.slane %v3450_v28, 5 }
 0x398   :  { %8836 = vst [vmem:[#allocation16_spill] sm:$0xff] %v8052_v32  ;;  %5819 = vmatprep.subr.bf16.mxu1 %v5869_v51  ;;  %v3466_v33 = vrot.slane %v3464_v13, 5  ;;  %v4032_v22 = vrot.slane %v4030_v5, 4  ;;  %v4035_v60 = vrot.slane %v4033_v23, 5  ;;  %v4047_v27 = vshll.u32 %v3951_v10, 16 }
 0x399   :  { %v3893_v52 = vpop.permute.xlu0 %3892  ;;  %3592 = vrot.lane.b32.xlu1 %v3417_v25, %s5885_s20  ;;  %v8106_v25 = vrot.slane %v4634_v61, 4  ;;  %v3463_v26 = vrot.slane %v3461_v30, 4  ;;  %v4058_v14 = vshrl.u32 %v3953_v57, 16  ;;  %v3955_v28 = vld [vmem:[#allocation4 + $0x40] sm:$0xf]  ;;  %vm5166_vm1 = vcmask 588800  }
 0x39a   :  { %3933 = vst.msk [vmem:[#allocation5 + $0x20] sm:$0xf] %vm3924_vm13, %v3893_v52  ;;  %v3449_v52 = vrot.slane %v3447_v45, 4  ;;  %v8123_v45 = vrot.slane %v3442_v39, 5  ;;  %v4561_v5 = vld [vmem:[#allocation4 + $0x30] sm:$0xf] }
 0x39b   :  { %3590 = vrot.lane.b32.xlu0 %v3403_v19, %s5885_s20  ;;  %v8087_v37 = vpop.permute.xlu1 %4506  ;;  %v3428_v19 = vshll.u32 %v8062_v49, 16  ;;  %v3439_v49 = vor.u32 %v3438_v46, %v3435_v34  ;;  %5820 = vmatpush3.bf16.msra.mxu1 %v5869_v51  ;;  %v4626_v34 = vsel %vm6116_vm14, %v8092_v50, %v8080_v9  ;;  %v8841_v51 = vsel %vm6116_vm14, %v8014_v24, %v8008_v40  ;;  %v4563_v40 = vld [vmem:[#allocation4 + $0x38] sm:$0xf]  ;;  %v5871_v24 = vld [vmem:[%s8772_s5] sm:$0xff]   ;;  %v3355_v17 = vld [vmem:[#allocation4 + $0x74] sm:$0x1] }
 0x39c   :  { %8837 = vst [vmem:[#allocation17_spill] sm:$0xff] %v8087_v37  ;;  %5821 = vmatprep.subr.bf16.mxu1 %v5870_v58  ;;  %v8135_v9 = vrot.slane %v3425_v31, 4  ;;  %v3467_v23 = vor.u32 %v3466_v33, %v3463_v26  ;;  %v3470_v39 = vshll.u32 %v3345_v38, 16  ;;  %v4075_v38 = vshll.u32 %v3955_v28, 16  ;;  %v3964_v37 = vld [vmem:[#allocation4 + $0x74] sm:$0x1] }
 0x39d   :  { %v8090_v59 = vpop.permute.xlu0 %3896  ;;  %4199 = vrot.lane.b32.xlu1 %v4000_v2, %s5892_s24  ;;  %v3456_v2 = vshll.u32 %v3343_v12, 16  ;;  %v8121_v46 = vrot.slane %v3428_v19, 5  ;;  %v4061_v12 = vshll.u32 %v3953_v57, 16  ;;  %v8137_v30 = vrot.slane %v3439_v49, 4 }
 0x39e   :  { %8838 = vst [vmem:[#allocation18_spill] sm:$0xff] %v8090_v59  ;;  %v3453_v19 = vor.u32 %v3452_v4, %v3449_v52  ;;  %v4049_v49 = vrot.slane %v4047_v27, 5  ;;  %v4072_v4 = vshrl.u32 %v3955_v28, 16  ;;  %v4645_v26 = vshll.u32 %v4561_v5, 16 }
 0x39f   :  { %4197 = vrot.lane.b32.xlu0 %v3986_v62, %s5892_s24  ;;  %v8112_v41 = vpop.permute.xlu1 %4510  ;;  %v4044_v62 = vshrl.u32 %v3951_v10, 16  ;;  %v8139_v13 = vrot.slane %v3456_v2, 5  ;;  %v4039_v10 = vshll.u32 %v3950_v63, 16  ;;  %v4060_v2 = vrot.slane %v4058_v14, 4  ;;  %5822 = vmatpush3.bf16.msra.mxu1 %v5870_v58 }
 0x3a0   :  { %8839 = vst [vmem:[#allocation19_spill] sm:$0xff] %v8112_v41  ;;  %v4063_v52 = vrot.slane %v4061_v12, 5  ;;  %v4642_v63 = vshrl.u32 %v4561_v5, 16  ;;  %5823 = vmatprep.subr.bf16.mxu1 %v5871_v24  ;;  %v4656_v33 = vshrl.u32 %v4563_v40, 16  ;;  %v8156_v58 = vrot.slane %v3453_v19, 4 }
 0x3a1   :  { %v8114_v61 = vpop.permute.xlu0 %4504  ;;  %4203 = vrot.lane.b32.xlu1 %v4028_v8, %s5892_s24  ;;  %v4640_v8 = vsel %vm6116_vm14, %v8106_v25, %v8094_v16  ;;  %v4036_v16 = vor.u32 %v4035_v60, %v4032_v22  ;;  %v3952_v25 = vld [vmem:[#allocation4 + $0x34] sm:$0x1]  ;;  %v4046_v31 = vrot.slane %v4044_v62, 4  ;;  %v3431_v60 = vsel %vm6116_vm14, %v8135_v9, %v8121_v46  ;;  %v4565_v12 = vld [vmem:[#allocation4 + $0x40] sm:$0xf] }
 0x3a2   :  { %8840 = vst [vmem:[#allocation20_spill] sm:$0xff] %v8114_v61  ;;  %v4659_v22 = vshll.u32 %v4563_v40, 16  ;;  %v8158_v27 = vrot.slane %v4039_v10, 5  ;;  %v4053_v14 = vshll.u32 %v3952_v25, 16  ;;  %v4064_v46 = vor.u32 %v4063_v52, %v4060_v2  ;;  %v3956_v9 = vld [vmem:[#allocation4 + $0x44] sm:$0x1] }
 0x3a3   :  { %4201 = vrot.lane.b32.xlu0 %v8841_v51, %s5892_s24  ;;  %v8141_v50 = vpop.permute.xlu1 %3902  ;;  %v3954_v51 = vld [vmem:[#allocation4 + $0x3c] sm:$0x1]  ;;  %v8162_v48 = vrot.slane %v4036_v16, 4  ;;  %5824 = vmatpush3.bf16.msra.mxu1 %v5871_v24  ;;  %v4074_v5 = vrot.slane %v4072_v4, 4  ;;  %v4077_v19 = vrot.slane %v4075_v38, 5  ;;  %v4644_v40 = vrot.slane %v4642_v63, 4 }
 0x3a4   :  { %8842 = vst [vmem:[#allocation21_spill] sm:$0xff] %v8141_v50  ;;  %v4050_v50 = vor.u32 %v4049_v49, %v4046_v31  ;;  %v4647_v10 = vrot.slane %v4645_v26, 5  ;;  %v4658_v25 = vrot.slane %v4656_v33, 4  ;;  %v3445_v24 = vsel %vm6116_vm14, %v8137_v30, %v8123_v45  ;;  %v3350_v30 = vld [vmem:[#allocation4 + $0x60] sm:$0xf] }
 0x3a5   :  { %v8146_v57 = vpop.permute.xlu0 %4508  ;;  %4811 = vrot.lane.b32.xlu1 %v4612_v43, %s5894_s30  ;;  %v3472_v43 = vrot.slane %v3470_v39, 5  ;;  %v4562_v39 = vld [vmem:[#allocation4 + $0x34] sm:$0x1]  ;;  %v4055_v16 = vrot.slane %v4053_v14, 5  ;;  %v4673_v31 = vshll.u32 %v4565_v12, 16  ;;  %v4081_v45 = vshll.u32 %v3956_v9, 16 }
 0x3a6   :  { %8843 = vst [vmem:[#allocation22_spill] sm:$0xff] %v8146_v57  ;;  %v4067_v57 = vshll.u32 %v3954_v51, 16  ;;  %v4042_v51 = vsel %vm6116_vm14, %v8162_v48, %v8158_v27  ;;  %v4051_v52 = vrot.slane %v4050_v50, 4  ;;  %v8185_v4 = vrot.slane %v4064_v46, 4  ;;  %v3352_v26 = vld [vmem:[#allocation4 + $0x68] sm:$0xf] }
 0x3a7   :  { %4809 = vrot.lane.b32.xlu0 %v4598_v29, %s5894_s30  ;;  %v8154_v62 = vpop.permute.xlu1 %3906  ;;  %v3468_v29 = vrot.slane %v3467_v23, 4  ;;  %v4078_v38 = vor.u32 %v4077_v19, %v4074_v5  ;;  %v4651_v63 = vshll.u32 %v4562_v39, 16  ;;  %v4648_v33 = vor.u32 %v4647_v10, %v4644_v40  ;;  %v4566_v50 = vld [vmem:[#allocation4 + $0x44] sm:$0x1]  ;;  %v3349_v10 = vld [vmem:[#allocation4 + $0x5c] sm:$0x1] }
 0x3a8   :  { %8844 = vst [vmem:[#allocation23_spill] sm:$0xff] %v8154_v62  ;;  %v4661_v62 = vrot.slane %v4659_v22, 5  ;;  %v4564_v22 = vld [vmem:[#allocation4 + $0x3c] sm:$0x1]  ;;  %v4675_v27 = vrot.slane %v4673_v31, 5  ;;  %v3506_v46 = vshll.u32 %v3350_v30, 16 }
 0x3a9   :  { %v8160_v28 = vpop.permute.xlu0 %3900  ;;  %4815 = vrot.lane.b32.xlu1 %v4640_v8, %s5894_s30  ;;  %v3459_v8 = vsel %vm6116_vm14, %v8156_v58, %v8139_v13  ;;  %v3473_v2 = vsel %vm6116_vm14, %v3468_v29, %v3472_v43  ;;  %v8187_v13 = vrot.slane %v4067_v57, 5  ;;  %v3503_v29 = vshrl.u32 %v3350_v30, 16 }
 0x3aa   :  { %8845 = vst [vmem:[#allocation24_spill] sm:$0xff] %v8160_v28  ;;  %v4670_v28 = vshrl.u32 %v4565_v12, 16  ;;  %v4662_v58 = vor.u32 %v4661_v62, %v4658_v25  ;;  %v4056_v57 = vsel %vm6116_vm14, %v4051_v52, %v4055_v16  ;;  %v4083_v5 = vrot.slane %v4081_v45, 5  ;;  %v3957_v25 = vld [vmem:[#allocation4 + $0x58] sm:$0xf] }
 0x3ab   :  { %4813 = vrot.lane.b32.xlu0 %v4626_v34, %s5894_s30  ;;  %v8166_v23 = vpop.permute.xlu1 %4514  ;;  %v3348_v34 = vld [vmem:[#allocation4 + $0x58] sm:$0xf]  ;;  %v3517_v19 = vshrl.u32 %v3352_v26, 16  ;;  %v4070_v62 = vsel %vm6116_vm14, %v8185_v4, %v8187_v13  ;;  %v8201_v40 = vrot.slane %v4651_v63, 5  ;;  %v4665_v39 = vshll.u32 %v4564_v22, 16 }
 0x3ac   :  { %8846 = vst [vmem:[#allocation25_spill] sm:$0xff] %v8166_v23  ;;  %v4672_v43 = vrot.slane %v4670_v28, 4  ;;  %v3489_v14 = vshrl.u32 %v3348_v34, 16  ;;  %v3492_v12 = vshll.u32 %v3348_v34, 16  ;;  %v4079_v28 = vrot.slane %v4078_v38, 4 }
 0x3ad   :  { %v8176_v49 = vpop.permute.xlu0 %3904  ;;  %3596 = vrot.lane.b32.xlu1 %v3445_v24, %s5885_s20  ;;  %v8204_v24 = vrot.slane %v4648_v33, 4  ;;  %v8206_v16 = vrot.slane %v4662_v58, 4  ;;  %v4679_v31 = vshll.u32 %v4566_v50, 16  ;;  %v3351_v4 = vld [vmem:[#allocation4 + $0x64] sm:$0x1]  ;;  %v3505_v13 = vrot.slane %v3503_v29, 4 }
 0x3ae   :  { %8847 = vst [vmem:[#allocation26_spill] sm:$0xff] %v8176_v49  ;;  %v3491_v34 = vrot.slane %v3489_v14, 4  ;;  %v4676_v45 = vor.u32 %v4675_v27, %v4672_v43  ;;  %v3494_v30 = vrot.slane %v3492_v12, 5  ;;  %v3508_v38 = vrot.slane %v3506_v46, 5  ;;  %v3961_v46 = vld [vmem:[#allocation4 + $0x68] sm:$0xf] }
 0x3af   :  { %3594 = vrot.lane.b32.xlu0 %v3431_v60, %s5885_s20  ;;  %v8190_v48 = vpop.permute.xlu1 %3781  ;;  %v3520_v60 = vshll.u32 %v3352_v26, 16  ;;  %v3353_v26 = vld [vmem:[#allocation4 + $0x6c] sm:$0x1]  ;;  %v3519_v22 = vrot.slane %v3517_v19, 4  ;;  %v4089_v33 = vshll.u32 %v3957_v25, 16  ;;  %v4084_v58 = vsel %vm6116_vm14, %v4079_v28, %v4083_v5 }
 0x3b0   :  { %v4667_v14 = vrot.slane %v4665_v39, 5  ;;  %v4654_v43 = vsel %vm6116_vm14, %v8204_v24, %v8201_v40  ;;  %v8220_v27 = vrot.slane %v4679_v31, 5  ;;  %v3498_v12 = vshll.u32 %v3349_v10, 16  ;;  %v3963_v39 = vld [vmem:[#allocation4 + $0x70] sm:$0xf] }
 0x3b1   :  { %v8192_v9 = vpop.permute.xlu0 %4512  ;;  %3600 = vrot.lane.b32.xlu1 %v3473_v2, %s5885_s20  ;;  %v3959_v2 = vld [vmem:[#allocation4 + $0x60] sm:$0xf]  ;;  %v3512_v29 = vshll.u32 %v3351_v4, 16  ;;  %v3495_v5 = vor.u32 %v3494_v30, %v3491_v34  ;;  %v3526_v28 = vshll.u32 %v3353_v26, 16  ;;  %v3958_v24 = vld [vmem:[#allocation4 + $0x5c] sm:$0x1] }
 0x3b2   :  { %8848 = vst [vmem:[#allocation27_spill] sm:$0xff] %v8192_v9  ;;  %v3522_v9 = vrot.slane %v3520_v60, 5  ;;  %v4100_v50 = vshrl.u32 %v3959_v2, 16  ;;  %v4103_v23 = vshll.u32 %v3959_v2, 16  ;;  %v3509_v60 = vor.u32 %v3508_v38, %v3505_v13  ;;  %v3960_v2 = vld [vmem:[#allocation4 + $0x64] sm:$0x1] }
 0x3b3   :  { %3598 = vrot.lane.b32.xlu0 %v3459_v8, %s5885_s20  ;;  %v8208_v52 = vpop.permute.xlu1 %3785  ;;  %v4086_v8 = vshrl.u32 %v3957_v25, 16  ;;  %v4091_v10 = vrot.slane %v4089_v33, 5  ;;  %v4117_v34 = vshll.u32 %v3961_v46, 16  ;;  %v3500_v30 = vrot.slane %v3498_v12, 5  ;;  %v3962_v38 = vld [vmem:[#allocation4 + $0x6c] sm:$0x1] }
 0x3b4   :  { %v3523_v40 = vor.u32 %v3522_v9, %v3519_v22  ;;  %v4102_v4 = vrot.slane %v4100_v50, 4  ;;  %v8233_v13 = vrot.slane %v3512_v29, 5  ;;  %v4128_v26 = vshrl.u32 %v3963_v39, 16  ;;  %v4569_v33 = vld [vmem:[#allocation4 + $0x60] sm:$0xf] }
 0x3b5   :  { %v8210_v63 = vpop.permute.xlu0 %4516  ;;  %4207 = vrot.lane.b32.xlu1 %v4056_v57, %s5892_s24  ;;  %v8224_v57 = vrot.slane %v4676_v45, 4  ;;  %v4088_v31 = vrot.slane %v4086_v8, 4  ;;  %v4105_v45 = vrot.slane %v4103_v23, 5  ;;  %v4131_v49 = vshll.u32 %v3963_v39, 16  ;;  %v4571_v29 = vld [vmem:[#allocation4 + $0x68] sm:$0xf] }
 0x3b6   :  { %8849 = vst [vmem:[#allocation28_spill] sm:$0xff] %v8210_v63  ;;  %v4114_v63 = vshrl.u32 %v3961_v46, 16  ;;  %v3496_v22 = vrot.slane %v3495_v5, 4  ;;  %v3510_v8 = vrot.slane %v3509_v60, 4  ;;  %v3528_v23 = vrot.slane %v3526_v28, 5 }
 0x3b7   :  { %4205 = vrot.lane.b32.xlu0 %v4042_v51, %s5892_s24  ;;  %v8222_v19 = vpop.permute.xlu1 %4392  ;;  %v4668_v51 = vsel %vm6116_vm14, %v8206_v16, %v4667_v14  ;;  %v4682_v9 = vsel %vm6116_vm14, %v8224_v57, %v8220_v27  ;;  %v4092_v14 = vor.u32 %v4091_v10, %v4088_v31  ;;  %v4095_v50 = vshll.u32 %v3958_v24, 16  ;;  %v4570_v24 = vld [vmem:[#allocation4 + $0x64] sm:$0x1] }
 0x3b8   :  { %v4109_v12 = vshll.u32 %v3960_v2, 16  ;;  %v4106_v46 = vor.u32 %v4105_v45, %v4102_v4  ;;  %v4116_v39 = vrot.slane %v4114_v63, 4  ;;  %v4119_v41 = vrot.slane %v4117_v34, 5  ;;  %v4573_v45 = vld [vmem:[#allocation4 + $0x70] sm:$0xf] }
 0x3b9   :  { %v8226_v25 = vpop.permute.xlu0 %3783  ;;  %4211 = vrot.lane.b32.xlu1 %v4084_v58, %s5892_s24  ;;  %v4123_v61 = vshll.u32 %v3962_v38, 16  ;;  %v4130_v27 = vrot.slane %v4128_v26, 4  ;;  %v4133_v57 = vrot.slane %v4131_v49, 5  ;;  %v4698_v5 = vshrl.u32 %v4569_v33, 16 }
 0x3ba   :  { %v4701_v60 = vshll.u32 %v4569_v33, 16  ;;  %v4712_v63 = vshrl.u32 %v4571_v29, 16  ;;  %v4715_v31 = vshll.u32 %v4571_v29, 16  ;;  %v4093_v2 = vrot.slane %v4092_v14, 4 }
 0x3bb   :  { %4209 = vrot.lane.b32.xlu0 %v4070_v62, %s5892_s24  ;;  %v8235_v16 = vpop.permute.xlu1 %4396  ;;  %v3524_v62 = vrot.slane %v3523_v40, 4  ;;  %v3501_v40 = vsel %vm6116_vm14, %v3496_v22, %v3500_v30  ;;  %v4111_v4 = vrot.slane %v4109_v12, 5  ;;  %v4137_v49 = vshll.u32 %v3964_v37, 16  ;;  %v4572_v37 = vld [vmem:[#allocation4 + $0x6c] sm:$0x1] }
 0x3bc   :  { %v4107_v30 = vrot.slane %v4106_v46, 4  ;;  %v4120_v38 = vor.u32 %v4119_v41, %v4116_v39  ;;  %v8257_v26 = vrot.slane %v4123_v61, 5  ;;  %v4134_v22 = vor.u32 %v4133_v57, %v4130_v27  ;;  %v3354_v57 = vld [vmem:[#allocation4 + $0x70] sm:$0xf] }
 0x3bd   :  { %v8241_v58 = vpop.permute.xlu0 %4390  ;;  %4819 = vrot.lane.b32.xlu1 %v4668_v51, %s5894_s30  ;;  %v3515_v51 = vsel %vm6116_vm14, %v3510_v8, %v8233_v13  ;;  %v3529_v34 = vsel %vm6116_vm14, %v3524_v62, %v3528_v23  ;;  %v4575_v13 = vld [vmem:[#allocation4 + $0x78] sm:$0xf]  ;;  %v4700_v8 = vrot.slane %v4698_v5, 4  ;;  %v4703_v33 = vrot.slane %v4701_v60, 5  ;;  %v4574_v62 = vld [vmem:[#allocation4 + $0x74] sm:$0x1] }
 0x3be   :  { %v4707_v14 = vshll.u32 %v4570_v24, 16  ;;  %v4714_v29 = vrot.slane %v4712_v63, 4  ;;  %v4726_v59 = vshrl.u32 %v4573_v45, 16  ;;  %v4729_v32 = vshll.u32 %v4573_v45, 16 }
 0x3bf   :  { %4817 = vrot.lane.b32.xlu0 %v4654_v43, %s5894_s30  ;;  %v8245_v28 = vpop.permute.xlu1 %5004  ;;  %v4097_v43 = vrot.slane %v4095_v50, 5  ;;  %v3356_v50 = vld [vmem:[#allocation4 + $0x78] sm:$0xf]  ;;  %v4139_v61 = vrot.slane %v4137_v49, 5  ;;  %v4743_v46 = vshll.u32 %v4575_v13, 16  ;;  %v4112_v39 = vsel %vm6116_vm14, %v4107_v30, %v4111_v4 }
 0x3c0   :  { %v4121_v27 = vrot.slane %v4120_v38, 4  ;;  %v3545_v5 = vshrl.u32 %v3356_v50, 16  ;;  %v3548_v60 = vshll.u32 %v3356_v50, 16  ;;  %v4135_v24 = vrot.slane %v4134_v22, 4  ;;  %v4576_v30 = vld [vmem:[#allocation4 + $0x7c] sm:$0x1] }
 0x3c1   :  { %v8252_v10 = vpop.permute.xlu0 %4394  ;;  %3604 = vrot.lane.b32.xlu1 %v3501_v40, %s5885_s20  ;;  %v4717_v40 = vrot.slane %v4715_v31, 5  ;;  %v4098_v41 = vsel %vm6116_vm14, %v4093_v2, %v4097_v43  ;;  %v4704_v63 = vor.u32 %v4703_v33, %v4700_v8  ;;  %v8270_v31 = vrot.slane %v4707_v14, 5  ;;  %v3358_v43 = vld [vmem:[#allocation4 + $0x80] sm:$0xf] }
 0x3c2   :  { %v4721_v2 = vshll.u32 %v4572_v37, 16  ;;  %v4735_v44 = vshll.u32 %v4574_v62, 16  ;;  %v4745_v50 = vrot.slane %v4743_v46, 5  ;;  %v3531_v15 = vshrl.u32 %v3354_v57, 16 }
 0x3c3   :  { %4821 = vrot.lane.b32.xlu0 %v4682_v9, %s5894_s30  ;;  %v8260_v12 = vpop.permute.xlu1 %5008  ;;  %v4740_v9 = vshrl.u32 %v4575_v13, 16  ;;  %v4718_v45 = vor.u32 %v4717_v40, %v4714_v29  ;;  %v4728_v13 = vrot.slane %v4726_v59, 4  ;;  %v3547_v22 = vrot.slane %v3545_v5, 4 }
 0x3c4   :  { %v3550_v8 = vrot.slane %v3548_v60, 5  ;;  %v3559_v33 = vshrl.u32 %v3358_v43, 16  ;;  %v3562_v14 = vshll.u32 %v3358_v43, 16  ;;  %v4140_v59 = vsel %vm6116_vm14, %v4135_v24, %v4139_v61 }
 0x3c5   :  { %v8262_v23 = vpop.permute.xlu0 %5002  ;;  %3608 = vrot.lane.b32.xlu1 %v3529_v34, %s5885_s20  ;;  %v4731_v34 = vrot.slane %v4729_v32, 5  ;;  %v4742_v38 = vrot.slane %v4740_v9, 4  ;;  %v4126_v32 = vsel %vm6116_vm14, %v4121_v27, %v8257_v26  ;;  %v3573_v37 = vshrl.u32 %v3360_v18, 16  ;;  %v3967_v26 = vld [vmem:[#allocation4 + $0x80] sm:$0xf] }
 0x3c6   :  { %v3576_v29 = vshll.u32 %v3360_v18, 16  ;;  %v4705_v62 = vrot.slane %v4704_v63, 4  ;;  %v4723_v9 = vrot.slane %v4721_v2, 5  ;;  %v4737_v46 = vrot.slane %v4735_v44, 5  ;;  %v3357_v27 = vld [vmem:[#allocation4 + $0x7c] sm:$0x1] }
 0x3c7   :  { %3606 = vrot.lane.b32.xlu0 %v3515_v51, %s5885_s20  ;;  %v8272_v49 = vpop.permute.xlu1 %3789  ;;  %v3534_v51 = vshll.u32 %v3354_v57, 16  ;;  %v3965_v57 = vld [vmem:[#allocation4 + $0x78] sm:$0xf]  ;;  %v4719_v60 = vrot.slane %v4718_v45, 4  ;;  %v4746_v43 = vor.u32 %v4745_v50, %v4742_v38  ;;  %v3533_v53 = vrot.slane %v3531_v15, 4 }
 0x3c8   :  { %v3551_v18 = vor.u32 %v3550_v8, %v3547_v22  ;;  %v3561_v24 = vrot.slane %v3559_v33, 4  ;;  %v3564_v36 = vrot.slane %v3562_v14, 5  ;;  %v3359_v44 = vld [vmem:[#allocation4 + $0x84] sm:$0x1]  ;;  %v3575_v63 = vrot.slane %v3573_v37, 4 }
 0x3c9   :  { %v8274_v4 = vpop.permute.xlu0 %5006  ;;  %4215 = vrot.lane.b32.xlu1 %v4112_v39, %s5892_s24  ;;  %v4749_v39 = vshll.u32 %v4576_v30, 16  ;;  %v3536_v61 = vrot.slane %v3534_v51, 5  ;;  %v3578_v2 = vrot.slane %v3576_v29, 5  ;;  %v4142_v30 = vshrl.u32 %v3965_v57, 16  ;;  %v3969_v14 = vld [vmem:[#allocation4 + $0x88] sm:$0xf] }
 0x3ca   :  { %v4145_v35 = vshll.u32 %v3965_v57, 16  ;;  %v4710_v15 = vsel %vm6116_vm14, %v4705_v62, %v8270_v31  ;;  %v4159_v38 = vshll.u32 %v3967_v26, 16  ;;  %v4724_v51 = vsel %vm6116_vm14, %v4719_v60, %v4723_v9  ;;  %v3971_v57 = vld [vmem:[#allocation4 + $0x90] sm:$0xf]  ;;  %v3361_v62 = vld [vmem:[#allocation4 + $0x8c] sm:$0x1] }
 0x3cb   :  { %4213 = vrot.lane.b32.xlu0 %v4098_v41, %s5892_s24  ;;  %v8283_v40 = vpop.permute.xlu1 %3793  ;;  %v4732_v41 = vor.u32 %v4731_v34, %v4728_v13  ;;  %v4751_v13 = vrot.slane %v4749_v39, 5  ;;  %v4156_v34 = vshrl.u32 %v3967_v26, 16  ;;  %v4747_v8 = vrot.slane %v4746_v43, 4 }
 0x3cc   :  { %v3554_v33 = vshll.u32 %v3357_v27, 16  ;;  %v3552_v37 = vrot.slane %v3551_v18, 4  ;;  %v3568_v29 = vshll.u32 %v3359_v44, 16  ;;  %v3565_v31 = vor.u32 %v3564_v36, %v3561_v24 }
 0x3cd   :  { %v8285_v5 = vpop.permute.xlu0 %3787  ;;  %4219 = vrot.lane.b32.xlu1 %v4140_v59, %s5892_s24  ;;  %v4733_v22 = vrot.slane %v4732_v41, 4  ;;  %v3540_v59 = vshll.u32 %v3355_v17, 16  ;;  %v3579_v39 = vor.u32 %v3578_v2, %v3575_v63  ;;  %v4144_v26 = vrot.slane %v4142_v30, 4  ;;  %v4579_v63 = vld [vmem:[#allocation4 + $0x88] sm:$0xf] }
 0x3ce   :  { %v4158_v9 = vrot.slane %v4156_v34, 4  ;;  %v4161_v60 = vrot.slane %v4159_v38, 5  ;;  %v4170_v41 = vshrl.u32 %v3969_v14, 16  ;;  %v4173_v43 = vshll.u32 %v3969_v14, 16  ;;  %v4577_v34 = vld [vmem:[#allocation4 + $0x80] sm:$0xf] }
 0x3cf   :  { %4217 = vrot.lane.b32.xlu0 %v4126_v32, %s5892_s24  ;;  %v8289_v45 = vpop.permute.xlu1 %4400  ;;  %v3537_v32 = vor.u32 %v3536_v61, %v3533_v53  ;;  %v4752_v53 = vsel %vm6116_vm14, %v4747_v8, %v4751_v13  ;;  %v3556_v17 = vrot.slane %v3554_v33, 5  ;;  %v4184_v61 = vshrl.u32 %v3971_v57, 16 }
 0x3d0   :  { %8850 = vst [vmem:[#allocation29_spill] sm:$0xff] %v8289_v45  ;;  %v4147_v45 = vrot.slane %v4145_v35, 5  ;;  %v4187_v18 = vshll.u32 %v3971_v57, 16  ;;  %v4738_v36 = vsel %vm6116_vm14, %v4733_v22, %v4737_v46  ;;  %v3542_v24 = vrot.slane %v3540_v59, 5  ;;  %v3968_v46 = vld [vmem:[#allocation4 + $0x84] sm:$0x1] }
 0x3d1   :  { %v8294_v50 = vpop.permute.xlu0 %3791  ;;  %4827 = vrot.lane.b32.xlu1 %v4724_v51, %s5894_s30  ;;  %v3538_v35 = vrot.slane %v3537_v32, 4  ;;  %v3582_v44 = vshll.u32 %v3361_v62, 16  ;;  %v3557_v2 = vsel %vm6116_vm14, %v3552_v37, %v3556_v17  ;;  %v3566_v30 = vrot.slane %v3565_v31, 4  ;;  %v3966_v51 = vld [vmem:[#allocation4 + $0x7c] sm:$0x1] }
 0x3d2   :  { %v3580_v13 = vrot.slane %v3579_v39, 4  ;;  %v4148_v8 = vor.u32 %v4147_v45, %v4144_v26  ;;  %v4162_v22 = vor.u32 %v4161_v60, %v4158_v9  ;;  %v4172_v33 = vrot.slane %v4170_v41, 4  ;;  %v4581_v9 = vld [vmem:[#allocation4 + $0x90] sm:$0xf] }
 0x3d3   :  { %4825 = vrot.lane.b32.xlu0 %v4710_v15, %s5894_s30  ;;  %v8300_v54 = vpop.permute.xlu1 %4404  ;;  %v3570_v15 = vrot.slane %v3568_v29, 5  ;;  %v4175_v14 = vrot.slane %v4173_v43, 5  ;;  %v4186_v59 = vrot.slane %v4184_v61, 4  ;;  %v4189_v57 = vrot.slane %v4187_v18, 5  ;;  %v3972_v18 = vld [vmem:[#allocation4 + $0x94] sm:$0x1] }
 0x3d4   :  { %v4768_v62 = vshrl.u32 %v4579_v63, 16  ;;  %v3543_v37 = vsel %vm6116_vm14, %v3538_v35, %v3542_v24  ;;  %v3584_v29 = vrot.slane %v3582_v44, 5  ;;  %v4754_v31 = vshrl.u32 %v4577_v34, 16  ;;  %v3970_v35 = vld [vmem:[#allocation4 + $0x8c] sm:$0x1] }
 0x3d5   :  { %v8302_v27 = vpop.permute.xlu0 %4398  ;;  %4831 = vrot.lane.b32.xlu1 %v4752_v53, %s5894_s30  ;;  %v4771_v53 = vshll.u32 %v4579_v63, 16  ;;  %v4757_v39 = vshll.u32 %v4577_v34, 16  ;;  %v4151_v45 = vshll.u32 %v3966_v51, 16  ;;  %v4165_v26 = vshll.u32 %v3968_v46, 16 }
 0x3d6   :  { %v3571_v41 = vsel %vm6116_vm14, %v3566_v30, %v3570_v15  ;;  %v3585_v43 = vsel %vm6116_vm14, %v3580_v13, %v3584_v29  ;;  %v4149_v17 = vrot.slane %v4148_v8, 4  ;;  %v4163_v61 = vrot.slane %v4162_v22, 4  ;;  %v4580_v29 = vld [vmem:[#allocation4 + $0x8c] sm:$0x1] }
 0x3d7   :  { %4829 = vrot.lane.b32.xlu0 %v4738_v36, %s5894_s30  ;;  %v8312_v38 = vpop.permute.xlu1 %5012  ;;  %v4176_v24 = vor.u32 %v4175_v14, %v4172_v33  ;;  %v4190_v44 = vor.u32 %v4189_v57, %v4186_v59  ;;  %v4770_v63 = vrot.slane %v4768_v62, 4  ;;  %v4756_v34 = vrot.slane %v4754_v31, 4  ;;  %v4578_v57 = vld [vmem:[#allocation4 + $0x84] sm:$0x1] }
 0x3d8   :  { %v4759_v51 = vrot.slane %v4757_v39, 5  ;;  %v4782_v46 = vshrl.u32 %v4581_v9, 16  ;;  %v4153_v30 = vrot.slane %v4151_v45, 5  ;;  %v4167_v15 = vrot.slane %v4165_v26, 5 }
 0x3d9   :  { %v8314_v32 = vpop.permute.xlu0 %4402  ;;  %3612 = vrot.lane.b32.xlu1 %v3557_v2, %s5885_s20  ;;  %v4773_v2 = vrot.slane %v4771_v53, 5  ;;  %v4193_v13 = vshll.u32 %v3972_v18, 16  ;;  %v4179_v22 = vshll.u32 %v3970_v35, 16  ;;  %v4191_v59 = vrot.slane %v4190_v44, 4  ;;  %v4904_v18 = vld [vmem:[#allocation4 + $0x98] sm:$0xe] }
 0x3da   :  { %v4154_v33 = vsel %vm6116_vm14, %v4149_v17, %v4153_v30  ;;  %v4168_v14 = vsel %vm6116_vm14, %v4163_v61, %v4167_v15  ;;  %v4177_v53 = vrot.slane %v4176_v24, 4  ;;  %v4760_v31 = vor.u32 %v4759_v51, %v4756_v34  ;;  %v4905_v35 = vld [vmem:[#allocation4 + $0x9c] sm:$0x1]  ;;  %v4582_v24 = vld [vmem:[#allocation4 + $0x94] sm:$0x1] }
 0x3db   :  { %3610 = vrot.lane.b32.xlu0 %v3543_v37, %s5885_s20  ;;  %v8320_v60 = vpop.permute.xlu1 %3797  ;;  %v4785_v37 = vshll.u32 %v4581_v9, 16  ;;  %v4774_v62 = vor.u32 %v4773_v2, %v4770_v63  ;;  %v4784_v39 = vrot.slane %v4782_v46, 4  ;;  %v4195_v26 = vrot.slane %v4193_v13, 5 }
 0x3dc   :  { %8851 = vst [vmem:[#allocation30_spill] sm:$0xff] %v8320_v60  ;;  %v4777_v9 = vshll.u32 %v4580_v29, 16  ;;  %v4763_v17 = vshll.u32 %v4578_v57, 16  ;;  %v4761_v34 = vrot.slane %v4760_v31, 4  ;;  %v5000_v30 = vrot.slane %v4905_v35, 5 }
 0x3dd   :  { %v8326_v36 = vpop.permute.xlu0 %5010  ;;  %3616 = vrot.lane.b32.xlu1 %v3585_v43, %s5885_s20  ;;  %v4787_v45 = vrot.slane %v4785_v37, 5  ;;  %v4181_v43 = vrot.slane %v4179_v22, 5  ;;  %v4196_v44 = vsel %vm6116_vm14, %v4191_v59, %v4195_v26  ;;  %v4775_v63 = vrot.slane %v4774_v62, 4  ;;  %v4902_v57 = vld [vmem:[#allocation4 + $0x90] sm:$0xe] }
 0x3de   :  { %v4779_v46 = vrot.slane %v4777_v9, 5  ;;  %v5712_v37 = vrot.slane %v4904_v18, 9  ;;  %v4765_v13 = vrot.slane %v4763_v17, 5  ;;  %v4791_v22 = vshll.u32 %v4582_v24, 16  ;;  %v4903_v62 = vld [vmem:[#allocation4 + $0x94] sm:$0x1] }
 0x3df   :  { %3614 = vrot.lane.b32.xlu0 %v3571_v41, %s5885_s20  ;;  %v8330_v8 = vpop.permute.xlu1 %3801  ;;  %v4182_v2 = vsel %vm6116_vm14, %v4177_v53, %v4181_v43  ;;  %v4788_v51 = vor.u32 %v4787_v45, %v4784_v39  ;;  %v5711_v9 = vrot.slane %v4902_v57, 9  ;;  %v4996_v43 = vrot.slane %v4903_v62, 5  ;;  %v8861_v62 = vld [vmem:[#allocation14_spill] sm:$0xff] }
 0x3e0   :  { %v5001_v53 = vsel %vm6052_vm11, %v5712_v37, %v5000_v30  ;;  %v4793_v39 = vrot.slane %v4791_v22, 5 }
 0x3e1   :  { %v8332_v60 = vpop.permute.xlu0 %5014  ;;  %4223 = vrot.lane.b32.xlu1 %v4168_v14, %s5892_s24  ;;  %v4766_v14 = vsel %vm6116_vm14, %v4761_v34, %v4765_v13  ;;  %v4789_v59 = vrot.slane %v4788_v51, 4  ;;  %v4997_v35 = vsel %vm6052_vm11, %v5711_v9, %v4996_v43  ;;  %vm4245_vm11 = vcmask 322816   ;;  %v8865_v43 = vld [vmem:[#allocation20_spill] sm:$0xff] }
 0x3e3   :  { %4221 = vrot.lane.b32.xlu0 %v4154_v33, %s5892_s24  ;;  %v8340_v41 = vpop.permute.xlu1 %4408  ;;  %v4780_v33 = vsel %vm6116_vm14, %v4775_v63, %v4779_v46  ;;  %v4794_v26 = vsel %vm6116_vm14, %v4789_v59, %v4793_v39  ;;  %vm4438_vm14 = vcmask 388416   ;;  %v8860_v57 = vld [vmem:[#allocation30_spill] sm:$0xff]  ;;  %v8862_v39 = vld [vmem:[#allocation16_spill] sm:$0xff] }
 0x3e5   :  { %v8342_v61 = vpop.permute.xlu0 %3799  ;;  %4227 = vrot.lane.b32.xlu1 %v4196_v44, %s5892_s24 }
 0x3e7   :  { %4225 = vrot.lane.b32.xlu0 %v4182_v2, %s5892_s24  ;;  %v8350_v15 = vpop.permute.xlu1 %4412 }
 0x3e9   :  { %v8352_v29 = vpop.permute.xlu0 %4406  ;;  %4835 = vrot.lane.b32.xlu1 %v4780_v33, %s5894_s30 }
 0x3eb   :  { %4833 = vrot.lane.b32.xlu0 %v4766_v14, %s5894_s30  ;;  %v8362_v31 = vpop.permute.xlu1 %5020  ;;  %v8859_v14 = vld [vmem:[#allocation8_spill] sm:$0xff] }
 0x3ed   :  { %v8364_v45 = vpop.permute.xlu0 %4410  ;;  %5032 = vrot.lane.b32.xlu1 %v5001_v53, %s5895_s10 }
 0x3ef   :  { %4837 = vrot.lane.b32.xlu0 %v4794_v26, %s5894_s30  ;;  %v8370_v17 = vpop.permute.xlu1 %5024 }
 0x3f1   :  { %v8372_v18 = vpop.permute.xlu0 %5018 }
 0x3f3   :  { %5030 = vrot.lane.b32.xlu0 %v4997_v35, %s5895_s10  ;;  %v8377_v44 = vpop.permute.xlu1 %3805 }
 0x3f5   :  { %v8379_v63 = vpop.permute.xlu0 %5022 }
 0x3f7   :  { %v8381_v42 = vpop.permute.xlu1 %3809 }
 0x3f9   :  { %v8383_v24 = vpop.permute.xlu0 %3803 }
 0x3fb   :  { %v8385_v2 = vpop.permute.xlu1 %4416 }
 0x3fd   :  { %v8387_v34 = vpop.permute.xlu0 %3807 }
 0x3ff   :  { %v8389_v51 = vpop.permute.xlu1 %4420 }
 0x401   :  { %v8391_v46 = vpop.permute.xlu0 %4414 }
 0x403   :  { %v8393_v6 = vpop.permute.xlu1 %5028 }
 0x405   :  { %v8395_v37 = vpop.permute.xlu0 %4418 }
 0x407   :  { %v3589_v30 = vpop.permute.xlu1 %3588 }
 0x408   :  { %3636 = vst.msk [vmem:[#allocation5 + $0x4] sm:$0xf] %vm3634_vm10, %v3589_v30 }
 0x409   :  { %v8397_v13 = vpop.permute.xlu0 %5026  ;;  %3829 = vst.msk [vmem:[#allocation5 + $0x4] sm:$0xf] %vm3827_vm12, %v8190_v48 }
 0x40a   :  { %3926 = vst.msk [vmem:[#allocation5 + $0x4] sm:$0xf] %vm3924_vm13, %v7815_v1 }
 0x40b   :  { %v3593_v22 = vpop.permute.xlu1 %3592 }
 0x40c   :  { %3638 = vst.msk [vmem:[#allocation5 + $0xc] sm:$0xf] %vm3634_vm10, %v3593_v22 }
 0x40d   :  { %v3591_v33 = vpop.permute.xlu0 %3590  ;;  %3831 = vst.msk [vmem:[#allocation5 + $0xc] sm:$0xf] %vm3827_vm12, %v8208_v52 }
 0x40e   :  { %3637 = vst.msk [vmem:[#allocation5 + $0x8] sm:$0xf] %vm3634_vm10, %v3591_v33 }
 0x40f   :  { %3830 = vst.msk [vmem:[#allocation5 + $0x8] sm:$0xf] %vm3827_vm12, %v8226_v25  ;;  %v4200_v1 = vpop.permute.xlu1 %4199 }
 0x410   :  { %3928 = vst.msk [vmem:[#allocation5 + $0xc] sm:$0xf] %vm3924_vm13, %v7840_v7  ;;  %3927 = vst.msk [vmem:[#allocation5 + $0x8] sm:$0xf] %vm3924_vm13, %v7848_v20 }
 0x411   :  { %v4198_v48 = vpop.permute.xlu0 %4197  ;;  %4247 = vst.msk [vmem:[#allocation5 + $0x4] sm:$0xf] %vm4245_vm11, %v4200_v1 }
 0x412   :  { %4246 = vst.msk [vmem:[#allocation5] sm:$0xf] %vm4245_vm11, %v4198_v48 }
 0x413   :  { %4440 = vst.msk [vmem:[#allocation5 + $0x4] sm:$0xf] %vm4438_vm14, %v8222_v19  ;;  %4439 = vst.msk [vmem:[#allocation5] sm:$0xf] %vm4438_vm14, %v8241_v58  ;;  %v4204_v7 = vpop.permute.xlu1 %4203 }
 0x414   :  { %4538 = vst.msk [vmem:[#allocation5 + $0x4] sm:$0xf] %vm4536_vm7, %v7867_v3  ;;  %4537 = vst.msk [vmem:[#allocation5] sm:$0xf] %vm4536_vm7, %v7880_v56 }
 0x415   :  { %v4202_v20 = vpop.permute.xlu0 %4201  ;;  %4249 = vst.msk [vmem:[#allocation5 + $0xc] sm:$0xf] %vm4245_vm11, %v4204_v7 }
 0x416   :  { %4248 = vst.msk [vmem:[#allocation5 + $0x8] sm:$0xf] %vm4245_vm11, %v4202_v20  ;;  %v8871_v20 = vld [vmem:[#allocation26_spill] sm:$0xff] }
 0x417   :  { %4442 = vst.msk [vmem:[#allocation5 + $0xc] sm:$0xf] %vm4438_vm14, %v8235_v16  ;;  %4441 = vst.msk [vmem:[#allocation5 + $0x8] sm:$0xf] %vm4438_vm14, %v8252_v10  ;;  %v4812_v3 = vpop.permute.xlu1 %4811 }
 0x418   :  { %4540 = vst.msk [vmem:[#allocation5 + $0xc] sm:$0xf] %vm4536_vm7, %v7905_v21  ;;  %4539 = vst.msk [vmem:[#allocation5 + $0x8] sm:$0xf] %vm4536_vm7, %v7910_v0 }
 0x419   :  { %v4810_v56 = vpop.permute.xlu0 %4809  ;;  %4859 = vst.msk [vmem:[#allocation5 + $0x4] sm:$0xf] %vm4857_vm9, %v4812_v3 }
 0x41a   :  { %4858 = vst.msk [vmem:[#allocation5] sm:$0xf] %vm4857_vm9, %v4810_v56 }
 0x41b   :  { %5052 = vst.msk [vmem:[#allocation5 + $0x4] sm:$0xf] %vm5050_vm15, %v8245_v28  ;;  %5051 = vst.msk [vmem:[#allocation5] sm:$0xf] %vm5050_vm15, %v8262_v23  ;;  %v4816_v52 = vpop.permute.xlu1 %4815  ;;  %v8854_v23 = vld [vmem:[#allocation12_spill] sm:$0xff] }
 0x41c   :  { %4861 = vst.msk [vmem:[#allocation5 + $0xc] sm:$0xf] %vm4857_vm9, %v4816_v52 }
 0x41d   :  { %v4814_v19 = vpop.permute.xlu0 %4813  ;;  %5054 = vst.msk [vmem:[#allocation5 + $0xc] sm:$0xf] %vm5050_vm15, %v8260_v12  ;;  %v8853_v12 = vld [vmem:[#allocation29_spill] sm:$0xff] }
 0x41e   :  { %4860 = vst.msk [vmem:[#allocation5 + $0x8] sm:$0xf] %vm4857_vm9, %v4814_v19 }
 0x41f   :  { %5053 = vst.msk [vmem:[#allocation5 + $0x8] sm:$0xf] %vm5050_vm15, %v8274_v4  ;;  %v3597_v21 = vpop.permute.xlu1 %3596 }
 0x420   :  { %3640 = vst.msk [vmem:[#allocation5 + $0x14] sm:$0xf] %vm3634_vm10, %v3597_v21  ;;  %v8876_v21 = vld [vmem:[#allocation10_spill] sm:$0xff] }
 0x421   :  { %v3595_v0 = vpop.permute.xlu0 %3594  ;;  %3833 = vst.msk [vmem:[#allocation5 + $0x14] sm:$0xf] %vm3827_vm12, %v8272_v49 }
 0x422   :  { %3639 = vst.msk [vmem:[#allocation5 + $0x10] sm:$0xf] %vm3634_vm10, %v3595_v0  ;;  %v5872_v25 = vld [vmem:[#allocation5] sm:$0xff]  }
 0x423   :  { %3832 = vst.msk [vmem:[#allocation5 + $0x10] sm:$0xf] %vm3827_vm12, %v8285_v5  ;;  %v3601_v16 = vpop.permute.xlu1 %3600  ;;  %5825 = vmatprep.mubr.msk.bf16.mxu1 %vm5166_vm1, %v5872_v25  ;;  %v8857_v5 = vld [vmem:[#allocation15_spill] sm:$0xff] }
 0x424   :  { %3930 = vst.msk [vmem:[#allocation5 + $0x14] sm:$0xf] %vm3924_vm13, %v7956_v11  ;;  %3929 = vst.msk [vmem:[#allocation5 + $0x10] sm:$0xf] %vm3924_vm13, %v7959_v55  ;;  %v8852_v11 = vld [vmem:[#allocation11_spill] sm:$0xff] }
 0x425   :  { %v3599_v58 = vpop.permute.xlu0 %3598  ;;  %3642 = vst.msk [vmem:[#allocation5 + $0x1c] sm:$0xf] %vm3634_vm10, %v3601_v16 }
 0x426   :  { %3641 = vst.msk [vmem:[#allocation5 + $0x18] sm:$0xf] %vm3634_vm10, %v3599_v58  ;;  %v5873_v28 = vld [vmem:[#allocation5 + $0x8] sm:$0xff]  }
 0x427   :  { %3835 = vst.msk [vmem:[#allocation5 + $0x1c] sm:$0xf] %vm3827_vm12, %v8283_v40  ;;  %3834 = vst.msk [vmem:[#allocation5 + $0x18] sm:$0xf] %vm3827_vm12, %v8294_v50  ;;  %v4208_v55 = vpop.permute.xlu1 %4207  ;;  %5826 = vmatmul.mubr.msk.bf16.vlgmr.msra.gmra.mxu1 %vm5166_vm1, %v5873_v28  ;;  %v8856_v40 = vld [vmem:[#allocation6_spill] sm:$0xff]  ;;  %v8858_v50 = vld [vmem:[#allocation7_spill] sm:$0xff] }
 0x428   :  { %3932 = vst.msk [vmem:[#allocation5 + $0x1c] sm:$0xf] %vm3924_vm13, %v7980_v47  ;;  %3931 = vst.msk [vmem:[#allocation5 + $0x18] sm:$0xf] %vm3924_vm13, %v8852_v11  ;;  %v8855_v47 = vld [vmem:[#allocation13_spill] sm:$0xff] }
 0x429   :  { %v4206_v10 = vpop.permute.xlu0 %4205  ;;  %4251 = vst.msk [vmem:[#allocation5 + $0x14] sm:$0xf] %vm4245_vm11, %v4208_v55 }
 0x42a   :  { %4250 = vst.msk [vmem:[#allocation5 + $0x10] sm:$0xf] %vm4245_vm11, %v4206_v10 }
 0x42b   :  { %4444 = vst.msk [vmem:[#allocation5 + $0x14] sm:$0xf] %vm4438_vm14, %v8853_v12  ;;  %4443 = vst.msk [vmem:[#allocation5 + $0x10] sm:$0xf] %vm4438_vm14, %v8302_v27  ;;  %v4212_v49 = vpop.permute.xlu1 %4211  ;;  %v5713_v12 = vld [vmem:[%s8773_s6] ss:$0 sm:$0xff] }
 0x42c   :  { %4542 = vst.msk [vmem:[#allocation5 + $0x14] sm:$0xf] %vm4536_vm7, %v8854_v23  ;;  %4541 = vst.msk [vmem:[#allocation5 + $0x10] sm:$0xf] %vm4536_vm7, %v8855_v47 }
 0x42d   :  { %v4210_v4 = vpop.permute.xlu0 %4209  ;;  %4253 = vst.msk [vmem:[#allocation5 + $0x1c] sm:$0xf] %vm4245_vm11, %v4212_v49 }
 0x42e   :  { %4252 = vst.msk [vmem:[#allocation5 + $0x18] sm:$0xf] %vm4245_vm11, %v4210_v4 }
 0x42f   :  { %4446 = vst.msk [vmem:[#allocation5 + $0x1c] sm:$0xf] %vm4438_vm14, %v8300_v54  ;;  %4445 = vst.msk [vmem:[#allocation5 + $0x18] sm:$0xf] %vm4438_vm14, %v8314_v32  ;;  %v4820_v27 = vpop.permute.xlu1 %4819 }
 0x430   :  { %4544 = vst.msk [vmem:[#allocation5 + $0x1c] sm:$0xf] %vm4536_vm7, %v8856_v40  ;;  %4543 = vst.msk [vmem:[#allocation5 + $0x18] sm:$0xf] %vm4536_vm7, %v8857_v5 }
 0x431   :  { %4865 = vst.msk [vmem:[#allocation5 + $0x1c] sm:$0xf] %vm4857_vm9, %v8858_v50  ;;  %v4818_v59 = vpop.permute.xlu0 %4817  ;;  %4863 = vst.msk [vmem:[#allocation5 + $0x14] sm:$0xf] %vm4857_vm9, %v4820_v27 }
 0x432   :  { %5058 = vst.msk [vmem:[#allocation5 + $0x1c] sm:$0xf] %vm5050_vm15, %v8859_v14  ;;  %5056 = vst.msk [vmem:[#allocation5 + $0x14] sm:$0xf] %vm5050_vm15, %v8312_v38 }
 0x433   :  { %4862 = vst.msk [vmem:[#allocation5 + $0x10] sm:$0xf] %vm4857_vm9, %v4818_v59  ;;  %v3605_v54 = vpop.permute.xlu1 %3604 }
 0x434   :  { %5055 = vst.msk [vmem:[#allocation5 + $0x10] sm:$0xf] %vm5050_vm15, %v8326_v36 }
 0x435   :  { %v4822_v32 = vpop.permute.xlu0 %4821  ;;  %3644 = vst.msk [vmem:[#allocation5 + $0x24] sm:$0xf] %vm3634_vm10, %v3605_v54 }
 0x436   :  { %4864 = vst.msk [vmem:[#allocation5 + $0x18] sm:$0xf] %vm4857_vm9, %v4822_v32 }
 0x437   :  { %3837 = vst.msk [vmem:[#allocation5 + $0x24] sm:$0xf] %vm3827_vm12, %v8860_v57  ;;  %v3609_v53 = vpop.permute.xlu1 %3608 }
 0x438   :  { %5057 = vst.msk [vmem:[#allocation5 + $0x18] sm:$0xf] %vm5050_vm15, %v8332_v60  ;;  %v8863_v60 = vld [vmem:[#allocation18_spill] sm:$0xff] }
 0x439   :  { %3934 = vst.msk [vmem:[#allocation5 + $0x24] sm:$0xf] %vm3924_vm13, %v8861_v62  ;;  %v3607_v38 = vpop.permute.xlu0 %3606 }
 0x43a   :  { %3646 = vst.msk [vmem:[#allocation5 + $0x2c] sm:$0xf] %vm3634_vm10, %v3609_v53  ;;  %3645 = vst.msk [vmem:[#allocation5 + $0x28] sm:$0xf] %vm3634_vm10, %v3607_v38 }
 0x43b   :  { %3839 = vst.msk [vmem:[#allocation5 + $0x2c] sm:$0xf] %vm3827_vm12, %v8330_v8  ;;  %v5874_v36 = vld [vmem:[#allocation5 + $0x10] sm:$0xff]   ;;  %3838 = vst.msk [vmem:[#allocation5 + $0x28] sm:$0xf] %vm3827_vm12, %v8342_v61  ;;  %v4216_v26 = vpop.permute.xlu1 %4215  ;;  %v8864_v61 = vld [vmem:[#allocation17_spill] sm:$0xff] }
 0x43c   :  { %3936 = vst.msk [vmem:[#allocation5 + $0x2c] sm:$0xf] %vm3924_vm13, %v8862_v39  ;;  %3935 = vst.msk [vmem:[#allocation5 + $0x28] sm:$0xf] %vm3924_vm13, %v8863_v60  ;;  %5829 = vmatprep.mubr.msk.bf16.mxu1 %vm5166_vm1, %v5874_v36 }
 0x43d   :  { %v4214_v9 = vpop.permute.xlu0 %4213  ;;  %4255 = vst.msk [vmem:[#allocation5 + $0x24] sm:$0xf] %vm4245_vm11, %v4216_v26 }
 0x43e   :  { %4254 = vst.msk [vmem:[#allocation5 + $0x20] sm:$0xf] %vm4245_vm11, %v4214_v9 }
 0x43f   :  { %4448 = vst.msk [vmem:[#allocation5 + $0x24] sm:$0xf] %vm4438_vm14, %v8340_v41  ;;  %v5875_v8 = vld [vmem:[#allocation5 + $0x18] sm:$0xff]   ;;  %4447 = vst.msk [vmem:[#allocation5 + $0x20] sm:$0xf] %vm4438_vm14, %v8352_v29  ;;  %v4220_v35 = vpop.permute.xlu1 %4219  ;;  %v8866_v41 = vld [vmem:[#allocation19_spill] sm:$0xff] }
 0x440   :  { %4546 = vst.msk [vmem:[#allocation5 + $0x24] sm:$0xf] %vm4536_vm7, %v8864_v61  ;;  %4545 = vst.msk [vmem:[#allocation5 + $0x20] sm:$0xf] %vm4536_vm7, %v8865_v43  ;;  %5830 = vmatmul.mubr.msk.bf16.gmra.mxu1 %vm5166_vm1, %v5875_v8  ;;  %v8867_v29 = vld [vmem:[#allocation22_spill] sm:$0xff] }
 0x441   :  { %v4218_v30 = vpop.permute.xlu0 %4217  ;;  %4257 = vst.msk [vmem:[#allocation5 + $0x2c] sm:$0xf] %vm4245_vm11, %v4220_v35 }
 0x442   :  { %4256 = vst.msk [vmem:[#allocation5 + $0x28] sm:$0xf] %vm4245_vm11, %v4218_v30 }
 0x443   :  { %4450 = vst.msk [vmem:[#allocation5 + $0x2c] sm:$0xf] %vm4438_vm14, %v8350_v15  ;;  %4449 = vst.msk [vmem:[#allocation5 + $0x28] sm:$0xf] %vm4438_vm14, %v8364_v45  ;;  %v4828_v22 = vpop.permute.xlu1 %4827 }
 0x444   :  { %4548 = vst.msk [vmem:[#allocation5 + $0x2c] sm:$0xf] %vm4536_vm7, %v8866_v41  ;;  %4547 = vst.msk [vmem:[#allocation5 + $0x28] sm:$0xf] %vm4536_vm7, %v8867_v29 }
 0x445   :  { %v4826_v33 = vpop.permute.xlu0 %4825  ;;  %4867 = vst.msk [vmem:[#allocation5 + $0x24] sm:$0xf] %vm4857_vm9, %v4828_v22 }
 0x446   :  { %4866 = vst.msk [vmem:[#allocation5 + $0x20] sm:$0xf] %vm4857_vm9, %v4826_v33 }
 0x447   :  { %5060 = vst.msk [vmem:[#allocation5 + $0x24] sm:$0xf] %vm5050_vm15, %v8362_v31  ;;  %5059 = vst.msk [vmem:[#allocation5 + $0x20] sm:$0xf] %vm5050_vm15, %v8372_v18  ;;  %v4832_v15 = vpop.permute.xlu1 %4831  ;;  %v8868_v18 = vld [vmem:[#allocation21_spill] sm:$0xff] }
 0x448   :  { %4869 = vst.msk [vmem:[#allocation5 + $0x2c] sm:$0xf] %vm4857_vm9, %v4832_v15 }
 0x449   :  { %v4830_v45 = vpop.permute.xlu0 %4829  ;;  %5062 = vst.msk [vmem:[#allocation5 + $0x2c] sm:$0xf] %vm5050_vm15, %v8370_v17  ;;  %v8869_v17 = vld [vmem:[#allocation24_spill] sm:$0xff] }
 0x44a   :  { %4868 = vst.msk [vmem:[#allocation5 + $0x28] sm:$0xf] %vm4857_vm9, %v4830_v45 }
 0x44b   :  { %5061 = vst.msk [vmem:[#allocation5 + $0x28] sm:$0xf] %vm5050_vm15, %v8379_v63  ;;  %v3613_v1 = vpop.permute.xlu1 %3612 }
 0x44c   :  { %3648 = vst.msk [vmem:[#allocation5 + $0x34] sm:$0xf] %vm3634_vm10, %v3613_v1 }
 0x44d   :  { %v3611_v48 = vpop.permute.xlu0 %3610  ;;  %3841 = vst.msk [vmem:[#allocation5 + $0x34] sm:$0xf] %vm3827_vm12, %v8377_v44 }
 0x44e   :  { %3647 = vst.msk [vmem:[#allocation5 + $0x30] sm:$0xf] %vm3634_vm10, %v3611_v48  ;;  %v5876_v31 = vld [vmem:[#allocation5 + $0x20] sm:$0xff]  }
 0x44f   :  { %3840 = vst.msk [vmem:[#allocation5 + $0x30] sm:$0xf] %vm3827_vm12, %v8383_v24  ;;  %v3617_v63 = vpop.permute.xlu1 %3616  ;;  %5833 = vmatprep.mubr.msk.bf16.mxu1 %vm5166_vm1, %v5876_v31  ;;  %v8870_v24 = vld [vmem:[#allocation23_spill] sm:$0xff] }
 0x450   :  { %3938 = vst.msk [vmem:[#allocation5 + $0x34] sm:$0xf] %vm3924_vm13, %v8868_v18  ;;  %3937 = vst.msk [vmem:[#allocation5 + $0x30] sm:$0xf] %vm3924_vm13, %v8869_v17 }
 0x451   :  { %v3615_v7 = vpop.permute.xlu0 %3614  ;;  %3650 = vst.msk [vmem:[#allocation5 + $0x3c] sm:$0xf] %vm3634_vm10, %v3617_v63 }
 0x452   :  { %3649 = vst.msk [vmem:[#allocation5 + $0x38] sm:$0xf] %vm3634_vm10, %v3615_v7  ;;  %v5877_v44 = vld [vmem:[#allocation5 + $0x28] sm:$0xff]  }
 0x453   :  { %3843 = vst.msk [vmem:[#allocation5 + $0x3c] sm:$0xf] %vm3827_vm12, %v8381_v42  ;;  %3842 = vst.msk [vmem:[#allocation5 + $0x38] sm:$0xf] %vm3827_vm12, %v8387_v34  ;;  %v4224_v3 = vpop.permute.xlu1 %4223  ;;  %5834 = vmatmul.mubr.msk.bf16.gmra.mxu1 %vm5166_vm1, %v5877_v44  ;;  %v8872_v42 = vld [vmem:[#allocation25_spill] sm:$0xff]  ;;  %v8873_v34 = vld [vmem:[#allocation27_spill] sm:$0xff] }
 0x454   :  { %3940 = vst.msk [vmem:[#allocation5 + $0x3c] sm:$0xf] %vm3924_vm13, %v8870_v24  ;;  %3939 = vst.msk [vmem:[#allocation5 + $0x38] sm:$0xf] %vm3924_vm13, %v8871_v20 }
 0x455   :  { %v4222_v56 = vpop.permute.xlu0 %4221  ;;  %4259 = vst.msk [vmem:[#allocation5 + $0x34] sm:$0xf] %vm4245_vm11, %v4224_v3 }
 0x456   :  { %4258 = vst.msk [vmem:[#allocation5 + $0x30] sm:$0xf] %vm4245_vm11, %v4222_v56 }
 0x457   :  { %4452 = vst.msk [vmem:[#allocation5 + $0x34] sm:$0xf] %vm4438_vm14, %v8385_v2  ;;  %4451 = vst.msk [vmem:[#allocation5 + $0x30] sm:$0xf] %vm4438_vm14, %v8391_v46  ;;  %v4228_v52 = vpop.permute.xlu1 %4227  ;;  %v8874_v2 = vld [vmem:[#allocation9_spill] sm:$0xff]  ;;  %v8875_v46 = vld [vmem:[#allocation28_spill] sm:$0xff] }
 0x458   :  { %4550 = vst.msk [vmem:[#allocation5 + $0x34] sm:$0xf] %vm4536_vm7, %v8872_v42  ;;  %4549 = vst.msk [vmem:[#allocation5 + $0x30] sm:$0xf] %vm4536_vm7, %v8873_v34 }
 0x459   :  { %v4226_v19 = vpop.permute.xlu0 %4225  ;;  %4261 = vst.msk [vmem:[#allocation5 + $0x3c] sm:$0xf] %vm4245_vm11, %v4228_v52 }
 0x45a   :  { %4260 = vst.msk [vmem:[#allocation5 + $0x38] sm:$0xf] %vm4245_vm11, %v4226_v19 }
 0x45b   :  { %4454 = vst.msk [vmem:[#allocation5 + $0x3c] sm:$0xf] %vm4438_vm14, %v8389_v51  ;;  %4453 = vst.msk [vmem:[#allocation5 + $0x38] sm:$0xf] %vm4438_vm14, %v8395_v37  ;;  %v4836_v0 = vpop.permute.xlu1 %4835 }
 0x45c   :  { %4552 = vst.msk [vmem:[#allocation5 + $0x3c] sm:$0xf] %vm4536_vm7, %v8874_v2  ;;  %4551 = vst.msk [vmem:[#allocation5 + $0x38] sm:$0xf] %vm4536_vm7, %v8875_v46 }
 0x45d   :  { %4873 = vst.msk [vmem:[#allocation5 + $0x3c] sm:$0xf] %vm4857_vm9, %v8876_v21  ;;  %v4834_v25 = vpop.permute.xlu0 %4833  ;;  %4871 = vst.msk [vmem:[#allocation5 + $0x34] sm:$0xf] %vm4857_vm9, %v4836_v0 }
 0x45e   :  { %4870 = vst.msk [vmem:[#allocation5 + $0x30] sm:$0xf] %vm4857_vm9, %v4834_v25 }
 0x45f   :  { %5064 = vst.msk [vmem:[#allocation5 + $0x34] sm:$0xf] %vm5050_vm15, %v8393_v6  ;;  %5063 = vst.msk [vmem:[#allocation5 + $0x30] sm:$0xf] %vm5050_vm15, %v8397_v13  ;;  %v5033_v51 = vpop.permute.xlu1 %5032 }
 0x460   :  { %5066 = vst.msk [vmem:[#allocation5 + $0x3c] sm:$0xf] %vm5050_vm15, %v5033_v51 }
 0x461   :  { %v4838_v37 = vpop.permute.xlu0 %4837 }
 0x462   :  { %4872 = vst.msk [vmem:[#allocation5 + $0x38] sm:$0xf] %vm4857_vm9, %v4838_v37 }
 0x465   :  { %v5031_v16 = vpop.permute.xlu0 %5030 }
 0x466   :  { %5065 = vst.msk [vmem:[#allocation5 + $0x38] sm:$0xf] %vm5050_vm15, %v5031_v16  ;;  %v5878_v58 = vld [vmem:[#allocation5 + $0x30] sm:$0xff]  }
 0x467   :  { %5837 = vmatprep.mubr.msk.bf16.mxu1 %vm5166_vm1, %v5878_v58 }
 0x46d   :  { %v5879_v28 = vld [vmem:[#allocation5 + $0x38] sm:$0xff]  }
 0x46e   :  { %5838 = vmatmul.mubr.msk.bf16.gmra.mxu1 %vm5166_vm1, %v5879_v28 }
 0x4e7   :  { %v5827_v11 = vpop.f32.mrf.mxu1 }
 0x4e8   :  { %v5238_v5 = vadd.f32 %v5827_v11, %v5713_v12 }
 0x4e9   :  { %v5229_v6 = vpop.f32.mrf.mxu1 }
 0x4ea   :  { %v8610_v49 = vadd.f32 %v5713_v12, %v5229_v6  ;;  %v5297_v54 = vsel %vm2653_vm0, %v5238_v5, 0.0 }
 0x4eb   :  { %v5828_v55 = vpop.f32.mrf.mxu1 }
 0x4ec   :  { %v5294_v50 = vsel %vm2653_vm0, %v8610_v49, 0.0  ;;  %v5241_v32 = vadd.f32 %v5828_v55, %v5713_v12 }
 0x4ed   :  { %v5232_v10 = vpop.f32.mrf.mxu1 }
 0x4ee   :  { %v8608_v47 = vadd.f32 %v5713_v12, %v5232_v10  ;;  %v5299_v36 = vsel %vm2653_vm0, %v5241_v32, 0.0 }
 0x4f0   :  { %v5295_v40 = vsel %vm2653_vm0, %v8608_v47, 0.0 }
 0x4f1   :  { %v5296_v27 = vadd.f32 %v5295_v40, %v5294_v50 }
 0x4f3   :  { %v5298_v62 = vadd.f32 %v5297_v54, %v5296_v27 }
 0x4f5   :  { %v5300_v60 = vadd.f32 %v5299_v36, %v5298_v62 }
 0x500   :  { %v5831_v13 = vpop.f32.mrf.mxu1 }
 0x501   :  { %v5254_v61 = vadd.f32 %v5831_v13, %v5713_v12 }
 0x502   :  { %v5245_v23 = vpop.f32.mrf.mxu1 }
 0x503   :  { %v5246_v57 = vadd.f32 %v5713_v12, %v5245_v23  ;;  %v5305_v30 = vsel %vm2653_vm0, %v5254_v61, 0.0 }
 0x504   :  { %v5832_v4 = vpop.f32.mrf.mxu1 }
 0x505   :  { %v5301_v39 = vsel %vm2653_vm0, %v5246_v57, 0.0  ;;  %v5257_v41 = vadd.f32 %v5832_v4, %v5713_v12 }
 0x506   :  { %v5248_v14 = vpop.f32.mrf.mxu1  ;;  %v5302_v9 = vadd.f32 %v5301_v39, %v5300_v60 }
 0x507   :  { %v5249_v53 = vadd.f32 %v5713_v12, %v5248_v14  ;;  %v5307_v15 = vsel %vm2653_vm0, %v5257_v41, 0.0 }
 0x509   :  { %v5303_v26 = vsel %vm2653_vm0, %v5249_v53, 0.0 }
 0x50a   :  { %v5304_v43 = vadd.f32 %v5303_v26, %v5302_v9 }
 0x50c   :  { %v5306_v22 = vadd.f32 %v5305_v30, %v5304_v43 }
 0x50e   :  { %v5308_v1 = vadd.f32 %v5307_v15, %v5306_v22 }
 0x513   :  { %v5835_v59 = vpop.f32.mrf.mxu1 }
 0x514   :  { %v5270_v18 = vadd.f32 %v5835_v59, %v5713_v12 }
 0x515   :  { %v5261_v38 = vpop.f32.mrf.mxu1 }
 0x516   :  { %v5262_v29 = vadd.f32 %v5713_v12, %v5261_v38  ;;  %v5313_v7 = vsel %vm2653_vm0, %v5270_v18, 0.0 }
 0x517   :  { %v5836_v8 = vpop.f32.mrf.mxu1 }
 0x518   :  { %v5309_v45 = vsel %vm2653_vm0, %v5262_v29, 0.0  ;;  %v5273_v44 = vadd.f32 %v5836_v8, %v5713_v12 }
 0x519   :  { %v5264_v35 = vpop.f32.mrf.mxu1  ;;  %v5310_v31 = vadd.f32 %v5309_v45, %v5308_v1 }
 0x51a   :  { %v5265_v33 = vadd.f32 %v5713_v12, %v5264_v35  ;;  %v5315_v42 = vsel %vm2653_vm0, %v5273_v44, 0.0 }
 0x51c   :  { %v5311_v48 = vsel %vm2653_vm0, %v5265_v33, 0.0 }
 0x51d   :  { %v5312_v17 = vadd.f32 %v5311_v48, %v5310_v31 }
 0x51f   :  { %v5314_v24 = vadd.f32 %v5313_v7, %v5312_v17 }
 0x521   :  { %v5316_v52 = vadd.f32 %v5315_v42, %v5314_v24 }
 0x52e   :  { %v5839_v63 = vpop.f32.mrf.mxu1 }
 0x52f   :  { %v5286_v2 = vadd.f32 %v5839_v63, %v5713_v12 }
 0x530   :  { %v5277_v20 = vpop.f32.mrf.mxu1 }
 0x531   :  { %v5278_v3 = vadd.f32 %v5713_v12, %v5277_v20  ;;  %v5321_v37 = vsel %vm2653_vm0, %v5286_v2, 0.0 }
 0x532   :  { %v5840_v56 = vpop.f32.mrf.mxu1 }
 0x533   :  { %v5317_v34 = vsel %vm2653_vm0, %v5278_v3, 0.0  ;;  %v8627_v0 = vadd.f32 %v5840_v56, %v5713_v12 }
 0x534   :  { %v5280_v19 = vpop.f32.mrf.mxu1  ;;  %v5318_v21 = vadd.f32 %v5317_v34, %v5316_v52 }
 0x535   :  { %v5281_v46 = vadd.f32 %v5713_v12, %v5280_v19  ;;  %v5323_v58 = vsel %vm2653_vm0, %v8627_v0, 0.0 }
 0x537   :  { %v5319_v25 = vsel %vm2653_vm0, %v5281_v46, 0.0 }
 0x538   :  { %v5320_v51 = vadd.f32 %v5319_v25, %v5318_v21 }
 0x53a   :  { %v5322_v16 = vadd.f32 %v5321_v37, %v5320_v51 }
 0x53c   :  { %v5324_v28 = vadd.f32 %v5323_v58, %v5322_v16 }
 0x53e   :  { %v5325_v11 = vrot.slane %v5324_v28, 4 }
 0x540   :  { %v5326_v6 = vadd.f32 %v5325_v11, %v5324_v28 }
 0x542   :  { %v5327_v55 = vrot.slane %v5326_v6, 2 }
 0x544   :  { %v5328_v10 = vadd.f32 %v5327_v55, %v5326_v6 }
 0x546   :  { %v5329_v13 = vrot.slane %v5328_v10, 1 }
 0x548   :  { %v5330_v23 = vadd.f32 %v5329_v13, %v5328_v10 }
 0x54a   :  { %v5331_v4 = vmul.f32 0.0078125, %v5330_v23 }
 0x54c   :  { %v8634_v12 = vsub.f32 %v8610_v49, %v5331_v4  ;;  %v8637_v40 = vsub.f32 %v8608_v47, %v5331_v4  ;;  %v8639_v50 = vsub.f32 %v5238_v5, %v5331_v4  ;;  %v8641_v27 = vsub.f32 %v5241_v32, %v5331_v4 }
 0x54d   :  { %v8647_v54 = vsub.f32 %v5246_v57, %v5331_v4  ;;  %v8651_v49 = vsub.f32 %v5249_v53, %v5331_v4  ;;  %v8657_v36 = vsub.f32 %v5254_v61, %v5331_v4  ;;  %v8662_v26 = vsub.f32 %v5257_v41, %v5331_v4 }
 0x54e   :  { %v5348_v14 = vmul.f32 %v8634_v12, %v8634_v12  ;;  %v5349_v59 = vmul.f32 %v8637_v40, %v8637_v40  ;;  %v5350_v62 = vmul.f32 %v8639_v50, %v8639_v50  ;;  %v5351_v47 = vmul.f32 %v8641_v27, %v8641_v27 }
 0x54f   :  { %v5352_v39 = vmul.f32 %v8647_v54, %v8647_v54  ;;  %v5353_v53 = vmul.f32 %v8651_v49, %v8651_v49  ;;  %v8667_v43 = vsub.f32 %v5262_v29, %v5331_v4  ;;  %v5354_v61 = vmul.f32 %v8657_v36, %v8657_v36 }
 0x550   :  { %v5364_v5 = vsel %vm2653_vm0, %v5348_v14, 0.0  ;;  %v5365_v32 = vsel %vm2653_vm0, %v5349_v59, 0.0  ;;  %v5367_v57 = vsel %vm2653_vm0, %v5350_v62, 0.0  ;;  %v5369_v9 = vsel %vm2653_vm0, %v5351_v47, 0.0 }
 0x551   :  { %v5366_v38 = vadd.f32 %v5365_v32, %v5364_v5  ;;  %v5371_v35 = vsel %vm2653_vm0, %v5352_v39, 0.0  ;;  %v5341_v22 = vsub.f32 %v5265_v33, %v5331_v4  ;;  %v5355_v15 = vmul.f32 %v8662_v26, %v8662_v26 }
 0x552   :  { %v5373_v41 = vsel %vm2653_vm0, %v5353_v53, 0.0  ;;  %v5342_v1 = vsub.f32 %v5270_v18, %v5331_v4  ;;  %v5356_v48 = vmul.f32 %v8667_v43, %v8667_v43  ;;  %v5375_v29 = vsel %vm2653_vm0, %v5354_v61, 0.0 }
 0x553   :  { %v5368_v60 = vadd.f32 %v5367_v57, %v5366_v38  ;;  %v5343_v17 = vsub.f32 %v5273_v44, %v5331_v4  ;;  %v5357_v63 = vmul.f32 %v5341_v22, %v5341_v22  ;;  %v5377_v7 = vsel %vm2653_vm0, %v5355_v15, 0.0 }
 0x554   :  { %v5344_v20 = vsub.f32 %v5278_v3, %v5331_v4  ;;  %v5358_v33 = vmul.f32 %v5342_v1, %v5342_v1  ;;  %v5379_v56 = vsel %vm2653_vm0, %v5356_v48, 0.0  ;;  %v5345_v34 = vsub.f32 %v5281_v46, %v5331_v4 }
 0x555   :  { %v5370_v8 = vadd.f32 %v5369_v9, %v5368_v60  ;;  %v5359_v52 = vmul.f32 %v5343_v17, %v5343_v17  ;;  %v5381_v18 = vsel %vm2653_vm0, %v5357_v63, 0.0  ;;  %v5346_v21 = vsub.f32 %v5286_v2, %v5331_v4 }
 0x556   :  { %v5360_v25 = vmul.f32 %v5344_v20, %v5344_v20  ;;  %v5383_v51 = vsel %vm2653_vm0, %v5358_v33, 0.0  ;;  %v5347_v44 = vsub.f32 %v8627_v0, %v5331_v4  ;;  %v5361_v16 = vmul.f32 %v5345_v34, %v5345_v34 }
 0x557   :  { %v5372_v30 = vadd.f32 %v5371_v35, %v5370_v8  ;;  %v5385_v58 = vsel %vm2653_vm0, %v5359_v52, 0.0  ;;  %v5362_v28 = vmul.f32 %v5346_v21, %v5346_v21  ;;  %v5735_v8 = vld [vmem:[%s8774_s7] ss:$0 sm:$0xff] }
 0x558   :  { %v5387_v11 = vsel %vm2653_vm0, %v5360_v25, 0.0  ;;  %v5363_v46 = vmul.f32 %v5347_v44, %v5347_v44  ;;  %v5389_v55 = vsel %vm2653_vm0, %v5361_v16, 0.0 }
 0x559   :  { %v5374_v45 = vadd.f32 %v5373_v41, %v5372_v30  ;;  %v5391_v2 = vsel %vm2653_vm0, %v5362_v28, 0.0 }
 0x55a   :  { %v5393_v23 = vsel %vm2653_vm0, %v5363_v46, 0.0 }
 0x55b   :  { %v5376_v31 = vadd.f32 %v5375_v29, %v5374_v45 }
 0x55d   :  { %v5378_v24 = vadd.f32 %v5377_v7, %v5376_v31 }
 0x55f   :  { %v5380_v42 = vadd.f32 %v5379_v56, %v5378_v24 }
 0x561   :  { %v5382_v19 = vadd.f32 %v5381_v18, %v5380_v42 }
 0x563   :  { %v5384_v37 = vadd.f32 %v5383_v51, %v5382_v19 }
 0x565   :  { %v5386_v3 = vadd.f32 %v5385_v58, %v5384_v37 }
 0x567   :  { %v5388_v6 = vadd.f32 %v5387_v11, %v5386_v3 }
 0x569   :  { %v5390_v10 = vadd.f32 %v5389_v55, %v5388_v6 }
 0x56b   :  { %v5392_v13 = vadd.f32 %v5391_v2, %v5390_v10 }
 0x56d   :  { %v5394_v14 = vadd.f32 %v5393_v23, %v5392_v13 }
 0x56f   :  { %v5395_v59 = vrot.slane %v5394_v14, 4 }
 0x571   :  { %v5396_v0 = vadd.f32 %v5395_v59, %v5394_v14 }
 0x573   :  { %v5397_v4 = vrot.slane %v5396_v0, 2 }
 0x575   :  { %v5398_v62 = vadd.f32 %v5397_v4, %v5396_v0 }
 0x577   :  { %v5399_v47 = vrot.slane %v5398_v62, 1 }
 0x579   :  { %v5400_v5 = vadd.f32 %v5399_v47, %v5398_v62 }
 0x57b   :  { %v5401_v32 = vmul.f32 0.0078125, %v5400_v5 }
 0x57d   :  { %v5402_v38 = vadd.f32 1e-05, %v5401_v32 }
 0x57f   :  { %5882 = vrsqrt.f32 %v5402_v38 }
 0x58c   :  { %v5883_v39 = vpop.eup %5882 }
 0x58d   :  { %v5404_v57 = vmul.f32 %v5883_v39, %v8634_v12  ;;  %v5405_v60 = vmul.f32 %v5883_v39, %v8637_v40  ;;  %v5406_v53 = vmul.f32 %v5883_v39, %v8639_v50  ;;  %v5407_v9 = vmul.f32 %v5883_v39, %v8641_v27 }
 0x58e   :  { %v5408_v61 = vmul.f32 %v5883_v39, %v8647_v54  ;;  %v5409_v35 = vmul.f32 %v5883_v39, %v8651_v49  ;;  %v5410_v30 = vmul.f32 %v5883_v39, %v8657_v36  ;;  %v5411_v15 = vmul.f32 %v5883_v39, %v8662_v26  ;;  %v5736_v54 = vld [vmem:[%s8775_s8] ss:$0 sm:$0xff] }
 0x58f   :  { %v5412_v12 = vmul.f32 %v5883_v39, %v8667_v43  ;;  %v5413_v41 = vmul.f32 %v5883_v39, %v5341_v22  ;;  %v5414_v40 = vmul.f32 %v5883_v39, %v5342_v1  ;;  %v5415_v45 = vmul.f32 %v5883_v39, %v5343_v17 }
 0x590   :  { %v5416_v50 = vmul.f32 %v5883_v39, %v5344_v20  ;;  %v5417_v48 = vmul.f32 %v5883_v39, %v5345_v34  ;;  %v5418_v27 = vmul.f32 %v5883_v39, %v5346_v21  ;;  %v5419_v29 = vmul.f32 %v5883_v39, %v5347_v44 }
 0x591   :  { %v5426_v31 = vmul.f32 %v5735_v8, %v5404_v57  ;;  %v5427_v63 = vmul.f32 %v5735_v8, %v5405_v60  ;;  %v5428_v7 = vmul.f32 %v5735_v8, %v5406_v53  ;;  %v5429_v24 = vmul.f32 %v5735_v8, %v5407_v9 }
 0x592   :  { %v5430_v49 = vmul.f32 %v5735_v8, %v5408_v61  ;;  %v5431_v36 = vmul.f32 %v5735_v8, %v5409_v35  ;;  %v5432_v26 = vmul.f32 %v5735_v8, %v5410_v30  ;;  %v5433_v33 = vmul.f32 %v5735_v8, %v5411_v15 }
 0x593   :  { %v5434_v43 = vmul.f32 %v5735_v8, %v5412_v12  ;;  %v5435_v22 = vmul.f32 %v5735_v8, %v5413_v41  ;;  %v5436_v1 = vmul.f32 %v5735_v8, %v5414_v40  ;;  %v5437_v17 = vmul.f32 %v5735_v8, %v5415_v45 }
 0x594   :  { %v5438_v20 = vmul.f32 %v5735_v8, %v5416_v50  ;;  %v5439_v56 = vmul.f32 %v5735_v8, %v5417_v48  ;;  %v5440_v42 = vmul.f32 %v5735_v8, %v5418_v27  ;;  %v5441_v34 = vmul.f32 %v5735_v8, %v5419_v29 }
 0x595   :  { %v5448_v52 = vadd.f32 %v5736_v54, %v5426_v31  ;;  %v5449_v18 = vadd.f32 %v5736_v54, %v5427_v63  ;;  %v5450_v19 = vadd.f32 %v5736_v54, %v5428_v7  ;;  %v5451_v21 = vadd.f32 %v5736_v54, %v5429_v24 }
 0x596   :  { %v5452_v25 = vadd.f32 %v5736_v54, %v5430_v49  ;;  %v5453_v51 = vadd.f32 %v5736_v54, %v5431_v36  ;;  %v5454_v37 = vadd.f32 %v5736_v54, %v5432_v26  ;;  %v5455_v44 = vadd.f32 %v5736_v54, %v5433_v33 }
 0x597   :  { %v5456_v16 = vadd.f32 %v5736_v54, %v5434_v43  ;;  %v5457_v58 = vadd.f32 %v5736_v54, %v5435_v22  ;;  %v5458_v3 = vadd.f32 %v5736_v54, %v5436_v1  ;;  %v5459_v28 = vadd.f32 %v5736_v54, %v5437_v17 }
 0x598   :  { %v5460_v11 = vadd.f32 %v5736_v54, %v5438_v20  ;;  %v5461_v6 = vadd.f32 %v5736_v54, %v5439_v56  ;;  %v5462_v46 = vadd.f32 %v5736_v54, %v5440_v42  ;;  %v5463_v55 = vadd.f32 %v5736_v54, %v5441_v34 }
 0x599   :  { %v5464_v10 = vmax.f32 %v5448_v52, 0.0  ;;  %v5465_v2 = vmax.f32 %v5449_v18, 0.0  ;;  %v5466_v13 = vmax.f32 %v5450_v19, 0.0  ;;  %v5467_v23 = vmax.f32 %v5451_v21, 0.0 }
 0x59a   :  { %v5468_v14 = vmax.f32 %v5452_v25, 0.0  ;;  %v5469_v59 = vmax.f32 %v5453_v51, 0.0  ;;  %v5470_v0 = vmax.f32 %v5454_v37, 0.0  ;;  %v5471_v4 = vmax.f32 %v5455_v44, 0.0 }
 0x59b   :  { %v5472_v62 = vmax.f32 %v5456_v16, 0.0  ;;  %v5473_v47 = vmax.f32 %v5457_v58, 0.0  ;;  %v5474_v5 = vmax.f32 %v5458_v3, 0.0  ;;  %v5475_v32 = vmax.f32 %v5459_v28, 0.0  ;;  %5480 = vst.msk [vmem:[%s8776_s9] sm:$0xff] %vm2653_vm0, %v5464_v10  ;;  %5481 = vst.msk [vmem:[%s8776_s9 + $0x8] sm:$0xff] %vm2653_vm0, %v5465_v2 }
 0x59c   :  { %5482 = vst.msk [vmem:[%s8776_s9 + $0x10] sm:$0xff] %vm2653_vm0, %v5466_v13  ;;  %5483 = vst.msk [vmem:[%s8776_s9 + $0x18] sm:$0xff] %vm2653_vm0, %v5467_v23  ;;  %v5476_v38 = vmax.f32 %v5460_v11, 0.0  ;;  %v5477_v39 = vmax.f32 %v5461_v6, 0.0  ;;  %v5478_v57 = vmax.f32 %v5462_v46, 0.0  ;;  %v5479_v60 = vmax.f32 %v5463_v55, 0.0 }
 0x59d   :  { %5484 = vst.msk [vmem:[%s8776_s9 + $0x20] sm:$0xff] %vm2653_vm0, %v5468_v14  ;;  %5485 = vst.msk [vmem:[%s8776_s9 + $0x28] sm:$0xff] %vm2653_vm0, %v5469_v59 }
 0x59e   :  { %5486 = vst.msk [vmem:[%s8776_s9 + $0x30] sm:$0xff] %vm2653_vm0, %v5470_v0  ;;  %5487 = vst.msk [vmem:[%s8776_s9 + $0x38] sm:$0xff] %vm2653_vm0, %v5471_v4 }
 0x59f   :  { %5488 = vst.msk [vmem:[%s8776_s9 + $0x40] sm:$0xff] %vm2653_vm0, %v5472_v62  ;;  %5489 = vst.msk [vmem:[%s8776_s9 + $0x48] sm:$0xff] %vm2653_vm0, %v5473_v47 }
 0x5a0   :  { %5490 = vst.msk [vmem:[%s8776_s9 + $0x50] sm:$0xff] %vm2653_vm0, %v5474_v5  ;;  %5491 = vst.msk [vmem:[%s8776_s9 + $0x58] sm:$0xff] %vm2653_vm0, %v5475_v32 }
 0x5a1   :  { %5492 = vst.msk [vmem:[%s8776_s9 + $0x60] sm:$0xff] %vm2653_vm0, %v5476_v38  ;;  %5493 = vst.msk [vmem:[%s8776_s9 + $0x68] sm:$0xff] %vm2653_vm0, %v5477_v39 }
 0x5a2   :  { %5494 = vst.msk [vmem:[%s8776_s9 + $0x70] sm:$0xff] %vm2653_vm0, %v5478_v57  ;;  %5495 = vst.msk [vmem:[%s8776_s9 + $0x78] sm:$0xff] %vm2653_vm0, %v5479_v60 }

</bundles_post_ra>
